<compile_context>
chip_gen: v7x
topology: tpu7x:2x2x1
jax: 0.10.0
libtpu: 0.0.40
codegen_flags: <defaults>
</compile_context>

<pallas_src>
import functools

import jax
import jax.numpy as jnp
from jax.experimental import pallas as pl
from jax.experimental.pallas import tpu as pltpu


# ----------------------------------------------------------------------------
# Fused kernel (one grid step = one batch block)
# ----------------------------------------------------------------------------

def mlstm_fcn_kernel(
    x_tm_ref,                                # (T, Bb, Cin)            f32
    cols1_ref,                               # (Bb*L1, K1*Cin)         f32
    wih_ref, whh_ref, lstm_b_ref,            # (Cin,4H) (H,4H) (1,4H)  f32
    c1w_ref, bn1s_ref, bn1b_ref,             # (K1*Cin,C1) bf16, (1,C1) f32 x2
    se1a_ref, se1b_ref,                      # (C1,C1/r) (C1/r,C1)     bf16
    c2w_ref, bn2s_ref, bn2b_ref,             # (K2*C1,C2) bf16, (1,C2) f32 x2
    se2a_ref, se2b_ref,                      # (C2,C2/r) (C2/r,C2)     bf16
    c3w_ref, bn3s_ref, bn3b_ref,             # (K3*C2,C3) bf16, (1,C3) f32 x2
    fcl_ref, fcc_ref, fcb_ref,               # (H,Np) (C3,Np) bf16, (1,Np) f32
    o_ref,                                   # (Bb, Np)                f32
):
    f32 = jnp.float32
    bf16 = jnp.bfloat16

    T, Bb, Cin = x_tm_ref.shape
    H = whh_ref.shape[0]

    # ---------------------------- LSTM branch ------------------------------
    # Input projection hoisted out of the recurrence: one flat 2-D MXU dot
    # (M = T*Bb rows).  Time-major so the in-loop access xw_*[t] is a cheap
    # leading-dim index (no per-step lane slicing).
    x2d = x_tm_ref[...].reshape(T * Bb, Cin)
    xw = (jnp.dot(x2d, wih_ref[...], preferred_element_type=f32)
          + lstm_b_ref[...]).reshape(T, Bb, 4 * H)
    # One-time per-gate split (off the serial chain); gate order [i, f, o, g].
    xw_i = xw[:, :, 0 * H:1 * H]
    xw_f = xw[:, :, 1 * H:2 * H]
    xw_o = xw[:, :, 2 * H:3 * H]
    xw_g = xw[:, :, 3 * H:4 * H]

    whh = whh_ref[...]
    # Pre-broadcast each W_hh row per gate once (loop-invariant), so the
    # recurrence is a pure VPU broadcast-FMA chain: no per-step MXU round
    # trip and no non-lane-aligned gate slicing on the serial chain.
    w_rows = []
    for k in range(H):
        w_rows.append(tuple(
            jnp.broadcast_to(whh[k:k + 1, g * H:(g + 1) * H], (Bb, H))
            for g in range(4)))

    h = jnp.zeros((Bb, H), f32)
    c = jnp.zeros((Bb, H), f32)
    # T is small and static -> full unroll; h/c live in vregs on the serial
    # chain.  For long T switch to lax.fori_loop over VMEM scratch.
    for t in range(T):
        ai, af, ao, ag = xw_i[t], xw_f[t], xw_o[t], xw_g[t]
        for k in range(H):
            hk = jnp.broadcast_to(h[:, k:k + 1], (Bb, H))
            wi, wf, wo, wg = w_rows[k]
            ai = ai + hk * wi
            af = af + hk * wf
            ao = ao + hk * wo
            ag = ag + hk * wg
        i_g = jax.nn.sigmoid(ai)
        f_g = jax.nn.sigmoid(af)
        o_g = jax.nn.sigmoid(ao)
        g_g = jnp.tanh(ag)
        c = f_g * c + i_g * g_g
        h = o_g * jnp.tanh(c)
    h_last = h                                             # (Bb, H)
    # TODO(synk): drop_lstm / fc_dropout are eval-mode identities here.
    # TODO(synk): on v7x with tiny B, the LSTM and conv branches could be
    # split across the two TensorCores via pl.core_map; here the batch grid
    # provides the megacore parallelism instead.

    # ---------------------------- Conv branch ------------------------------
    def se(y, w1_ref, w2_ref):
        pooled = jnp.mean(y, axis=1)                       # (Bb, C)
        hdn = jnp.maximum(
            jnp.dot(pooled.astype(bf16), w1_ref[...],
                    preferred_element_type=f32), 0.0)      # (Bb, C/r)
        s = jax.nn.sigmoid(
            jnp.dot(hdn.astype(bf16), w2_ref[...],
                    preferred_element_type=f32))           # (Bb, C)
        return y * s[:, None, :]

    # conv1: im2col precomputed in the wrapper (width-4 lane concat is cheap
    # in XLA, expensive as in-kernel XLU shuffles); already flattened 2-D.
    C1 = c1w_ref.shape[1]
    L1 = cols1_ref.shape[0] // Bb
    y1f = jnp.dot(cols1_ref[...].astype(bf16), c1w_ref[...],
                  preferred_element_type=f32)              # (Bb*L1, C1)
    y1f = jnp.maximum(y1f * bn1s_ref[...] + bn1b_ref[...], 0.0)
    y1 = se(y1f.reshape(Bb, L1, C1), se1a_ref, se1b_ref)

    def conv_bn_relu(y, w_ref, s_ref, b_ref):
        # y: (Bb, Lin, Ci) f32 ; w_ref: (K*Ci, Cout) bf16, k-major / ci-minor.
        Ci = y.shape[2]
        K = w_ref.shape[0] // Ci
        Lout = y.shape[1] - K + 1                          # valid padding
        # Lane-aligned im2col (Ci is a multiple of 128 here), flattened to a
        # single 2-D MXU dot with M = Bb*Lout rows (no per-batch matmul loop).
        cols = jnp.concatenate([y[:, k:k + Lout, :] for k in range(K)],
                               axis=2)                     # (Bb, Lout, K*Ci)
        out = jnp.dot(cols.reshape(Bb * Lout, K * Ci).astype(bf16), w_ref[...],
                      preferred_element_type=f32)          # (Bb*Lout, Cout)
        out = jnp.maximum(out * s_ref[...] + b_ref[...], 0.0)   # folded BN
        return out.reshape(Bb, Lout, w_ref.shape[1])

    y2 = conv_bn_relu(y1, c2w_ref, bn2s_ref, bn2b_ref)
    y2 = se(y2, se2a_ref, se2b_ref)
    y3 = conv_bn_relu(y2, c3w_ref, bn3s_ref, bn3b_ref)
    pooled3 = jnp.mean(y3, axis=1)                         # (Bb, C3)

    # ------------------------------- Head -----------------------------------
    # Lane-dense (128-padded) output; wrapper slices back to n_classes.
    o_ref[...] = (jnp.dot(h_last.astype(bf16), fcl_ref[...],
                          preferred_element_type=f32)
                  + jnp.dot(pooled3.astype(bf16), fcc_ref[...],
                            preferred_element_type=f32)
                  + fcb_ref[...])


# ----------------------------------------------------------------------------
# Wrapper: batch grid, weights VMEM-resident, x / cols1 / logits pipelined
# ----------------------------------------------------------------------------

def mlstm_fcn_forward(x, params, *, n_classes, b_blk=8):
    """x: (B, T, Cin) float32.  Returns logits (B, n_classes) float32."""
    B, T, Cin = x.shape
    assert b_blk % 8 == 0
    n_pad = params['fc_b'].shape[-1]
    H = params['lstm_whh'].shape[0]

    C1 = params['conv1_w'].shape[1]
    K1 = params['conv1_w'].shape[0] // Cin
    C2 = params['conv2_w'].shape[1]
    K2 = params['conv2_w'].shape[0] // C1
    C3 = params['conv3_w'].shape[1]
    K3 = params['conv3_w'].shape[0] // C2
    L1 = T - K1 + 1
    L2 = L1 - K2 + 1
    L3 = L2 - K3 + 1
    assert L3 >= 1, "sequence too short for the three valid convolutions"

    # Pad batch to a sublane-friendly block multiple (padded rows are junk,
    # sliced off below).
    B_pad = ((B + b_blk - 1) // b_blk) * b_blk
    x_p = jnp.pad(x, ((0, B_pad - B), (0, 0), (0, 0)))

    # Time-major LSTM input: per-step access in the kernel is a leading-dim
    # index, off the lane/sublane axes.
    x_tm = jnp.transpose(x_p, (1, 0, 2))                   # (T, B_pad, Cin)
    # conv1 im2col precomputed here (Cin=4 lane concat done once by XLA),
    # already flattened to 2-D for a single MXU dot in the kernel.
    cols1 = jnp.concatenate([x_p[:, k:k + L1, :] for k in range(K1)],
                            axis=2).reshape(B_pad * L1, K1 * Cin)

    weights = (
        params['lstm_wih'], params['lstm_whh'], params['lstm_b'],
        params['conv1_w'], params['bn1_scale'], params['bn1_shift'],
        params['se1_w1'], params['se1_w2'],
        params['conv2_w'], params['bn2_scale'], params['bn2_shift'],
        params['se2_w1'], params['se2_w2'],
        params['conv3_w'], params['bn3_scale'], params['bn3_shift'],
        params['fc_w_lstm'], params['fc_w_conv'], params['fc_b'],
    )

    def _resident(a):
        # Whole-array block, constant index map -> stays VMEM-resident
        # across the batch grid.
        return pl.BlockSpec(a.shape, lambda b, _nd=a.ndim: (0,) * _nd)

    in_specs = (
        [pl.BlockSpec((T, b_blk, Cin), lambda b: (0, b, 0)),
         pl.BlockSpec((b_blk * L1, K1 * Cin), lambda b: (b, 0))]
        + [_resident(w) for w in weights]
    )
    out_specs = pl.BlockSpec((b_blk, n_pad), lambda b: (b, 0))

    # Advisory cost estimate (helps XLA schedule around the custom call).
    flops = 2 * B_pad * (
        T * Cin * 4 * H + T * H * 4 * H
        + L1 * K1 * Cin * C1 + L2 * K2 * C1 * C2 + L3 * K3 * C2 * C3
        + 2 * (C1 * params['se1_w1'].shape[1] + C2 * params['se2_w1'].shape[1])
        + (H + C3) * n_pad)
    transc = B_pad * (T * 5 * H + C1 + C2)
    nbytes = sum(int(a.size) * a.dtype.itemsize for a in (x_tm, cols1) + weights)
    nbytes += B_pad * n_pad * 4

    logits_pad = pl.pallas_call(
        mlstm_fcn_kernel,
        out_shape=jax.ShapeDtypeStruct((B_pad, n_pad), jnp.float32),
        grid=(B_pad // b_blk,),
        in_specs=in_specs,
        out_specs=out_specs,
        compiler_params=pltpu.CompilerParams(
            dimension_semantics=("parallel",),
            vmem_limit_bytes=32 * 1024 * 1024),
        cost_estimate=pl.CostEstimate(
            flops=int(flops), transcendentals=int(transc),
            bytes_accessed=int(nbytes)),
    )(x_tm, cols1, *weights)
    return logits_pad[:B, :n_classes]


# ----------------------------------------------------------------------------
# Deterministic parameter construction (eval-mode BN folded, bf16 MXU weights)
# ----------------------------------------------------------------------------

def make_params(key, input_size, n_classes, lstm_hidden=8,
                conv1_size=128, conv2_size=256, conv3_size=128,
                conv1_kernel=8, conv2_kernel=5, conv3_kernel=3,
                reduction=16, eps=1e-5):
    ks = iter(jax.random.split(key, 32))
    rnd = lambda shape, s=0.1: s * jax.random.normal(next(ks), shape, jnp.float32)

    p = {}
    H = lstm_hidden
    # LSTM weights pre-transposed; gate order [i, f, o, g] (a PyTorch import
    # would permute the [i, f, g, o] columns of weight_ih/weight_hh/biases).
    p['lstm_wih'] = rnd((input_size, 4 * H))
    p['lstm_whh'] = rnd((H, 4 * H))
    p['lstm_b'] = rnd((1, 4 * H))                       # b_ih + b_hh folded

    convs = [(input_size, conv1_size, conv1_kernel),
             (conv1_size, conv2_size, conv2_kernel),
             (conv2_size, conv3_size, conv3_kernel)]
    for i, (cin, cout, k) in enumerate(convs, start=1):
        # (K, Cin, Cout) == torch weight (Cout, Cin, K).transpose(2, 1, 0);
        # flattened k-major / ci-minor to match the kernel's im2col layout.
        w = rnd((k, cin, cout))
        p[f'conv{i}_w'] = w.reshape(k * cin, cout).astype(jnp.bfloat16)
        conv_bias = rnd((cout,))
        gamma = 1.0 + rnd((cout,))
        beta = rnd((cout,))
        run_mean = rnd((cout,))
        run_var = jnp.abs(1.0 + rnd((cout,)))
        scale = gamma / jnp.sqrt(run_var + eps)         # eval-mode BN folding
        shift = scale * (conv_bias - run_mean) + beta
        p[f'bn{i}_scale'] = scale.reshape(1, cout)
        p[f'bn{i}_shift'] = shift.reshape(1, cout)

    for i, c in ((1, conv1_size), (2, conv2_size)):
        cr = c // reduction
        p[f'se{i}_w1'] = rnd((c, cr)).astype(jnp.bfloat16)     # bias=False
        p[f'se{i}_w2'] = rnd((cr, c)).astype(jnp.bfloat16)     # bias=False

    # fc: Linear(lstm_hidden + conv3_size, n_classes); concat order
    # (lstm, conv).  Columns zero-padded to a lane-dense width (>=128).
    n_pad = max(128, ((n_classes + 127) // 128) * 128)
    wl = jnp.pad(rnd((H, n_classes)), ((0, 0), (0, n_pad - n_classes)))
    wc = jnp.pad(rnd((conv3_size, n_classes)), ((0, 0), (0, n_pad - n_classes)))
    b = jnp.pad(rnd((1, n_classes)), ((0, 0), (0, n_pad - n_classes)))
    p['fc_w_lstm'] = wl.astype(jnp.bfloat16)
    p['fc_w_conv'] = wc.astype(jnp.bfloat16)
    p['fc_b'] = b
    return p


# ----------------------------------------------------------------------------
if __name__ == "__main__":
    B, T, C_IN, N_CLASSES = 2, 16, 4, 3                 # T >= 8+5+3-2 = 14

    key = jax.random.PRNGKey(0)
    k_x, k_p = jax.random.split(key)
    x = jax.random.normal(k_x, (B, T, C_IN), jnp.float32)
    params = make_params(k_p, input_size=C_IN, n_classes=N_CLASSES)

    fwd = jax.jit(functools.partial(mlstm_fcn_forward, n_classes=N_CLASSES))
    logits = jax.block_until_ready(fwd(x, params))

    assert logits.shape == (B, N_CLASSES), logits.shape
    assert bool(jnp.all(jnp.isfinite(logits)))
    print("KERNEL_OK")
</pallas_src>

<mosaic_0001>
module attributes {stable_mosaic.version = 11 : i64} {
  func.func @mlstm_fcn_kernel(%arg0: i32, %arg1: memref<16x8x4xf32, #tpu.memory_space<vmem>>, %arg2: memref<72x32xf32, #tpu.memory_space<vmem>>, %arg3: memref<4x32xf32, #tpu.memory_space<vmem>>, %arg4: memref<8x32xf32, #tpu.memory_space<vmem>>, %arg5: memref<1x32xf32, #tpu.memory_space<vmem>>, %arg6: memref<32x128xbf16, #tpu.memory_space<vmem>>, %arg7: memref<1x128xf32, #tpu.memory_space<vmem>>, %arg8: memref<1x128xf32, #tpu.memory_space<vmem>>, %arg9: memref<128x8xbf16, #tpu.memory_space<vmem>>, %arg10: memref<8x128xbf16, #tpu.memory_space<vmem>>, %arg11: memref<640x256xbf16, #tpu.memory_space<vmem>>, %arg12: memref<1x256xf32, #tpu.memory_space<vmem>>, %arg13: memref<1x256xf32, #tpu.memory_space<vmem>>, %arg14: memref<256x16xbf16, #tpu.memory_space<vmem>>, %arg15: memref<16x256xbf16, #tpu.memory_space<vmem>>, %arg16: memref<768x128xbf16, #tpu.memory_space<vmem>>, %arg17: memref<1x128xf32, #tpu.memory_space<vmem>>, %arg18: memref<1x128xf32, #tpu.memory_space<vmem>>, %arg19: memref<8x128xbf16, #tpu.memory_space<vmem>>, %arg20: memref<128x128xbf16, #tpu.memory_space<vmem>>, %arg21: memref<1x128xf32, #tpu.memory_space<vmem>>, %arg22: memref<8x128xf32, #tpu.memory_space<vmem>>) attributes {dimension_semantics = [#tpu.dimension_semantics<parallel>], iteration_bounds = array<i64: 1>, scalar_prefetch = 0 : i64, scratch_operands = 0 : i64, tpu.core_type = #tpu.core_type<tc>, window_params = [{transform_indices = @transform_0, window_bounds = array<i64: 16, 8, 4>}, {transform_indices = @transform_1, window_bounds = array<i64: 72, 32>}, {pipeline_mode = #tpu.pipeline_mode<synchronous>, transform_indices = @transform_2, window_bounds = array<i64: 4, 32>}, {pipeline_mode = #tpu.pipeline_mode<synchronous>, transform_indices = @transform_3, window_bounds = array<i64: 8, 32>}, {pipeline_mode = #tpu.pipeline_mode<synchronous>, transform_indices = @transform_4, window_bounds = array<i64: 1, 32>}, {pipeline_mode = #tpu.pipeline_mode<synchronous>, transform_indices = @transform_5, window_bounds = array<i64: 32, 128>}, {pipeline_mode = #tpu.pipeline_mode<synchronous>, transform_indices = @transform_6, window_bounds = array<i64: 1, 128>}, {pipeline_mode = #tpu.pipeline_mode<synchronous>, transform_indices = @transform_7, window_bounds = array<i64: 1, 128>}, {pipeline_mode = #tpu.pipeline_mode<synchronous>, transform_indices = @transform_8, window_bounds = array<i64: 128, 8>}, {pipeline_mode = #tpu.pipeline_mode<synchronous>, transform_indices = @transform_9, window_bounds = array<i64: 8, 128>}, {pipeline_mode = #tpu.pipeline_mode<synchronous>, transform_indices = @transform_10, window_bounds = array<i64: 640, 256>}, {pipeline_mode = #tpu.pipeline_mode<synchronous>, transform_indices = @transform_11, window_bounds = array<i64: 1, 256>}, {pipeline_mode = #tpu.pipeline_mode<synchronous>, transform_indices = @transform_12, window_bounds = array<i64: 1, 256>}, {pipeline_mode = #tpu.pipeline_mode<synchronous>, transform_indices = @transform_13, window_bounds = array<i64: 256, 16>}, {pipeline_mode = #tpu.pipeline_mode<synchronous>, transform_indices = @transform_14, window_bounds = array<i64: 16, 256>}, {pipeline_mode = #tpu.pipeline_mode<synchronous>, transform_indices = @transform_15, window_bounds = array<i64: 768, 128>}, {pipeline_mode = #tpu.pipeline_mode<synchronous>, transform_indices = @transform_16, window_bounds = array<i64: 1, 128>}, {pipeline_mode = #tpu.pipeline_mode<synchronous>, transform_indices = @transform_17, window_bounds = array<i64: 1, 128>}, {pipeline_mode = #tpu.pipeline_mode<synchronous>, transform_indices = @transform_18, window_bounds = array<i64: 8, 128>}, {pipeline_mode = #tpu.pipeline_mode<synchronous>, transform_indices = @transform_19, window_bounds = array<i64: 128, 128>}, {pipeline_mode = #tpu.pipeline_mode<synchronous>, transform_indices = @transform_20, window_bounds = array<i64: 1, 128>}, {transform_indices = @transform_21, window_bounds = array<i64: 8, 128>}]} {
    %c0 = arith.constant 0 : index
    %c0_0 = arith.constant 0 : index
    %c0_1 = arith.constant 0 : index
    %0 = vector.load %arg1[%c0, %c0_0, %c0_1] : memref<16x8x4xf32, #tpu.memory_space<vmem>>, vector<16x8x4xf32>
    %1 = vector.shape_cast %0 : vector<16x8x4xf32> to vector<128x4xf32>
    %c0_2 = arith.constant 0 : index
    %c0_3 = arith.constant 0 : index
    %2 = vector.load %arg3[%c0_2, %c0_3] : memref<4x32xf32, #tpu.memory_space<vmem>>, vector<4x32xf32>
    %cst = arith.constant dense<0.000000e+00> : vector<128x32xf32>
    %3 = tpu.matmul %1, %2, %cst {dimension_numbers = #tpu.dot_dimension_numbers<[1], [0], [0], [1], [0, 0, 1, 1], [], []>} : vector<128x4xf32>, vector<4x32xf32>, vector<128x32xf32> -> vector<128x32xf32>
    %c0_4 = arith.constant 0 : index
    %c0_5 = arith.constant 0 : index
    %4 = vector.load %arg5[%c0_4, %c0_5] : memref<1x32xf32, #tpu.memory_space<vmem>>, vector<1x32xf32>
    %5 = vector.broadcast %4 : vector<1x32xf32> to vector<128x32xf32>
    %6 = arith.addf %3, %5 : vector<128x32xf32>
    %7 = vector.shape_cast %6 : vector<128x32xf32> to vector<16x8x32xf32>
    %8 = vector.extract_strided_slice %7 {offsets = [0, 0, 0], sizes = [16, 8, 8], strides = [1, 1, 1]} : vector<16x8x32xf32> to vector<16x8x8xf32>
    %9 = vector.extract_strided_slice %7 {offsets = [0, 0, 8], sizes = [16, 8, 8], strides = [1, 1, 1]} : vector<16x8x32xf32> to vector<16x8x8xf32>
    %10 = vector.extract_strided_slice %7 {offsets = [0, 0, 16], sizes = [16, 8, 8], strides = [1, 1, 1]} : vector<16x8x32xf32> to vector<16x8x8xf32>
    %11 = vector.extract_strided_slice %7 {offsets = [0, 0, 24], sizes = [16, 8, 8], strides = [1, 1, 1]} : vector<16x8x32xf32> to vector<16x8x8xf32>
    %c0_6 = arith.constant 0 : index
    %c0_7 = arith.constant 0 : index
    %12 = vector.load %arg4[%c0_6, %c0_7] : memref<8x32xf32, #tpu.memory_space<vmem>>, vector<8x32xf32>
    %13 = vector.extract_strided_slice %12 {offsets = [0, 0], sizes = [1, 8], strides = [1, 1]} : vector<8x32xf32> to vector<1x8xf32>
    %14 = vector.shape_cast %13 : vector<1x8xf32> to vector<1x8xf32>
    %15 = vector.broadcast %14 : vector<1x8xf32> to vector<8x8xf32>
    %16 = vector.extract_strided_slice %12 {offsets = [0, 8], sizes = [1, 8], strides = [1, 1]} : vector<8x32xf32> to vector<1x8xf32>
    %17 = vector.shape_cast %16 : vector<1x8xf32> to vector<1x8xf32>
    %18 = vector.broadcast %17 : vector<1x8xf32> to vector<8x8xf32>
    %19 = vector.extract_strided_slice %12 {offsets = [0, 16], sizes = [1, 8], strides = [1, 1]} : vector<8x32xf32> to vector<1x8xf32>
    %20 = vector.shape_cast %19 : vector<1x8xf32> to vector<1x8xf32>
    %21 = vector.broadcast %20 : vector<1x8xf32> to vector<8x8xf32>
    %22 = vector.extract_strided_slice %12 {offsets = [0, 24], sizes = [1, 8], strides = [1, 1]} : vector<8x32xf32> to vector<1x8xf32>
    %23 = vector.shape_cast %22 : vector<1x8xf32> to vector<1x8xf32>
    %24 = vector.broadcast %23 : vector<1x8xf32> to vector<8x8xf32>
    %25 = vector.extract_strided_slice %12 {offsets = [1, 0], sizes = [1, 8], strides = [1, 1]} : vector<8x32xf32> to vector<1x8xf32>
    %26 = vector.shape_cast %25 : vector<1x8xf32> to vector<1x8xf32>
    %27 = vector.broadcast %26 : vector<1x8xf32> to vector<8x8xf32>
    %28 = vector.extract_strided_slice %12 {offsets = [1, 8], sizes = [1, 8], strides = [1, 1]} : vector<8x32xf32> to vector<1x8xf32>
    %29 = vector.shape_cast %28 : vector<1x8xf32> to vector<1x8xf32>
    %30 = vector.broadcast %29 : vector<1x8xf32> to vector<8x8xf32>
    %31 = vector.extract_strided_slice %12 {offsets = [1, 16], sizes = [1, 8], strides = [1, 1]} : vector<8x32xf32> to vector<1x8xf32>
    %32 = vector.shape_cast %31 : vector<1x8xf32> to vector<1x8xf32>
    %33 = vector.broadcast %32 : vector<1x8xf32> to vector<8x8xf32>
    %34 = vector.extract_strided_slice %12 {offsets = [1, 24], sizes = [1, 8], strides = [1, 1]} : vector<8x32xf32> to vector<1x8xf32>
    %35 = vector.shape_cast %34 : vector<1x8xf32> to vector<1x8xf32>
    %36 = vector.broadcast %35 : vector<1x8xf32> to vector<8x8xf32>
    %37 = vector.extract_strided_slice %12 {offsets = [2, 0], sizes = [1, 8], strides = [1, 1]} : vector<8x32xf32> to vector<1x8xf32>
    %38 = vector.shape_cast %37 : vector<1x8xf32> to vector<1x8xf32>
    %39 = vector.broadcast %38 : vector<1x8xf32> to vector<8x8xf32>
    %40 = vector.extract_strided_slice %12 {offsets = [2, 8], sizes = [1, 8], strides = [1, 1]} : vector<8x32xf32> to vector<1x8xf32>
    %41 = vector.shape_cast %40 : vector<1x8xf32> to vector<1x8xf32>
    %42 = vector.broadcast %41 : vector<1x8xf32> to vector<8x8xf32>
    %43 = vector.extract_strided_slice %12 {offsets = [2, 16], sizes = [1, 8], strides = [1, 1]} : vector<8x32xf32> to vector<1x8xf32>
    %44 = vector.shape_cast %43 : vector<1x8xf32> to vector<1x8xf32>
    %45 = vector.broadcast %44 : vector<1x8xf32> to vector<8x8xf32>
    %46 = vector.extract_strided_slice %12 {offsets = [2, 24], sizes = [1, 8], strides = [1, 1]} : vector<8x32xf32> to vector<1x8xf32>
    %47 = vector.shape_cast %46 : vector<1x8xf32> to vector<1x8xf32>
    %48 = vector.broadcast %47 : vector<1x8xf32> to vector<8x8xf32>
    %49 = vector.extract_strided_slice %12 {offsets = [3, 0], sizes = [1, 8], strides = [1, 1]} : vector<8x32xf32> to vector<1x8xf32>
    %50 = vector.shape_cast %49 : vector<1x8xf32> to vector<1x8xf32>
    %51 = vector.broadcast %50 : vector<1x8xf32> to vector<8x8xf32>
    %52 = vector.extract_strided_slice %12 {offsets = [3, 8], sizes = [1, 8], strides = [1, 1]} : vector<8x32xf32> to vector<1x8xf32>
    %53 = vector.shape_cast %52 : vector<1x8xf32> to vector<1x8xf32>
    %54 = vector.broadcast %53 : vector<1x8xf32> to vector<8x8xf32>
    %55 = vector.extract_strided_slice %12 {offsets = [3, 16], sizes = [1, 8], strides = [1, 1]} : vector<8x32xf32> to vector<1x8xf32>
    %56 = vector.shape_cast %55 : vector<1x8xf32> to vector<1x8xf32>
    %57 = vector.broadcast %56 : vector<1x8xf32> to vector<8x8xf32>
    %58 = vector.extract_strided_slice %12 {offsets = [3, 24], sizes = [1, 8], strides = [1, 1]} : vector<8x32xf32> to vector<1x8xf32>
    %59 = vector.shape_cast %58 : vector<1x8xf32> to vector<1x8xf32>
    %60 = vector.broadcast %59 : vector<1x8xf32> to vector<8x8xf32>
    %61 = vector.extract_strided_slice %12 {offsets = [4, 0], sizes = [1, 8], strides = [1, 1]} : vector<8x32xf32> to vector<1x8xf32>
    %62 = vector.shape_cast %61 : vector<1x8xf32> to vector<1x8xf32>
    %63 = vector.broadcast %62 : vector<1x8xf32> to vector<8x8xf32>
    %64 = vector.extract_strided_slice %12 {offsets = [4, 8], sizes = [1, 8], strides = [1, 1]} : vector<8x32xf32> to vector<1x8xf32>
    %65 = vector.shape_cast %64 : vector<1x8xf32> to vector<1x8xf32>
    %66 = vector.broadcast %65 : vector<1x8xf32> to vector<8x8xf32>
    %67 = vector.extract_strided_slice %12 {offsets = [4, 16], sizes = [1, 8], strides = [1, 1]} : vector<8x32xf32> to vector<1x8xf32>
    %68 = vector.shape_cast %67 : vector<1x8xf32> to vector<1x8xf32>
    %69 = vector.broadcast %68 : vector<1x8xf32> to vector<8x8xf32>
    %70 = vector.extract_strided_slice %12 {offsets = [4, 24], sizes = [1, 8], strides = [1, 1]} : vector<8x32xf32> to vector<1x8xf32>
    %71 = vector.shape_cast %70 : vector<1x8xf32> to vector<1x8xf32>
    %72 = vector.broadcast %71 : vector<1x8xf32> to vector<8x8xf32>
    %73 = vector.extract_strided_slice %12 {offsets = [5, 0], sizes = [1, 8], strides = [1, 1]} : vector<8x32xf32> to vector<1x8xf32>
    %74 = vector.shape_cast %73 : vector<1x8xf32> to vector<1x8xf32>
    %75 = vector.broadcast %74 : vector<1x8xf32> to vector<8x8xf32>
    %76 = vector.extract_strided_slice %12 {offsets = [5, 8], sizes = [1, 8], strides = [1, 1]} : vector<8x32xf32> to vector<1x8xf32>
    %77 = vector.shape_cast %76 : vector<1x8xf32> to vector<1x8xf32>
    %78 = vector.broadcast %77 : vector<1x8xf32> to vector<8x8xf32>
    %79 = vector.extract_strided_slice %12 {offsets = [5, 16], sizes = [1, 8], strides = [1, 1]} : vector<8x32xf32> to vector<1x8xf32>
    %80 = vector.shape_cast %79 : vector<1x8xf32> to vector<1x8xf32>
    %81 = vector.broadcast %80 : vector<1x8xf32> to vector<8x8xf32>
    %82 = vector.extract_strided_slice %12 {offsets = [5, 24], sizes = [1, 8], strides = [1, 1]} : vector<8x32xf32> to vector<1x8xf32>
    %83 = vector.shape_cast %82 : vector<1x8xf32> to vector<1x8xf32>
    %84 = vector.broadcast %83 : vector<1x8xf32> to vector<8x8xf32>
    %85 = vector.extract_strided_slice %12 {offsets = [6, 0], sizes = [1, 8], strides = [1, 1]} : vector<8x32xf32> to vector<1x8xf32>
    %86 = vector.shape_cast %85 : vector<1x8xf32> to vector<1x8xf32>
    %87 = vector.broadcast %86 : vector<1x8xf32> to vector<8x8xf32>
    %88 = vector.extract_strided_slice %12 {offsets = [6, 8], sizes = [1, 8], strides = [1, 1]} : vector<8x32xf32> to vector<1x8xf32>
    %89 = vector.shape_cast %88 : vector<1x8xf32> to vector<1x8xf32>
    %90 = vector.broadcast %89 : vector<1x8xf32> to vector<8x8xf32>
    %91 = vector.extract_strided_slice %12 {offsets = [6, 16], sizes = [1, 8], strides = [1, 1]} : vector<8x32xf32> to vector<1x8xf32>
    %92 = vector.shape_cast %91 : vector<1x8xf32> to vector<1x8xf32>
    %93 = vector.broadcast %92 : vector<1x8xf32> to vector<8x8xf32>
    %94 = vector.extract_strided_slice %12 {offsets = [6, 24], sizes = [1, 8], strides = [1, 1]} : vector<8x32xf32> to vector<1x8xf32>
    %95 = vector.shape_cast %94 : vector<1x8xf32> to vector<1x8xf32>
    %96 = vector.broadcast %95 : vector<1x8xf32> to vector<8x8xf32>
    %97 = vector.extract_strided_slice %12 {offsets = [7, 0], sizes = [1, 8], strides = [1, 1]} : vector<8x32xf32> to vector<1x8xf32>
    %98 = vector.shape_cast %97 : vector<1x8xf32> to vector<1x8xf32>
    %99 = vector.broadcast %98 : vector<1x8xf32> to vector<8x8xf32>
    %100 = vector.extract_strided_slice %12 {offsets = [7, 8], sizes = [1, 8], strides = [1, 1]} : vector<8x32xf32> to vector<1x8xf32>
    %101 = vector.shape_cast %100 : vector<1x8xf32> to vector<1x8xf32>
    %102 = vector.broadcast %101 : vector<1x8xf32> to vector<8x8xf32>
    %103 = vector.extract_strided_slice %12 {offsets = [7, 16], sizes = [1, 8], strides = [1, 1]} : vector<8x32xf32> to vector<1x8xf32>
    %104 = vector.shape_cast %103 : vector<1x8xf32> to vector<1x8xf32>
    %105 = vector.broadcast %104 : vector<1x8xf32> to vector<8x8xf32>
    %106 = vector.extract_strided_slice %12 {offsets = [7, 24], sizes = [1, 8], strides = [1, 1]} : vector<8x32xf32> to vector<1x8xf32>
    %107 = vector.shape_cast %106 : vector<1x8xf32> to vector<1x8xf32>
    %108 = vector.broadcast %107 : vector<1x8xf32> to vector<8x8xf32>
    %cst_8 = arith.constant 0.000000e+00 : f32
    %109 = vector.broadcast %cst_8 : f32 to vector<8x8xf32>
    %cst_9 = arith.constant 0.000000e+00 : f32
    %110 = vector.broadcast %cst_9 : f32 to vector<8x8xf32>
    %111 = vector.extract_strided_slice %8 {offsets = [0, 0, 0], sizes = [1, 8, 8], strides = [1, 1, 1]} : vector<16x8x8xf32> to vector<1x8x8xf32>
    %112 = vector.shape_cast %111 : vector<1x8x8xf32> to vector<8x8xf32>
    %113 = vector.extract_strided_slice %9 {offsets = [0, 0, 0], sizes = [1, 8, 8], strides = [1, 1, 1]} : vector<16x8x8xf32> to vector<1x8x8xf32>
    %114 = vector.shape_cast %113 : vector<1x8x8xf32> to vector<8x8xf32>
    %115 = vector.extract_strided_slice %10 {offsets = [0, 0, 0], sizes = [1, 8, 8], strides = [1, 1, 1]} : vector<16x8x8xf32> to vector<1x8x8xf32>
    %116 = vector.shape_cast %115 : vector<1x8x8xf32> to vector<8x8xf32>
    %117 = vector.extract_strided_slice %11 {offsets = [0, 0, 0], sizes = [1, 8, 8], strides = [1, 1, 1]} : vector<16x8x8xf32> to vector<1x8x8xf32>
    %118 = vector.shape_cast %117 : vector<1x8x8xf32> to vector<8x8xf32>
    %119 = vector.extract_strided_slice %109 {offsets = [0, 0], sizes = [8, 1], strides = [1, 1]} : vector<8x8xf32> to vector<8x1xf32>
    %120 = vector.shape_cast %119 : vector<8x1xf32> to vector<8x1xf32>
    %121 = vector.broadcast %120 : vector<8x1xf32> to vector<8x8xf32>
    %122 = arith.mulf %121, %15 : vector<8x8xf32>
    %123 = arith.addf %112, %122 : vector<8x8xf32>
    %124 = arith.mulf %121, %18 : vector<8x8xf32>
    %125 = arith.addf %114, %124 : vector<8x8xf32>
    %126 = arith.mulf %121, %21 : vector<8x8xf32>
    %127 = arith.addf %116, %126 : vector<8x8xf32>
    %128 = arith.mulf %121, %24 : vector<8x8xf32>
    %129 = arith.addf %118, %128 : vector<8x8xf32>
    %130 = vector.extract_strided_slice %109 {offsets = [0, 1], sizes = [8, 1], strides = [1, 1]} : vector<8x8xf32> to vector<8x1xf32>
    %131 = vector.shape_cast %130 : vector<8x1xf32> to vector<8x1xf32>
    %132 = vector.broadcast %131 : vector<8x1xf32> to vector<8x8xf32>
    %133 = arith.mulf %132, %27 : vector<8x8xf32>
    %134 = arith.addf %123, %133 : vector<8x8xf32>
    %135 = arith.mulf %132, %30 : vector<8x8xf32>
    %136 = arith.addf %125, %135 : vector<8x8xf32>
    %137 = arith.mulf %132, %33 : vector<8x8xf32>
    %138 = arith.addf %127, %137 : vector<8x8xf32>
    %139 = arith.mulf %132, %36 : vector<8x8xf32>
    %140 = arith.addf %129, %139 : vector<8x8xf32>
    %141 = vector.extract_strided_slice %109 {offsets = [0, 2], sizes = [8, 1], strides = [1, 1]} : vector<8x8xf32> to vector<8x1xf32>
    %142 = vector.shape_cast %141 : vector<8x1xf32> to vector<8x1xf32>
    %143 = vector.broadcast %142 : vector<8x1xf32> to vector<8x8xf32>
    %144 = arith.mulf %143, %39 : vector<8x8xf32>
    %145 = arith.addf %134, %144 : vector<8x8xf32>
    %146 = arith.mulf %143, %42 : vector<8x8xf32>
    %147 = arith.addf %136, %146 : vector<8x8xf32>
    %148 = arith.mulf %143, %45 : vector<8x8xf32>
    %149 = arith.addf %138, %148 : vector<8x8xf32>
    %150 = arith.mulf %143, %48 : vector<8x8xf32>
    %151 = arith.addf %140, %150 : vector<8x8xf32>
    %152 = vector.extract_strided_slice %109 {offsets = [0, 3], sizes = [8, 1], strides = [1, 1]} : vector<8x8xf32> to vector<8x1xf32>
    %153 = vector.shape_cast %152 : vector<8x1xf32> to vector<8x1xf32>
    %154 = vector.broadcast %153 : vector<8x1xf32> to vector<8x8xf32>
    %155 = arith.mulf %154, %51 : vector<8x8xf32>
    %156 = arith.addf %145, %155 : vector<8x8xf32>
    %157 = arith.mulf %154, %54 : vector<8x8xf32>
    %158 = arith.addf %147, %157 : vector<8x8xf32>
    %159 = arith.mulf %154, %57 : vector<8x8xf32>
    %160 = arith.addf %149, %159 : vector<8x8xf32>
    %161 = arith.mulf %154, %60 : vector<8x8xf32>
    %162 = arith.addf %151, %161 : vector<8x8xf32>
    %163 = vector.extract_strided_slice %109 {offsets = [0, 4], sizes = [8, 1], strides = [1, 1]} : vector<8x8xf32> to vector<8x1xf32>
    %164 = vector.shape_cast %163 : vector<8x1xf32> to vector<8x1xf32>
    %165 = vector.broadcast %164 : vector<8x1xf32> to vector<8x8xf32>
    %166 = arith.mulf %165, %63 : vector<8x8xf32>
    %167 = arith.addf %156, %166 : vector<8x8xf32>
    %168 = arith.mulf %165, %66 : vector<8x8xf32>
    %169 = arith.addf %158, %168 : vector<8x8xf32>
    %170 = arith.mulf %165, %69 : vector<8x8xf32>
    %171 = arith.addf %160, %170 : vector<8x8xf32>
    %172 = arith.mulf %165, %72 : vector<8x8xf32>
    %173 = arith.addf %162, %172 : vector<8x8xf32>
    %174 = vector.extract_strided_slice %109 {offsets = [0, 5], sizes = [8, 1], strides = [1, 1]} : vector<8x8xf32> to vector<8x1xf32>
    %175 = vector.shape_cast %174 : vector<8x1xf32> to vector<8x1xf32>
    %176 = vector.broadcast %175 : vector<8x1xf32> to vector<8x8xf32>
    %177 = arith.mulf %176, %75 : vector<8x8xf32>
    %178 = arith.addf %167, %177 : vector<8x8xf32>
    %179 = arith.mulf %176, %78 : vector<8x8xf32>
    %180 = arith.addf %169, %179 : vector<8x8xf32>
    %181 = arith.mulf %176, %81 : vector<8x8xf32>
    %182 = arith.addf %171, %181 : vector<8x8xf32>
    %183 = arith.mulf %176, %84 : vector<8x8xf32>
    %184 = arith.addf %173, %183 : vector<8x8xf32>
    %185 = vector.extract_strided_slice %109 {offsets = [0, 6], sizes = [8, 1], strides = [1, 1]} : vector<8x8xf32> to vector<8x1xf32>
    %186 = vector.shape_cast %185 : vector<8x1xf32> to vector<8x1xf32>
    %187 = vector.broadcast %186 : vector<8x1xf32> to vector<8x8xf32>
    %188 = arith.mulf %187, %87 : vector<8x8xf32>
    %189 = arith.addf %178, %188 : vector<8x8xf32>
    %190 = arith.mulf %187, %90 : vector<8x8xf32>
    %191 = arith.addf %180, %190 : vector<8x8xf32>
    %192 = arith.mulf %187, %93 : vector<8x8xf32>
    %193 = arith.addf %182, %192 : vector<8x8xf32>
    %194 = arith.mulf %187, %96 : vector<8x8xf32>
    %195 = arith.addf %184, %194 : vector<8x8xf32>
    %196 = vector.extract_strided_slice %109 {offsets = [0, 7], sizes = [8, 1], strides = [1, 1]} : vector<8x8xf32> to vector<8x1xf32>
    %197 = vector.shape_cast %196 : vector<8x1xf32> to vector<8x1xf32>
    %198 = vector.broadcast %197 : vector<8x1xf32> to vector<8x8xf32>
    %199 = arith.mulf %198, %99 : vector<8x8xf32>
    %200 = arith.addf %189, %199 : vector<8x8xf32>
    %201 = arith.mulf %198, %102 : vector<8x8xf32>
    %202 = arith.addf %191, %201 : vector<8x8xf32>
    %203 = arith.mulf %198, %105 : vector<8x8xf32>
    %204 = arith.addf %193, %203 : vector<8x8xf32>
    %205 = arith.mulf %198, %108 : vector<8x8xf32>
    %206 = arith.addf %195, %205 : vector<8x8xf32>
    %207 = arith.negf %200 : vector<8x8xf32>
    %208 = math.exp %207 : vector<8x8xf32>
    %cst_10 = arith.constant 1.000000e+00 : f32
    %209 = vector.broadcast %cst_10 : f32 to vector<8x8xf32>
    %210 = arith.addf %209, %208 : vector<8x8xf32>
    %211 = arith.divf %209, %210 : vector<8x8xf32>
    %212 = arith.negf %202 : vector<8x8xf32>
    %213 = math.exp %212 : vector<8x8xf32>
    %cst_11 = arith.constant 1.000000e+00 : f32
    %214 = vector.broadcast %cst_11 : f32 to vector<8x8xf32>
    %215 = arith.addf %214, %213 : vector<8x8xf32>
    %216 = arith.divf %214, %215 : vector<8x8xf32>
    %217 = arith.negf %204 : vector<8x8xf32>
    %218 = math.exp %217 : vector<8x8xf32>
    %cst_12 = arith.constant 1.000000e+00 : f32
    %219 = vector.broadcast %cst_12 : f32 to vector<8x8xf32>
    %220 = arith.addf %219, %218 : vector<8x8xf32>
    %221 = arith.divf %219, %220 : vector<8x8xf32>
    %222 = math.tanh %206 : vector<8x8xf32>
    %223 = arith.mulf %216, %110 : vector<8x8xf32>
    %224 = arith.mulf %211, %222 : vector<8x8xf32>
    %225 = arith.addf %223, %224 : vector<8x8xf32>
    %226 = math.tanh %225 : vector<8x8xf32>
    %227 = arith.mulf %221, %226 : vector<8x8xf32>
    %228 = vector.extract_strided_slice %8 {offsets = [1, 0, 0], sizes = [1, 8, 8], strides = [1, 1, 1]} : vector<16x8x8xf32> to vector<1x8x8xf32>
    %229 = vector.shape_cast %228 : vector<1x8x8xf32> to vector<8x8xf32>
    %230 = vector.extract_strided_slice %9 {offsets = [1, 0, 0], sizes = [1, 8, 8], strides = [1, 1, 1]} : vector<16x8x8xf32> to vector<1x8x8xf32>
    %231 = vector.shape_cast %230 : vector<1x8x8xf32> to vector<8x8xf32>
    %232 = vector.extract_strided_slice %10 {offsets = [1, 0, 0], sizes = [1, 8, 8], strides = [1, 1, 1]} : vector<16x8x8xf32> to vector<1x8x8xf32>
    %233 = vector.shape_cast %232 : vector<1x8x8xf32> to vector<8x8xf32>
    %234 = vector.extract_strided_slice %11 {offsets = [1, 0, 0], sizes = [1, 8, 8], strides = [1, 1, 1]} : vector<16x8x8xf32> to vector<1x8x8xf32>
    %235 = vector.shape_cast %234 : vector<1x8x8xf32> to vector<8x8xf32>
    %236 = vector.extract_strided_slice %227 {offsets = [0, 0], sizes = [8, 1], strides = [1, 1]} : vector<8x8xf32> to vector<8x1xf32>
    %237 = vector.shape_cast %236 : vector<8x1xf32> to vector<8x1xf32>
    %238 = vector.broadcast %237 : vector<8x1xf32> to vector<8x8xf32>
    %239 = arith.mulf %238, %15 : vector<8x8xf32>
    %240 = arith.addf %229, %239 : vector<8x8xf32>
    %241 = arith.mulf %238, %18 : vector<8x8xf32>
    %242 = arith.addf %231, %241 : vector<8x8xf32>
    %243 = arith.mulf %238, %21 : vector<8x8xf32>
    %244 = arith.addf %233, %243 : vector<8x8xf32>
    %245 = arith.mulf %238, %24 : vector<8x8xf32>
    %246 = arith.addf %235, %245 : vector<8x8xf32>
    %247 = vector.extract_strided_slice %227 {offsets = [0, 1], sizes = [8, 1], strides = [1, 1]} : vector<8x8xf32> to vector<8x1xf32>
    %248 = vector.shape_cast %247 : vector<8x1xf32> to vector<8x1xf32>
    %249 = vector.broadcast %248 : vector<8x1xf32> to vector<8x8xf32>
    %250 = arith.mulf %249, %27 : vector<8x8xf32>
    %251 = arith.addf %240, %250 : vector<8x8xf32>
    %252 = arith.mulf %249, %30 : vector<8x8xf32>
    %253 = arith.addf %242, %252 : vector<8x8xf32>
    %254 = arith.mulf %249, %33 : vector<8x8xf32>
    %255 = arith.addf %244, %254 : vector<8x8xf32>
    %256 = arith.mulf %249, %36 : vector<8x8xf32>
    %257 = arith.addf %246, %256 : vector<8x8xf32>
    %258 = vector.extract_strided_slice %227 {offsets = [0, 2], sizes = [8, 1], strides = [1, 1]} : vector<8x8xf32> to vector<8x1xf32>
    %259 = vector.shape_cast %258 : vector<8x1xf32> to vector<8x1xf32>
    %260 = vector.broadcast %259 : vector<8x1xf32> to vector<8x8xf32>
    %261 = arith.mulf %260, %39 : vector<8x8xf32>
    %262 = arith.addf %251, %261 : vector<8x8xf32>
    %263 = arith.mulf %260, %42 : vector<8x8xf32>
    %264 = arith.addf %253, %263 : vector<8x8xf32>
    %265 = arith.mulf %260, %45 : vector<8x8xf32>
    %266 = arith.addf %255, %265 : vector<8x8xf32>
    %267 = arith.mulf %260, %48 : vector<8x8xf32>
    %268 = arith.addf %257, %267 : vector<8x8xf32>
    %269 = vector.extract_strided_slice %227 {offsets = [0, 3], sizes = [8, 1], strides = [1, 1]} : vector<8x8xf32> to vector<8x1xf32>
    %270 = vector.shape_cast %269 : vector<8x1xf32> to vector<8x1xf32>
    %271 = vector.broadcast %270 : vector<8x1xf32> to vector<8x8xf32>
    %272 = arith.mulf %271, %51 : vector<8x8xf32>
    %273 = arith.addf %262, %272 : vector<8x8xf32>
    %274 = arith.mulf %271, %54 : vector<8x8xf32>
    %275 = arith.addf %264, %274 : vector<8x8xf32>
    %276 = arith.mulf %271, %57 : vector<8x8xf32>
    %277 = arith.addf %266, %276 : vector<8x8xf32>
    %278 = arith.mulf %271, %60 : vector<8x8xf32>
    %279 = arith.addf %268, %278 : vector<8x8xf32>
    %280 = vector.extract_strided_slice %227 {offsets = [0, 4], sizes = [8, 1], strides = [1, 1]} : vector<8x8xf32> to vector<8x1xf32>
    %281 = vector.shape_cast %280 : vector<8x1xf32> to vector<8x1xf32>
    %282 = vector.broadcast %281 : vector<8x1xf32> to vector<8x8xf32>
    %283 = arith.mulf %282, %63 : vector<8x8xf32>
    %284 = arith.addf %273, %283 : vector<8x8xf32>
    %285 = arith.mulf %282, %66 : vector<8x8xf32>
    %286 = arith.addf %275, %285 : vector<8x8xf32>
    %287 = arith.mulf %282, %69 : vector<8x8xf32>
    %288 = arith.addf %277, %287 : vector<8x8xf32>
    %289 = arith.mulf %282, %72 : vector<8x8xf32>
    %290 = arith.addf %279, %289 : vector<8x8xf32>
    %291 = vector.extract_strided_slice %227 {offsets = [0, 5], sizes = [8, 1], strides = [1, 1]} : vector<8x8xf32> to vector<8x1xf32>
    %292 = vector.shape_cast %291 : vector<8x1xf32> to vector<8x1xf32>
    %293 = vector.broadcast %292 : vector<8x1xf32> to vector<8x8xf32>
    %294 = arith.mulf %293, %75 : vector<8x8xf32>
    %295 = arith.addf %284, %294 : vector<8x8xf32>
    %296 = arith.mulf %293, %78 : vector<8x8xf32>
    %297 = arith.addf %286, %296 : vector<8x8xf32>
    %298 = arith.mulf %293, %81 : vector<8x8xf32>
    %299 = arith.addf %288, %298 : vector<8x8xf32>
    %300 = arith.mulf %293, %84 : vector<8x8xf32>
    %301 = arith.addf %290, %300 : vector<8x8xf32>
    %302 = vector.extract_strided_slice %227 {offsets = [0, 6], sizes = [8, 1], strides = [1, 1]} : vector<8x8xf32> to vector<8x1xf32>
    %303 = vector.shape_cast %302 : vector<8x1xf32> to vector<8x1xf32>
    %304 = vector.broadcast %303 : vector<8x1xf32> to vector<8x8xf32>
    %305 = arith.mulf %304, %87 : vector<8x8xf32>
    %306 = arith.addf %295, %305 : vector<8x8xf32>
    %307 = arith.mulf %304, %90 : vector<8x8xf32>
    %308 = arith.addf %297, %307 : vector<8x8xf32>
    %309 = arith.mulf %304, %93 : vector<8x8xf32>
    %310 = arith.addf %299, %309 : vector<8x8xf32>
    %311 = arith.mulf %304, %96 : vector<8x8xf32>
    %312 = arith.addf %301, %311 : vector<8x8xf32>
    %313 = vector.extract_strided_slice %227 {offsets = [0, 7], sizes = [8, 1], strides = [1, 1]} : vector<8x8xf32> to vector<8x1xf32>
    %314 = vector.shape_cast %313 : vector<8x1xf32> to vector<8x1xf32>
    %315 = vector.broadcast %314 : vector<8x1xf32> to vector<8x8xf32>
    %316 = arith.mulf %315, %99 : vector<8x8xf32>
    %317 = arith.addf %306, %316 : vector<8x8xf32>
    %318 = arith.mulf %315, %102 : vector<8x8xf32>
    %319 = arith.addf %308, %318 : vector<8x8xf32>
    %320 = arith.mulf %315, %105 : vector<8x8xf32>
    %321 = arith.addf %310, %320 : vector<8x8xf32>
    %322 = arith.mulf %315, %108 : vector<8x8xf32>
    %323 = arith.addf %312, %322 : vector<8x8xf32>
    %324 = arith.negf %317 : vector<8x8xf32>
    %325 = math.exp %324 : vector<8x8xf32>
    %cst_13 = arith.constant 1.000000e+00 : f32
    %326 = vector.broadcast %cst_13 : f32 to vector<8x8xf32>
    %327 = arith.addf %326, %325 : vector<8x8xf32>
    %328 = arith.divf %326, %327 : vector<8x8xf32>
    %329 = arith.negf %319 : vector<8x8xf32>
    %330 = math.exp %329 : vector<8x8xf32>
    %cst_14 = arith.constant 1.000000e+00 : f32
    %331 = vector.broadcast %cst_14 : f32 to vector<8x8xf32>
    %332 = arith.addf %331, %330 : vector<8x8xf32>
    %333 = arith.divf %331, %332 : vector<8x8xf32>
    %334 = arith.negf %321 : vector<8x8xf32>
    %335 = math.exp %334 : vector<8x8xf32>
    %cst_15 = arith.constant 1.000000e+00 : f32
    %336 = vector.broadcast %cst_15 : f32 to vector<8x8xf32>
    %337 = arith.addf %336, %335 : vector<8x8xf32>
    %338 = arith.divf %336, %337 : vector<8x8xf32>
    %339 = math.tanh %323 : vector<8x8xf32>
    %340 = arith.mulf %333, %225 : vector<8x8xf32>
    %341 = arith.mulf %328, %339 : vector<8x8xf32>
    %342 = arith.addf %340, %341 : vector<8x8xf32>
    %343 = math.tanh %342 : vector<8x8xf32>
    %344 = arith.mulf %338, %343 : vector<8x8xf32>
    %345 = vector.extract_strided_slice %8 {offsets = [2, 0, 0], sizes = [1, 8, 8], strides = [1, 1, 1]} : vector<16x8x8xf32> to vector<1x8x8xf32>
    %346 = vector.shape_cast %345 : vector<1x8x8xf32> to vector<8x8xf32>
    %347 = vector.extract_strided_slice %9 {offsets = [2, 0, 0], sizes = [1, 8, 8], strides = [1, 1, 1]} : vector<16x8x8xf32> to vector<1x8x8xf32>
    %348 = vector.shape_cast %347 : vector<1x8x8xf32> to vector<8x8xf32>
    %349 = vector.extract_strided_slice %10 {offsets = [2, 0, 0], sizes = [1, 8, 8], strides = [1, 1, 1]} : vector<16x8x8xf32> to vector<1x8x8xf32>
    %350 = vector.shape_cast %349 : vector<1x8x8xf32> to vector<8x8xf32>
    %351 = vector.extract_strided_slice %11 {offsets = [2, 0, 0], sizes = [1, 8, 8], strides = [1, 1, 1]} : vector<16x8x8xf32> to vector<1x8x8xf32>
    %352 = vector.shape_cast %351 : vector<1x8x8xf32> to vector<8x8xf32>
    %353 = vector.extract_strided_slice %344 {offsets = [0, 0], sizes = [8, 1], strides = [1, 1]} : vector<8x8xf32> to vector<8x1xf32>
    %354 = vector.shape_cast %353 : vector<8x1xf32> to vector<8x1xf32>
    %355 = vector.broadcast %354 : vector<8x1xf32> to vector<8x8xf32>
    %356 = arith.mulf %355, %15 : vector<8x8xf32>
    %357 = arith.addf %346, %356 : vector<8x8xf32>
    %358 = arith.mulf %355, %18 : vector<8x8xf32>
    %359 = arith.addf %348, %358 : vector<8x8xf32>
    %360 = arith.mulf %355, %21 : vector<8x8xf32>
    %361 = arith.addf %350, %360 : vector<8x8xf32>
    %362 = arith.mulf %355, %24 : vector<8x8xf32>
    %363 = arith.addf %352, %362 : vector<8x8xf32>
    %364 = vector.extract_strided_slice %344 {offsets = [0, 1], sizes = [8, 1], strides = [1, 1]} : vector<8x8xf32> to vector<8x1xf32>
    %365 = vector.shape_cast %364 : vector<8x1xf32> to vector<8x1xf32>
    %366 = vector.broadcast %365 : vector<8x1xf32> to vector<8x8xf32>
    %367 = arith.mulf %366, %27 : vector<8x8xf32>
    %368 = arith.addf %357, %367 : vector<8x8xf32>
    %369 = arith.mulf %366, %30 : vector<8x8xf32>
    %370 = arith.addf %359, %369 : vector<8x8xf32>
    %371 = arith.mulf %366, %33 : vector<8x8xf32>
    %372 = arith.addf %361, %371 : vector<8x8xf32>
    %373 = arith.mulf %366, %36 : vector<8x8xf32>
    %374 = arith.addf %363, %373 : vector<8x8xf32>
    %375 = vector.extract_strided_slice %344 {offsets = [0, 2], sizes = [8, 1], strides = [1, 1]} : vector<8x8xf32> to vector<8x1xf32>
    %376 = vector.shape_cast %375 : vector<8x1xf32> to vector<8x1xf32>
    %377 = vector.broadcast %376 : vector<8x1xf32> to vector<8x8xf32>
    %378 = arith.mulf %377, %39 : vector<8x8xf32>
    %379 = arith.addf %368, %378 : vector<8x8xf32>
    %380 = arith.mulf %377, %42 : vector<8x8xf32>
    %381 = arith.addf %370, %380 : vector<8x8xf32>
    %382 = arith.mulf %377, %45 : vector<8x8xf32>
    %383 = arith.addf %372, %382 : vector<8x8xf32>
    %384 = arith.mulf %377, %48 : vector<8x8xf32>
    %385 = arith.addf %374, %384 : vector<8x8xf32>
    %386 = vector.extract_strided_slice %344 {offsets = [0, 3], sizes = [8, 1], strides = [1, 1]} : vector<8x8xf32> to vector<8x1xf32>
    %387 = vector.shape_cast %386 : vector<8x1xf32> to vector<8x1xf32>
    %388 = vector.broadcast %387 : vector<8x1xf32> to vector<8x8xf32>
    %389 = arith.mulf %388, %51 : vector<8x8xf32>
    %390 = arith.addf %379, %389 : vector<8x8xf32>
    %391 = arith.mulf %388, %54 : vector<8x8xf32>
    %392 = arith.addf %381, %391 : vector<8x8xf32>
    %393 = arith.mulf %388, %57 : vector<8x8xf32>
    %394 = arith.addf %383, %393 : vector<8x8xf32>
    %395 = arith.mulf %388, %60 : vector<8x8xf32>
    %396 = arith.addf %385, %395 : vector<8x8xf32>
    %397 = vector.extract_strided_slice %344 {offsets = [0, 4], sizes = [8, 1], strides = [1, 1]} : vector<8x8xf32> to vector<8x1xf32>
    %398 = vector.shape_cast %397 : vector<8x1xf32> to vector<8x1xf32>
    %399 = vector.broadcast %398 : vector<8x1xf32> to vector<8x8xf32>
    %400 = arith.mulf %399, %63 : vector<8x8xf32>
    %401 = arith.addf %390, %400 : vector<8x8xf32>
    %402 = arith.mulf %399, %66 : vector<8x8xf32>
    %403 = arith.addf %392, %402 : vector<8x8xf32>
    %404 = arith.mulf %399, %69 : vector<8x8xf32>
    %405 = arith.addf %394, %404 : vector<8x8xf32>
    %406 = arith.mulf %399, %72 : vector<8x8xf32>
    %407 = arith.addf %396, %406 : vector<8x8xf32>
    %408 = vector.extract_strided_slice %344 {offsets = [0, 5], sizes = [8, 1], strides = [1, 1]} : vector<8x8xf32> to vector<8x1xf32>
    %409 = vector.shape_cast %408 : vector<8x1xf32> to vector<8x1xf32>
    %410 = vector.broadcast %409 : vector<8x1xf32> to vector<8x8xf32>
    %411 = arith.mulf %410, %75 : vector<8x8xf32>
    %412 = arith.addf %401, %411 : vector<8x8xf32>
    %413 = arith.mulf %410, %78 : vector<8x8xf32>
    %414 = arith.addf %403, %413 : vector<8x8xf32>
    %415 = arith.mulf %410, %81 : vector<8x8xf32>
    %416 = arith.addf %405, %415 : vector<8x8xf32>
    %417 = arith.mulf %410, %84 : vector<8x8xf32>
    %418 = arith.addf %407, %417 : vector<8x8xf32>
    %419 = vector.extract_strided_slice %344 {offsets = [0, 6], sizes = [8, 1], strides = [1, 1]} : vector<8x8xf32> to vector<8x1xf32>
    %420 = vector.shape_cast %419 : vector<8x1xf32> to vector<8x1xf32>
    %421 = vector.broadcast %420 : vector<8x1xf32> to vector<8x8xf32>
    %422 = arith.mulf %421, %87 : vector<8x8xf32>
    %423 = arith.addf %412, %422 : vector<8x8xf32>
    %424 = arith.mulf %421, %90 : vector<8x8xf32>
    %425 = arith.addf %414, %424 : vector<8x8xf32>
    %426 = arith.mulf %421, %93 : vector<8x8xf32>
    %427 = arith.addf %416, %426 : vector<8x8xf32>
    %428 = arith.mulf %421, %96 : vector<8x8xf32>
    %429 = arith.addf %418, %428 : vector<8x8xf32>
    %430 = vector.extract_strided_slice %344 {offsets = [0, 7], sizes = [8, 1], strides = [1, 1]} : vector<8x8xf32> to vector<8x1xf32>
    %431 = vector.shape_cast %430 : vector<8x1xf32> to vector<8x1xf32>
    %432 = vector.broadcast %431 : vector<8x1xf32> to vector<8x8xf32>
    %433 = arith.mulf %432, %99 : vector<8x8xf32>
    %434 = arith.addf %423, %433 : vector<8x8xf32>
    %435 = arith.mulf %432, %102 : vector<8x8xf32>
    %436 = arith.addf %425, %435 : vector<8x8xf32>
    %437 = arith.mulf %432, %105 : vector<8x8xf32>
    %438 = arith.addf %427, %437 : vector<8x8xf32>
    %439 = arith.mulf %432, %108 : vector<8x8xf32>
    %440 = arith.addf %429, %439 : vector<8x8xf32>
    %441 = arith.negf %434 : vector<8x8xf32>
    %442 = math.exp %441 : vector<8x8xf32>
    %cst_16 = arith.constant 1.000000e+00 : f32
    %443 = vector.broadcast %cst_16 : f32 to vector<8x8xf32>
    %444 = arith.addf %443, %442 : vector<8x8xf32>
    %445 = arith.divf %443, %444 : vector<8x8xf32>
    %446 = arith.negf %436 : vector<8x8xf32>
    %447 = math.exp %446 : vector<8x8xf32>
    %cst_17 = arith.constant 1.000000e+00 : f32
    %448 = vector.broadcast %cst_17 : f32 to vector<8x8xf32>
    %449 = arith.addf %448, %447 : vector<8x8xf32>
    %450 = arith.divf %448, %449 : vector<8x8xf32>
    %451 = arith.negf %438 : vector<8x8xf32>
    %452 = math.exp %451 : vector<8x8xf32>
    %cst_18 = arith.constant 1.000000e+00 : f32
    %453 = vector.broadcast %cst_18 : f32 to vector<8x8xf32>
    %454 = arith.addf %453, %452 : vector<8x8xf32>
    %455 = arith.divf %453, %454 : vector<8x8xf32>
    %456 = math.tanh %440 : vector<8x8xf32>
    %457 = arith.mulf %450, %342 : vector<8x8xf32>
    %458 = arith.mulf %445, %456 : vector<8x8xf32>
    %459 = arith.addf %457, %458 : vector<8x8xf32>
    %460 = math.tanh %459 : vector<8x8xf32>
    %461 = arith.mulf %455, %460 : vector<8x8xf32>
    %462 = vector.extract_strided_slice %8 {offsets = [3, 0, 0], sizes = [1, 8, 8], strides = [1, 1, 1]} : vector<16x8x8xf32> to vector<1x8x8xf32>
    %463 = vector.shape_cast %462 : vector<1x8x8xf32> to vector<8x8xf32>
    %464 = vector.extract_strided_slice %9 {offsets = [3, 0, 0], sizes = [1, 8, 8], strides = [1, 1, 1]} : vector<16x8x8xf32> to vector<1x8x8xf32>
    %465 = vector.shape_cast %464 : vector<1x8x8xf32> to vector<8x8xf32>
    %466 = vector.extract_strided_slice %10 {offsets = [3, 0, 0], sizes = [1, 8, 8], strides = [1, 1, 1]} : vector<16x8x8xf32> to vector<1x8x8xf32>
    %467 = vector.shape_cast %466 : vector<1x8x8xf32> to vector<8x8xf32>
    %468 = vector.extract_strided_slice %11 {offsets = [3, 0, 0], sizes = [1, 8, 8], strides = [1, 1, 1]} : vector<16x8x8xf32> to vector<1x8x8xf32>
    %469 = vector.shape_cast %468 : vector<1x8x8xf32> to vector<8x8xf32>
    %470 = vector.extract_strided_slice %461 {offsets = [0, 0], sizes = [8, 1], strides = [1, 1]} : vector<8x8xf32> to vector<8x1xf32>
    %471 = vector.shape_cast %470 : vector<8x1xf32> to vector<8x1xf32>
    %472 = vector.broadcast %471 : vector<8x1xf32> to vector<8x8xf32>
    %473 = arith.mulf %472, %15 : vector<8x8xf32>
    %474 = arith.addf %463, %473 : vector<8x8xf32>
    %475 = arith.mulf %472, %18 : vector<8x8xf32>
    %476 = arith.addf %465, %475 : vector<8x8xf32>
    %477 = arith.mulf %472, %21 : vector<8x8xf32>
    %478 = arith.addf %467, %477 : vector<8x8xf32>
    %479 = arith.mulf %472, %24 : vector<8x8xf32>
    %480 = arith.addf %469, %479 : vector<8x8xf32>
    %481 = vector.extract_strided_slice %461 {offsets = [0, 1], sizes = [8, 1], strides = [1, 1]} : vector<8x8xf32> to vector<8x1xf32>
    %482 = vector.shape_cast %481 : vector<8x1xf32> to vector<8x1xf32>
    %483 = vector.broadcast %482 : vector<8x1xf32> to vector<8x8xf32>
    %484 = arith.mulf %483, %27 : vector<8x8xf32>
    %485 = arith.addf %474, %484 : vector<8x8xf32>
    %486 = arith.mulf %483, %30 : vector<8x8xf32>
    %487 = arith.addf %476, %486 : vector<8x8xf32>
    %488 = arith.mulf %483, %33 : vector<8x8xf32>
    %489 = arith.addf %478, %488 : vector<8x8xf32>
    %490 = arith.mulf %483, %36 : vector<8x8xf32>
    %491 = arith.addf %480, %490 : vector<8x8xf32>
    %492 = vector.extract_strided_slice %461 {offsets = [0, 2], sizes = [8, 1], strides = [1, 1]} : vector<8x8xf32> to vector<8x1xf32>
    %493 = vector.shape_cast %492 : vector<8x1xf32> to vector<8x1xf32>
    %494 = vector.broadcast %493 : vector<8x1xf32> to vector<8x8xf32>
    %495 = arith.mulf %494, %39 : vector<8x8xf32>
    %496 = arith.addf %485, %495 : vector<8x8xf32>
    %497 = arith.mulf %494, %42 : vector<8x8xf32>
    %498 = arith.addf %487, %497 : vector<8x8xf32>
    %499 = arith.mulf %494, %45 : vector<8x8xf32>
    %500 = arith.addf %489, %499 : vector<8x8xf32>
    %501 = arith.mulf %494, %48 : vector<8x8xf32>
    %502 = arith.addf %491, %501 : vector<8x8xf32>
    %503 = vector.extract_strided_slice %461 {offsets = [0, 3], sizes = [8, 1], strides = [1, 1]} : vector<8x8xf32> to vector<8x1xf32>
    %504 = vector.shape_cast %503 : vector<8x1xf32> to vector<8x1xf32>
    %505 = vector.broadcast %504 : vector<8x1xf32> to vector<8x8xf32>
    %506 = arith.mulf %505, %51 : vector<8x8xf32>
    %507 = arith.addf %496, %506 : vector<8x8xf32>
    %508 = arith.mulf %505, %54 : vector<8x8xf32>
    %509 = arith.addf %498, %508 : vector<8x8xf32>
    %510 = arith.mulf %505, %57 : vector<8x8xf32>
    %511 = arith.addf %500, %510 : vector<8x8xf32>
    %512 = arith.mulf %505, %60 : vector<8x8xf32>
    %513 = arith.addf %502, %512 : vector<8x8xf32>
    %514 = vector.extract_strided_slice %461 {offsets = [0, 4], sizes = [8, 1], strides = [1, 1]} : vector<8x8xf32> to vector<8x1xf32>
    %515 = vector.shape_cast %514 : vector<8x1xf32> to vector<8x1xf32>
    %516 = vector.broadcast %515 : vector<8x1xf32> to vector<8x8xf32>
    %517 = arith.mulf %516, %63 : vector<8x8xf32>
    %518 = arith.addf %507, %517 : vector<8x8xf32>
    %519 = arith.mulf %516, %66 : vector<8x8xf32>
    %520 = arith.addf %509, %519 : vector<8x8xf32>
    %521 = arith.mulf %516, %69 : vector<8x8xf32>
    %522 = arith.addf %511, %521 : vector<8x8xf32>
    %523 = arith.mulf %516, %72 : vector<8x8xf32>
    %524 = arith.addf %513, %523 : vector<8x8xf32>
    %525 = vector.extract_strided_slice %461 {offsets = [0, 5], sizes = [8, 1], strides = [1, 1]} : vector<8x8xf32> to vector<8x1xf32>
    %526 = vector.shape_cast %525 : vector<8x1xf32> to vector<8x1xf32>
    %527 = vector.broadcast %526 : vector<8x1xf32> to vector<8x8xf32>
    %528 = arith.mulf %527, %75 : vector<8x8xf32>
    %529 = arith.addf %518, %528 : vector<8x8xf32>
    %530 = arith.mulf %527, %78 : vector<8x8xf32>
    %531 = arith.addf %520, %530 : vector<8x8xf32>
    %532 = arith.mulf %527, %81 : vector<8x8xf32>
    %533 = arith.addf %522, %532 : vector<8x8xf32>
    %534 = arith.mulf %527, %84 : vector<8x8xf32>
    %535 = arith.addf %524, %534 : vector<8x8xf32>
    %536 = vector.extract_strided_slice %461 {offsets = [0, 6], sizes = [8, 1], strides = [1, 1]} : vector<8x8xf32> to vector<8x1xf32>
    %537 = vector.shape_cast %536 : vector<8x1xf32> to vector<8x1xf32>
    %538 = vector.broadcast %537 : vector<8x1xf32> to vector<8x8xf32>
    %539 = arith.mulf %538, %87 : vector<8x8xf32>
    %540 = arith.addf %529, %539 : vector<8x8xf32>
    %541 = arith.mulf %538, %90 : vector<8x8xf32>
    %542 = arith.addf %531, %541 : vector<8x8xf32>
    %543 = arith.mulf %538, %93 : vector<8x8xf32>
    %544 = arith.addf %533, %543 : vector<8x8xf32>
    %545 = arith.mulf %538, %96 : vector<8x8xf32>
    %546 = arith.addf %535, %545 : vector<8x8xf32>
    %547 = vector.extract_strided_slice %461 {offsets = [0, 7], sizes = [8, 1], strides = [1, 1]} : vector<8x8xf32> to vector<8x1xf32>
    %548 = vector.shape_cast %547 : vector<8x1xf32> to vector<8x1xf32>
    %549 = vector.broadcast %548 : vector<8x1xf32> to vector<8x8xf32>
    %550 = arith.mulf %549, %99 : vector<8x8xf32>
    %551 = arith.addf %540, %550 : vector<8x8xf32>
    %552 = arith.mulf %549, %102 : vector<8x8xf32>
    %553 = arith.addf %542, %552 : vector<8x8xf32>
    %554 = arith.mulf %549, %105 : vector<8x8xf32>
    %555 = arith.addf %544, %554 : vector<8x8xf32>
    %556 = arith.mulf %549, %108 : vector<8x8xf32>
    %557 = arith.addf %546, %556 : vector<8x8xf32>
    %558 = arith.negf %551 : vector<8x8xf32>
    %559 = math.exp %558 : vector<8x8xf32>
    %cst_19 = arith.constant 1.000000e+00 : f32
    %560 = vector.broadcast %cst_19 : f32 to vector<8x8xf32>
    %561 = arith.addf %560, %559 : vector<8x8xf32>
    %562 = arith.divf %560, %561 : vector<8x8xf32>
    %563 = arith.negf %553 : vector<8x8xf32>
    %564 = math.exp %563 : vector<8x8xf32>
    %cst_20 = arith.constant 1.000000e+00 : f32
    %565 = vector.broadcast %cst_20 : f32 to vector<8x8xf32>
    %566 = arith.addf %565, %564 : vector<8x8xf32>
    %567 = arith.divf %565, %566 : vector<8x8xf32>
    %568 = arith.negf %555 : vector<8x8xf32>
    %569 = math.exp %568 : vector<8x8xf32>
    %cst_21 = arith.constant 1.000000e+00 : f32
    %570 = vector.broadcast %cst_21 : f32 to vector<8x8xf32>
    %571 = arith.addf %570, %569 : vector<8x8xf32>
    %572 = arith.divf %570, %571 : vector<8x8xf32>
    %573 = math.tanh %557 : vector<8x8xf32>
    %574 = arith.mulf %567, %459 : vector<8x8xf32>
    %575 = arith.mulf %562, %573 : vector<8x8xf32>
    %576 = arith.addf %574, %575 : vector<8x8xf32>
    %577 = math.tanh %576 : vector<8x8xf32>
    %578 = arith.mulf %572, %577 : vector<8x8xf32>
    %579 = vector.extract_strided_slice %8 {offsets = [4, 0, 0], sizes = [1, 8, 8], strides = [1, 1, 1]} : vector<16x8x8xf32> to vector<1x8x8xf32>
    %580 = vector.shape_cast %579 : vector<1x8x8xf32> to vector<8x8xf32>
    %581 = vector.extract_strided_slice %9 {offsets = [4, 0, 0], sizes = [1, 8, 8], strides = [1, 1, 1]} : vector<16x8x8xf32> to vector<1x8x8xf32>
    %582 = vector.shape_cast %581 : vector<1x8x8xf32> to vector<8x8xf32>
    %583 = vector.extract_strided_slice %10 {offsets = [4, 0, 0], sizes = [1, 8, 8], strides = [1, 1, 1]} : vector<16x8x8xf32> to vector<1x8x8xf32>
    %584 = vector.shape_cast %583 : vector<1x8x8xf32> to vector<8x8xf32>
    %585 = vector.extract_strided_slice %11 {offsets = [4, 0, 0], sizes = [1, 8, 8], strides = [1, 1, 1]} : vector<16x8x8xf32> to vector<1x8x8xf32>
    %586 = vector.shape_cast %585 : vector<1x8x8xf32> to vector<8x8xf32>
    %587 = vector.extract_strided_slice %578 {offsets = [0, 0], sizes = [8, 1], strides = [1, 1]} : vector<8x8xf32> to vector<8x1xf32>
    %588 = vector.shape_cast %587 : vector<8x1xf32> to vector<8x1xf32>
    %589 = vector.broadcast %588 : vector<8x1xf32> to vector<8x8xf32>
    %590 = arith.mulf %589, %15 : vector<8x8xf32>
    %591 = arith.addf %580, %590 : vector<8x8xf32>
    %592 = arith.mulf %589, %18 : vector<8x8xf32>
    %593 = arith.addf %582, %592 : vector<8x8xf32>
    %594 = arith.mulf %589, %21 : vector<8x8xf32>
    %595 = arith.addf %584, %594 : vector<8x8xf32>
    %596 = arith.mulf %589, %24 : vector<8x8xf32>
    %597 = arith.addf %586, %596 : vector<8x8xf32>
    %598 = vector.extract_strided_slice %578 {offsets = [0, 1], sizes = [8, 1], strides = [1, 1]} : vector<8x8xf32> to vector<8x1xf32>
    %599 = vector.shape_cast %598 : vector<8x1xf32> to vector<8x1xf32>
    %600 = vector.broadcast %599 : vector<8x1xf32> to vector<8x8xf32>
    %601 = arith.mulf %600, %27 : vector<8x8xf32>
    %602 = arith.addf %591, %601 : vector<8x8xf32>
    %603 = arith.mulf %600, %30 : vector<8x8xf32>
    %604 = arith.addf %593, %603 : vector<8x8xf32>
    %605 = arith.mulf %600, %33 : vector<8x8xf32>
    %606 = arith.addf %595, %605 : vector<8x8xf32>
    %607 = arith.mulf %600, %36 : vector<8x8xf32>
    %608 = arith.addf %597, %607 : vector<8x8xf32>
    %609 = vector.extract_strided_slice %578 {offsets = [0, 2], sizes = [8, 1], strides = [1, 1]} : vector<8x8xf32> to vector<8x1xf32>
    %610 = vector.shape_cast %609 : vector<8x1xf32> to vector<8x1xf32>
    %611 = vector.broadcast %610 : vector<8x1xf32> to vector<8x8xf32>
    %612 = arith.mulf %611, %39 : vector<8x8xf32>
    %613 = arith.addf %602, %612 : vector<8x8xf32>
    %614 = arith.mulf %611, %42 : vector<8x8xf32>
    %615 = arith.addf %604, %614 : vector<8x8xf32>
    %616 = arith.mulf %611, %45 : vector<8x8xf32>
    %617 = arith.addf %606, %616 : vector<8x8xf32>
    %618 = arith.mulf %611, %48 : vector<8x8xf32>
    %619 = arith.addf %608, %618 : vector<8x8xf32>
    %620 = vector.extract_strided_slice %578 {offsets = [0, 3], sizes = [8, 1], strides = [1, 1]} : vector<8x8xf32> to vector<8x1xf32>
    %621 = vector.shape_cast %620 : vector<8x1xf32> to vector<8x1xf32>
    %622 = vector.broadcast %621 : vector<8x1xf32> to vector<8x8xf32>
    %623 = arith.mulf %622, %51 : vector<8x8xf32>
    %624 = arith.addf %613, %623 : vector<8x8xf32>
    %625 = arith.mulf %622, %54 : vector<8x8xf32>
    %626 = arith.addf %615, %625 : vector<8x8xf32>
    %627 = arith.mulf %622, %57 : vector<8x8xf32>
    %628 = arith.addf %617, %627 : vector<8x8xf32>
    %629 = arith.mulf %622, %60 : vector<8x8xf32>
    %630 = arith.addf %619, %629 : vector<8x8xf32>
    %631 = vector.extract_strided_slice %578 {offsets = [0, 4], sizes = [8, 1], strides = [1, 1]} : vector<8x8xf32> to vector<8x1xf32>
    %632 = vector.shape_cast %631 : vector<8x1xf32> to vector<8x1xf32>
    %633 = vector.broadcast %632 : vector<8x1xf32> to vector<8x8xf32>
    %634 = arith.mulf %633, %63 : vector<8x8xf32>
    %635 = arith.addf %624, %634 : vector<8x8xf32>
    %636 = arith.mulf %633, %66 : vector<8x8xf32>
    %637 = arith.addf %626, %636 : vector<8x8xf32>
    %638 = arith.mulf %633, %69 : vector<8x8xf32>
    %639 = arith.addf %628, %638 : vector<8x8xf32>
    %640 = arith.mulf %633, %72 : vector<8x8xf32>
    %641 = arith.addf %630, %640 : vector<8x8xf32>
    %642 = vector.extract_strided_slice %578 {offsets = [0, 5], sizes = [8, 1], strides = [1, 1]} : vector<8x8xf32> to vector<8x1xf32>
    %643 = vector.shape_cast %642 : vector<8x1xf32> to vector<8x1xf32>
    %644 = vector.broadcast %643 : vector<8x1xf32> to vector<8x8xf32>
    %645 = arith.mulf %644, %75 : vector<8x8xf32>
    %646 = arith.addf %635, %645 : vector<8x8xf32>
    %647 = arith.mulf %644, %78 : vector<8x8xf32>
    %648 = arith.addf %637, %647 : vector<8x8xf32>
    %649 = arith.mulf %644, %81 : vector<8x8xf32>
    %650 = arith.addf %639, %649 : vector<8x8xf32>
    %651 = arith.mulf %644, %84 : vector<8x8xf32>
    %652 = arith.addf %641, %651 : vector<8x8xf32>
    %653 = vector.extract_strided_slice %578 {offsets = [0, 6], sizes = [8, 1], strides = [1, 1]} : vector<8x8xf32> to vector<8x1xf32>
    %654 = vector.shape_cast %653 : vector<8x1xf32> to vector<8x1xf32>
    %655 = vector.broadcast %654 : vector<8x1xf32> to vector<8x8xf32>
    %656 = arith.mulf %655, %87 : vector<8x8xf32>
    %657 = arith.addf %646, %656 : vector<8x8xf32>
    %658 = arith.mulf %655, %90 : vector<8x8xf32>
    %659 = arith.addf %648, %658 : vector<8x8xf32>
    %660 = arith.mulf %655, %93 : vector<8x8xf32>
    %661 = arith.addf %650, %660 : vector<8x8xf32>
    %662 = arith.mulf %655, %96 : vector<8x8xf32>
    %663 = arith.addf %652, %662 : vector<8x8xf32>
    %664 = vector.extract_strided_slice %578 {offsets = [0, 7], sizes = [8, 1], strides = [1, 1]} : vector<8x8xf32> to vector<8x1xf32>
    %665 = vector.shape_cast %664 : vector<8x1xf32> to vector<8x1xf32>
    %666 = vector.broadcast %665 : vector<8x1xf32> to vector<8x8xf32>
    %667 = arith.mulf %666, %99 : vector<8x8xf32>
    %668 = arith.addf %657, %667 : vector<8x8xf32>
    %669 = arith.mulf %666, %102 : vector<8x8xf32>
    %670 = arith.addf %659, %669 : vector<8x8xf32>
    %671 = arith.mulf %666, %105 : vector<8x8xf32>
    %672 = arith.addf %661, %671 : vector<8x8xf32>
    %673 = arith.mulf %666, %108 : vector<8x8xf32>
    %674 = arith.addf %663, %673 : vector<8x8xf32>
    %675 = arith.negf %668 : vector<8x8xf32>
    %676 = math.exp %675 : vector<8x8xf32>
    %cst_22 = arith.constant 1.000000e+00 : f32
    %677 = vector.broadcast %cst_22 : f32 to vector<8x8xf32>
    %678 = arith.addf %677, %676 : vector<8x8xf32>
    %679 = arith.divf %677, %678 : vector<8x8xf32>
    %680 = arith.negf %670 : vector<8x8xf32>
    %681 = math.exp %680 : vector<8x8xf32>
    %cst_23 = arith.constant 1.000000e+00 : f32
    %682 = vector.broadcast %cst_23 : f32 to vector<8x8xf32>
    %683 = arith.addf %682, %681 : vector<8x8xf32>
    %684 = arith.divf %682, %683 : vector<8x8xf32>
    %685 = arith.negf %672 : vector<8x8xf32>
    %686 = math.exp %685 : vector<8x8xf32>
    %cst_24 = arith.constant 1.000000e+00 : f32
    %687 = vector.broadcast %cst_24 : f32 to vector<8x8xf32>
    %688 = arith.addf %687, %686 : vector<8x8xf32>
    %689 = arith.divf %687, %688 : vector<8x8xf32>
    %690 = math.tanh %674 : vector<8x8xf32>
    %691 = arith.mulf %684, %576 : vector<8x8xf32>
    %692 = arith.mulf %679, %690 : vector<8x8xf32>
    %693 = arith.addf %691, %692 : vector<8x8xf32>
    %694 = math.tanh %693 : vector<8x8xf32>
    %695 = arith.mulf %689, %694 : vector<8x8xf32>
    %696 = vector.extract_strided_slice %8 {offsets = [5, 0, 0], sizes = [1, 8, 8], strides = [1, 1, 1]} : vector<16x8x8xf32> to vector<1x8x8xf32>
    %697 = vector.shape_cast %696 : vector<1x8x8xf32> to vector<8x8xf32>
    %698 = vector.extract_strided_slice %9 {offsets = [5, 0, 0], sizes = [1, 8, 8], strides = [1, 1, 1]} : vector<16x8x8xf32> to vector<1x8x8xf32>
    %699 = vector.shape_cast %698 : vector<1x8x8xf32> to vector<8x8xf32>
    %700 = vector.extract_strided_slice %10 {offsets = [5, 0, 0], sizes = [1, 8, 8], strides = [1, 1, 1]} : vector<16x8x8xf32> to vector<1x8x8xf32>
    %701 = vector.shape_cast %700 : vector<1x8x8xf32> to vector<8x8xf32>
    %702 = vector.extract_strided_slice %11 {offsets = [5, 0, 0], sizes = [1, 8, 8], strides = [1, 1, 1]} : vector<16x8x8xf32> to vector<1x8x8xf32>
    %703 = vector.shape_cast %702 : vector<1x8x8xf32> to vector<8x8xf32>
    %704 = vector.extract_strided_slice %695 {offsets = [0, 0], sizes = [8, 1], strides = [1, 1]} : vector<8x8xf32> to vector<8x1xf32>
    %705 = vector.shape_cast %704 : vector<8x1xf32> to vector<8x1xf32>
    %706 = vector.broadcast %705 : vector<8x1xf32> to vector<8x8xf32>
    %707 = arith.mulf %706, %15 : vector<8x8xf32>
    %708 = arith.addf %697, %707 : vector<8x8xf32>
    %709 = arith.mulf %706, %18 : vector<8x8xf32>
    %710 = arith.addf %699, %709 : vector<8x8xf32>
    %711 = arith.mulf %706, %21 : vector<8x8xf32>
    %712 = arith.addf %701, %711 : vector<8x8xf32>
    %713 = arith.mulf %706, %24 : vector<8x8xf32>
    %714 = arith.addf %703, %713 : vector<8x8xf32>
    %715 = vector.extract_strided_slice %695 {offsets = [0, 1], sizes = [8, 1], strides = [1, 1]} : vector<8x8xf32> to vector<8x1xf32>
    %716 = vector.shape_cast %715 : vector<8x1xf32> to vector<8x1xf32>
    %717 = vector.broadcast %716 : vector<8x1xf32> to vector<8x8xf32>
    %718 = arith.mulf %717, %27 : vector<8x8xf32>
    %719 = arith.addf %708, %718 : vector<8x8xf32>
    %720 = arith.mulf %717, %30 : vector<8x8xf32>
    %721 = arith.addf %710, %720 : vector<8x8xf32>
    %722 = arith.mulf %717, %33 : vector<8x8xf32>
    %723 = arith.addf %712, %722 : vector<8x8xf32>
    %724 = arith.mulf %717, %36 : vector<8x8xf32>
    %725 = arith.addf %714, %724 : vector<8x8xf32>
    %726 = vector.extract_strided_slice %695 {offsets = [0, 2], sizes = [8, 1], strides = [1, 1]} : vector<8x8xf32> to vector<8x1xf32>
    %727 = vector.shape_cast %726 : vector<8x1xf32> to vector<8x1xf32>
    %728 = vector.broadcast %727 : vector<8x1xf32> to vector<8x8xf32>
    %729 = arith.mulf %728, %39 : vector<8x8xf32>
    %730 = arith.addf %719, %729 : vector<8x8xf32>
    %731 = arith.mulf %728, %42 : vector<8x8xf32>
    %732 = arith.addf %721, %731 : vector<8x8xf32>
    %733 = arith.mulf %728, %45 : vector<8x8xf32>
    %734 = arith.addf %723, %733 : vector<8x8xf32>
    %735 = arith.mulf %728, %48 : vector<8x8xf32>
    %736 = arith.addf %725, %735 : vector<8x8xf32>
    %737 = vector.extract_strided_slice %695 {offsets = [0, 3], sizes = [8, 1], strides = [1, 1]} : vector<8x8xf32> to vector<8x1xf32>
    %738 = vector.shape_cast %737 : vector<8x1xf32> to vector<8x1xf32>
    %739 = vector.broadcast %738 : vector<8x1xf32> to vector<8x8xf32>
    %740 = arith.mulf %739, %51 : vector<8x8xf32>
    %741 = arith.addf %730, %740 : vector<8x8xf32>
    %742 = arith.mulf %739, %54 : vector<8x8xf32>
    %743 = arith.addf %732, %742 : vector<8x8xf32>
    %744 = arith.mulf %739, %57 : vector<8x8xf32>
    %745 = arith.addf %734, %744 : vector<8x8xf32>
    %746 = arith.mulf %739, %60 : vector<8x8xf32>
    %747 = arith.addf %736, %746 : vector<8x8xf32>
    %748 = vector.extract_strided_slice %695 {offsets = [0, 4], sizes = [8, 1], strides = [1, 1]} : vector<8x8xf32> to vector<8x1xf32>
    %749 = vector.shape_cast %748 : vector<8x1xf32> to vector<8x1xf32>
    %750 = vector.broadcast %749 : vector<8x1xf32> to vector<8x8xf32>
    %751 = arith.mulf %750, %63 : vector<8x8xf32>
    %752 = arith.addf %741, %751 : vector<8x8xf32>
    %753 = arith.mulf %750, %66 : vector<8x8xf32>
    %754 = arith.addf %743, %753 : vector<8x8xf32>
    %755 = arith.mulf %750, %69 : vector<8x8xf32>
    %756 = arith.addf %745, %755 : vector<8x8xf32>
    %757 = arith.mulf %750, %72 : vector<8x8xf32>
    %758 = arith.addf %747, %757 : vector<8x8xf32>
    %759 = vector.extract_strided_slice %695 {offsets = [0, 5], sizes = [8, 1], strides = [1, 1]} : vector<8x8xf32> to vector<8x1xf32>
    %760 = vector.shape_cast %759 : vector<8x1xf32> to vector<8x1xf32>
    %761 = vector.broadcast %760 : vector<8x1xf32> to vector<8x8xf32>
    %762 = arith.mulf %761, %75 : vector<8x8xf32>
    %763 = arith.addf %752, %762 : vector<8x8xf32>
    %764 = arith.mulf %761, %78 : vector<8x8xf32>
    %765 = arith.addf %754, %764 : vector<8x8xf32>
    %766 = arith.mulf %761, %81 : vector<8x8xf32>
    %767 = arith.addf %756, %766 : vector<8x8xf32>
    %768 = arith.mulf %761, %84 : vector<8x8xf32>
    %769 = arith.addf %758, %768 : vector<8x8xf32>
    %770 = vector.extract_strided_slice %695 {offsets = [0, 6], sizes = [8, 1], strides = [1, 1]} : vector<8x8xf32> to vector<8x1xf32>
    %771 = vector.shape_cast %770 : vector<8x1xf32> to vector<8x1xf32>
    %772 = vector.broadcast %771 : vector<8x1xf32> to vector<8x8xf32>
    %773 = arith.mulf %772, %87 : vector<8x8xf32>
    %774 = arith.addf %763, %773 : vector<8x8xf32>
    %775 = arith.mulf %772, %90 : vector<8x8xf32>
    %776 = arith.addf %765, %775 : vector<8x8xf32>
    %777 = arith.mulf %772, %93 : vector<8x8xf32>
    %778 = arith.addf %767, %777 : vector<8x8xf32>
    %779 = arith.mulf %772, %96 : vector<8x8xf32>
    %780 = arith.addf %769, %779 : vector<8x8xf32>
    %781 = vector.extract_strided_slice %695 {offsets = [0, 7], sizes = [8, 1], strides = [1, 1]} : vector<8x8xf32> to vector<8x1xf32>
    %782 = vector.shape_cast %781 : vector<8x1xf32> to vector<8x1xf32>
    %783 = vector.broadcast %782 : vector<8x1xf32> to vector<8x8xf32>
    %784 = arith.mulf %783, %99 : vector<8x8xf32>
    %785 = arith.addf %774, %784 : vector<8x8xf32>
    %786 = arith.mulf %783, %102 : vector<8x8xf32>
    %787 = arith.addf %776, %786 : vector<8x8xf32>
    %788 = arith.mulf %783, %105 : vector<8x8xf32>
    %789 = arith.addf %778, %788 : vector<8x8xf32>
    %790 = arith.mulf %783, %108 : vector<8x8xf32>
    %791 = arith.addf %780, %790 : vector<8x8xf32>
    %792 = arith.negf %785 : vector<8x8xf32>
    %793 = math.exp %792 : vector<8x8xf32>
    %cst_25 = arith.constant 1.000000e+00 : f32
    %794 = vector.broadcast %cst_25 : f32 to vector<8x8xf32>
    %795 = arith.addf %794, %793 : vector<8x8xf32>
    %796 = arith.divf %794, %795 : vector<8x8xf32>
    %797 = arith.negf %787 : vector<8x8xf32>
    %798 = math.exp %797 : vector<8x8xf32>
    %cst_26 = arith.constant 1.000000e+00 : f32
    %799 = vector.broadcast %cst_26 : f32 to vector<8x8xf32>
    %800 = arith.addf %799, %798 : vector<8x8xf32>
    %801 = arith.divf %799, %800 : vector<8x8xf32>
    %802 = arith.negf %789 : vector<8x8xf32>
    %803 = math.exp %802 : vector<8x8xf32>
    %cst_27 = arith.constant 1.000000e+00 : f32
    %804 = vector.broadcast %cst_27 : f32 to vector<8x8xf32>
    %805 = arith.addf %804, %803 : vector<8x8xf32>
    %806 = arith.divf %804, %805 : vector<8x8xf32>
    %807 = math.tanh %791 : vector<8x8xf32>
    %808 = arith.mulf %801, %693 : vector<8x8xf32>
    %809 = arith.mulf %796, %807 : vector<8x8xf32>
    %810 = arith.addf %808, %809 : vector<8x8xf32>
    %811 = math.tanh %810 : vector<8x8xf32>
    %812 = arith.mulf %806, %811 : vector<8x8xf32>
    %813 = vector.extract_strided_slice %8 {offsets = [6, 0, 0], sizes = [1, 8, 8], strides = [1, 1, 1]} : vector<16x8x8xf32> to vector<1x8x8xf32>
    %814 = vector.shape_cast %813 : vector<1x8x8xf32> to vector<8x8xf32>
    %815 = vector.extract_strided_slice %9 {offsets = [6, 0, 0], sizes = [1, 8, 8], strides = [1, 1, 1]} : vector<16x8x8xf32> to vector<1x8x8xf32>
    %816 = vector.shape_cast %815 : vector<1x8x8xf32> to vector<8x8xf32>
    %817 = vector.extract_strided_slice %10 {offsets = [6, 0, 0], sizes = [1, 8, 8], strides = [1, 1, 1]} : vector<16x8x8xf32> to vector<1x8x8xf32>
    %818 = vector.shape_cast %817 : vector<1x8x8xf32> to vector<8x8xf32>
    %819 = vector.extract_strided_slice %11 {offsets = [6, 0, 0], sizes = [1, 8, 8], strides = [1, 1, 1]} : vector<16x8x8xf32> to vector<1x8x8xf32>
    %820 = vector.shape_cast %819 : vector<1x8x8xf32> to vector<8x8xf32>
    %821 = vector.extract_strided_slice %812 {offsets = [0, 0], sizes = [8, 1], strides = [1, 1]} : vector<8x8xf32> to vector<8x1xf32>
    %822 = vector.shape_cast %821 : vector<8x1xf32> to vector<8x1xf32>
    %823 = vector.broadcast %822 : vector<8x1xf32> to vector<8x8xf32>
    %824 = arith.mulf %823, %15 : vector<8x8xf32>
    %825 = arith.addf %814, %824 : vector<8x8xf32>
    %826 = arith.mulf %823, %18 : vector<8x8xf32>
    %827 = arith.addf %816, %826 : vector<8x8xf32>
    %828 = arith.mulf %823, %21 : vector<8x8xf32>
    %829 = arith.addf %818, %828 : vector<8x8xf32>
    %830 = arith.mulf %823, %24 : vector<8x8xf32>
    %831 = arith.addf %820, %830 : vector<8x8xf32>
    %832 = vector.extract_strided_slice %812 {offsets = [0, 1], sizes = [8, 1], strides = [1, 1]} : vector<8x8xf32> to vector<8x1xf32>
    %833 = vector.shape_cast %832 : vector<8x1xf32> to vector<8x1xf32>
    %834 = vector.broadcast %833 : vector<8x1xf32> to vector<8x8xf32>
    %835 = arith.mulf %834, %27 : vector<8x8xf32>
    %836 = arith.addf %825, %835 : vector<8x8xf32>
    %837 = arith.mulf %834, %30 : vector<8x8xf32>
    %838 = arith.addf %827, %837 : vector<8x8xf32>
    %839 = arith.mulf %834, %33 : vector<8x8xf32>
    %840 = arith.addf %829, %839 : vector<8x8xf32>
    %841 = arith.mulf %834, %36 : vector<8x8xf32>
    %842 = arith.addf %831, %841 : vector<8x8xf32>
    %843 = vector.extract_strided_slice %812 {offsets = [0, 2], sizes = [8, 1], strides = [1, 1]} : vector<8x8xf32> to vector<8x1xf32>
    %844 = vector.shape_cast %843 : vector<8x1xf32> to vector<8x1xf32>
    %845 = vector.broadcast %844 : vector<8x1xf32> to vector<8x8xf32>
    %846 = arith.mulf %845, %39 : vector<8x8xf32>
    %847 = arith.addf %836, %846 : vector<8x8xf32>
    %848 = arith.mulf %845, %42 : vector<8x8xf32>
    %849 = arith.addf %838, %848 : vector<8x8xf32>
    %850 = arith.mulf %845, %45 : vector<8x8xf32>
    %851 = arith.addf %840, %850 : vector<8x8xf32>
    %852 = arith.mulf %845, %48 : vector<8x8xf32>
    %853 = arith.addf %842, %852 : vector<8x8xf32>
    %854 = vector.extract_strided_slice %812 {offsets = [0, 3], sizes = [8, 1], strides = [1, 1]} : vector<8x8xf32> to vector<8x1xf32>
    %855 = vector.shape_cast %854 : vector<8x1xf32> to vector<8x1xf32>
    %856 = vector.broadcast %855 : vector<8x1xf32> to vector<8x8xf32>
    %857 = arith.mulf %856, %51 : vector<8x8xf32>
    %858 = arith.addf %847, %857 : vector<8x8xf32>
    %859 = arith.mulf %856, %54 : vector<8x8xf32>
    %860 = arith.addf %849, %859 : vector<8x8xf32>
    %861 = arith.mulf %856, %57 : vector<8x8xf32>
    %862 = arith.addf %851, %861 : vector<8x8xf32>
    %863 = arith.mulf %856, %60 : vector<8x8xf32>
    %864 = arith.addf %853, %863 : vector<8x8xf32>
    %865 = vector.extract_strided_slice %812 {offsets = [0, 4], sizes = [8, 1], strides = [1, 1]} : vector<8x8xf32> to vector<8x1xf32>
    %866 = vector.shape_cast %865 : vector<8x1xf32> to vector<8x1xf32>
    %867 = vector.broadcast %866 : vector<8x1xf32> to vector<8x8xf32>
    %868 = arith.mulf %867, %63 : vector<8x8xf32>
    %869 = arith.addf %858, %868 : vector<8x8xf32>
    %870 = arith.mulf %867, %66 : vector<8x8xf32>
    %871 = arith.addf %860, %870 : vector<8x8xf32>
    %872 = arith.mulf %867, %69 : vector<8x8xf32>
    %873 = arith.addf %862, %872 : vector<8x8xf32>
    %874 = arith.mulf %867, %72 : vector<8x8xf32>
    %875 = arith.addf %864, %874 : vector<8x8xf32>
    %876 = vector.extract_strided_slice %812 {offsets = [0, 5], sizes = [8, 1], strides = [1, 1]} : vector<8x8xf32> to vector<8x1xf32>
    %877 = vector.shape_cast %876 : vector<8x1xf32> to vector<8x1xf32>
    %878 = vector.broadcast %877 : vector<8x1xf32> to vector<8x8xf32>
    %879 = arith.mulf %878, %75 : vector<8x8xf32>
    %880 = arith.addf %869, %879 : vector<8x8xf32>
    %881 = arith.mulf %878, %78 : vector<8x8xf32>
    %882 = arith.addf %871, %881 : vector<8x8xf32>
    %883 = arith.mulf %878, %81 : vector<8x8xf32>
    %884 = arith.addf %873, %883 : vector<8x8xf32>
    %885 = arith.mulf %878, %84 : vector<8x8xf32>
    %886 = arith.addf %875, %885 : vector<8x8xf32>
    %887 = vector.extract_strided_slice %812 {offsets = [0, 6], sizes = [8, 1], strides = [1, 1]} : vector<8x8xf32> to vector<8x1xf32>
    %888 = vector.shape_cast %887 : vector<8x1xf32> to vector<8x1xf32>
    %889 = vector.broadcast %888 : vector<8x1xf32> to vector<8x8xf32>
    %890 = arith.mulf %889, %87 : vector<8x8xf32>
    %891 = arith.addf %880, %890 : vector<8x8xf32>
    %892 = arith.mulf %889, %90 : vector<8x8xf32>
    %893 = arith.addf %882, %892 : vector<8x8xf32>
    %894 = arith.mulf %889, %93 : vector<8x8xf32>
    %895 = arith.addf %884, %894 : vector<8x8xf32>
    %896 = arith.mulf %889, %96 : vector<8x8xf32>
    %897 = arith.addf %886, %896 : vector<8x8xf32>
    %898 = vector.extract_strided_slice %812 {offsets = [0, 7], sizes = [8, 1], strides = [1, 1]} : vector<8x8xf32> to vector<8x1xf32>
    %899 = vector.shape_cast %898 : vector<8x1xf32> to vector<8x1xf32>
    %900 = vector.broadcast %899 : vector<8x1xf32> to vector<8x8xf32>
    %901 = arith.mulf %900, %99 : vector<8x8xf32>
    %902 = arith.addf %891, %901 : vector<8x8xf32>
    %903 = arith.mulf %900, %102 : vector<8x8xf32>
    %904 = arith.addf %893, %903 : vector<8x8xf32>
    %905 = arith.mulf %900, %105 : vector<8x8xf32>
    %906 = arith.addf %895, %905 : vector<8x8xf32>
    %907 = arith.mulf %900, %108 : vector<8x8xf32>
    %908 = arith.addf %897, %907 : vector<8x8xf32>
    %909 = arith.negf %902 : vector<8x8xf32>
    %910 = math.exp %909 : vector<8x8xf32>
    %cst_28 = arith.constant 1.000000e+00 : f32
    %911 = vector.broadcast %cst_28 : f32 to vector<8x8xf32>
    %912 = arith.addf %911, %910 : vector<8x8xf32>
    %913 = arith.divf %911, %912 : vector<8x8xf32>
    %914 = arith.negf %904 : vector<8x8xf32>
    %915 = math.exp %914 : vector<8x8xf32>
    %cst_29 = arith.constant 1.000000e+00 : f32
    %916 = vector.broadcast %cst_29 : f32 to vector<8x8xf32>
    %917 = arith.addf %916, %915 : vector<8x8xf32>
    %918 = arith.divf %916, %917 : vector<8x8xf32>
    %919 = arith.negf %906 : vector<8x8xf32>
    %920 = math.exp %919 : vector<8x8xf32>
    %cst_30 = arith.constant 1.000000e+00 : f32
    %921 = vector.broadcast %cst_30 : f32 to vector<8x8xf32>
    %922 = arith.addf %921, %920 : vector<8x8xf32>
    %923 = arith.divf %921, %922 : vector<8x8xf32>
    %924 = math.tanh %908 : vector<8x8xf32>
    %925 = arith.mulf %918, %810 : vector<8x8xf32>
    %926 = arith.mulf %913, %924 : vector<8x8xf32>
    %927 = arith.addf %925, %926 : vector<8x8xf32>
    %928 = math.tanh %927 : vector<8x8xf32>
    %929 = arith.mulf %923, %928 : vector<8x8xf32>
    %930 = vector.extract_strided_slice %8 {offsets = [7, 0, 0], sizes = [1, 8, 8], strides = [1, 1, 1]} : vector<16x8x8xf32> to vector<1x8x8xf32>
    %931 = vector.shape_cast %930 : vector<1x8x8xf32> to vector<8x8xf32>
    %932 = vector.extract_strided_slice %9 {offsets = [7, 0, 0], sizes = [1, 8, 8], strides = [1, 1, 1]} : vector<16x8x8xf32> to vector<1x8x8xf32>
    %933 = vector.shape_cast %932 : vector<1x8x8xf32> to vector<8x8xf32>
    %934 = vector.extract_strided_slice %10 {offsets = [7, 0, 0], sizes = [1, 8, 8], strides = [1, 1, 1]} : vector<16x8x8xf32> to vector<1x8x8xf32>
    %935 = vector.shape_cast %934 : vector<1x8x8xf32> to vector<8x8xf32>
    %936 = vector.extract_strided_slice %11 {offsets = [7, 0, 0], sizes = [1, 8, 8], strides = [1, 1, 1]} : vector<16x8x8xf32> to vector<1x8x8xf32>
    %937 = vector.shape_cast %936 : vector<1x8x8xf32> to vector<8x8xf32>
    %938 = vector.extract_strided_slice %929 {offsets = [0, 0], sizes = [8, 1], strides = [1, 1]} : vector<8x8xf32> to vector<8x1xf32>
    %939 = vector.shape_cast %938 : vector<8x1xf32> to vector<8x1xf32>
    %940 = vector.broadcast %939 : vector<8x1xf32> to vector<8x8xf32>
    %941 = arith.mulf %940, %15 : vector<8x8xf32>
    %942 = arith.addf %931, %941 : vector<8x8xf32>
    %943 = arith.mulf %940, %18 : vector<8x8xf32>
    %944 = arith.addf %933, %943 : vector<8x8xf32>
    %945 = arith.mulf %940, %21 : vector<8x8xf32>
    %946 = arith.addf %935, %945 : vector<8x8xf32>
    %947 = arith.mulf %940, %24 : vector<8x8xf32>
    %948 = arith.addf %937, %947 : vector<8x8xf32>
    %949 = vector.extract_strided_slice %929 {offsets = [0, 1], sizes = [8, 1], strides = [1, 1]} : vector<8x8xf32> to vector<8x1xf32>
    %950 = vector.shape_cast %949 : vector<8x1xf32> to vector<8x1xf32>
    %951 = vector.broadcast %950 : vector<8x1xf32> to vector<8x8xf32>
    %952 = arith.mulf %951, %27 : vector<8x8xf32>
    %953 = arith.addf %942, %952 : vector<8x8xf32>
    %954 = arith.mulf %951, %30 : vector<8x8xf32>
    %955 = arith.addf %944, %954 : vector<8x8xf32>
    %956 = arith.mulf %951, %33 : vector<8x8xf32>
    %957 = arith.addf %946, %956 : vector<8x8xf32>
    %958 = arith.mulf %951, %36 : vector<8x8xf32>
    %959 = arith.addf %948, %958 : vector<8x8xf32>
    %960 = vector.extract_strided_slice %929 {offsets = [0, 2], sizes = [8, 1], strides = [1, 1]} : vector<8x8xf32> to vector<8x1xf32>
    %961 = vector.shape_cast %960 : vector<8x1xf32> to vector<8x1xf32>
    %962 = vector.broadcast %961 : vector<8x1xf32> to vector<8x8xf32>
    %963 = arith.mulf %962, %39 : vector<8x8xf32>
    %964 = arith.addf %953, %963 : vector<8x8xf32>
    %965 = arith.mulf %962, %42 : vector<8x8xf32>
    %966 = arith.addf %955, %965 : vector<8x8xf32>
    %967 = arith.mulf %962, %45 : vector<8x8xf32>
    %968 = arith.addf %957, %967 : vector<8x8xf32>
    %969 = arith.mulf %962, %48 : vector<8x8xf32>
    %970 = arith.addf %959, %969 : vector<8x8xf32>
    %971 = vector.extract_strided_slice %929 {offsets = [0, 3], sizes = [8, 1], strides = [1, 1]} : vector<8x8xf32> to vector<8x1xf32>
    %972 = vector.shape_cast %971 : vector<8x1xf32> to vector<8x1xf32>
    %973 = vector.broadcast %972 : vector<8x1xf32> to vector<8x8xf32>
    %974 = arith.mulf %973, %51 : vector<8x8xf32>
    %975 = arith.addf %964, %974 : vector<8x8xf32>
    %976 = arith.mulf %973, %54 : vector<8x8xf32>
    %977 = arith.addf %966, %976 : vector<8x8xf32>
    %978 = arith.mulf %973, %57 : vector<8x8xf32>
    %979 = arith.addf %968, %978 : vector<8x8xf32>
    %980 = arith.mulf %973, %60 : vector<8x8xf32>
    %981 = arith.addf %970, %980 : vector<8x8xf32>
    %982 = vector.extract_strided_slice %929 {offsets = [0, 4], sizes = [8, 1], strides = [1, 1]} : vector<8x8xf32> to vector<8x1xf32>
    %983 = vector.shape_cast %982 : vector<8x1xf32> to vector<8x1xf32>
    %984 = vector.broadcast %983 : vector<8x1xf32> to vector<8x8xf32>
    %985 = arith.mulf %984, %63 : vector<8x8xf32>
    %986 = arith.addf %975, %985 : vector<8x8xf32>
    %987 = arith.mulf %984, %66 : vector<8x8xf32>
    %988 = arith.addf %977, %987 : vector<8x8xf32>
    %989 = arith.mulf %984, %69 : vector<8x8xf32>
    %990 = arith.addf %979, %989 : vector<8x8xf32>
    %991 = arith.mulf %984, %72 : vector<8x8xf32>
    %992 = arith.addf %981, %991 : vector<8x8xf32>
    %993 = vector.extract_strided_slice %929 {offsets = [0, 5], sizes = [8, 1], strides = [1, 1]} : vector<8x8xf32> to vector<8x1xf32>
    %994 = vector.shape_cast %993 : vector<8x1xf32> to vector<8x1xf32>
    %995 = vector.broadcast %994 : vector<8x1xf32> to vector<8x8xf32>
    %996 = arith.mulf %995, %75 : vector<8x8xf32>
    %997 = arith.addf %986, %996 : vector<8x8xf32>
    %998 = arith.mulf %995, %78 : vector<8x8xf32>
    %999 = arith.addf %988, %998 : vector<8x8xf32>
    %1000 = arith.mulf %995, %81 : vector<8x8xf32>
    %1001 = arith.addf %990, %1000 : vector<8x8xf32>
    %1002 = arith.mulf %995, %84 : vector<8x8xf32>
    %1003 = arith.addf %992, %1002 : vector<8x8xf32>
    %1004 = vector.extract_strided_slice %929 {offsets = [0, 6], sizes = [8, 1], strides = [1, 1]} : vector<8x8xf32> to vector<8x1xf32>
    %1005 = vector.shape_cast %1004 : vector<8x1xf32> to vector<8x1xf32>
    %1006 = vector.broadcast %1005 : vector<8x1xf32> to vector<8x8xf32>
    %1007 = arith.mulf %1006, %87 : vector<8x8xf32>
    %1008 = arith.addf %997, %1007 : vector<8x8xf32>
    %1009 = arith.mulf %1006, %90 : vector<8x8xf32>
    %1010 = arith.addf %999, %1009 : vector<8x8xf32>
    %1011 = arith.mulf %1006, %93 : vector<8x8xf32>
    %1012 = arith.addf %1001, %1011 : vector<8x8xf32>
    %1013 = arith.mulf %1006, %96 : vector<8x8xf32>
    %1014 = arith.addf %1003, %1013 : vector<8x8xf32>
    %1015 = vector.extract_strided_slice %929 {offsets = [0, 7], sizes = [8, 1], strides = [1, 1]} : vector<8x8xf32> to vector<8x1xf32>
    %1016 = vector.shape_cast %1015 : vector<8x1xf32> to vector<8x1xf32>
    %1017 = vector.broadcast %1016 : vector<8x1xf32> to vector<8x8xf32>
    %1018 = arith.mulf %1017, %99 : vector<8x8xf32>
    %1019 = arith.addf %1008, %1018 : vector<8x8xf32>
    %1020 = arith.mulf %1017, %102 : vector<8x8xf32>
    %1021 = arith.addf %1010, %1020 : vector<8x8xf32>
    %1022 = arith.mulf %1017, %105 : vector<8x8xf32>
    %1023 = arith.addf %1012, %1022 : vector<8x8xf32>
    %1024 = arith.mulf %1017, %108 : vector<8x8xf32>
    %1025 = arith.addf %1014, %1024 : vector<8x8xf32>
    %1026 = arith.negf %1019 : vector<8x8xf32>
    %1027 = math.exp %1026 : vector<8x8xf32>
    %cst_31 = arith.constant 1.000000e+00 : f32
    %1028 = vector.broadcast %cst_31 : f32 to vector<8x8xf32>
    %1029 = arith.addf %1028, %1027 : vector<8x8xf32>
    %1030 = arith.divf %1028, %1029 : vector<8x8xf32>
    %1031 = arith.negf %1021 : vector<8x8xf32>
    %1032 = math.exp %1031 : vector<8x8xf32>
    %cst_32 = arith.constant 1.000000e+00 : f32
    %1033 = vector.broadcast %cst_32 : f32 to vector<8x8xf32>
    %1034 = arith.addf %1033, %1032 : vector<8x8xf32>
    %1035 = arith.divf %1033, %1034 : vector<8x8xf32>
    %1036 = arith.negf %1023 : vector<8x8xf32>
    %1037 = math.exp %1036 : vector<8x8xf32>
    %cst_33 = arith.constant 1.000000e+00 : f32
    %1038 = vector.broadcast %cst_33 : f32 to vector<8x8xf32>
    %1039 = arith.addf %1038, %1037 : vector<8x8xf32>
    %1040 = arith.divf %1038, %1039 : vector<8x8xf32>
    %1041 = math.tanh %1025 : vector<8x8xf32>
    %1042 = arith.mulf %1035, %927 : vector<8x8xf32>
    %1043 = arith.mulf %1030, %1041 : vector<8x8xf32>
    %1044 = arith.addf %1042, %1043 : vector<8x8xf32>
    %1045 = math.tanh %1044 : vector<8x8xf32>
    %1046 = arith.mulf %1040, %1045 : vector<8x8xf32>
    %1047 = vector.extract_strided_slice %8 {offsets = [8, 0, 0], sizes = [1, 8, 8], strides = [1, 1, 1]} : vector<16x8x8xf32> to vector<1x8x8xf32>
    %1048 = vector.shape_cast %1047 : vector<1x8x8xf32> to vector<8x8xf32>
    %1049 = vector.extract_strided_slice %9 {offsets = [8, 0, 0], sizes = [1, 8, 8], strides = [1, 1, 1]} : vector<16x8x8xf32> to vector<1x8x8xf32>
    %1050 = vector.shape_cast %1049 : vector<1x8x8xf32> to vector<8x8xf32>
    %1051 = vector.extract_strided_slice %10 {offsets = [8, 0, 0], sizes = [1, 8, 8], strides = [1, 1, 1]} : vector<16x8x8xf32> to vector<1x8x8xf32>
    %1052 = vector.shape_cast %1051 : vector<1x8x8xf32> to vector<8x8xf32>
    %1053 = vector.extract_strided_slice %11 {offsets = [8, 0, 0], sizes = [1, 8, 8], strides = [1, 1, 1]} : vector<16x8x8xf32> to vector<1x8x8xf32>
    %1054 = vector.shape_cast %1053 : vector<1x8x8xf32> to vector<8x8xf32>
    %1055 = vector.extract_strided_slice %1046 {offsets = [0, 0], sizes = [8, 1], strides = [1, 1]} : vector<8x8xf32> to vector<8x1xf32>
    %1056 = vector.shape_cast %1055 : vector<8x1xf32> to vector<8x1xf32>
    %1057 = vector.broadcast %1056 : vector<8x1xf32> to vector<8x8xf32>
    %1058 = arith.mulf %1057, %15 : vector<8x8xf32>
    %1059 = arith.addf %1048, %1058 : vector<8x8xf32>
    %1060 = arith.mulf %1057, %18 : vector<8x8xf32>
    %1061 = arith.addf %1050, %1060 : vector<8x8xf32>
    %1062 = arith.mulf %1057, %21 : vector<8x8xf32>
    %1063 = arith.addf %1052, %1062 : vector<8x8xf32>
    %1064 = arith.mulf %1057, %24 : vector<8x8xf32>
    %1065 = arith.addf %1054, %1064 : vector<8x8xf32>
    %1066 = vector.extract_strided_slice %1046 {offsets = [0, 1], sizes = [8, 1], strides = [1, 1]} : vector<8x8xf32> to vector<8x1xf32>
    %1067 = vector.shape_cast %1066 : vector<8x1xf32> to vector<8x1xf32>
    %1068 = vector.broadcast %1067 : vector<8x1xf32> to vector<8x8xf32>
    %1069 = arith.mulf %1068, %27 : vector<8x8xf32>
    %1070 = arith.addf %1059, %1069 : vector<8x8xf32>
    %1071 = arith.mulf %1068, %30 : vector<8x8xf32>
    %1072 = arith.addf %1061, %1071 : vector<8x8xf32>
    %1073 = arith.mulf %1068, %33 : vector<8x8xf32>
    %1074 = arith.addf %1063, %1073 : vector<8x8xf32>
    %1075 = arith.mulf %1068, %36 : vector<8x8xf32>
    %1076 = arith.addf %1065, %1075 : vector<8x8xf32>
    %1077 = vector.extract_strided_slice %1046 {offsets = [0, 2], sizes = [8, 1], strides = [1, 1]} : vector<8x8xf32> to vector<8x1xf32>
    %1078 = vector.shape_cast %1077 : vector<8x1xf32> to vector<8x1xf32>
    %1079 = vector.broadcast %1078 : vector<8x1xf32> to vector<8x8xf32>
    %1080 = arith.mulf %1079, %39 : vector<8x8xf32>
    %1081 = arith.addf %1070, %1080 : vector<8x8xf32>
    %1082 = arith.mulf %1079, %42 : vector<8x8xf32>
    %1083 = arith.addf %1072, %1082 : vector<8x8xf32>
    %1084 = arith.mulf %1079, %45 : vector<8x8xf32>
    %1085 = arith.addf %1074, %1084 : vector<8x8xf32>
    %1086 = arith.mulf %1079, %48 : vector<8x8xf32>
    %1087 = arith.addf %1076, %1086 : vector<8x8xf32>
    %1088 = vector.extract_strided_slice %1046 {offsets = [0, 3], sizes = [8, 1], strides = [1, 1]} : vector<8x8xf32> to vector<8x1xf32>
    %1089 = vector.shape_cast %1088 : vector<8x1xf32> to vector<8x1xf32>
    %1090 = vector.broadcast %1089 : vector<8x1xf32> to vector<8x8xf32>
    %1091 = arith.mulf %1090, %51 : vector<8x8xf32>
    %1092 = arith.addf %1081, %1091 : vector<8x8xf32>
    %1093 = arith.mulf %1090, %54 : vector<8x8xf32>
    %1094 = arith.addf %1083, %1093 : vector<8x8xf32>
    %1095 = arith.mulf %1090, %57 : vector<8x8xf32>
    %1096 = arith.addf %1085, %1095 : vector<8x8xf32>
    %1097 = arith.mulf %1090, %60 : vector<8x8xf32>
    %1098 = arith.addf %1087, %1097 : vector<8x8xf32>
    %1099 = vector.extract_strided_slice %1046 {offsets = [0, 4], sizes = [8, 1], strides = [1, 1]} : vector<8x8xf32> to vector<8x1xf32>
    %1100 = vector.shape_cast %1099 : vector<8x1xf32> to vector<8x1xf32>
    %1101 = vector.broadcast %1100 : vector<8x1xf32> to vector<8x8xf32>
    %1102 = arith.mulf %1101, %63 : vector<8x8xf32>
    %1103 = arith.addf %1092, %1102 : vector<8x8xf32>
    %1104 = arith.mulf %1101, %66 : vector<8x8xf32>
    %1105 = arith.addf %1094, %1104 : vector<8x8xf32>
    %1106 = arith.mulf %1101, %69 : vector<8x8xf32>
    %1107 = arith.addf %1096, %1106 : vector<8x8xf32>
    %1108 = arith.mulf %1101, %72 : vector<8x8xf32>
    %1109 = arith.addf %1098, %1108 : vector<8x8xf32>
    %1110 = vector.extract_strided_slice %1046 {offsets = [0, 5], sizes = [8, 1], strides = [1, 1]} : vector<8x8xf32> to vector<8x1xf32>
    %1111 = vector.shape_cast %1110 : vector<8x1xf32> to vector<8x1xf32>
    %1112 = vector.broadcast %1111 : vector<8x1xf32> to vector<8x8xf32>
    %1113 = arith.mulf %1112, %75 : vector<8x8xf32>
    %1114 = arith.addf %1103, %1113 : vector<8x8xf32>
    %1115 = arith.mulf %1112, %78 : vector<8x8xf32>
    %1116 = arith.addf %1105, %1115 : vector<8x8xf32>
    %1117 = arith.mulf %1112, %81 : vector<8x8xf32>
    %1118 = arith.addf %1107, %1117 : vector<8x8xf32>
    %1119 = arith.mulf %1112, %84 : vector<8x8xf32>
    %1120 = arith.addf %1109, %1119 : vector<8x8xf32>
    %1121 = vector.extract_strided_slice %1046 {offsets = [0, 6], sizes = [8, 1], strides = [1, 1]} : vector<8x8xf32> to vector<8x1xf32>
    %1122 = vector.shape_cast %1121 : vector<8x1xf32> to vector<8x1xf32>
    %1123 = vector.broadcast %1122 : vector<8x1xf32> to vector<8x8xf32>
    %1124 = arith.mulf %1123, %87 : vector<8x8xf32>
    %1125 = arith.addf %1114, %1124 : vector<8x8xf32>
    %1126 = arith.mulf %1123, %90 : vector<8x8xf32>
    %1127 = arith.addf %1116, %1126 : vector<8x8xf32>
    %1128 = arith.mulf %1123, %93 : vector<8x8xf32>
    %1129 = arith.addf %1118, %1128 : vector<8x8xf32>
    %1130 = arith.mulf %1123, %96 : vector<8x8xf32>
    %1131 = arith.addf %1120, %1130 : vector<8x8xf32>
    %1132 = vector.extract_strided_slice %1046 {offsets = [0, 7], sizes = [8, 1], strides = [1, 1]} : vector<8x8xf32> to vector<8x1xf32>
    %1133 = vector.shape_cast %1132 : vector<8x1xf32> to vector<8x1xf32>
    %1134 = vector.broadcast %1133 : vector<8x1xf32> to vector<8x8xf32>
    %1135 = arith.mulf %1134, %99 : vector<8x8xf32>
    %1136 = arith.addf %1125, %1135 : vector<8x8xf32>
    %1137 = arith.mulf %1134, %102 : vector<8x8xf32>
    %1138 = arith.addf %1127, %1137 : vector<8x8xf32>
    %1139 = arith.mulf %1134, %105 : vector<8x8xf32>
    %1140 = arith.addf %1129, %1139 : vector<8x8xf32>
    %1141 = arith.mulf %1134, %108 : vector<8x8xf32>
    %1142 = arith.addf %1131, %1141 : vector<8x8xf32>
    %1143 = arith.negf %1136 : vector<8x8xf32>
    %1144 = math.exp %1143 : vector<8x8xf32>
    %cst_34 = arith.constant 1.000000e+00 : f32
    %1145 = vector.broadcast %cst_34 : f32 to vector<8x8xf32>
    %1146 = arith.addf %1145, %1144 : vector<8x8xf32>
    %1147 = arith.divf %1145, %1146 : vector<8x8xf32>
    %1148 = arith.negf %1138 : vector<8x8xf32>
    %1149 = math.exp %1148 : vector<8x8xf32>
    %cst_35 = arith.constant 1.000000e+00 : f32
    %1150 = vector.broadcast %cst_35 : f32 to vector<8x8xf32>
    %1151 = arith.addf %1150, %1149 : vector<8x8xf32>
    %1152 = arith.divf %1150, %1151 : vector<8x8xf32>
    %1153 = arith.negf %1140 : vector<8x8xf32>
    %1154 = math.exp %1153 : vector<8x8xf32>
    %cst_36 = arith.constant 1.000000e+00 : f32
    %1155 = vector.broadcast %cst_36 : f32 to vector<8x8xf32>
    %1156 = arith.addf %1155, %1154 : vector<8x8xf32>
    %1157 = arith.divf %1155, %1156 : vector<8x8xf32>
    %1158 = math.tanh %1142 : vector<8x8xf32>
    %1159 = arith.mulf %1152, %1044 : vector<8x8xf32>
    %1160 = arith.mulf %1147, %1158 : vector<8x8xf32>
    %1161 = arith.addf %1159, %1160 : vector<8x8xf32>
    %1162 = math.tanh %1161 : vector<8x8xf32>
    %1163 = arith.mulf %1157, %1162 : vector<8x8xf32>
    %1164 = vector.extract_strided_slice %8 {offsets = [9, 0, 0], sizes = [1, 8, 8], strides = [1, 1, 1]} : vector<16x8x8xf32> to vector<1x8x8xf32>
    %1165 = vector.shape_cast %1164 : vector<1x8x8xf32> to vector<8x8xf32>
    %1166 = vector.extract_strided_slice %9 {offsets = [9, 0, 0], sizes = [1, 8, 8], strides = [1, 1, 1]} : vector<16x8x8xf32> to vector<1x8x8xf32>
    %1167 = vector.shape_cast %1166 : vector<1x8x8xf32> to vector<8x8xf32>
    %1168 = vector.extract_strided_slice %10 {offsets = [9, 0, 0], sizes = [1, 8, 8], strides = [1, 1, 1]} : vector<16x8x8xf32> to vector<1x8x8xf32>
    %1169 = vector.shape_cast %1168 : vector<1x8x8xf32> to vector<8x8xf32>
    %1170 = vector.extract_strided_slice %11 {offsets = [9, 0, 0], sizes = [1, 8, 8], strides = [1, 1, 1]} : vector<16x8x8xf32> to vector<1x8x8xf32>
    %1171 = vector.shape_cast %1170 : vector<1x8x8xf32> to vector<8x8xf32>
    %1172 = vector.extract_strided_slice %1163 {offsets = [0, 0], sizes = [8, 1], strides = [1, 1]} : vector<8x8xf32> to vector<8x1xf32>
    %1173 = vector.shape_cast %1172 : vector<8x1xf32> to vector<8x1xf32>
    %1174 = vector.broadcast %1173 : vector<8x1xf32> to vector<8x8xf32>
    %1175 = arith.mulf %1174, %15 : vector<8x8xf32>
    %1176 = arith.addf %1165, %1175 : vector<8x8xf32>
    %1177 = arith.mulf %1174, %18 : vector<8x8xf32>
    %1178 = arith.addf %1167, %1177 : vector<8x8xf32>
    %1179 = arith.mulf %1174, %21 : vector<8x8xf32>
    %1180 = arith.addf %1169, %1179 : vector<8x8xf32>
    %1181 = arith.mulf %1174, %24 : vector<8x8xf32>
    %1182 = arith.addf %1171, %1181 : vector<8x8xf32>
    %1183 = vector.extract_strided_slice %1163 {offsets = [0, 1], sizes = [8, 1], strides = [1, 1]} : vector<8x8xf32> to vector<8x1xf32>
    %1184 = vector.shape_cast %1183 : vector<8x1xf32> to vector<8x1xf32>
    %1185 = vector.broadcast %1184 : vector<8x1xf32> to vector<8x8xf32>
    %1186 = arith.mulf %1185, %27 : vector<8x8xf32>
    %1187 = arith.addf %1176, %1186 : vector<8x8xf32>
    %1188 = arith.mulf %1185, %30 : vector<8x8xf32>
    %1189 = arith.addf %1178, %1188 : vector<8x8xf32>
    %1190 = arith.mulf %1185, %33 : vector<8x8xf32>
    %1191 = arith.addf %1180, %1190 : vector<8x8xf32>
    %1192 = arith.mulf %1185, %36 : vector<8x8xf32>
    %1193 = arith.addf %1182, %1192 : vector<8x8xf32>
    %1194 = vector.extract_strided_slice %1163 {offsets = [0, 2], sizes = [8, 1], strides = [1, 1]} : vector<8x8xf32> to vector<8x1xf32>
    %1195 = vector.shape_cast %1194 : vector<8x1xf32> to vector<8x1xf32>
    %1196 = vector.broadcast %1195 : vector<8x1xf32> to vector<8x8xf32>
    %1197 = arith.mulf %1196, %39 : vector<8x8xf32>
    %1198 = arith.addf %1187, %1197 : vector<8x8xf32>
    %1199 = arith.mulf %1196, %42 : vector<8x8xf32>
    %1200 = arith.addf %1189, %1199 : vector<8x8xf32>
    %1201 = arith.mulf %1196, %45 : vector<8x8xf32>
    %1202 = arith.addf %1191, %1201 : vector<8x8xf32>
    %1203 = arith.mulf %1196, %48 : vector<8x8xf32>
    %1204 = arith.addf %1193, %1203 : vector<8x8xf32>
    %1205 = vector.extract_strided_slice %1163 {offsets = [0, 3], sizes = [8, 1], strides = [1, 1]} : vector<8x8xf32> to vector<8x1xf32>
    %1206 = vector.shape_cast %1205 : vector<8x1xf32> to vector<8x1xf32>
    %1207 = vector.broadcast %1206 : vector<8x1xf32> to vector<8x8xf32>
    %1208 = arith.mulf %1207, %51 : vector<8x8xf32>
    %1209 = arith.addf %1198, %1208 : vector<8x8xf32>
    %1210 = arith.mulf %1207, %54 : vector<8x8xf32>
    %1211 = arith.addf %1200, %1210 : vector<8x8xf32>
    %1212 = arith.mulf %1207, %57 : vector<8x8xf32>
    %1213 = arith.addf %1202, %1212 : vector<8x8xf32>
    %1214 = arith.mulf %1207, %60 : vector<8x8xf32>
    %1215 = arith.addf %1204, %1214 : vector<8x8xf32>
    %1216 = vector.extract_strided_slice %1163 {offsets = [0, 4], sizes = [8, 1], strides = [1, 1]} : vector<8x8xf32> to vector<8x1xf32>
    %1217 = vector.shape_cast %1216 : vector<8x1xf32> to vector<8x1xf32>
    %1218 = vector.broadcast %1217 : vector<8x1xf32> to vector<8x8xf32>
    %1219 = arith.mulf %1218, %63 : vector<8x8xf32>
    %1220 = arith.addf %1209, %1219 : vector<8x8xf32>
    %1221 = arith.mulf %1218, %66 : vector<8x8xf32>
    %1222 = arith.addf %1211, %1221 : vector<8x8xf32>
    %1223 = arith.mulf %1218, %69 : vector<8x8xf32>
    %1224 = arith.addf %1213, %1223 : vector<8x8xf32>
    %1225 = arith.mulf %1218, %72 : vector<8x8xf32>
    %1226 = arith.addf %1215, %1225 : vector<8x8xf32>
    %1227 = vector.extract_strided_slice %1163 {offsets = [0, 5], sizes = [8, 1], strides = [1, 1]} : vector<8x8xf32> to vector<8x1xf32>
    %1228 = vector.shape_cast %1227 : vector<8x1xf32> to vector<8x1xf32>
    %1229 = vector.broadcast %1228 : vector<8x1xf32> to vector<8x8xf32>
    %1230 = arith.mulf %1229, %75 : vector<8x8xf32>
    %1231 = arith.addf %1220, %1230 : vector<8x8xf32>
    %1232 = arith.mulf %1229, %78 : vector<8x8xf32>
    %1233 = arith.addf %1222, %1232 : vector<8x8xf32>
    %1234 = arith.mulf %1229, %81 : vector<8x8xf32>
    %1235 = arith.addf %1224, %1234 : vector<8x8xf32>
    %1236 = arith.mulf %1229, %84 : vector<8x8xf32>
    %1237 = arith.addf %1226, %1236 : vector<8x8xf32>
    %1238 = vector.extract_strided_slice %1163 {offsets = [0, 6], sizes = [8, 1], strides = [1, 1]} : vector<8x8xf32> to vector<8x1xf32>
    %1239 = vector.shape_cast %1238 : vector<8x1xf32> to vector<8x1xf32>
    %1240 = vector.broadcast %1239 : vector<8x1xf32> to vector<8x8xf32>
    %1241 = arith.mulf %1240, %87 : vector<8x8xf32>
    %1242 = arith.addf %1231, %1241 : vector<8x8xf32>
    %1243 = arith.mulf %1240, %90 : vector<8x8xf32>
    %1244 = arith.addf %1233, %1243 : vector<8x8xf32>
    %1245 = arith.mulf %1240, %93 : vector<8x8xf32>
    %1246 = arith.addf %1235, %1245 : vector<8x8xf32>
    %1247 = arith.mulf %1240, %96 : vector<8x8xf32>
    %1248 = arith.addf %1237, %1247 : vector<8x8xf32>
    %1249 = vector.extract_strided_slice %1163 {offsets = [0, 7], sizes = [8, 1], strides = [1, 1]} : vector<8x8xf32> to vector<8x1xf32>
    %1250 = vector.shape_cast %1249 : vector<8x1xf32> to vector<8x1xf32>
    %1251 = vector.broadcast %1250 : vector<8x1xf32> to vector<8x8xf32>
    %1252 = arith.mulf %1251, %99 : vector<8x8xf32>
    %1253 = arith.addf %1242, %1252 : vector<8x8xf32>
    %1254 = arith.mulf %1251, %102 : vector<8x8xf32>
    %1255 = arith.addf %1244, %1254 : vector<8x8xf32>
    %1256 = arith.mulf %1251, %105 : vector<8x8xf32>
    %1257 = arith.addf %1246, %1256 : vector<8x8xf32>
    %1258 = arith.mulf %1251, %108 : vector<8x8xf32>
    %1259 = arith.addf %1248, %1258 : vector<8x8xf32>
    %1260 = arith.negf %1253 : vector<8x8xf32>
    %1261 = math.exp %1260 : vector<8x8xf32>
    %cst_37 = arith.constant 1.000000e+00 : f32
    %1262 = vector.broadcast %cst_37 : f32 to vector<8x8xf32>
    %1263 = arith.addf %1262, %1261 : vector<8x8xf32>
    %1264 = arith.divf %1262, %1263 : vector<8x8xf32>
    %1265 = arith.negf %1255 : vector<8x8xf32>
    %1266 = math.exp %1265 : vector<8x8xf32>
    %cst_38 = arith.constant 1.000000e+00 : f32
    %1267 = vector.broadcast %cst_38 : f32 to vector<8x8xf32>
    %1268 = arith.addf %1267, %1266 : vector<8x8xf32>
    %1269 = arith.divf %1267, %1268 : vector<8x8xf32>
    %1270 = arith.negf %1257 : vector<8x8xf32>
    %1271 = math.exp %1270 : vector<8x8xf32>
    %cst_39 = arith.constant 1.000000e+00 : f32
    %1272 = vector.broadcast %cst_39 : f32 to vector<8x8xf32>
    %1273 = arith.addf %1272, %1271 : vector<8x8xf32>
    %1274 = arith.divf %1272, %1273 : vector<8x8xf32>
    %1275 = math.tanh %1259 : vector<8x8xf32>
    %1276 = arith.mulf %1269, %1161 : vector<8x8xf32>
    %1277 = arith.mulf %1264, %1275 : vector<8x8xf32>
    %1278 = arith.addf %1276, %1277 : vector<8x8xf32>
    %1279 = math.tanh %1278 : vector<8x8xf32>
    %1280 = arith.mulf %1274, %1279 : vector<8x8xf32>
    %1281 = vector.extract_strided_slice %8 {offsets = [10, 0, 0], sizes = [1, 8, 8], strides = [1, 1, 1]} : vector<16x8x8xf32> to vector<1x8x8xf32>
    %1282 = vector.shape_cast %1281 : vector<1x8x8xf32> to vector<8x8xf32>
    %1283 = vector.extract_strided_slice %9 {offsets = [10, 0, 0], sizes = [1, 8, 8], strides = [1, 1, 1]} : vector<16x8x8xf32> to vector<1x8x8xf32>
    %1284 = vector.shape_cast %1283 : vector<1x8x8xf32> to vector<8x8xf32>
    %1285 = vector.extract_strided_slice %10 {offsets = [10, 0, 0], sizes = [1, 8, 8], strides = [1, 1, 1]} : vector<16x8x8xf32> to vector<1x8x8xf32>
    %1286 = vector.shape_cast %1285 : vector<1x8x8xf32> to vector<8x8xf32>
    %1287 = vector.extract_strided_slice %11 {offsets = [10, 0, 0], sizes = [1, 8, 8], strides = [1, 1, 1]} : vector<16x8x8xf32> to vector<1x8x8xf32>
    %1288 = vector.shape_cast %1287 : vector<1x8x8xf32> to vector<8x8xf32>
    %1289 = vector.extract_strided_slice %1280 {offsets = [0, 0], sizes = [8, 1], strides = [1, 1]} : vector<8x8xf32> to vector<8x1xf32>
    %1290 = vector.shape_cast %1289 : vector<8x1xf32> to vector<8x1xf32>
    %1291 = vector.broadcast %1290 : vector<8x1xf32> to vector<8x8xf32>
    %1292 = arith.mulf %1291, %15 : vector<8x8xf32>
    %1293 = arith.addf %1282, %1292 : vector<8x8xf32>
    %1294 = arith.mulf %1291, %18 : vector<8x8xf32>
    %1295 = arith.addf %1284, %1294 : vector<8x8xf32>
    %1296 = arith.mulf %1291, %21 : vector<8x8xf32>
    %1297 = arith.addf %1286, %1296 : vector<8x8xf32>
    %1298 = arith.mulf %1291, %24 : vector<8x8xf32>
    %1299 = arith.addf %1288, %1298 : vector<8x8xf32>
    %1300 = vector.extract_strided_slice %1280 {offsets = [0, 1], sizes = [8, 1], strides = [1, 1]} : vector<8x8xf32> to vector<8x1xf32>
    %1301 = vector.shape_cast %1300 : vector<8x1xf32> to vector<8x1xf32>
    %1302 = vector.broadcast %1301 : vector<8x1xf32> to vector<8x8xf32>
    %1303 = arith.mulf %1302, %27 : vector<8x8xf32>
    %1304 = arith.addf %1293, %1303 : vector<8x8xf32>
    %1305 = arith.mulf %1302, %30 : vector<8x8xf32>
    %1306 = arith.addf %1295, %1305 : vector<8x8xf32>
    %1307 = arith.mulf %1302, %33 : vector<8x8xf32>
    %1308 = arith.addf %1297, %1307 : vector<8x8xf32>
    %1309 = arith.mulf %1302, %36 : vector<8x8xf32>
    %1310 = arith.addf %1299, %1309 : vector<8x8xf32>
    %1311 = vector.extract_strided_slice %1280 {offsets = [0, 2], sizes = [8, 1], strides = [1, 1]} : vector<8x8xf32> to vector<8x1xf32>
    %1312 = vector.shape_cast %1311 : vector<8x1xf32> to vector<8x1xf32>
    %1313 = vector.broadcast %1312 : vector<8x1xf32> to vector<8x8xf32>
    %1314 = arith.mulf %1313, %39 : vector<8x8xf32>
    %1315 = arith.addf %1304, %1314 : vector<8x8xf32>
    %1316 = arith.mulf %1313, %42 : vector<8x8xf32>
    %1317 = arith.addf %1306, %1316 : vector<8x8xf32>
    %1318 = arith.mulf %1313, %45 : vector<8x8xf32>
    %1319 = arith.addf %1308, %1318 : vector<8x8xf32>
    %1320 = arith.mulf %1313, %48 : vector<8x8xf32>
    %1321 = arith.addf %1310, %1320 : vector<8x8xf32>
    %1322 = vector.extract_strided_slice %1280 {offsets = [0, 3], sizes = [8, 1], strides = [1, 1]} : vector<8x8xf32> to vector<8x1xf32>
    %1323 = vector.shape_cast %1322 : vector<8x1xf32> to vector<8x1xf32>
    %1324 = vector.broadcast %1323 : vector<8x1xf32> to vector<8x8xf32>
    %1325 = arith.mulf %1324, %51 : vector<8x8xf32>
    %1326 = arith.addf %1315, %1325 : vector<8x8xf32>
    %1327 = arith.mulf %1324, %54 : vector<8x8xf32>
    %1328 = arith.addf %1317, %1327 : vector<8x8xf32>
    %1329 = arith.mulf %1324, %57 : vector<8x8xf32>
    %1330 = arith.addf %1319, %1329 : vector<8x8xf32>
    %1331 = arith.mulf %1324, %60 : vector<8x8xf32>
    %1332 = arith.addf %1321, %1331 : vector<8x8xf32>
    %1333 = vector.extract_strided_slice %1280 {offsets = [0, 4], sizes = [8, 1], strides = [1, 1]} : vector<8x8xf32> to vector<8x1xf32>
    %1334 = vector.shape_cast %1333 : vector<8x1xf32> to vector<8x1xf32>
    %1335 = vector.broadcast %1334 : vector<8x1xf32> to vector<8x8xf32>
    %1336 = arith.mulf %1335, %63 : vector<8x8xf32>
    %1337 = arith.addf %1326, %1336 : vector<8x8xf32>
    %1338 = arith.mulf %1335, %66 : vector<8x8xf32>
    %1339 = arith.addf %1328, %1338 : vector<8x8xf32>
    %1340 = arith.mulf %1335, %69 : vector<8x8xf32>
    %1341 = arith.addf %1330, %1340 : vector<8x8xf32>
    %1342 = arith.mulf %1335, %72 : vector<8x8xf32>
    %1343 = arith.addf %1332, %1342 : vector<8x8xf32>
    %1344 = vector.extract_strided_slice %1280 {offsets = [0, 5], sizes = [8, 1], strides = [1, 1]} : vector<8x8xf32> to vector<8x1xf32>
    %1345 = vector.shape_cast %1344 : vector<8x1xf32> to vector<8x1xf32>
    %1346 = vector.broadcast %1345 : vector<8x1xf32> to vector<8x8xf32>
    %1347 = arith.mulf %1346, %75 : vector<8x8xf32>
    %1348 = arith.addf %1337, %1347 : vector<8x8xf32>
    %1349 = arith.mulf %1346, %78 : vector<8x8xf32>
    %1350 = arith.addf %1339, %1349 : vector<8x8xf32>
    %1351 = arith.mulf %1346, %81 : vector<8x8xf32>
    %1352 = arith.addf %1341, %1351 : vector<8x8xf32>
    %1353 = arith.mulf %1346, %84 : vector<8x8xf32>
    %1354 = arith.addf %1343, %1353 : vector<8x8xf32>
    %1355 = vector.extract_strided_slice %1280 {offsets = [0, 6], sizes = [8, 1], strides = [1, 1]} : vector<8x8xf32> to vector<8x1xf32>
    %1356 = vector.shape_cast %1355 : vector<8x1xf32> to vector<8x1xf32>
    %1357 = vector.broadcast %1356 : vector<8x1xf32> to vector<8x8xf32>
    %1358 = arith.mulf %1357, %87 : vector<8x8xf32>
    %1359 = arith.addf %1348, %1358 : vector<8x8xf32>
    %1360 = arith.mulf %1357, %90 : vector<8x8xf32>
    %1361 = arith.addf %1350, %1360 : vector<8x8xf32>
    %1362 = arith.mulf %1357, %93 : vector<8x8xf32>
    %1363 = arith.addf %1352, %1362 : vector<8x8xf32>
    %1364 = arith.mulf %1357, %96 : vector<8x8xf32>
    %1365 = arith.addf %1354, %1364 : vector<8x8xf32>
    %1366 = vector.extract_strided_slice %1280 {offsets = [0, 7], sizes = [8, 1], strides = [1, 1]} : vector<8x8xf32> to vector<8x1xf32>
    %1367 = vector.shape_cast %1366 : vector<8x1xf32> to vector<8x1xf32>
    %1368 = vector.broadcast %1367 : vector<8x1xf32> to vector<8x8xf32>
    %1369 = arith.mulf %1368, %99 : vector<8x8xf32>
    %1370 = arith.addf %1359, %1369 : vector<8x8xf32>
    %1371 = arith.mulf %1368, %102 : vector<8x8xf32>
    %1372 = arith.addf %1361, %1371 : vector<8x8xf32>
    %1373 = arith.mulf %1368, %105 : vector<8x8xf32>
    %1374 = arith.addf %1363, %1373 : vector<8x8xf32>
    %1375 = arith.mulf %1368, %108 : vector<8x8xf32>
    %1376 = arith.addf %1365, %1375 : vector<8x8xf32>
    %1377 = arith.negf %1370 : vector<8x8xf32>
    %1378 = math.exp %1377 : vector<8x8xf32>
    %cst_40 = arith.constant 1.000000e+00 : f32
    %1379 = vector.broadcast %cst_40 : f32 to vector<8x8xf32>
    %1380 = arith.addf %1379, %1378 : vector<8x8xf32>
    %1381 = arith.divf %1379, %1380 : vector<8x8xf32>
    %1382 = arith.negf %1372 : vector<8x8xf32>
    %1383 = math.exp %1382 : vector<8x8xf32>
    %cst_41 = arith.constant 1.000000e+00 : f32
    %1384 = vector.broadcast %cst_41 : f32 to vector<8x8xf32>
    %1385 = arith.addf %1384, %1383 : vector<8x8xf32>
    %1386 = arith.divf %1384, %1385 : vector<8x8xf32>
    %1387 = arith.negf %1374 : vector<8x8xf32>
    %1388 = math.exp %1387 : vector<8x8xf32>
    %cst_42 = arith.constant 1.000000e+00 : f32
    %1389 = vector.broadcast %cst_42 : f32 to vector<8x8xf32>
    %1390 = arith.addf %1389, %1388 : vector<8x8xf32>
    %1391 = arith.divf %1389, %1390 : vector<8x8xf32>
    %1392 = math.tanh %1376 : vector<8x8xf32>
    %1393 = arith.mulf %1386, %1278 : vector<8x8xf32>
    %1394 = arith.mulf %1381, %1392 : vector<8x8xf32>
    %1395 = arith.addf %1393, %1394 : vector<8x8xf32>
    %1396 = math.tanh %1395 : vector<8x8xf32>
    %1397 = arith.mulf %1391, %1396 : vector<8x8xf32>
    %1398 = vector.extract_strided_slice %8 {offsets = [11, 0, 0], sizes = [1, 8, 8], strides = [1, 1, 1]} : vector<16x8x8xf32> to vector<1x8x8xf32>
    %1399 = vector.shape_cast %1398 : vector<1x8x8xf32> to vector<8x8xf32>
    %1400 = vector.extract_strided_slice %9 {offsets = [11, 0, 0], sizes = [1, 8, 8], strides = [1, 1, 1]} : vector<16x8x8xf32> to vector<1x8x8xf32>
    %1401 = vector.shape_cast %1400 : vector<1x8x8xf32> to vector<8x8xf32>
    %1402 = vector.extract_strided_slice %10 {offsets = [11, 0, 0], sizes = [1, 8, 8], strides = [1, 1, 1]} : vector<16x8x8xf32> to vector<1x8x8xf32>
    %1403 = vector.shape_cast %1402 : vector<1x8x8xf32> to vector<8x8xf32>
    %1404 = vector.extract_strided_slice %11 {offsets = [11, 0, 0], sizes = [1, 8, 8], strides = [1, 1, 1]} : vector<16x8x8xf32> to vector<1x8x8xf32>
    %1405 = vector.shape_cast %1404 : vector<1x8x8xf32> to vector<8x8xf32>
    %1406 = vector.extract_strided_slice %1397 {offsets = [0, 0], sizes = [8, 1], strides = [1, 1]} : vector<8x8xf32> to vector<8x1xf32>
    %1407 = vector.shape_cast %1406 : vector<8x1xf32> to vector<8x1xf32>
    %1408 = vector.broadcast %1407 : vector<8x1xf32> to vector<8x8xf32>
    %1409 = arith.mulf %1408, %15 : vector<8x8xf32>
    %1410 = arith.addf %1399, %1409 : vector<8x8xf32>
    %1411 = arith.mulf %1408, %18 : vector<8x8xf32>
    %1412 = arith.addf %1401, %1411 : vector<8x8xf32>
    %1413 = arith.mulf %1408, %21 : vector<8x8xf32>
    %1414 = arith.addf %1403, %1413 : vector<8x8xf32>
    %1415 = arith.mulf %1408, %24 : vector<8x8xf32>
    %1416 = arith.addf %1405, %1415 : vector<8x8xf32>
    %1417 = vector.extract_strided_slice %1397 {offsets = [0, 1], sizes = [8, 1], strides = [1, 1]} : vector<8x8xf32> to vector<8x1xf32>
    %1418 = vector.shape_cast %1417 : vector<8x1xf32> to vector<8x1xf32>
    %1419 = vector.broadcast %1418 : vector<8x1xf32> to vector<8x8xf32>
    %1420 = arith.mulf %1419, %27 : vector<8x8xf32>
    %1421 = arith.addf %1410, %1420 : vector<8x8xf32>
    %1422 = arith.mulf %1419, %30 : vector<8x8xf32>
    %1423 = arith.addf %1412, %1422 : vector<8x8xf32>
    %1424 = arith.mulf %1419, %33 : vector<8x8xf32>
    %1425 = arith.addf %1414, %1424 : vector<8x8xf32>
    %1426 = arith.mulf %1419, %36 : vector<8x8xf32>
    %1427 = arith.addf %1416, %1426 : vector<8x8xf32>
    %1428 = vector.extract_strided_slice %1397 {offsets = [0, 2], sizes = [8, 1], strides = [1, 1]} : vector<8x8xf32> to vector<8x1xf32>
    %1429 = vector.shape_cast %1428 : vector<8x1xf32> to vector<8x1xf32>
    %1430 = vector.broadcast %1429 : vector<8x1xf32> to vector<8x8xf32>
    %1431 = arith.mulf %1430, %39 : vector<8x8xf32>
    %1432 = arith.addf %1421, %1431 : vector<8x8xf32>
    %1433 = arith.mulf %1430, %42 : vector<8x8xf32>
    %1434 = arith.addf %1423, %1433 : vector<8x8xf32>
    %1435 = arith.mulf %1430, %45 : vector<8x8xf32>
    %1436 = arith.addf %1425, %1435 : vector<8x8xf32>
    %1437 = arith.mulf %1430, %48 : vector<8x8xf32>
    %1438 = arith.addf %1427, %1437 : vector<8x8xf32>
    %1439 = vector.extract_strided_slice %1397 {offsets = [0, 3], sizes = [8, 1], strides = [1, 1]} : vector<8x8xf32> to vector<8x1xf32>
    %1440 = vector.shape_cast %1439 : vector<8x1xf32> to vector<8x1xf32>
    %1441 = vector.broadcast %1440 : vector<8x1xf32> to vector<8x8xf32>
    %1442 = arith.mulf %1441, %51 : vector<8x8xf32>
    %1443 = arith.addf %1432, %1442 : vector<8x8xf32>
    %1444 = arith.mulf %1441, %54 : vector<8x8xf32>
    %1445 = arith.addf %1434, %1444 : vector<8x8xf32>
    %1446 = arith.mulf %1441, %57 : vector<8x8xf32>
    %1447 = arith.addf %1436, %1446 : vector<8x8xf32>
    %1448 = arith.mulf %1441, %60 : vector<8x8xf32>
    %1449 = arith.addf %1438, %1448 : vector<8x8xf32>
    %1450 = vector.extract_strided_slice %1397 {offsets = [0, 4], sizes = [8, 1], strides = [1, 1]} : vector<8x8xf32> to vector<8x1xf32>
    %1451 = vector.shape_cast %1450 : vector<8x1xf32> to vector<8x1xf32>
    %1452 = vector.broadcast %1451 : vector<8x1xf32> to vector<8x8xf32>
    %1453 = arith.mulf %1452, %63 : vector<8x8xf32>
    %1454 = arith.addf %1443, %1453 : vector<8x8xf32>
    %1455 = arith.mulf %1452, %66 : vector<8x8xf32>
    %1456 = arith.addf %1445, %1455 : vector<8x8xf32>
    %1457 = arith.mulf %1452, %69 : vector<8x8xf32>
    %1458 = arith.addf %1447, %1457 : vector<8x8xf32>
    %1459 = arith.mulf %1452, %72 : vector<8x8xf32>
    %1460 = arith.addf %1449, %1459 : vector<8x8xf32>
    %1461 = vector.extract_strided_slice %1397 {offsets = [0, 5], sizes = [8, 1], strides = [1, 1]} : vector<8x8xf32> to vector<8x1xf32>
    %1462 = vector.shape_cast %1461 : vector<8x1xf32> to vector<8x1xf32>
    %1463 = vector.broadcast %1462 : vector<8x1xf32> to vector<8x8xf32>
    %1464 = arith.mulf %1463, %75 : vector<8x8xf32>
    %1465 = arith.addf %1454, %1464 : vector<8x8xf32>
    %1466 = arith.mulf %1463, %78 : vector<8x8xf32>
    %1467 = arith.addf %1456, %1466 : vector<8x8xf32>
    %1468 = arith.mulf %1463, %81 : vector<8x8xf32>
    %1469 = arith.addf %1458, %1468 : vector<8x8xf32>
    %1470 = arith.mulf %1463, %84 : vector<8x8xf32>
    %1471 = arith.addf %1460, %1470 : vector<8x8xf32>
    %1472 = vector.extract_strided_slice %1397 {offsets = [0, 6], sizes = [8, 1], strides = [1, 1]} : vector<8x8xf32> to vector<8x1xf32>
    %1473 = vector.shape_cast %1472 : vector<8x1xf32> to vector<8x1xf32>
    %1474 = vector.broadcast %1473 : vector<8x1xf32> to vector<8x8xf32>
    %1475 = arith.mulf %1474, %87 : vector<8x8xf32>
    %1476 = arith.addf %1465, %1475 : vector<8x8xf32>
    %1477 = arith.mulf %1474, %90 : vector<8x8xf32>
    %1478 = arith.addf %1467, %1477 : vector<8x8xf32>
    %1479 = arith.mulf %1474, %93 : vector<8x8xf32>
    %1480 = arith.addf %1469, %1479 : vector<8x8xf32>
    %1481 = arith.mulf %1474, %96 : vector<8x8xf32>
    %1482 = arith.addf %1471, %1481 : vector<8x8xf32>
    %1483 = vector.extract_strided_slice %1397 {offsets = [0, 7], sizes = [8, 1], strides = [1, 1]} : vector<8x8xf32> to vector<8x1xf32>
    %1484 = vector.shape_cast %1483 : vector<8x1xf32> to vector<8x1xf32>
    %1485 = vector.broadcast %1484 : vector<8x1xf32> to vector<8x8xf32>
    %1486 = arith.mulf %1485, %99 : vector<8x8xf32>
    %1487 = arith.addf %1476, %1486 : vector<8x8xf32>
    %1488 = arith.mulf %1485, %102 : vector<8x8xf32>
    %1489 = arith.addf %1478, %1488 : vector<8x8xf32>
    %1490 = arith.mulf %1485, %105 : vector<8x8xf32>
    %1491 = arith.addf %1480, %1490 : vector<8x8xf32>
    %1492 = arith.mulf %1485, %108 : vector<8x8xf32>
    %1493 = arith.addf %1482, %1492 : vector<8x8xf32>
    %1494 = arith.negf %1487 : vector<8x8xf32>
    %1495 = math.exp %1494 : vector<8x8xf32>
    %cst_43 = arith.constant 1.000000e+00 : f32
    %1496 = vector.broadcast %cst_43 : f32 to vector<8x8xf32>
    %1497 = arith.addf %1496, %1495 : vector<8x8xf32>
    %1498 = arith.divf %1496, %1497 : vector<8x8xf32>
    %1499 = arith.negf %1489 : vector<8x8xf32>
    %1500 = math.exp %1499 : vector<8x8xf32>
    %cst_44 = arith.constant 1.000000e+00 : f32
    %1501 = vector.broadcast %cst_44 : f32 to vector<8x8xf32>
    %1502 = arith.addf %1501, %1500 : vector<8x8xf32>
    %1503 = arith.divf %1501, %1502 : vector<8x8xf32>
    %1504 = arith.negf %1491 : vector<8x8xf32>
    %1505 = math.exp %1504 : vector<8x8xf32>
    %cst_45 = arith.constant 1.000000e+00 : f32
    %1506 = vector.broadcast %cst_45 : f32 to vector<8x8xf32>
    %1507 = arith.addf %1506, %1505 : vector<8x8xf32>
    %1508 = arith.divf %1506, %1507 : vector<8x8xf32>
    %1509 = math.tanh %1493 : vector<8x8xf32>
    %1510 = arith.mulf %1503, %1395 : vector<8x8xf32>
    %1511 = arith.mulf %1498, %1509 : vector<8x8xf32>
    %1512 = arith.addf %1510, %1511 : vector<8x8xf32>
    %1513 = math.tanh %1512 : vector<8x8xf32>
    %1514 = arith.mulf %1508, %1513 : vector<8x8xf32>
    %1515 = vector.extract_strided_slice %8 {offsets = [12, 0, 0], sizes = [1, 8, 8], strides = [1, 1, 1]} : vector<16x8x8xf32> to vector<1x8x8xf32>
    %1516 = vector.shape_cast %1515 : vector<1x8x8xf32> to vector<8x8xf32>
    %1517 = vector.extract_strided_slice %9 {offsets = [12, 0, 0], sizes = [1, 8, 8], strides = [1, 1, 1]} : vector<16x8x8xf32> to vector<1x8x8xf32>
    %1518 = vector.shape_cast %1517 : vector<1x8x8xf32> to vector<8x8xf32>
    %1519 = vector.extract_strided_slice %10 {offsets = [12, 0, 0], sizes = [1, 8, 8], strides = [1, 1, 1]} : vector<16x8x8xf32> to vector<1x8x8xf32>
    %1520 = vector.shape_cast %1519 : vector<1x8x8xf32> to vector<8x8xf32>
    %1521 = vector.extract_strided_slice %11 {offsets = [12, 0, 0], sizes = [1, 8, 8], strides = [1, 1, 1]} : vector<16x8x8xf32> to vector<1x8x8xf32>
    %1522 = vector.shape_cast %1521 : vector<1x8x8xf32> to vector<8x8xf32>
    %1523 = vector.extract_strided_slice %1514 {offsets = [0, 0], sizes = [8, 1], strides = [1, 1]} : vector<8x8xf32> to vector<8x1xf32>
    %1524 = vector.shape_cast %1523 : vector<8x1xf32> to vector<8x1xf32>
    %1525 = vector.broadcast %1524 : vector<8x1xf32> to vector<8x8xf32>
    %1526 = arith.mulf %1525, %15 : vector<8x8xf32>
    %1527 = arith.addf %1516, %1526 : vector<8x8xf32>
    %1528 = arith.mulf %1525, %18 : vector<8x8xf32>
    %1529 = arith.addf %1518, %1528 : vector<8x8xf32>
    %1530 = arith.mulf %1525, %21 : vector<8x8xf32>
    %1531 = arith.addf %1520, %1530 : vector<8x8xf32>
    %1532 = arith.mulf %1525, %24 : vector<8x8xf32>
    %1533 = arith.addf %1522, %1532 : vector<8x8xf32>
    %1534 = vector.extract_strided_slice %1514 {offsets = [0, 1], sizes = [8, 1], strides = [1, 1]} : vector<8x8xf32> to vector<8x1xf32>
    %1535 = vector.shape_cast %1534 : vector<8x1xf32> to vector<8x1xf32>
    %1536 = vector.broadcast %1535 : vector<8x1xf32> to vector<8x8xf32>
    %1537 = arith.mulf %1536, %27 : vector<8x8xf32>
    %1538 = arith.addf %1527, %1537 : vector<8x8xf32>
    %1539 = arith.mulf %1536, %30 : vector<8x8xf32>
    %1540 = arith.addf %1529, %1539 : vector<8x8xf32>
    %1541 = arith.mulf %1536, %33 : vector<8x8xf32>
    %1542 = arith.addf %1531, %1541 : vector<8x8xf32>
    %1543 = arith.mulf %1536, %36 : vector<8x8xf32>
    %1544 = arith.addf %1533, %1543 : vector<8x8xf32>
    %1545 = vector.extract_strided_slice %1514 {offsets = [0, 2], sizes = [8, 1], strides = [1, 1]} : vector<8x8xf32> to vector<8x1xf32>
    %1546 = vector.shape_cast %1545 : vector<8x1xf32> to vector<8x1xf32>
    %1547 = vector.broadcast %1546 : vector<8x1xf32> to vector<8x8xf32>
    %1548 = arith.mulf %1547, %39 : vector<8x8xf32>
    %1549 = arith.addf %1538, %1548 : vector<8x8xf32>
    %1550 = arith.mulf %1547, %42 : vector<8x8xf32>
    %1551 = arith.addf %1540, %1550 : vector<8x8xf32>
    %1552 = arith.mulf %1547, %45 : vector<8x8xf32>
    %1553 = arith.addf %1542, %1552 : vector<8x8xf32>
    %1554 = arith.mulf %1547, %48 : vector<8x8xf32>
    %1555 = arith.addf %1544, %1554 : vector<8x8xf32>
    %1556 = vector.extract_strided_slice %1514 {offsets = [0, 3], sizes = [8, 1], strides = [1, 1]} : vector<8x8xf32> to vector<8x1xf32>
    %1557 = vector.shape_cast %1556 : vector<8x1xf32> to vector<8x1xf32>
    %1558 = vector.broadcast %1557 : vector<8x1xf32> to vector<8x8xf32>
    %1559 = arith.mulf %1558, %51 : vector<8x8xf32>
    %1560 = arith.addf %1549, %1559 : vector<8x8xf32>
    %1561 = arith.mulf %1558, %54 : vector<8x8xf32>
    %1562 = arith.addf %1551, %1561 : vector<8x8xf32>
    %1563 = arith.mulf %1558, %57 : vector<8x8xf32>
    %1564 = arith.addf %1553, %1563 : vector<8x8xf32>
    %1565 = arith.mulf %1558, %60 : vector<8x8xf32>
    %1566 = arith.addf %1555, %1565 : vector<8x8xf32>
    %1567 = vector.extract_strided_slice %1514 {offsets = [0, 4], sizes = [8, 1], strides = [1, 1]} : vector<8x8xf32> to vector<8x1xf32>
    %1568 = vector.shape_cast %1567 : vector<8x1xf32> to vector<8x1xf32>
    %1569 = vector.broadcast %1568 : vector<8x1xf32> to vector<8x8xf32>
    %1570 = arith.mulf %1569, %63 : vector<8x8xf32>
    %1571 = arith.addf %1560, %1570 : vector<8x8xf32>
    %1572 = arith.mulf %1569, %66 : vector<8x8xf32>
    %1573 = arith.addf %1562, %1572 : vector<8x8xf32>
    %1574 = arith.mulf %1569, %69 : vector<8x8xf32>
    %1575 = arith.addf %1564, %1574 : vector<8x8xf32>
    %1576 = arith.mulf %1569, %72 : vector<8x8xf32>
    %1577 = arith.addf %1566, %1576 : vector<8x8xf32>
    %1578 = vector.extract_strided_slice %1514 {offsets = [0, 5], sizes = [8, 1], strides = [1, 1]} : vector<8x8xf32> to vector<8x1xf32>
    %1579 = vector.shape_cast %1578 : vector<8x1xf32> to vector<8x1xf32>
    %1580 = vector.broadcast %1579 : vector<8x1xf32> to vector<8x8xf32>
    %1581 = arith.mulf %1580, %75 : vector<8x8xf32>
    %1582 = arith.addf %1571, %1581 : vector<8x8xf32>
    %1583 = arith.mulf %1580, %78 : vector<8x8xf32>
    %1584 = arith.addf %1573, %1583 : vector<8x8xf32>
    %1585 = arith.mulf %1580, %81 : vector<8x8xf32>
    %1586 = arith.addf %1575, %1585 : vector<8x8xf32>
    %1587 = arith.mulf %1580, %84 : vector<8x8xf32>
    %1588 = arith.addf %1577, %1587 : vector<8x8xf32>
    %1589 = vector.extract_strided_slice %1514 {offsets = [0, 6], sizes = [8, 1], strides = [1, 1]} : vector<8x8xf32> to vector<8x1xf32>
    %1590 = vector.shape_cast %1589 : vector<8x1xf32> to vector<8x1xf32>
    %1591 = vector.broadcast %1590 : vector<8x1xf32> to vector<8x8xf32>
    %1592 = arith.mulf %1591, %87 : vector<8x8xf32>
    %1593 = arith.addf %1582, %1592 : vector<8x8xf32>
    %1594 = arith.mulf %1591, %90 : vector<8x8xf32>
    %1595 = arith.addf %1584, %1594 : vector<8x8xf32>
    %1596 = arith.mulf %1591, %93 : vector<8x8xf32>
    %1597 = arith.addf %1586, %1596 : vector<8x8xf32>
    %1598 = arith.mulf %1591, %96 : vector<8x8xf32>
    %1599 = arith.addf %1588, %1598 : vector<8x8xf32>
    %1600 = vector.extract_strided_slice %1514 {offsets = [0, 7], sizes = [8, 1], strides = [1, 1]} : vector<8x8xf32> to vector<8x1xf32>
    %1601 = vector.shape_cast %1600 : vector<8x1xf32> to vector<8x1xf32>
    %1602 = vector.broadcast %1601 : vector<8x1xf32> to vector<8x8xf32>
    %1603 = arith.mulf %1602, %99 : vector<8x8xf32>
    %1604 = arith.addf %1593, %1603 : vector<8x8xf32>
    %1605 = arith.mulf %1602, %102 : vector<8x8xf32>
    %1606 = arith.addf %1595, %1605 : vector<8x8xf32>
    %1607 = arith.mulf %1602, %105 : vector<8x8xf32>
    %1608 = arith.addf %1597, %1607 : vector<8x8xf32>
    %1609 = arith.mulf %1602, %108 : vector<8x8xf32>
    %1610 = arith.addf %1599, %1609 : vector<8x8xf32>
    %1611 = arith.negf %1604 : vector<8x8xf32>
    %1612 = math.exp %1611 : vector<8x8xf32>
    %cst_46 = arith.constant 1.000000e+00 : f32
    %1613 = vector.broadcast %cst_46 : f32 to vector<8x8xf32>
    %1614 = arith.addf %1613, %1612 : vector<8x8xf32>
    %1615 = arith.divf %1613, %1614 : vector<8x8xf32>
    %1616 = arith.negf %1606 : vector<8x8xf32>
    %1617 = math.exp %1616 : vector<8x8xf32>
    %cst_47 = arith.constant 1.000000e+00 : f32
    %1618 = vector.broadcast %cst_47 : f32 to vector<8x8xf32>
    %1619 = arith.addf %1618, %1617 : vector<8x8xf32>
    %1620 = arith.divf %1618, %1619 : vector<8x8xf32>
    %1621 = arith.negf %1608 : vector<8x8xf32>
    %1622 = math.exp %1621 : vector<8x8xf32>
    %cst_48 = arith.constant 1.000000e+00 : f32
    %1623 = vector.broadcast %cst_48 : f32 to vector<8x8xf32>
    %1624 = arith.addf %1623, %1622 : vector<8x8xf32>
    %1625 = arith.divf %1623, %1624 : vector<8x8xf32>
    %1626 = math.tanh %1610 : vector<8x8xf32>
    %1627 = arith.mulf %1620, %1512 : vector<8x8xf32>
    %1628 = arith.mulf %1615, %1626 : vector<8x8xf32>
    %1629 = arith.addf %1627, %1628 : vector<8x8xf32>
    %1630 = math.tanh %1629 : vector<8x8xf32>
    %1631 = arith.mulf %1625, %1630 : vector<8x8xf32>
    %1632 = vector.extract_strided_slice %8 {offsets = [13, 0, 0], sizes = [1, 8, 8], strides = [1, 1, 1]} : vector<16x8x8xf32> to vector<1x8x8xf32>
    %1633 = vector.shape_cast %1632 : vector<1x8x8xf32> to vector<8x8xf32>
    %1634 = vector.extract_strided_slice %9 {offsets = [13, 0, 0], sizes = [1, 8, 8], strides = [1, 1, 1]} : vector<16x8x8xf32> to vector<1x8x8xf32>
    %1635 = vector.shape_cast %1634 : vector<1x8x8xf32> to vector<8x8xf32>
    %1636 = vector.extract_strided_slice %10 {offsets = [13, 0, 0], sizes = [1, 8, 8], strides = [1, 1, 1]} : vector<16x8x8xf32> to vector<1x8x8xf32>
    %1637 = vector.shape_cast %1636 : vector<1x8x8xf32> to vector<8x8xf32>
    %1638 = vector.extract_strided_slice %11 {offsets = [13, 0, 0], sizes = [1, 8, 8], strides = [1, 1, 1]} : vector<16x8x8xf32> to vector<1x8x8xf32>
    %1639 = vector.shape_cast %1638 : vector<1x8x8xf32> to vector<8x8xf32>
    %1640 = vector.extract_strided_slice %1631 {offsets = [0, 0], sizes = [8, 1], strides = [1, 1]} : vector<8x8xf32> to vector<8x1xf32>
    %1641 = vector.shape_cast %1640 : vector<8x1xf32> to vector<8x1xf32>
    %1642 = vector.broadcast %1641 : vector<8x1xf32> to vector<8x8xf32>
    %1643 = arith.mulf %1642, %15 : vector<8x8xf32>
    %1644 = arith.addf %1633, %1643 : vector<8x8xf32>
    %1645 = arith.mulf %1642, %18 : vector<8x8xf32>
    %1646 = arith.addf %1635, %1645 : vector<8x8xf32>
    %1647 = arith.mulf %1642, %21 : vector<8x8xf32>
    %1648 = arith.addf %1637, %1647 : vector<8x8xf32>
    %1649 = arith.mulf %1642, %24 : vector<8x8xf32>
    %1650 = arith.addf %1639, %1649 : vector<8x8xf32>
    %1651 = vector.extract_strided_slice %1631 {offsets = [0, 1], sizes = [8, 1], strides = [1, 1]} : vector<8x8xf32> to vector<8x1xf32>
    %1652 = vector.shape_cast %1651 : vector<8x1xf32> to vector<8x1xf32>
    %1653 = vector.broadcast %1652 : vector<8x1xf32> to vector<8x8xf32>
    %1654 = arith.mulf %1653, %27 : vector<8x8xf32>
    %1655 = arith.addf %1644, %1654 : vector<8x8xf32>
    %1656 = arith.mulf %1653, %30 : vector<8x8xf32>
    %1657 = arith.addf %1646, %1656 : vector<8x8xf32>
    %1658 = arith.mulf %1653, %33 : vector<8x8xf32>
    %1659 = arith.addf %1648, %1658 : vector<8x8xf32>
    %1660 = arith.mulf %1653, %36 : vector<8x8xf32>
    %1661 = arith.addf %1650, %1660 : vector<8x8xf32>
    %1662 = vector.extract_strided_slice %1631 {offsets = [0, 2], sizes = [8, 1], strides = [1, 1]} : vector<8x8xf32> to vector<8x1xf32>
    %1663 = vector.shape_cast %1662 : vector<8x1xf32> to vector<8x1xf32>
    %1664 = vector.broadcast %1663 : vector<8x1xf32> to vector<8x8xf32>
    %1665 = arith.mulf %1664, %39 : vector<8x8xf32>
    %1666 = arith.addf %1655, %1665 : vector<8x8xf32>
    %1667 = arith.mulf %1664, %42 : vector<8x8xf32>
    %1668 = arith.addf %1657, %1667 : vector<8x8xf32>
    %1669 = arith.mulf %1664, %45 : vector<8x8xf32>
    %1670 = arith.addf %1659, %1669 : vector<8x8xf32>
    %1671 = arith.mulf %1664, %48 : vector<8x8xf32>
    %1672 = arith.addf %1661, %1671 : vector<8x8xf32>
    %1673 = vector.extract_strided_slice %1631 {offsets = [0, 3], sizes = [8, 1], strides = [1, 1]} : vector<8x8xf32> to vector<8x1xf32>
    %1674 = vector.shape_cast %1673 : vector<8x1xf32> to vector<8x1xf32>
    %1675 = vector.broadcast %1674 : vector<8x1xf32> to vector<8x8xf32>
    %1676 = arith.mulf %1675, %51 : vector<8x8xf32>
    %1677 = arith.addf %1666, %1676 : vector<8x8xf32>
    %1678 = arith.mulf %1675, %54 : vector<8x8xf32>
    %1679 = arith.addf %1668, %1678 : vector<8x8xf32>
    %1680 = arith.mulf %1675, %57 : vector<8x8xf32>
    %1681 = arith.addf %1670, %1680 : vector<8x8xf32>
    %1682 = arith.mulf %1675, %60 : vector<8x8xf32>
    %1683 = arith.addf %1672, %1682 : vector<8x8xf32>
    %1684 = vector.extract_strided_slice %1631 {offsets = [0, 4], sizes = [8, 1], strides = [1, 1]} : vector<8x8xf32> to vector<8x1xf32>
    %1685 = vector.shape_cast %1684 : vector<8x1xf32> to vector<8x1xf32>
    %1686 = vector.broadcast %1685 : vector<8x1xf32> to vector<8x8xf32>
    %1687 = arith.mulf %1686, %63 : vector<8x8xf32>
    %1688 = arith.addf %1677, %1687 : vector<8x8xf32>
    %1689 = arith.mulf %1686, %66 : vector<8x8xf32>
    %1690 = arith.addf %1679, %1689 : vector<8x8xf32>
    %1691 = arith.mulf %1686, %69 : vector<8x8xf32>
    %1692 = arith.addf %1681, %1691 : vector<8x8xf32>
    %1693 = arith.mulf %1686, %72 : vector<8x8xf32>
    %1694 = arith.addf %1683, %1693 : vector<8x8xf32>
    %1695 = vector.extract_strided_slice %1631 {offsets = [0, 5], sizes = [8, 1], strides = [1, 1]} : vector<8x8xf32> to vector<8x1xf32>
    %1696 = vector.shape_cast %1695 : vector<8x1xf32> to vector<8x1xf32>
    %1697 = vector.broadcast %1696 : vector<8x1xf32> to vector<8x8xf32>
    %1698 = arith.mulf %1697, %75 : vector<8x8xf32>
    %1699 = arith.addf %1688, %1698 : vector<8x8xf32>
    %1700 = arith.mulf %1697, %78 : vector<8x8xf32>
    %1701 = arith.addf %1690, %1700 : vector<8x8xf32>
    %1702 = arith.mulf %1697, %81 : vector<8x8xf32>
    %1703 = arith.addf %1692, %1702 : vector<8x8xf32>
    %1704 = arith.mulf %1697, %84 : vector<8x8xf32>
    %1705 = arith.addf %1694, %1704 : vector<8x8xf32>
    %1706 = vector.extract_strided_slice %1631 {offsets = [0, 6], sizes = [8, 1], strides = [1, 1]} : vector<8x8xf32> to vector<8x1xf32>
    %1707 = vector.shape_cast %1706 : vector<8x1xf32> to vector<8x1xf32>
    %1708 = vector.broadcast %1707 : vector<8x1xf32> to vector<8x8xf32>
    %1709 = arith.mulf %1708, %87 : vector<8x8xf32>
    %1710 = arith.addf %1699, %1709 : vector<8x8xf32>
    %1711 = arith.mulf %1708, %90 : vector<8x8xf32>
    %1712 = arith.addf %1701, %1711 : vector<8x8xf32>
    %1713 = arith.mulf %1708, %93 : vector<8x8xf32>
    %1714 = arith.addf %1703, %1713 : vector<8x8xf32>
    %1715 = arith.mulf %1708, %96 : vector<8x8xf32>
    %1716 = arith.addf %1705, %1715 : vector<8x8xf32>
    %1717 = vector.extract_strided_slice %1631 {offsets = [0, 7], sizes = [8, 1], strides = [1, 1]} : vector<8x8xf32> to vector<8x1xf32>
    %1718 = vector.shape_cast %1717 : vector<8x1xf32> to vector<8x1xf32>
    %1719 = vector.broadcast %1718 : vector<8x1xf32> to vector<8x8xf32>
    %1720 = arith.mulf %1719, %99 : vector<8x8xf32>
    %1721 = arith.addf %1710, %1720 : vector<8x8xf32>
    %1722 = arith.mulf %1719, %102 : vector<8x8xf32>
    %1723 = arith.addf %1712, %1722 : vector<8x8xf32>
    %1724 = arith.mulf %1719, %105 : vector<8x8xf32>
    %1725 = arith.addf %1714, %1724 : vector<8x8xf32>
    %1726 = arith.mulf %1719, %108 : vector<8x8xf32>
    %1727 = arith.addf %1716, %1726 : vector<8x8xf32>
    %1728 = arith.negf %1721 : vector<8x8xf32>
    %1729 = math.exp %1728 : vector<8x8xf32>
    %cst_49 = arith.constant 1.000000e+00 : f32
    %1730 = vector.broadcast %cst_49 : f32 to vector<8x8xf32>
    %1731 = arith.addf %1730, %1729 : vector<8x8xf32>
    %1732 = arith.divf %1730, %1731 : vector<8x8xf32>
    %1733 = arith.negf %1723 : vector<8x8xf32>
    %1734 = math.exp %1733 : vector<8x8xf32>
    %cst_50 = arith.constant 1.000000e+00 : f32
    %1735 = vector.broadcast %cst_50 : f32 to vector<8x8xf32>
    %1736 = arith.addf %1735, %1734 : vector<8x8xf32>
    %1737 = arith.divf %1735, %1736 : vector<8x8xf32>
    %1738 = arith.negf %1725 : vector<8x8xf32>
    %1739 = math.exp %1738 : vector<8x8xf32>
    %cst_51 = arith.constant 1.000000e+00 : f32
    %1740 = vector.broadcast %cst_51 : f32 to vector<8x8xf32>
    %1741 = arith.addf %1740, %1739 : vector<8x8xf32>
    %1742 = arith.divf %1740, %1741 : vector<8x8xf32>
    %1743 = math.tanh %1727 : vector<8x8xf32>
    %1744 = arith.mulf %1737, %1629 : vector<8x8xf32>
    %1745 = arith.mulf %1732, %1743 : vector<8x8xf32>
    %1746 = arith.addf %1744, %1745 : vector<8x8xf32>
    %1747 = math.tanh %1746 : vector<8x8xf32>
    %1748 = arith.mulf %1742, %1747 : vector<8x8xf32>
    %1749 = vector.extract_strided_slice %8 {offsets = [14, 0, 0], sizes = [1, 8, 8], strides = [1, 1, 1]} : vector<16x8x8xf32> to vector<1x8x8xf32>
    %1750 = vector.shape_cast %1749 : vector<1x8x8xf32> to vector<8x8xf32>
    %1751 = vector.extract_strided_slice %9 {offsets = [14, 0, 0], sizes = [1, 8, 8], strides = [1, 1, 1]} : vector<16x8x8xf32> to vector<1x8x8xf32>
    %1752 = vector.shape_cast %1751 : vector<1x8x8xf32> to vector<8x8xf32>
    %1753 = vector.extract_strided_slice %10 {offsets = [14, 0, 0], sizes = [1, 8, 8], strides = [1, 1, 1]} : vector<16x8x8xf32> to vector<1x8x8xf32>
    %1754 = vector.shape_cast %1753 : vector<1x8x8xf32> to vector<8x8xf32>
    %1755 = vector.extract_strided_slice %11 {offsets = [14, 0, 0], sizes = [1, 8, 8], strides = [1, 1, 1]} : vector<16x8x8xf32> to vector<1x8x8xf32>
    %1756 = vector.shape_cast %1755 : vector<1x8x8xf32> to vector<8x8xf32>
    %1757 = vector.extract_strided_slice %1748 {offsets = [0, 0], sizes = [8, 1], strides = [1, 1]} : vector<8x8xf32> to vector<8x1xf32>
    %1758 = vector.shape_cast %1757 : vector<8x1xf32> to vector<8x1xf32>
    %1759 = vector.broadcast %1758 : vector<8x1xf32> to vector<8x8xf32>
    %1760 = arith.mulf %1759, %15 : vector<8x8xf32>
    %1761 = arith.addf %1750, %1760 : vector<8x8xf32>
    %1762 = arith.mulf %1759, %18 : vector<8x8xf32>
    %1763 = arith.addf %1752, %1762 : vector<8x8xf32>
    %1764 = arith.mulf %1759, %21 : vector<8x8xf32>
    %1765 = arith.addf %1754, %1764 : vector<8x8xf32>
    %1766 = arith.mulf %1759, %24 : vector<8x8xf32>
    %1767 = arith.addf %1756, %1766 : vector<8x8xf32>
    %1768 = vector.extract_strided_slice %1748 {offsets = [0, 1], sizes = [8, 1], strides = [1, 1]} : vector<8x8xf32> to vector<8x1xf32>
    %1769 = vector.shape_cast %1768 : vector<8x1xf32> to vector<8x1xf32>
    %1770 = vector.broadcast %1769 : vector<8x1xf32> to vector<8x8xf32>
    %1771 = arith.mulf %1770, %27 : vector<8x8xf32>
    %1772 = arith.addf %1761, %1771 : vector<8x8xf32>
    %1773 = arith.mulf %1770, %30 : vector<8x8xf32>
    %1774 = arith.addf %1763, %1773 : vector<8x8xf32>
    %1775 = arith.mulf %1770, %33 : vector<8x8xf32>
    %1776 = arith.addf %1765, %1775 : vector<8x8xf32>
    %1777 = arith.mulf %1770, %36 : vector<8x8xf32>
    %1778 = arith.addf %1767, %1777 : vector<8x8xf32>
    %1779 = vector.extract_strided_slice %1748 {offsets = [0, 2], sizes = [8, 1], strides = [1, 1]} : vector<8x8xf32> to vector<8x1xf32>
    %1780 = vector.shape_cast %1779 : vector<8x1xf32> to vector<8x1xf32>
    %1781 = vector.broadcast %1780 : vector<8x1xf32> to vector<8x8xf32>
    %1782 = arith.mulf %1781, %39 : vector<8x8xf32>
    %1783 = arith.addf %1772, %1782 : vector<8x8xf32>
    %1784 = arith.mulf %1781, %42 : vector<8x8xf32>
    %1785 = arith.addf %1774, %1784 : vector<8x8xf32>
    %1786 = arith.mulf %1781, %45 : vector<8x8xf32>
    %1787 = arith.addf %1776, %1786 : vector<8x8xf32>
    %1788 = arith.mulf %1781, %48 : vector<8x8xf32>
    %1789 = arith.addf %1778, %1788 : vector<8x8xf32>
    %1790 = vector.extract_strided_slice %1748 {offsets = [0, 3], sizes = [8, 1], strides = [1, 1]} : vector<8x8xf32> to vector<8x1xf32>
    %1791 = vector.shape_cast %1790 : vector<8x1xf32> to vector<8x1xf32>
    %1792 = vector.broadcast %1791 : vector<8x1xf32> to vector<8x8xf32>
    %1793 = arith.mulf %1792, %51 : vector<8x8xf32>
    %1794 = arith.addf %1783, %1793 : vector<8x8xf32>
    %1795 = arith.mulf %1792, %54 : vector<8x8xf32>
    %1796 = arith.addf %1785, %1795 : vector<8x8xf32>
    %1797 = arith.mulf %1792, %57 : vector<8x8xf32>
    %1798 = arith.addf %1787, %1797 : vector<8x8xf32>
    %1799 = arith.mulf %1792, %60 : vector<8x8xf32>
    %1800 = arith.addf %1789, %1799 : vector<8x8xf32>
    %1801 = vector.extract_strided_slice %1748 {offsets = [0, 4], sizes = [8, 1], strides = [1, 1]} : vector<8x8xf32> to vector<8x1xf32>
    %1802 = vector.shape_cast %1801 : vector<8x1xf32> to vector<8x1xf32>
    %1803 = vector.broadcast %1802 : vector<8x1xf32> to vector<8x8xf32>
    %1804 = arith.mulf %1803, %63 : vector<8x8xf32>
    %1805 = arith.addf %1794, %1804 : vector<8x8xf32>
    %1806 = arith.mulf %1803, %66 : vector<8x8xf32>
    %1807 = arith.addf %1796, %1806 : vector<8x8xf32>
    %1808 = arith.mulf %1803, %69 : vector<8x8xf32>
    %1809 = arith.addf %1798, %1808 : vector<8x8xf32>
    %1810 = arith.mulf %1803, %72 : vector<8x8xf32>
    %1811 = arith.addf %1800, %1810 : vector<8x8xf32>
    %1812 = vector.extract_strided_slice %1748 {offsets = [0, 5], sizes = [8, 1], strides = [1, 1]} : vector<8x8xf32> to vector<8x1xf32>
    %1813 = vector.shape_cast %1812 : vector<8x1xf32> to vector<8x1xf32>
    %1814 = vector.broadcast %1813 : vector<8x1xf32> to vector<8x8xf32>
    %1815 = arith.mulf %1814, %75 : vector<8x8xf32>
    %1816 = arith.addf %1805, %1815 : vector<8x8xf32>
    %1817 = arith.mulf %1814, %78 : vector<8x8xf32>
    %1818 = arith.addf %1807, %1817 : vector<8x8xf32>
    %1819 = arith.mulf %1814, %81 : vector<8x8xf32>
    %1820 = arith.addf %1809, %1819 : vector<8x8xf32>
    %1821 = arith.mulf %1814, %84 : vector<8x8xf32>
    %1822 = arith.addf %1811, %1821 : vector<8x8xf32>
    %1823 = vector.extract_strided_slice %1748 {offsets = [0, 6], sizes = [8, 1], strides = [1, 1]} : vector<8x8xf32> to vector<8x1xf32>
    %1824 = vector.shape_cast %1823 : vector<8x1xf32> to vector<8x1xf32>
    %1825 = vector.broadcast %1824 : vector<8x1xf32> to vector<8x8xf32>
    %1826 = arith.mulf %1825, %87 : vector<8x8xf32>
    %1827 = arith.addf %1816, %1826 : vector<8x8xf32>
    %1828 = arith.mulf %1825, %90 : vector<8x8xf32>
    %1829 = arith.addf %1818, %1828 : vector<8x8xf32>
    %1830 = arith.mulf %1825, %93 : vector<8x8xf32>
    %1831 = arith.addf %1820, %1830 : vector<8x8xf32>
    %1832 = arith.mulf %1825, %96 : vector<8x8xf32>
    %1833 = arith.addf %1822, %1832 : vector<8x8xf32>
    %1834 = vector.extract_strided_slice %1748 {offsets = [0, 7], sizes = [8, 1], strides = [1, 1]} : vector<8x8xf32> to vector<8x1xf32>
    %1835 = vector.shape_cast %1834 : vector<8x1xf32> to vector<8x1xf32>
    %1836 = vector.broadcast %1835 : vector<8x1xf32> to vector<8x8xf32>
    %1837 = arith.mulf %1836, %99 : vector<8x8xf32>
    %1838 = arith.addf %1827, %1837 : vector<8x8xf32>
    %1839 = arith.mulf %1836, %102 : vector<8x8xf32>
    %1840 = arith.addf %1829, %1839 : vector<8x8xf32>
    %1841 = arith.mulf %1836, %105 : vector<8x8xf32>
    %1842 = arith.addf %1831, %1841 : vector<8x8xf32>
    %1843 = arith.mulf %1836, %108 : vector<8x8xf32>
    %1844 = arith.addf %1833, %1843 : vector<8x8xf32>
    %1845 = arith.negf %1838 : vector<8x8xf32>
    %1846 = math.exp %1845 : vector<8x8xf32>
    %cst_52 = arith.constant 1.000000e+00 : f32
    %1847 = vector.broadcast %cst_52 : f32 to vector<8x8xf32>
    %1848 = arith.addf %1847, %1846 : vector<8x8xf32>
    %1849 = arith.divf %1847, %1848 : vector<8x8xf32>
    %1850 = arith.negf %1840 : vector<8x8xf32>
    %1851 = math.exp %1850 : vector<8x8xf32>
    %cst_53 = arith.constant 1.000000e+00 : f32
    %1852 = vector.broadcast %cst_53 : f32 to vector<8x8xf32>
    %1853 = arith.addf %1852, %1851 : vector<8x8xf32>
    %1854 = arith.divf %1852, %1853 : vector<8x8xf32>
    %1855 = arith.negf %1842 : vector<8x8xf32>
    %1856 = math.exp %1855 : vector<8x8xf32>
    %cst_54 = arith.constant 1.000000e+00 : f32
    %1857 = vector.broadcast %cst_54 : f32 to vector<8x8xf32>
    %1858 = arith.addf %1857, %1856 : vector<8x8xf32>
    %1859 = arith.divf %1857, %1858 : vector<8x8xf32>
    %1860 = math.tanh %1844 : vector<8x8xf32>
    %1861 = arith.mulf %1854, %1746 : vector<8x8xf32>
    %1862 = arith.mulf %1849, %1860 : vector<8x8xf32>
    %1863 = arith.addf %1861, %1862 : vector<8x8xf32>
    %1864 = math.tanh %1863 : vector<8x8xf32>
    %1865 = arith.mulf %1859, %1864 : vector<8x8xf32>
    %1866 = vector.extract_strided_slice %8 {offsets = [15, 0, 0], sizes = [1, 8, 8], strides = [1, 1, 1]} : vector<16x8x8xf32> to vector<1x8x8xf32>
    %1867 = vector.shape_cast %1866 : vector<1x8x8xf32> to vector<8x8xf32>
    %1868 = vector.extract_strided_slice %9 {offsets = [15, 0, 0], sizes = [1, 8, 8], strides = [1, 1, 1]} : vector<16x8x8xf32> to vector<1x8x8xf32>
    %1869 = vector.shape_cast %1868 : vector<1x8x8xf32> to vector<8x8xf32>
    %1870 = vector.extract_strided_slice %10 {offsets = [15, 0, 0], sizes = [1, 8, 8], strides = [1, 1, 1]} : vector<16x8x8xf32> to vector<1x8x8xf32>
    %1871 = vector.shape_cast %1870 : vector<1x8x8xf32> to vector<8x8xf32>
    %1872 = vector.extract_strided_slice %11 {offsets = [15, 0, 0], sizes = [1, 8, 8], strides = [1, 1, 1]} : vector<16x8x8xf32> to vector<1x8x8xf32>
    %1873 = vector.shape_cast %1872 : vector<1x8x8xf32> to vector<8x8xf32>
    %1874 = vector.extract_strided_slice %1865 {offsets = [0, 0], sizes = [8, 1], strides = [1, 1]} : vector<8x8xf32> to vector<8x1xf32>
    %1875 = vector.shape_cast %1874 : vector<8x1xf32> to vector<8x1xf32>
    %1876 = vector.broadcast %1875 : vector<8x1xf32> to vector<8x8xf32>
    %1877 = arith.mulf %1876, %15 : vector<8x8xf32>
    %1878 = arith.addf %1867, %1877 : vector<8x8xf32>
    %1879 = arith.mulf %1876, %18 : vector<8x8xf32>
    %1880 = arith.addf %1869, %1879 : vector<8x8xf32>
    %1881 = arith.mulf %1876, %21 : vector<8x8xf32>
    %1882 = arith.addf %1871, %1881 : vector<8x8xf32>
    %1883 = arith.mulf %1876, %24 : vector<8x8xf32>
    %1884 = arith.addf %1873, %1883 : vector<8x8xf32>
    %1885 = vector.extract_strided_slice %1865 {offsets = [0, 1], sizes = [8, 1], strides = [1, 1]} : vector<8x8xf32> to vector<8x1xf32>
    %1886 = vector.shape_cast %1885 : vector<8x1xf32> to vector<8x1xf32>
    %1887 = vector.broadcast %1886 : vector<8x1xf32> to vector<8x8xf32>
    %1888 = arith.mulf %1887, %27 : vector<8x8xf32>
    %1889 = arith.addf %1878, %1888 : vector<8x8xf32>
    %1890 = arith.mulf %1887, %30 : vector<8x8xf32>
    %1891 = arith.addf %1880, %1890 : vector<8x8xf32>
    %1892 = arith.mulf %1887, %33 : vector<8x8xf32>
    %1893 = arith.addf %1882, %1892 : vector<8x8xf32>
    %1894 = arith.mulf %1887, %36 : vector<8x8xf32>
    %1895 = arith.addf %1884, %1894 : vector<8x8xf32>
    %1896 = vector.extract_strided_slice %1865 {offsets = [0, 2], sizes = [8, 1], strides = [1, 1]} : vector<8x8xf32> to vector<8x1xf32>
    %1897 = vector.shape_cast %1896 : vector<8x1xf32> to vector<8x1xf32>
    %1898 = vector.broadcast %1897 : vector<8x1xf32> to vector<8x8xf32>
    %1899 = arith.mulf %1898, %39 : vector<8x8xf32>
    %1900 = arith.addf %1889, %1899 : vector<8x8xf32>
    %1901 = arith.mulf %1898, %42 : vector<8x8xf32>
    %1902 = arith.addf %1891, %1901 : vector<8x8xf32>
    %1903 = arith.mulf %1898, %45 : vector<8x8xf32>
    %1904 = arith.addf %1893, %1903 : vector<8x8xf32>
    %1905 = arith.mulf %1898, %48 : vector<8x8xf32>
    %1906 = arith.addf %1895, %1905 : vector<8x8xf32>
    %1907 = vector.extract_strided_slice %1865 {offsets = [0, 3], sizes = [8, 1], strides = [1, 1]} : vector<8x8xf32> to vector<8x1xf32>
    %1908 = vector.shape_cast %1907 : vector<8x1xf32> to vector<8x1xf32>
    %1909 = vector.broadcast %1908 : vector<8x1xf32> to vector<8x8xf32>
    %1910 = arith.mulf %1909, %51 : vector<8x8xf32>
    %1911 = arith.addf %1900, %1910 : vector<8x8xf32>
    %1912 = arith.mulf %1909, %54 : vector<8x8xf32>
    %1913 = arith.addf %1902, %1912 : vector<8x8xf32>
    %1914 = arith.mulf %1909, %57 : vector<8x8xf32>
    %1915 = arith.addf %1904, %1914 : vector<8x8xf32>
    %1916 = arith.mulf %1909, %60 : vector<8x8xf32>
    %1917 = arith.addf %1906, %1916 : vector<8x8xf32>
    %1918 = vector.extract_strided_slice %1865 {offsets = [0, 4], sizes = [8, 1], strides = [1, 1]} : vector<8x8xf32> to vector<8x1xf32>
    %1919 = vector.shape_cast %1918 : vector<8x1xf32> to vector<8x1xf32>
    %1920 = vector.broadcast %1919 : vector<8x1xf32> to vector<8x8xf32>
    %1921 = arith.mulf %1920, %63 : vector<8x8xf32>
    %1922 = arith.addf %1911, %1921 : vector<8x8xf32>
    %1923 = arith.mulf %1920, %66 : vector<8x8xf32>
    %1924 = arith.addf %1913, %1923 : vector<8x8xf32>
    %1925 = arith.mulf %1920, %69 : vector<8x8xf32>
    %1926 = arith.addf %1915, %1925 : vector<8x8xf32>
    %1927 = arith.mulf %1920, %72 : vector<8x8xf32>
    %1928 = arith.addf %1917, %1927 : vector<8x8xf32>
    %1929 = vector.extract_strided_slice %1865 {offsets = [0, 5], sizes = [8, 1], strides = [1, 1]} : vector<8x8xf32> to vector<8x1xf32>
    %1930 = vector.shape_cast %1929 : vector<8x1xf32> to vector<8x1xf32>
    %1931 = vector.broadcast %1930 : vector<8x1xf32> to vector<8x8xf32>
    %1932 = arith.mulf %1931, %75 : vector<8x8xf32>
    %1933 = arith.addf %1922, %1932 : vector<8x8xf32>
    %1934 = arith.mulf %1931, %78 : vector<8x8xf32>
    %1935 = arith.addf %1924, %1934 : vector<8x8xf32>
    %1936 = arith.mulf %1931, %81 : vector<8x8xf32>
    %1937 = arith.addf %1926, %1936 : vector<8x8xf32>
    %1938 = arith.mulf %1931, %84 : vector<8x8xf32>
    %1939 = arith.addf %1928, %1938 : vector<8x8xf32>
    %1940 = vector.extract_strided_slice %1865 {offsets = [0, 6], sizes = [8, 1], strides = [1, 1]} : vector<8x8xf32> to vector<8x1xf32>
    %1941 = vector.shape_cast %1940 : vector<8x1xf32> to vector<8x1xf32>
    %1942 = vector.broadcast %1941 : vector<8x1xf32> to vector<8x8xf32>
    %1943 = arith.mulf %1942, %87 : vector<8x8xf32>
    %1944 = arith.addf %1933, %1943 : vector<8x8xf32>
    %1945 = arith.mulf %1942, %90 : vector<8x8xf32>
    %1946 = arith.addf %1935, %1945 : vector<8x8xf32>
    %1947 = arith.mulf %1942, %93 : vector<8x8xf32>
    %1948 = arith.addf %1937, %1947 : vector<8x8xf32>
    %1949 = arith.mulf %1942, %96 : vector<8x8xf32>
    %1950 = arith.addf %1939, %1949 : vector<8x8xf32>
    %1951 = vector.extract_strided_slice %1865 {offsets = [0, 7], sizes = [8, 1], strides = [1, 1]} : vector<8x8xf32> to vector<8x1xf32>
    %1952 = vector.shape_cast %1951 : vector<8x1xf32> to vector<8x1xf32>
    %1953 = vector.broadcast %1952 : vector<8x1xf32> to vector<8x8xf32>
    %1954 = arith.mulf %1953, %99 : vector<8x8xf32>
    %1955 = arith.addf %1944, %1954 : vector<8x8xf32>
    %1956 = arith.mulf %1953, %102 : vector<8x8xf32>
    %1957 = arith.addf %1946, %1956 : vector<8x8xf32>
    %1958 = arith.mulf %1953, %105 : vector<8x8xf32>
    %1959 = arith.addf %1948, %1958 : vector<8x8xf32>
    %1960 = arith.mulf %1953, %108 : vector<8x8xf32>
    %1961 = arith.addf %1950, %1960 : vector<8x8xf32>
    %1962 = arith.negf %1955 : vector<8x8xf32>
    %1963 = math.exp %1962 : vector<8x8xf32>
    %cst_55 = arith.constant 1.000000e+00 : f32
    %1964 = vector.broadcast %cst_55 : f32 to vector<8x8xf32>
    %1965 = arith.addf %1964, %1963 : vector<8x8xf32>
    %1966 = arith.divf %1964, %1965 : vector<8x8xf32>
    %1967 = arith.negf %1957 : vector<8x8xf32>
    %1968 = math.exp %1967 : vector<8x8xf32>
    %cst_56 = arith.constant 1.000000e+00 : f32
    %1969 = vector.broadcast %cst_56 : f32 to vector<8x8xf32>
    %1970 = arith.addf %1969, %1968 : vector<8x8xf32>
    %1971 = arith.divf %1969, %1970 : vector<8x8xf32>
    %1972 = arith.negf %1959 : vector<8x8xf32>
    %1973 = math.exp %1972 : vector<8x8xf32>
    %cst_57 = arith.constant 1.000000e+00 : f32
    %1974 = vector.broadcast %cst_57 : f32 to vector<8x8xf32>
    %1975 = arith.addf %1974, %1973 : vector<8x8xf32>
    %1976 = arith.divf %1974, %1975 : vector<8x8xf32>
    %1977 = math.tanh %1961 : vector<8x8xf32>
    %1978 = arith.mulf %1971, %1863 : vector<8x8xf32>
    %1979 = arith.mulf %1966, %1977 : vector<8x8xf32>
    %1980 = arith.addf %1978, %1979 : vector<8x8xf32>
    %1981 = math.tanh %1980 : vector<8x8xf32>
    %1982 = arith.mulf %1976, %1981 : vector<8x8xf32>
    %c0_58 = arith.constant 0 : index
    %c0_59 = arith.constant 0 : index
    %1983 = vector.load %arg2[%c0_58, %c0_59] : memref<72x32xf32, #tpu.memory_space<vmem>>, vector<72x32xf32>
    %1984 = arith.truncf %1983 : vector<72x32xf32> to vector<72x32xbf16>
    %c0_60 = arith.constant 0 : index
    %c0_61 = arith.constant 0 : index
    %1985 = vector.load %arg6[%c0_60, %c0_61] : memref<32x128xbf16, #tpu.memory_space<vmem>>, vector<32x128xbf16>
    %cst_62 = arith.constant dense<0.000000e+00> : vector<72x128xf32>
    %1986 = tpu.matmul %1984, %1985, %cst_62 {dimension_numbers = #tpu.dot_dimension_numbers<[1], [0], [0], [1], [0, 0, 1, 1], [], []>} : vector<72x32xbf16>, vector<32x128xbf16>, vector<72x128xf32> -> vector<72x128xf32>
    %c0_63 = arith.constant 0 : index
    %c0_64 = arith.constant 0 : index
    %1987 = vector.load %arg7[%c0_63, %c0_64] : memref<1x128xf32, #tpu.memory_space<vmem>>, vector<1x128xf32>
    %1988 = vector.broadcast %1987 : vector<1x128xf32> to vector<72x128xf32>
    %1989 = arith.mulf %1986, %1988 : vector<72x128xf32>
    %c0_65 = arith.constant 0 : index
    %c0_66 = arith.constant 0 : index
    %1990 = vector.load %arg8[%c0_65, %c0_66] : memref<1x128xf32, #tpu.memory_space<vmem>>, vector<1x128xf32>
    %1991 = vector.broadcast %1990 : vector<1x128xf32> to vector<72x128xf32>
    %1992 = arith.addf %1989, %1991 : vector<72x128xf32>
    %cst_67 = arith.constant 0.000000e+00 : f32
    %1993 = vector.broadcast %cst_67 : f32 to vector<72x128xf32>
    %1994 = arith.maximumf %1992, %1993 : vector<72x128xf32>
    %1995 = vector.shape_cast %1994 : vector<72x128xf32> to vector<8x9x128xf32>
    %cst_68 = arith.constant dense<0.000000e+00> : vector<8x128xf32>
    %1996 = vector.multi_reduction <add>, %1995, %cst_68 [1] : vector<8x9x128xf32> to vector<8x128xf32>
    %cst_69 = arith.constant 9.000000e+00 : f32
    %1997 = vector.broadcast %cst_69 : f32 to vector<8x128xf32>
    %1998 = arith.divf %1996, %1997 : vector<8x128xf32>
    %1999 = arith.truncf %1998 : vector<8x128xf32> to vector<8x128xbf16>
    %c0_70 = arith.constant 0 : index
    %c0_71 = arith.constant 0 : index
    %2000 = vector.load %arg9[%c0_70, %c0_71] : memref<128x8xbf16, #tpu.memory_space<vmem>>, vector<128x8xbf16>
    %cst_72 = arith.constant dense<0.000000e+00> : vector<8x8xf32>
    %2001 = tpu.matmul %1999, %2000, %cst_72 {dimension_numbers = #tpu.dot_dimension_numbers<[1], [0], [0], [1], [0, 0, 1, 1], [], []>} : vector<8x128xbf16>, vector<128x8xbf16>, vector<8x8xf32> -> vector<8x8xf32>
    %cst_73 = arith.constant 0.000000e+00 : f32
    %2002 = vector.broadcast %cst_73 : f32 to vector<8x8xf32>
    %2003 = arith.maximumf %2001, %2002 : vector<8x8xf32>
    %2004 = arith.truncf %2003 : vector<8x8xf32> to vector<8x8xbf16>
    %c0_74 = arith.constant 0 : index
    %c0_75 = arith.constant 0 : index
    %2005 = vector.load %arg10[%c0_74, %c0_75] : memref<8x128xbf16, #tpu.memory_space<vmem>>, vector<8x128xbf16>
    %cst_76 = arith.constant dense<0.000000e+00> : vector<8x128xf32>
    %2006 = tpu.matmul %2004, %2005, %cst_76 {dimension_numbers = #tpu.dot_dimension_numbers<[1], [0], [0], [1], [0, 0, 1, 1], [], []>} : vector<8x8xbf16>, vector<8x128xbf16>, vector<8x128xf32> -> vector<8x128xf32>
    %2007 = arith.negf %2006 : vector<8x128xf32>
    %2008 = math.exp %2007 : vector<8x128xf32>
    %cst_77 = arith.constant 1.000000e+00 : f32
    %2009 = vector.broadcast %cst_77 : f32 to vector<8x128xf32>
    %2010 = arith.addf %2009, %2008 : vector<8x128xf32>
    %2011 = arith.divf %2009, %2010 : vector<8x128xf32>
    %2012 = vector.shape_cast %2011 : vector<8x128xf32> to vector<8x1x128xf32>
    %2013 = vector.broadcast %2012 : vector<8x1x128xf32> to vector<8x9x128xf32>
    %2014 = arith.mulf %1995, %2013 : vector<8x9x128xf32>
    %2015 = vector.extract_strided_slice %2014 {offsets = [0, 0, 0], sizes = [8, 5, 128], strides = [1, 1, 1]} : vector<8x9x128xf32> to vector<8x5x128xf32>
    %2016 = vector.extract_strided_slice %2014 {offsets = [0, 1, 0], sizes = [8, 5, 128], strides = [1, 1, 1]} : vector<8x9x128xf32> to vector<8x5x128xf32>
    %2017 = vector.extract_strided_slice %2014 {offsets = [0, 2, 0], sizes = [8, 5, 128], strides = [1, 1, 1]} : vector<8x9x128xf32> to vector<8x5x128xf32>
    %2018 = vector.extract_strided_slice %2014 {offsets = [0, 3, 0], sizes = [8, 5, 128], strides = [1, 1, 1]} : vector<8x9x128xf32> to vector<8x5x128xf32>
    %2019 = vector.extract_strided_slice %2014 {offsets = [0, 4, 0], sizes = [8, 5, 128], strides = [1, 1, 1]} : vector<8x9x128xf32> to vector<8x5x128xf32>
    %2020 = tpu.concatenate %2015, %2016, %2017, %2018, %2019 in 2 : vector<8x5x128xf32>, vector<8x5x128xf32>, vector<8x5x128xf32>, vector<8x5x128xf32>, vector<8x5x128xf32> -> vector<8x5x640xf32>
    %2021 = vector.shape_cast %2020 : vector<8x5x640xf32> to vector<40x640xf32>
    %2022 = arith.truncf %2021 : vector<40x640xf32> to vector<40x640xbf16>
    %c0_78 = arith.constant 0 : index
    %c0_79 = arith.constant 0 : index
    %2023 = vector.load %arg11[%c0_78, %c0_79] : memref<640x256xbf16, #tpu.memory_space<vmem>>, vector<640x256xbf16>
    %cst_80 = arith.constant dense<0.000000e+00> : vector<40x256xf32>
    %2024 = tpu.matmul %2022, %2023, %cst_80 {dimension_numbers = #tpu.dot_dimension_numbers<[1], [0], [0], [1], [0, 0, 1, 1], [], []>} : vector<40x640xbf16>, vector<640x256xbf16>, vector<40x256xf32> -> vector<40x256xf32>
    %c0_81 = arith.constant 0 : index
    %c0_82 = arith.constant 0 : index
    %2025 = vector.load %arg12[%c0_81, %c0_82] : memref<1x256xf32, #tpu.memory_space<vmem>>, vector<1x256xf32>
    %2026 = vector.broadcast %2025 : vector<1x256xf32> to vector<40x256xf32>
    %2027 = arith.mulf %2024, %2026 : vector<40x256xf32>
    %c0_83 = arith.constant 0 : index
    %c0_84 = arith.constant 0 : index
    %2028 = vector.load %arg13[%c0_83, %c0_84] : memref<1x256xf32, #tpu.memory_space<vmem>>, vector<1x256xf32>
    %2029 = vector.broadcast %2028 : vector<1x256xf32> to vector<40x256xf32>
    %2030 = arith.addf %2027, %2029 : vector<40x256xf32>
    %cst_85 = arith.constant 0.000000e+00 : f32
    %2031 = vector.broadcast %cst_85 : f32 to vector<40x256xf32>
    %2032 = arith.maximumf %2030, %2031 : vector<40x256xf32>
    %2033 = vector.shape_cast %2032 : vector<40x256xf32> to vector<8x5x256xf32>
    %cst_86 = arith.constant dense<0.000000e+00> : vector<8x256xf32>
    %2034 = vector.multi_reduction <add>, %2033, %cst_86 [1] : vector<8x5x256xf32> to vector<8x256xf32>
    %cst_87 = arith.constant 5.000000e+00 : f32
    %2035 = vector.broadcast %cst_87 : f32 to vector<8x256xf32>
    %2036 = arith.divf %2034, %2035 : vector<8x256xf32>
    %2037 = arith.truncf %2036 : vector<8x256xf32> to vector<8x256xbf16>
    %c0_88 = arith.constant 0 : index
    %c0_89 = arith.constant 0 : index
    %2038 = vector.load %arg14[%c0_88, %c0_89] : memref<256x16xbf16, #tpu.memory_space<vmem>>, vector<256x16xbf16>
    %cst_90 = arith.constant dense<0.000000e+00> : vector<8x16xf32>
    %2039 = tpu.matmul %2037, %2038, %cst_90 {dimension_numbers = #tpu.dot_dimension_numbers<[1], [0], [0], [1], [0, 0, 1, 1], [], []>} : vector<8x256xbf16>, vector<256x16xbf16>, vector<8x16xf32> -> vector<8x16xf32>
    %cst_91 = arith.constant 0.000000e+00 : f32
    %2040 = vector.broadcast %cst_91 : f32 to vector<8x16xf32>
    %2041 = arith.maximumf %2039, %2040 : vector<8x16xf32>
    %2042 = arith.truncf %2041 : vector<8x16xf32> to vector<8x16xbf16>
    %c0_92 = arith.constant 0 : index
    %c0_93 = arith.constant 0 : index
    %2043 = vector.load %arg15[%c0_92, %c0_93] : memref<16x256xbf16, #tpu.memory_space<vmem>>, vector<16x256xbf16>
    %cst_94 = arith.constant dense<0.000000e+00> : vector<8x256xf32>
    %2044 = tpu.matmul %2042, %2043, %cst_94 {dimension_numbers = #tpu.dot_dimension_numbers<[1], [0], [0], [1], [0, 0, 1, 1], [], []>} : vector<8x16xbf16>, vector<16x256xbf16>, vector<8x256xf32> -> vector<8x256xf32>
    %2045 = arith.negf %2044 : vector<8x256xf32>
    %2046 = math.exp %2045 : vector<8x256xf32>
    %cst_95 = arith.constant 1.000000e+00 : f32
    %2047 = vector.broadcast %cst_95 : f32 to vector<8x256xf32>
    %2048 = arith.addf %2047, %2046 : vector<8x256xf32>
    %2049 = arith.divf %2047, %2048 : vector<8x256xf32>
    %2050 = vector.shape_cast %2049 : vector<8x256xf32> to vector<8x1x256xf32>
    %2051 = vector.broadcast %2050 : vector<8x1x256xf32> to vector<8x5x256xf32>
    %2052 = arith.mulf %2033, %2051 : vector<8x5x256xf32>
    %2053 = vector.extract_strided_slice %2052 {offsets = [0, 0, 0], sizes = [8, 3, 256], strides = [1, 1, 1]} : vector<8x5x256xf32> to vector<8x3x256xf32>
    %2054 = vector.extract_strided_slice %2052 {offsets = [0, 1, 0], sizes = [8, 3, 256], strides = [1, 1, 1]} : vector<8x5x256xf32> to vector<8x3x256xf32>
    %2055 = vector.extract_strided_slice %2052 {offsets = [0, 2, 0], sizes = [8, 3, 256], strides = [1, 1, 1]} : vector<8x5x256xf32> to vector<8x3x256xf32>
    %2056 = tpu.concatenate %2053, %2054, %2055 in 2 : vector<8x3x256xf32>, vector<8x3x256xf32>, vector<8x3x256xf32> -> vector<8x3x768xf32>
    %2057 = vector.shape_cast %2056 : vector<8x3x768xf32> to vector<24x768xf32>
    %2058 = arith.truncf %2057 : vector<24x768xf32> to vector<24x768xbf16>
    %c0_96 = arith.constant 0 : index
    %c0_97 = arith.constant 0 : index
    %2059 = vector.load %arg16[%c0_96, %c0_97] : memref<768x128xbf16, #tpu.memory_space<vmem>>, vector<768x128xbf16>
    %cst_98 = arith.constant dense<0.000000e+00> : vector<24x128xf32>
    %2060 = tpu.matmul %2058, %2059, %cst_98 {dimension_numbers = #tpu.dot_dimension_numbers<[1], [0], [0], [1], [0, 0, 1, 1], [], []>} : vector<24x768xbf16>, vector<768x128xbf16>, vector<24x128xf32> -> vector<24x128xf32>
    %c0_99 = arith.constant 0 : index
    %c0_100 = arith.constant 0 : index
    %2061 = vector.load %arg17[%c0_99, %c0_100] : memref<1x128xf32, #tpu.memory_space<vmem>>, vector<1x128xf32>
    %2062 = vector.broadcast %2061 : vector<1x128xf32> to vector<24x128xf32>
    %2063 = arith.mulf %2060, %2062 : vector<24x128xf32>
    %c0_101 = arith.constant 0 : index
    %c0_102 = arith.constant 0 : index
    %2064 = vector.load %arg18[%c0_101, %c0_102] : memref<1x128xf32, #tpu.memory_space<vmem>>, vector<1x128xf32>
    %2065 = vector.broadcast %2064 : vector<1x128xf32> to vector<24x128xf32>
    %2066 = arith.addf %2063, %2065 : vector<24x128xf32>
    %cst_103 = arith.constant 0.000000e+00 : f32
    %2067 = vector.broadcast %cst_103 : f32 to vector<24x128xf32>
    %2068 = arith.maximumf %2066, %2067 : vector<24x128xf32>
    %2069 = vector.shape_cast %2068 : vector<24x128xf32> to vector<8x3x128xf32>
    %cst_104 = arith.constant dense<0.000000e+00> : vector<8x128xf32>
    %2070 = vector.multi_reduction <add>, %2069, %cst_104 [1] : vector<8x3x128xf32> to vector<8x128xf32>
    %cst_105 = arith.constant 3.000000e+00 : f32
    %2071 = vector.broadcast %cst_105 : f32 to vector<8x128xf32>
    %2072 = arith.divf %2070, %2071 : vector<8x128xf32>
    %2073 = arith.truncf %1982 : vector<8x8xf32> to vector<8x8xbf16>
    %c0_106 = arith.constant 0 : index
    %c0_107 = arith.constant 0 : index
    %2074 = vector.load %arg19[%c0_106, %c0_107] : memref<8x128xbf16, #tpu.memory_space<vmem>>, vector<8x128xbf16>
    %cst_108 = arith.constant dense<0.000000e+00> : vector<8x128xf32>
    %2075 = tpu.matmul %2073, %2074, %cst_108 {dimension_numbers = #tpu.dot_dimension_numbers<[1], [0], [0], [1], [0, 0, 1, 1], [], []>} : vector<8x8xbf16>, vector<8x128xbf16>, vector<8x128xf32> -> vector<8x128xf32>
    %2076 = arith.truncf %2072 : vector<8x128xf32> to vector<8x128xbf16>
    %c0_109 = arith.constant 0 : index
    %c0_110 = arith.constant 0 : index
    %2077 = vector.load %arg20[%c0_109, %c0_110] : memref<128x128xbf16, #tpu.memory_space<vmem>>, vector<128x128xbf16>
    %cst_111 = arith.constant dense<0.000000e+00> : vector<8x128xf32>
    %2078 = tpu.matmul %2076, %2077, %cst_111 {dimension_numbers = #tpu.dot_dimension_numbers<[1], [0], [0], [1], [0, 0, 1, 1], [], []>} : vector<8x128xbf16>, vector<128x128xbf16>, vector<8x128xf32> -> vector<8x128xf32>
    %2079 = arith.addf %2075, %2078 : vector<8x128xf32>
    %c0_112 = arith.constant 0 : index
    %c0_113 = arith.constant 0 : index
    %2080 = vector.load %arg21[%c0_112, %c0_113] : memref<1x128xf32, #tpu.memory_space<vmem>>, vector<1x128xf32>
    %2081 = vector.broadcast %2080 : vector<1x128xf32> to vector<8x128xf32>
    %2082 = arith.addf %2079, %2081 : vector<8x128xf32>
    %c0_114 = arith.constant 0 : index
    %c0_115 = arith.constant 0 : index
    %2083 = vector.load %arg22[%c0_114, %c0_115] : memref<8x128xf32, #tpu.memory_space<vmem>>, vector<8x128xf32>
    tpu.vector_store %arg22[%c0_114, %c0_115], %2082 {strides = array<i32>} : memref<8x128xf32, #tpu.memory_space<vmem>>, vector<8x128xf32>,
    return
  }
  func.func @transform_0(%arg0: i32) -> (i32, i32, i32) {
    %c0_i32 = arith.constant 0 : i32
    %c0_i32_0 = arith.constant 0 : i32
    %c0_i32_1 = arith.constant 0 : i32
    return %c0_i32, %arg0, %c0_i32_0 : i32, i32, i32
  }
  func.func @transform_1(%arg0: i32) -> (i32, i32) {
    %c0_i32 = arith.constant 0 : i32
    %c0_i32_0 = arith.constant 0 : i32
    return %arg0, %c0_i32 : i32, i32
  }
  func.func @transform_2(%arg0: i32) -> (i32, i32) {
    %c0_i32 = arith.constant 0 : i32
    %c0_i32_0 = arith.constant 0 : i32
    %c0_i32_1 = arith.constant 0 : i32
    return %c0_i32, %c0_i32_0 : i32, i32
  }
  func.func @transform_3(%arg0: i32) -> (i32, i32) {
    %c0_i32 = arith.constant 0 : i32
    %c0_i32_0 = arith.constant 0 : i32
    %c0_i32_1 = arith.constant 0 : i32
    return %c0_i32, %c0_i32_0 : i32, i32
  }
  func.func @transform_4(%arg0: i32) -> (i32, i32) {
    %c0_i32 = arith.constant 0 : i32
    %c0_i32_0 = arith.constant 0 : i32
    %c0_i32_1 = arith.constant 0 : i32
    return %c0_i32, %c0_i32_0 : i32, i32
  }
  func.func @transform_5(%arg0: i32) -> (i32, i32) {
    %c0_i32 = arith.constant 0 : i32
    %c0_i32_0 = arith.constant 0 : i32
    %c0_i32_1 = arith.constant 0 : i32
    return %c0_i32, %c0_i32_0 : i32, i32
  }
  func.func @transform_6(%arg0: i32) -> (i32, i32) {
    %c0_i32 = arith.constant 0 : i32
    %c0_i32_0 = arith.constant 0 : i32
    %c0_i32_1 = arith.constant 0 : i32
    return %c0_i32, %c0_i32_0 : i32, i32
  }
  func.func @transform_7(%arg0: i32) -> (i32, i32) {
    %c0_i32 = arith.constant 0 : i32
    %c0_i32_0 = arith.constant 0 : i32
    %c0_i32_1 = arith.constant 0 : i32
    return %c0_i32, %c0_i32_0 : i32, i32
  }
  func.func @transform_8(%arg0: i32) -> (i32, i32) {
    %c0_i32 = arith.constant 0 : i32
    %c0_i32_0 = arith.constant 0 : i32
    %c0_i32_1 = arith.constant 0 : i32
    return %c0_i32, %c0_i32_0 : i32, i32
  }
  func.func @transform_9(%arg0: i32) -> (i32, i32) {
    %c0_i32 = arith.constant 0 : i32
    %c0_i32_0 = arith.constant 0 : i32
    %c0_i32_1 = arith.constant 0 : i32
    return %c0_i32, %c0_i32_0 : i32, i32
  }
  func.func @transform_10(%arg0: i32) -> (i32, i32) {
    %c0_i32 = arith.constant 0 : i32
    %c0_i32_0 = arith.constant 0 : i32
    %c0_i32_1 = arith.constant 0 : i32
    return %c0_i32, %c0_i32_0 : i32, i32
  }
  func.func @transform_11(%arg0: i32) -> (i32, i32) {
    %c0_i32 = arith.constant 0 : i32
    %c0_i32_0 = arith.constant 0 : i32
    %c0_i32_1 = arith.constant 0 : i32
    return %c0_i32, %c0_i32_0 : i32, i32
  }
  func.func @transform_12(%arg0: i32) -> (i32, i32) {
    %c0_i32 = arith.constant 0 : i32
    %c0_i32_0 = arith.constant 0 : i32
    %c0_i32_1 = arith.constant 0 : i32
    return %c0_i32, %c0_i32_0 : i32, i32
  }
  func.func @transform_13(%arg0: i32) -> (i32, i32) {
    %c0_i32 = arith.constant 0 : i32
    %c0_i32_0 = arith.constant 0 : i32
    %c0_i32_1 = arith.constant 0 : i32
    return %c0_i32, %c0_i32_0 : i32, i32
  }
  func.func @transform_14(%arg0: i32) -> (i32, i32) {
    %c0_i32 = arith.constant 0 : i32
    %c0_i32_0 = arith.constant 0 : i32
    %c0_i32_1 = arith.constant 0 : i32
    return %c0_i32, %c0_i32_0 : i32, i32
  }
  func.func @transform_15(%arg0: i32) -> (i32, i32) {
    %c0_i32 = arith.constant 0 : i32
    %c0_i32_0 = arith.constant 0 : i32
    %c0_i32_1 = arith.constant 0 : i32
    return %c0_i32, %c0_i32_0 : i32, i32
  }
  func.func @transform_16(%arg0: i32) -> (i32, i32) {
    %c0_i32 = arith.constant 0 : i32
    %c0_i32_0 = arith.constant 0 : i32
    %c0_i32_1 = arith.constant 0 : i32
    return %c0_i32, %c0_i32_0 : i32, i32
  }
  func.func @transform_17(%arg0: i32) -> (i32, i32) {
    %c0_i32 = arith.constant 0 : i32
    %c0_i32_0 = arith.constant 0 : i32
    %c0_i32_1 = arith.constant 0 : i32
    return %c0_i32, %c0_i32_0 : i32, i32
  }
  func.func @transform_18(%arg0: i32) -> (i32, i32) {
    %c0_i32 = arith.constant 0 : i32
    %c0_i32_0 = arith.constant 0 : i32
    %c0_i32_1 = arith.constant 0 : i32
    return %c0_i32, %c0_i32_0 : i32, i32
  }
  func.func @transform_19(%arg0: i32) -> (i32, i32) {
    %c0_i32 = arith.constant 0 : i32
    %c0_i32_0 = arith.constant 0 : i32
    %c0_i32_1 = arith.constant 0 : i32
    return %c0_i32, %c0_i32_0 : i32, i32
  }
  func.func @transform_20(%arg0: i32) -> (i32, i32) {
    %c0_i32 = arith.constant 0 : i32
    %c0_i32_0 = arith.constant 0 : i32
    %c0_i32_1 = arith.constant 0 : i32
    return %c0_i32, %c0_i32_0 : i32, i32
  }
  func.func @transform_21(%arg0: i32) -> (i32, i32) {
    %c0_i32 = arith.constant 0 : i32
    %c0_i32_0 = arith.constant 0 : i32
    return %arg0, %c0_i32 : i32, i32
  }
}

</mosaic_0001>

<bundles_post_ra>
// kernel: mlstm_fcn_forward.1
= control target key start
LH: loop header
LB: loop body
LE: loop exit
PB: predicated region body
PF: predicated region fallthrough
CT: control target
= control target key end

     0   :  { %vm142_vm0 = vcmask 1043456   ;;  %vm93_vm1 = vcmask 31744   ;;  %v292_v3 = vlaneseq  ;;  %s12759_s24 = smov 104   ;;  %v17026_v52 = vmov 17   ;;  %s16996_s2 = inlined_call_operand.vmem [shape: f32[4,32], index: 2, kind: input, shape index: {}]   ;;  %s16997_s0 = inlined_call_operand.vmem [shape: f32[16,8,4], index: 0, kind: input, shape index: {}]   ;;  %s16998_s3 = inlined_call_operand.vmem [shape: f32[8,32], index: 3, kind: input, shape index: {}]   ;;  %s16999_s4 = inlined_call_operand.vmem [shape: f32[1,32], index: 4, kind: input, shape index: {}]   ;;  %s17000_s5 = inlined_call_operand.vmem [shape: bf16[32,128], index: 5, kind: input, shape index: {}]   ;;  %s17001_s1 = inlined_call_operand.vmem [shape: f32[72,32], index: 1, kind: input, shape index: {}]   ;;  %s17002_s8 = inlined_call_operand.vmem [shape: bf16[128,8], index: 8, kind: input, shape index: {}]   ;;  %s17003_s6 = inlined_call_operand.vmem [shape: f32[1,128], index: 6, kind: input, shape index: {}]   ;;  %s17004_s7 = inlined_call_operand.vmem [shape: f32[1,128], index: 7, kind: input, shape index: {}]   ;;  %s17005_s9 = inlined_call_operand.vmem [shape: bf16[8,128], index: 9, kind: input, shape index: {}]   ;;  %s17006_s10 = inlined_call_operand.vmem [shape: bf16[640,256], index: 10, kind: input, shape index: {}]   ;;  %s17007_s13 = inlined_call_operand.vmem [shape: bf16[256,16], index: 13, kind: input, shape index: {}]   ;;  %s17008_s11 = inlined_call_operand.vmem [shape: f32[1,256], index: 11, kind: input, shape index: {}]   ;;  %s17009_s12 = inlined_call_operand.vmem [shape: f32[1,256], index: 12, kind: input, shape index: {}]   ;;  %s17010_s14 = inlined_call_operand.vmem [shape: bf16[16,256], index: 14, kind: input, shape index: {}]   ;;  %s17011_s15 = inlined_call_operand.vmem [shape: bf16[768,128], index: 15, kind: input, shape index: {}]   ;;  %s17012_s19 = inlined_call_operand.vmem [shape: bf16[128,128], index: 19, kind: input, shape index: {}]   ;;  %s17013_s16 = inlined_call_operand.vmem [shape: f32[1,128], index: 16, kind: input, shape index: {}]   ;;  %s17014_s17 = inlined_call_operand.vmem [shape: f32[1,128], index: 17, kind: input, shape index: {}]   ;;  %s17015_s18 = inlined_call_operand.vmem [shape: bf16[8,128], index: 18, kind: input, shape index: {}]   ;;  %s17016_s20 = inlined_call_operand.vmem [shape: f32[1,128], index: 20, kind: input, shape index: {}]   ;;  %s17017_s21 = inlined_call_operand.vmem [shape: f32[8,128], index: 21, kind: output, shape index: {}]  }
   0x1   :  { %17172 = sst [smem:[#allocation70_spill]] %s16996_s2  ;;  %12291 = vset.pattern.permute.xlu0 %v17026_v52  ;;  %v17022_v53 = vmov 16   ;;  %v17036_v57 = vmov 20   ;;  %v17034_v58 = vmov 18   ;;  %v17032_v59 = vmov 23  }
   0x2   :  { %17173 = sst [smem:[#allocation71_spill]] %s16997_s0  ;;  %s17178_s26 = sld [smem:[#allocation70_spill]]  ;;  %v12897_v4 = vshrl.u32 %v292_v3, 7  ;;  %12290 = vset.pattern.permute.xlu1 %v17022_v53  ;;  %v17030_v60 = vmov 19   ;;  %v17028_v61 = vmov 21   ;;  %v17024_v62 = vmov 22  }
   0x3   :  { %17174 = sst [smem:[#allocation72_spill]] %s16998_s3  ;;  %s17179_s28 = sld [smem:[#allocation71_spill]]  ;;  %vm12770_vm2 = vmmov 0   ;;  %vm1489_vm3 = vcmask 261120   ;;  %vm2660_vm4 = vcmask 1040384   ;;  %vm2774_vm5 = vcmask 1041409  }
   0x4   :  { %17175 = sst [smem:[#allocation73_spill]] %s16999_s4  ;;  %v12900_v5 = vsub.s32 0, %v12897_v4  ;;  %v12906_v7 = vsub.s32 1, %v12897_v4  ;;  %v302_v9 = vsub.s32 2, %v12897_v4  ;;  %v306_v11 = vsub.s32 3, %v12897_v4  ;;  %s12760_s3 = smov 8  }
   0x5   :  { %17176 = sst [smem:[#allocation74_spill]] %s17000_s5  ;;  %s17185_s0 = sld [smem:[#allocation73_spill]]  ;;  %v310_v15 = vsub.s32 4, %v12897_v4  ;;  %v314_v20 = vsub.s32 5, %v12897_v4  ;;  %v318_v25 = vsub.s32 6, %v12897_v4  ;;  %v322_v29 = vsub.s32 7, %v12897_v4 }
   0x6   :  { %17177 = sst [smem:[#allocation75_spill]] %s17001_s1  ;;  %17180 = vst [vmem:[#allocation2_spill] sm:$0xff] %v12900_v5  ;;  %s17181_s1 = sld [smem:[#allocation72_spill]]  ;;  %17182 = vst [vmem:[#allocation3_spill] sm:$0xff] %v12906_v7  ;;  %vm2776_vm6 = vcmask 1042434   ;;  %vm2778_vm7 = vcmask 1043459  }
   0x7   :  { %s17192_s27 = sld [smem:[#allocation74_spill]]  ;;  %s17193_s30 = sld [smem:[#allocation75_spill]]  ;;  %vm2780_vm8 = vcmask 1044484   ;;  %vm2782_vm9 = vcmask 1045509   ;;  %vm2784_vm10 = vcmask 1046534   ;;  %vm2786_vm11 = vcmask 1047559  }
   0x8   :  { %v85_v0 = vld [vmem:[%s17178_s26] sm:$0xf]  ;;  %vm2881_vm12 = vcmask 64512   ;;  %vm7874_vm13 = vcmask 1044480   ;;  %vm8252_vm14 = vcmask 130048   ;;  %vm11398_vm15 = vcmask 1042432  }
   0x9   :  { %v69_v1 = vld [vmem:[%s17179_s28] sm:$0xff]  ;;  %v70_v2 = vld [vmem:[%s17179_s28 + $0x8] sm:$0xff]  ;;  %12149 = vmatprep.subr.msk.mxu0 %vm142_vm0, %v85_v0 }
   0xa   :  { %12151 = vmatprep.mubr.msk.f32.mxu0 %vm93_vm1, %v69_v1  ;;  %12150 = vmatpush3.msk.msra.mxu0 %vm142_vm0, %v85_v0 }
   0xb   :  { %12152 = vmatmul.mubr.msk.f32.vlgmr.msra.gmra.mrb[0].mxu0 %vm93_vm1, %v70_v2  ;;  %v12919_v12 = vld [vmem:[%s17185_s0] ss:$0 sm:$0xff] }
   0xc   :  { %v291_v6 = vld [vmem:[%s17181_s1] sm:$0xff] }
   0xd   :  { %v12909_v8 = vrot.slane %v291_v6, %v12900_v5  ;;  %v12913_v10 = vrot.slane %v291_v6, %v12906_v7  ;;  %v12923_v14 = vrot.slane %v291_v6, %v302_v9  ;;  %v12928_v19 = vrot.slane %v291_v6, %v306_v11 }
   0xe   :  { %v12932_v22 = vrot.slane %v291_v6, %v310_v15  ;;  %v12936_v26 = vrot.slane %v291_v6, %v314_v20  ;;  %v12941_v32 = vrot.slane %v291_v6, %v318_v25  ;;  %v12944_v35 = vrot.slane %v291_v6, %v322_v29 }
   0xf   :  { %17183 = vst [vmem:[#allocation4_spill] sm:$0xff] %v12909_v8  ;;  %17184 = vst [vmem:[#allocation5_spill] sm:$0xff] %v12913_v10  ;;  %v324_v16 = vmul.f32 0.0, %v12909_v8  ;;  %v326_v21 = vmul.f32 0.0, %v12913_v10  ;;  %v328_v24 = vmul.f32 0.0, %v12923_v14  ;;  %v330_v28 = vmul.f32 0.0, %v12928_v19 }
  0x10   :  { %17186 = vst [vmem:[#allocation6_spill] sm:$0xff] %v12923_v14  ;;  %17187 = vst [vmem:[#allocation7_spill] sm:$0xff] %v12928_v19  ;;  %v332_v31 = vmul.f32 0.0, %v12932_v22  ;;  %v334_v34 = vmul.f32 0.0, %v12936_v26  ;;  %v336_v37 = vmul.f32 0.0, %v12941_v32  ;;  %v338_v39 = vmul.f32 0.0, %v12944_v35 }
  0x11   :  { %17188 = vst [vmem:[#allocation8_spill] sm:$0xff] %v12932_v22  ;;  %17189 = vst [vmem:[#allocation9_spill] sm:$0xff] %v12936_v26 }
  0x12   :  { %17190 = vst [vmem:[#allocation10_spill] sm:$0xff] %v12941_v32  ;;  %17191 = vst [vmem:[#allocation11_spill] sm:$0xff] %v12944_v35 }
  0xde   :  { %v12921_v13 = vpop.f32.mrb[0].mxu0 }
  0xdf   :  { %v212_v17 = vpop.f32.mrb[1].mxu0  ;;  %v218_v0 = vadd.f32 %v12921_v13, %v12919_v12 }
  0xe0   :  { %v213_v18 = vadd.f32 %v12919_v12, %v212_v17 }
  0xe2   :  { %v325_v23 = vadd.f32 %v324_v16, %v213_v18 }
  0xe4   :  { %v327_v27 = vadd.f32 %v326_v21, %v325_v23 }
  0xe6   :  { %v329_v30 = vadd.f32 %v328_v24, %v327_v27 }
  0xe8   :  { %v331_v33 = vadd.f32 %v330_v28, %v329_v30 }
  0xea   :  { %v333_v36 = vadd.f32 %v332_v31, %v331_v33 }
  0xec   :  { %v335_v38 = vadd.f32 %v334_v34, %v333_v36 }
  0xee   :  { %v337_v40 = vadd.f32 %v336_v37, %v335_v38 }
  0xf0   :  { %v339_v41 = vadd.f32 %v338_v39, %v337_v40 }
  0xf2   :  { %12615 = vtanh.f32 %v339_v41  ;;  %v11683_v43 = vmul.f32 -1.442695, %v339_v41 }
  0xf4   :  { %12617 = vpow2.f32 %v11683_v43  ;;  %v71_v43 = vld [vmem:[%s17179_s28 + $0x10] sm:$0xff] }
  0xf5   :  { %12154 = vmatprep.mubr.msk.f32.mxu0 %vm93_vm1, %v71_v43 }
  0xfc   :  { %v12616_v42 = vpop.eup %12615 }
  0xfd   :  { %349 = vrot.lane.b32.xlu0 %v12616_v42, %s12759_s24 }
  0xfe   :  { %v12618_v44 = vpop.eup %12617 }
  0xff   :  { %v343_v45 = vadd.f32 1.0, %v12618_v44  ;;  %v72_v44 = vld [vmem:[%s17179_s28 + $0x18] sm:$0xff] }
 0x100   :  { %12155 = vmatmul.mubr.msk.f32.gmra.mrb[2].mxu0 %vm93_vm1, %v72_v44 }
 0x101   :  { %12619 = vrcp.f32 %v343_v45 }
 0x10b   :  { %v12620_v46 = vpop.eup %12619 }
 0x10c   :  { %v347_v49 = vmul.f32 0.0, %v12620_v46 }
 0x16f   :  { %v350_v47 = vpop.permute.xlu0 %349 }
 0x170   :  { %v352_v48 = vmul.f32 %v12620_v46, %v350_v47 }
 0x172   :  { %354 = vrot.lane.b32.xlu0 %v352_v48, %s12760_s3 }
 0x1e4   :  { %v355_v50 = vpop.permute.xlu0 %354 }
 0x1e5   :  { %v12950_v51 = vadd.f32 %v355_v50, %v347_v49  ;;  %v12986_v49 = vpop.f32.mrb[2].mxu0 }
 0x1e6   :  { %v222_v50 = vpop.f32.mrb[3].mxu0 }
 0x1e7   :  { %12621 = vtanh.f32 %v12950_v51 }
 0x1f1   :  { %v12622_v54 = vpop.eup %12621 }
 0x1f2   :  { %360 = vrot.lane.b32.xlu1 %v12622_v54, %s12760_s3 }
 0x264   :  { %v361_v55 = vpop.permute.xlu1 %360 }
 0x265   :  { %v363_v56 = vmul.f32 %v12620_v46, %v361_v55 }
 0x267   :  { %372 = vperm.xlu0 %12291, %v363_v56   ;;  %366 = vperm.xlu1 %12290, %v363_v56  }
 0x26b   :  { %12294 = vset.pattern.permute.xlu0 %v17036_v57  ;;  %12292 = vset.pattern.permute.xlu1 %v17034_v58 }
 0x26c   :  { %390 = vperm.xlu0 %12294, %v363_v56   ;;  %378 = vperm.xlu1 %12292, %v363_v56  }
 0x270   :  { %12297 = vset.pattern.permute.xlu0 %v17032_v59  ;;  %12293 = vset.pattern.permute.xlu1 %v17030_v60 }
 0x271   :  { %408 = vperm.xlu0 %12297, %v363_v56   ;;  %384 = vperm.xlu1 %12293, %v363_v56  }
 0x275   :  { %12295 = vset.pattern.permute.xlu1 %v17028_v61  ;;  %12299 = vset.pattern.permute.xlu0 %v17026_v52 }
 0x276   :  { %396 = vperm.xlu1 %12295, %v363_v56  }
 0x27a   :  { %12296 = vset.pattern.permute.xlu1 %v17024_v62 }
 0x27b   :  { %402 = vperm.xlu1 %12296, %v363_v56  }
 0x27f   :  { %12298 = vset.pattern.permute.xlu1 %v17022_v53 }
 0x2e6   :  { %v367_v63 = vpop.permute.xlu1 %366  ;;  %v373_v2 = vpop.permute.xlu0 %372 }
 0x2e7   :  { %v369_v1 = vmul.f32 %v367_v63, %v12909_v8  ;;  %v375_v6 = vmul.f32 %v373_v2, %v12913_v10 }
 0x2e9   :  { %v370_v3 = vadd.f32 %v369_v1, %v218_v0 }
 0x2eb   :  { %v379_v9 = vpop.permute.xlu1 %378  ;;  %v376_v11 = vadd.f32 %v375_v6, %v370_v3  ;;  %v391_v20 = vpop.permute.xlu0 %390 }
 0x2ec   :  { %v381_v15 = vmul.f32 %v379_v9, %v12923_v14  ;;  %v393_v23 = vmul.f32 %v391_v20, %v12932_v22 }
 0x2ee   :  { %v382_v17 = vadd.f32 %v381_v15, %v376_v11 }
 0x2f0   :  { %v385_v16 = vpop.permute.xlu1 %384  ;;  %v409_v27 = vpop.permute.xlu0 %408 }
 0x2f1   :  { %v387_v18 = vmul.f32 %v385_v16, %v12928_v19  ;;  %v411_v31 = vmul.f32 %v409_v27, %v12944_v35 }
 0x2f3   :  { %v388_v21 = vadd.f32 %v387_v18, %v382_v17 }
 0x2f5   :  { %v397_v24 = vpop.permute.xlu1 %396  ;;  %v394_v13 = vadd.f32 %v393_v23, %v388_v21 }
 0x2f6   :  { %v399_v25 = vmul.f32 %v397_v24, %v12936_v26 }
 0x2f8   :  { %v400_v29 = vadd.f32 %v399_v25, %v394_v13 }
 0x2fa   :  { %v403_v28 = vpop.permute.xlu1 %402 }
 0x2fb   :  { %v405_v30 = vmul.f32 %v403_v28, %v12941_v32 }
 0x2fd   :  { %v406_v33 = vadd.f32 %v405_v30, %v400_v29 }
 0x2ff   :  { %v412_v34 = vadd.f32 %v411_v31, %v406_v33 }
 0x301   :  { %12623 = vtanh.f32 %v412_v34  ;;  %v11684_v37 = vmul.f32 -1.442695, %v412_v34 }
 0x303   :  { %12625 = vpow2.f32 %v11684_v37 }
 0x30b   :  { %v12624_v36 = vpop.eup %12623 }
 0x30c   :  { %422 = vrot.lane.b32.xlu1 %v12624_v36, %s12759_s24 }
 0x30d   :  { %v12626_v38 = vpop.eup %12625 }
 0x30e   :  { %v416_v39 = vadd.f32 1.0, %v12626_v38 }
 0x310   :  { %12627 = vrcp.f32 %v416_v39 }
 0x31a   :  { %v12628_v40 = vpop.eup %12627 }
 0x31b   :  { %v420_v45 = vmul.f32 %v12628_v40, %v12950_v51  ;;  %v223_v51 = vadd.f32 %v12919_v12, %v222_v50 }
 0x37e   :  { %v423_v41 = vpop.permute.xlu1 %422 }
 0x37f   :  { %v425_v42 = vmul.f32 %v12628_v40, %v423_v41 }
 0x381   :  { %427 = vrot.lane.b32.xlu1 %v425_v42, %s12760_s3 }
 0x3f3   :  { %v428_v46 = vpop.permute.xlu1 %427 }
 0x3f4   :  { %v430_v47 = vadd.f32 %v428_v46, %v420_v45 }
 0x3f6   :  { %12629 = vtanh.f32 %v430_v47 }
 0x400   :  { %v12630_v48 = vpop.eup %12629 }
 0x401   :  { %433 = vrot.lane.b32.xlu0 %v12630_v48, %s12760_s3  ;;  %v228_v48 = vadd.f32 %v12986_v49, %v12919_v12 }
 0x473   :  { %v434_v54 = vpop.permute.xlu0 %433 }
 0x474   :  { %v436_v55 = vmul.f32 %v12628_v40, %v434_v54 }
 0x476   :  { %445 = vperm.xlu0 %12299, %v436_v55   ;;  %439 = vperm.xlu1 %12298, %v436_v55  }
 0x47a   :  { %12302 = vset.pattern.permute.xlu0 %v17036_v57  ;;  %12300 = vset.pattern.permute.xlu1 %v17034_v58 }
 0x47b   :  { %463 = vperm.xlu0 %12302, %v436_v55   ;;  %451 = vperm.xlu1 %12300, %v436_v55  }
 0x47f   :  { %12305 = vset.pattern.permute.xlu0 %v17032_v59  ;;  %12301 = vset.pattern.permute.xlu1 %v17030_v60 }
 0x480   :  { %481 = vperm.xlu0 %12305, %v436_v55   ;;  %457 = vperm.xlu1 %12301, %v436_v55  }
 0x484   :  { %12303 = vset.pattern.permute.xlu1 %v17028_v61  ;;  %12307 = vset.pattern.permute.xlu0 %v17026_v52 }
 0x485   :  { %469 = vperm.xlu1 %12303, %v436_v55  }
 0x489   :  { %12304 = vset.pattern.permute.xlu1 %v17024_v62 }
 0x48a   :  { %475 = vperm.xlu1 %12304, %v436_v55  }
 0x48e   :  { %12306 = vset.pattern.permute.xlu1 %v17022_v53 }
 0x4f5   :  { %v440_v56 = vpop.permute.xlu1 %439  ;;  %v446_v0 = vpop.permute.xlu0 %445 }
 0x4f6   :  { %v442_v63 = vmul.f32 %v440_v56, %v12909_v8  ;;  %v448_v2 = vmul.f32 %v446_v0, %v12913_v10 }
 0x4f8   :  { %v443_v1 = vadd.f32 %v442_v63, %v223_v51 }
 0x4fa   :  { %v452_v3 = vpop.permute.xlu1 %451  ;;  %v449_v6 = vadd.f32 %v448_v2, %v443_v1  ;;  %v464_v17 = vpop.permute.xlu0 %463 }
 0x4fb   :  { %v454_v9 = vmul.f32 %v452_v3, %v12923_v14  ;;  %v466_v20 = vmul.f32 %v464_v17, %v12932_v22 }
 0x4fd   :  { %v455_v15 = vadd.f32 %v454_v9, %v449_v6 }
 0x4ff   :  { %v458_v11 = vpop.permute.xlu1 %457  ;;  %v482_v13 = vpop.permute.xlu0 %481 }
 0x500   :  { %v460_v16 = vmul.f32 %v458_v11, %v12928_v19  ;;  %v484_v29 = vmul.f32 %v482_v13, %v12944_v35 }
 0x502   :  { %v461_v18 = vadd.f32 %v460_v16, %v455_v15 }
 0x504   :  { %v470_v21 = vpop.permute.xlu1 %469  ;;  %v467_v23 = vadd.f32 %v466_v20, %v461_v18 }
 0x505   :  { %v472_v24 = vmul.f32 %v470_v21, %v12936_v26 }
 0x507   :  { %v473_v27 = vadd.f32 %v472_v24, %v467_v23 }
 0x509   :  { %v476_v25 = vpop.permute.xlu1 %475 }
 0x50a   :  { %v478_v28 = vmul.f32 %v476_v25, %v12941_v32 }
 0x50c   :  { %v479_v30 = vadd.f32 %v478_v28, %v473_v27 }
 0x50e   :  { %v485_v31 = vadd.f32 %v484_v29, %v479_v30 }
 0x510   :  { %12631 = vtanh.f32 %v485_v31  ;;  %v11685_v34 = vmul.f32 -1.442695, %v485_v31 }
 0x512   :  { %12633 = vpow2.f32 %v11685_v34  ;;  %v73_v34 = vld [vmem:[%s17179_s28 + $0x20] sm:$0xff] }
 0x513   :  { %12157 = vmatprep.mubr.msk.f32.mxu0 %vm93_vm1, %v73_v34 }
 0x51a   :  { %v12632_v33 = vpop.eup %12631 }
 0x51b   :  { %495 = vrot.lane.b32.xlu1 %v12632_v33, %s12759_s24 }
 0x51c   :  { %v12634_v36 = vpop.eup %12633 }
 0x51d   :  { %v489_v37 = vadd.f32 1.0, %v12634_v36  ;;  %v74_v36 = vld [vmem:[%s17179_s28 + $0x28] sm:$0xff] }
 0x51e   :  { %12158 = vmatmul.mubr.msk.f32.gmra.mrb[4].mxu0 %vm93_vm1, %v74_v36 }
 0x51f   :  { %12635 = vrcp.f32 %v489_v37 }
 0x529   :  { %v12636_v38 = vpop.eup %12635 }
 0x52a   :  { %v493_v41 = vmul.f32 %v12636_v38, %v430_v47 }
 0x58d   :  { %v496_v39 = vpop.permute.xlu1 %495 }
 0x58e   :  { %v498_v40 = vmul.f32 %v12636_v38, %v496_v39 }
 0x590   :  { %500 = vrot.lane.b32.xlu1 %v498_v40, %s12760_s3 }
 0x602   :  { %v501_v42 = vpop.permute.xlu1 %500 }
 0x603   :  { %v13007_v43 = vadd.f32 %v501_v42, %v493_v41  ;;  %v13041_v41 = vpop.f32.mrb[4].mxu0 }
 0x604   :  { %v232_v42 = vpop.f32.mrb[5].mxu0 }
 0x605   :  { %12637 = vtanh.f32 %v13007_v43 }
 0x60f   :  { %v12638_v44 = vpop.eup %12637 }
 0x610   :  { %506 = vrot.lane.b32.xlu0 %v12638_v44, %s12760_s3 }
 0x682   :  { %v507_v45 = vpop.permute.xlu0 %506 }
 0x683   :  { %v509_v46 = vmul.f32 %v12636_v38, %v507_v45 }
 0x685   :  { %518 = vperm.xlu0 %12307, %v509_v46   ;;  %512 = vperm.xlu1 %12306, %v509_v46  }
 0x689   :  { %12310 = vset.pattern.permute.xlu0 %v17036_v57  ;;  %12308 = vset.pattern.permute.xlu1 %v17034_v58 }
 0x68a   :  { %536 = vperm.xlu0 %12310, %v509_v46   ;;  %524 = vperm.xlu1 %12308, %v509_v46  }
 0x68e   :  { %12313 = vset.pattern.permute.xlu0 %v17032_v59  ;;  %12309 = vset.pattern.permute.xlu1 %v17030_v60 }
 0x68f   :  { %554 = vperm.xlu0 %12313, %v509_v46   ;;  %530 = vperm.xlu1 %12309, %v509_v46  }
 0x693   :  { %12311 = vset.pattern.permute.xlu1 %v17028_v61  ;;  %12315 = vset.pattern.permute.xlu0 %v17026_v52 }
 0x694   :  { %542 = vperm.xlu1 %12311, %v509_v46  }
 0x698   :  { %12312 = vset.pattern.permute.xlu1 %v17024_v62 }
 0x699   :  { %548 = vperm.xlu1 %12312, %v509_v46  }
 0x69d   :  { %12314 = vset.pattern.permute.xlu1 %v17022_v53 }
 0x704   :  { %v513_v47 = vpop.permute.xlu1 %512  ;;  %v519_v54 = vpop.permute.xlu0 %518 }
 0x705   :  { %v515_v50 = vmul.f32 %v513_v47, %v12909_v8  ;;  %v521_v51 = vmul.f32 %v519_v54, %v12913_v10 }
 0x707   :  { %v516_v55 = vadd.f32 %v515_v50, %v228_v48 }
 0x709   :  { %v525_v56 = vpop.permute.xlu1 %524  ;;  %v522_v63 = vadd.f32 %v521_v51, %v516_v55  ;;  %v537_v6 = vpop.permute.xlu0 %536 }
 0x70a   :  { %v527_v0 = vmul.f32 %v525_v56, %v12923_v14  ;;  %v539_v11 = vmul.f32 %v537_v6, %v12932_v22 }
 0x70c   :  { %v528_v2 = vadd.f32 %v527_v0, %v522_v63 }
 0x70e   :  { %v531_v1 = vpop.permute.xlu1 %530  ;;  %v555_v17 = vpop.permute.xlu0 %554 }
 0x70f   :  { %v533_v3 = vmul.f32 %v531_v1, %v12928_v19  ;;  %v557_v23 = vmul.f32 %v555_v17, %v12944_v35 }
 0x711   :  { %v534_v9 = vadd.f32 %v533_v3, %v528_v2 }
 0x713   :  { %v543_v15 = vpop.permute.xlu1 %542  ;;  %v540_v49 = vadd.f32 %v539_v11, %v534_v9 }
 0x714   :  { %v545_v16 = vmul.f32 %v543_v15, %v12936_v26 }
 0x716   :  { %v546_v20 = vadd.f32 %v545_v16, %v540_v49 }
 0x718   :  { %v549_v18 = vpop.permute.xlu1 %548 }
 0x719   :  { %v551_v21 = vmul.f32 %v549_v18, %v12941_v32 }
 0x71b   :  { %v552_v24 = vadd.f32 %v551_v21, %v546_v20 }
 0x71d   :  { %v558_v13 = vadd.f32 %v557_v23, %v552_v24 }
 0x71f   :  { %12639 = vtanh.f32 %v558_v13  ;;  %v11686_v27 = vmul.f32 -1.442695, %v558_v13 }
 0x721   :  { %12641 = vpow2.f32 %v11686_v27 }
 0x729   :  { %v12640_v25 = vpop.eup %12639 }
 0x72a   :  { %568 = vrot.lane.b32.xlu1 %v12640_v25, %s12759_s24 }
 0x72b   :  { %v12642_v28 = vpop.eup %12641 }
 0x72c   :  { %v562_v29 = vadd.f32 1.0, %v12642_v28 }
 0x72e   :  { %12643 = vrcp.f32 %v562_v29 }
 0x738   :  { %v12644_v30 = vpop.eup %12643 }
 0x739   :  { %v566_v37 = vmul.f32 %v12644_v30, %v13007_v43  ;;  %v233_v43 = vadd.f32 %v12919_v12, %v232_v42 }
 0x79c   :  { %v569_v31 = vpop.permute.xlu1 %568 }
 0x79d   :  { %v571_v33 = vmul.f32 %v12644_v30, %v569_v31 }
 0x79f   :  { %573 = vrot.lane.b32.xlu1 %v571_v33, %s12760_s3 }
 0x811   :  { %v574_v38 = vpop.permute.xlu1 %573 }
 0x812   :  { %v576_v39 = vadd.f32 %v574_v38, %v566_v37 }
 0x814   :  { %12645 = vtanh.f32 %v576_v39 }
 0x81e   :  { %v12646_v40 = vpop.eup %12645 }
 0x81f   :  { %579 = vrot.lane.b32.xlu0 %v12646_v40, %s12760_s3  ;;  %v238_v40 = vadd.f32 %v13041_v41, %v12919_v12 }
 0x891   :  { %v580_v44 = vpop.permute.xlu0 %579 }
 0x892   :  { %v582_v45 = vmul.f32 %v12644_v30, %v580_v44 }
 0x894   :  { %591 = vperm.xlu0 %12315, %v582_v45   ;;  %585 = vperm.xlu1 %12314, %v582_v45  }
 0x898   :  { %12318 = vset.pattern.permute.xlu0 %v17036_v57  ;;  %12316 = vset.pattern.permute.xlu1 %v17034_v58 }
 0x899   :  { %609 = vperm.xlu0 %12318, %v582_v45   ;;  %597 = vperm.xlu1 %12316, %v582_v45  }
 0x89d   :  { %12321 = vset.pattern.permute.xlu0 %v17032_v59  ;;  %12317 = vset.pattern.permute.xlu1 %v17030_v60 }
 0x89e   :  { %627 = vperm.xlu0 %12321, %v582_v45   ;;  %603 = vperm.xlu1 %12317, %v582_v45  }
 0x8a2   :  { %12319 = vset.pattern.permute.xlu1 %v17028_v61  ;;  %12323 = vset.pattern.permute.xlu0 %v17026_v52 }
 0x8a3   :  { %615 = vperm.xlu1 %12319, %v582_v45  }
 0x8a7   :  { %12320 = vset.pattern.permute.xlu1 %v17024_v62 }
 0x8a8   :  { %621 = vperm.xlu1 %12320, %v582_v45  }
 0x8ac   :  { %12322 = vset.pattern.permute.xlu1 %v17022_v53 }
 0x913   :  { %v586_v46 = vpop.permute.xlu1 %585  ;;  %v592_v48 = vpop.permute.xlu0 %591 }
 0x914   :  { %v588_v47 = vmul.f32 %v586_v46, %v12909_v8  ;;  %v594_v54 = vmul.f32 %v592_v48, %v12913_v10 }
 0x916   :  { %v589_v50 = vadd.f32 %v588_v47, %v233_v43 }
 0x918   :  { %v598_v55 = vpop.permute.xlu1 %597  ;;  %v595_v51 = vadd.f32 %v594_v54, %v589_v50  ;;  %v610_v2 = vpop.permute.xlu0 %609 }
 0x919   :  { %v600_v56 = vmul.f32 %v598_v55, %v12923_v14  ;;  %v612_v6 = vmul.f32 %v610_v2, %v12932_v22 }
 0x91b   :  { %v601_v0 = vadd.f32 %v600_v56, %v595_v51 }
 0x91d   :  { %v604_v63 = vpop.permute.xlu1 %603  ;;  %v628_v49 = vpop.permute.xlu0 %627 }
 0x91e   :  { %v606_v1 = vmul.f32 %v604_v63, %v12928_v19  ;;  %v630_v20 = vmul.f32 %v628_v49, %v12944_v35 }
 0x920   :  { %v607_v3 = vadd.f32 %v606_v1, %v601_v0 }
 0x922   :  { %v616_v9 = vpop.permute.xlu1 %615  ;;  %v613_v11 = vadd.f32 %v612_v6, %v607_v3 }
 0x923   :  { %v618_v15 = vmul.f32 %v616_v9, %v12936_v26 }
 0x925   :  { %v619_v17 = vadd.f32 %v618_v15, %v613_v11 }
 0x927   :  { %v622_v16 = vpop.permute.xlu1 %621 }
 0x928   :  { %v624_v18 = vmul.f32 %v622_v16, %v12941_v32 }
 0x92a   :  { %v625_v21 = vadd.f32 %v624_v18, %v619_v17 }
 0x92c   :  { %v631_v23 = vadd.f32 %v630_v20, %v625_v21 }
 0x92e   :  { %12647 = vtanh.f32 %v631_v23  ;;  %v11687_v13 = vmul.f32 -1.442695, %v631_v23 }
 0x930   :  { %12649 = vpow2.f32 %v11687_v13  ;;  %v75_v13 = vld [vmem:[%s17179_s28 + $0x30] sm:$0xff] }
 0x931   :  { %12160 = vmatprep.mubr.msk.f32.mxu0 %vm93_vm1, %v75_v13 }
 0x938   :  { %v12648_v24 = vpop.eup %12647 }
 0x939   :  { %641 = vrot.lane.b32.xlu1 %v12648_v24, %s12759_s24 }
 0x93a   :  { %v12650_v25 = vpop.eup %12649 }
 0x93b   :  { %v635_v27 = vadd.f32 1.0, %v12650_v25  ;;  %v76_v25 = vld [vmem:[%s17179_s28 + $0x38] sm:$0xff] }
 0x93c   :  { %12161 = vmatmul.mubr.msk.f32.gmra.mrb[6].mxu0 %vm93_vm1, %v76_v25 }
 0x93d   :  { %12651 = vrcp.f32 %v635_v27 }
 0x947   :  { %v12652_v28 = vpop.eup %12651 }
 0x948   :  { %v639_v31 = vmul.f32 %v12652_v28, %v576_v39 }
 0x9ab   :  { %v642_v29 = vpop.permute.xlu1 %641 }
 0x9ac   :  { %v644_v30 = vmul.f32 %v12652_v28, %v642_v29 }
 0x9ae   :  { %646 = vrot.lane.b32.xlu1 %v644_v30, %s12760_s3 }
 0xa20   :  { %v647_v33 = vpop.permute.xlu1 %646 }
 0xa21   :  { %v13062_v34 = vadd.f32 %v647_v33, %v639_v31  ;;  %v13096_v31 = vpop.f32.mrb[6].mxu0 }
 0xa22   :  { %v242_v33 = vpop.f32.mrb[7].mxu0 }
 0xa23   :  { %12653 = vtanh.f32 %v13062_v34 }
 0xa2d   :  { %v12654_v36 = vpop.eup %12653 }
 0xa2e   :  { %652 = vrot.lane.b32.xlu0 %v12654_v36, %s12760_s3 }
 0xaa0   :  { %v653_v37 = vpop.permute.xlu0 %652 }
 0xaa1   :  { %v655_v38 = vmul.f32 %v12652_v28, %v653_v37 }
 0xaa3   :  { %664 = vperm.xlu0 %12323, %v655_v38   ;;  %658 = vperm.xlu1 %12322, %v655_v38  }
 0xaa7   :  { %12326 = vset.pattern.permute.xlu0 %v17036_v57  ;;  %12324 = vset.pattern.permute.xlu1 %v17034_v58 }
 0xaa8   :  { %682 = vperm.xlu0 %12326, %v655_v38   ;;  %670 = vperm.xlu1 %12324, %v655_v38  }
 0xaac   :  { %12329 = vset.pattern.permute.xlu0 %v17032_v59  ;;  %12325 = vset.pattern.permute.xlu1 %v17030_v60 }
 0xaad   :  { %700 = vperm.xlu0 %12329, %v655_v38   ;;  %676 = vperm.xlu1 %12325, %v655_v38  }
 0xab1   :  { %12327 = vset.pattern.permute.xlu1 %v17028_v61  ;;  %12331 = vset.pattern.permute.xlu0 %v17026_v52 }
 0xab2   :  { %688 = vperm.xlu1 %12327, %v655_v38  }
 0xab6   :  { %12328 = vset.pattern.permute.xlu1 %v17024_v62 }
 0xab7   :  { %694 = vperm.xlu1 %12328, %v655_v38  }
 0xabb   :  { %12330 = vset.pattern.permute.xlu1 %v17022_v53 }
 0xb22   :  { %v659_v39 = vpop.permute.xlu1 %658  ;;  %v665_v44 = vpop.permute.xlu0 %664 }
 0xb23   :  { %v661_v42 = vmul.f32 %v659_v39, %v12909_v8  ;;  %v667_v43 = vmul.f32 %v665_v44, %v12913_v10 }
 0xb25   :  { %v662_v45 = vadd.f32 %v661_v42, %v238_v40 }
 0xb27   :  { %v671_v46 = vpop.permute.xlu1 %670  ;;  %v668_v47 = vadd.f32 %v667_v43, %v662_v45  ;;  %v683_v51 = vpop.permute.xlu0 %682 }
 0xb28   :  { %v673_v48 = vmul.f32 %v671_v46, %v12923_v14  ;;  %v685_v63 = vmul.f32 %v683_v51, %v12932_v22 }
 0xb2a   :  { %v674_v54 = vadd.f32 %v673_v48, %v668_v47 }
 0xb2c   :  { %v677_v50 = vpop.permute.xlu1 %676  ;;  %v701_v2 = vpop.permute.xlu0 %700 }
 0xb2d   :  { %v679_v55 = vmul.f32 %v677_v50, %v12928_v19  ;;  %v703_v11 = vmul.f32 %v701_v2, %v12944_v35 }
 0xb2f   :  { %v680_v56 = vadd.f32 %v679_v55, %v674_v54 }
 0xb31   :  { %v689_v0 = vpop.permute.xlu1 %688  ;;  %v686_v41 = vadd.f32 %v685_v63, %v680_v56 }
 0xb32   :  { %v691_v1 = vmul.f32 %v689_v0, %v12936_v26 }
 0xb34   :  { %v692_v6 = vadd.f32 %v691_v1, %v686_v41 }
 0xb36   :  { %v695_v3 = vpop.permute.xlu1 %694 }
 0xb37   :  { %v697_v9 = vmul.f32 %v695_v3, %v12941_v32 }
 0xb39   :  { %v698_v15 = vadd.f32 %v697_v9, %v692_v6 }
 0xb3b   :  { %v704_v49 = vadd.f32 %v703_v11, %v698_v15 }
 0xb3d   :  { %12655 = vtanh.f32 %v704_v49  ;;  %v11688_v17 = vmul.f32 -1.442695, %v704_v49 }
 0xb3f   :  { %12657 = vpow2.f32 %v11688_v17 }
 0xb47   :  { %v12656_v16 = vpop.eup %12655 }
 0xb48   :  { %714 = vrot.lane.b32.xlu1 %v12656_v16, %s12759_s24 }
 0xb49   :  { %v12658_v18 = vpop.eup %12657 }
 0xb4a   :  { %v708_v20 = vadd.f32 1.0, %v12658_v18 }
 0xb4c   :  { %12659 = vrcp.f32 %v708_v20 }
 0xb56   :  { %v12660_v21 = vpop.eup %12659 }
 0xb57   :  { %v712_v27 = vmul.f32 %v12660_v21, %v13062_v34  ;;  %v243_v34 = vadd.f32 %v12919_v12, %v242_v33 }
 0xbba   :  { %v715_v23 = vpop.permute.xlu1 %714 }
 0xbbb   :  { %v717_v24 = vmul.f32 %v12660_v21, %v715_v23 }
 0xbbd   :  { %719 = vrot.lane.b32.xlu1 %v717_v24, %s12760_s3 }
 0xc2f   :  { %v720_v28 = vpop.permute.xlu1 %719 }
 0xc30   :  { %v722_v29 = vadd.f32 %v720_v28, %v712_v27 }
 0xc32   :  { %12661 = vtanh.f32 %v722_v29 }
 0xc3c   :  { %v12662_v30 = vpop.eup %12661 }
 0xc3d   :  { %725 = vrot.lane.b32.xlu0 %v12662_v30, %s12760_s3  ;;  %v248_v30 = vadd.f32 %v13096_v31, %v12919_v12 }
 0xcaf   :  { %v726_v36 = vpop.permute.xlu0 %725 }
 0xcb0   :  { %v728_v37 = vmul.f32 %v12660_v21, %v726_v36 }
 0xcb2   :  { %737 = vperm.xlu0 %12331, %v728_v37   ;;  %731 = vperm.xlu1 %12330, %v728_v37  }
 0xcb6   :  { %12334 = vset.pattern.permute.xlu0 %v17036_v57  ;;  %12332 = vset.pattern.permute.xlu1 %v17034_v58 }
 0xcb7   :  { %755 = vperm.xlu0 %12334, %v728_v37   ;;  %743 = vperm.xlu1 %12332, %v728_v37  }
 0xcbb   :  { %12337 = vset.pattern.permute.xlu0 %v17032_v59  ;;  %12333 = vset.pattern.permute.xlu1 %v17030_v60 }
 0xcbc   :  { %773 = vperm.xlu0 %12337, %v728_v37   ;;  %749 = vperm.xlu1 %12333, %v728_v37  }
 0xcc0   :  { %12335 = vset.pattern.permute.xlu1 %v17028_v61  ;;  %12339 = vset.pattern.permute.xlu0 %v17026_v52 }
 0xcc1   :  { %761 = vperm.xlu1 %12335, %v728_v37  }
 0xcc5   :  { %12336 = vset.pattern.permute.xlu1 %v17024_v62 }
 0xcc6   :  { %767 = vperm.xlu1 %12336, %v728_v37  }
 0xcca   :  { %12338 = vset.pattern.permute.xlu1 %v17022_v53 }
 0xd31   :  { %v732_v38 = vpop.permute.xlu1 %731  ;;  %v738_v40 = vpop.permute.xlu0 %737 }
 0xd32   :  { %v734_v39 = vmul.f32 %v732_v38, %v12909_v8  ;;  %v740_v44 = vmul.f32 %v738_v40, %v12913_v10 }
 0xd34   :  { %v735_v42 = vadd.f32 %v734_v39, %v243_v34 }
 0xd36   :  { %v744_v45 = vpop.permute.xlu1 %743  ;;  %v741_v43 = vadd.f32 %v740_v44, %v735_v42  ;;  %v756_v54 = vpop.permute.xlu0 %755 }
 0xd37   :  { %v746_v46 = vmul.f32 %v744_v45, %v12923_v14  ;;  %v758_v51 = vmul.f32 %v756_v54, %v12932_v22 }
 0xd39   :  { %v747_v48 = vadd.f32 %v746_v46, %v741_v43 }
 0xd3b   :  { %v750_v47 = vpop.permute.xlu1 %749  ;;  %v774_v41 = vpop.permute.xlu0 %773 }
 0xd3c   :  { %v752_v50 = vmul.f32 %v750_v47, %v12928_v19  ;;  %v776_v6 = vmul.f32 %v774_v41, %v12944_v35 }
 0xd3e   :  { %v753_v55 = vadd.f32 %v752_v50, %v747_v48 }
 0xd40   :  { %v762_v56 = vpop.permute.xlu1 %761  ;;  %v759_v63 = vadd.f32 %v758_v51, %v753_v55 }
 0xd41   :  { %v764_v0 = vmul.f32 %v762_v56, %v12936_v26 }
 0xd43   :  { %v765_v2 = vadd.f32 %v764_v0, %v759_v63 }
 0xd45   :  { %v768_v1 = vpop.permute.xlu1 %767 }
 0xd46   :  { %v770_v3 = vmul.f32 %v768_v1, %v12941_v32 }
 0xd48   :  { %v771_v9 = vadd.f32 %v770_v3, %v765_v2 }
 0xd4a   :  { %v777_v11 = vadd.f32 %v776_v6, %v771_v9 }
 0xd4c   :  { %12663 = vtanh.f32 %v777_v11  ;;  %v11689_v49 = vmul.f32 -1.442695, %v777_v11 }
 0xd4e   :  { %12665 = vpow2.f32 %v11689_v49  ;;  %v78_v49 = vld [vmem:[%s17179_s28 + $0x48] sm:$0xff] }
 0xd56   :  { %v12664_v15 = vpop.eup %12663 }
 0xd57   :  { %787 = vrot.lane.b32.xlu1 %v12664_v15, %s12759_s24  ;;  %v77_v15 = vld [vmem:[%s17179_s28 + $0x40] sm:$0xff] }
 0xd58   :  { %v12666_v16 = vpop.eup %12665  ;;  %12163 = vmatprep.mubr.msk.f32.mxu0 %vm93_vm1, %v77_v15 }
 0xd59   :  { %v781_v17 = vadd.f32 1.0, %v12666_v16  ;;  %12164 = vmatmul.mubr.msk.f32.gmra.mrb[8].mxu0 %vm93_vm1, %v78_v49 }
 0xd5b   :  { %12667 = vrcp.f32 %v781_v17 }
 0xd65   :  { %v12668_v18 = vpop.eup %12667 }
 0xd66   :  { %v785_v23 = vmul.f32 %v12668_v18, %v722_v29 }
 0xdc9   :  { %v788_v20 = vpop.permute.xlu1 %787 }
 0xdca   :  { %v790_v21 = vmul.f32 %v12668_v18, %v788_v20 }
 0xdcc   :  { %792 = vrot.lane.b32.xlu1 %v790_v21, %s12760_s3 }
 0xe2c   :  { %v13151_v21 = vpop.f32.mrb[8].mxu0 }
 0xe3e   :  { %v793_v24 = vpop.permute.xlu1 %792 }
 0xe3f   :  { %v13117_v13 = vadd.f32 %v793_v24, %v785_v23  ;;  %v252_v23 = vpop.f32.mrb[9].mxu0 }
 0xe41   :  { %12669 = vtanh.f32 %v13117_v13 }
 0xe4b   :  { %v12670_v25 = vpop.eup %12669 }
 0xe4c   :  { %798 = vrot.lane.b32.xlu0 %v12670_v25, %s12760_s3 }
 0xebe   :  { %v799_v27 = vpop.permute.xlu0 %798 }
 0xebf   :  { %v801_v28 = vmul.f32 %v12668_v18, %v799_v27 }
 0xec1   :  { %810 = vperm.xlu0 %12339, %v801_v28   ;;  %804 = vperm.xlu1 %12338, %v801_v28  }
 0xec5   :  { %12342 = vset.pattern.permute.xlu0 %v17036_v57  ;;  %12340 = vset.pattern.permute.xlu1 %v17034_v58 }
 0xec6   :  { %828 = vperm.xlu0 %12342, %v801_v28   ;;  %816 = vperm.xlu1 %12340, %v801_v28  }
 0xeca   :  { %12345 = vset.pattern.permute.xlu0 %v17032_v59  ;;  %12341 = vset.pattern.permute.xlu1 %v17030_v60 }
 0xecb   :  { %846 = vperm.xlu0 %12345, %v801_v28   ;;  %822 = vperm.xlu1 %12341, %v801_v28  }
 0xecf   :  { %12343 = vset.pattern.permute.xlu1 %v17028_v61  ;;  %12347 = vset.pattern.permute.xlu0 %v17026_v52 }
 0xed0   :  { %834 = vperm.xlu1 %12343, %v801_v28  }
 0xed4   :  { %12344 = vset.pattern.permute.xlu1 %v17024_v62 }
 0xed5   :  { %840 = vperm.xlu1 %12344, %v801_v28  }
 0xed9   :  { %12346 = vset.pattern.permute.xlu1 %v17022_v53 }
 0xf40   :  { %v805_v29 = vpop.permute.xlu1 %804  ;;  %v811_v36 = vpop.permute.xlu0 %810 }
 0xf41   :  { %v807_v33 = vmul.f32 %v805_v29, %v12909_v8  ;;  %v813_v34 = vmul.f32 %v811_v36, %v12913_v10 }
 0xf43   :  { %v808_v37 = vadd.f32 %v807_v33, %v248_v30 }
 0xf45   :  { %v817_v38 = vpop.permute.xlu1 %816  ;;  %v814_v39 = vadd.f32 %v813_v34, %v808_v37  ;;  %v829_v43 = vpop.permute.xlu0 %828 }
 0xf46   :  { %v819_v40 = vmul.f32 %v817_v38, %v12923_v14  ;;  %v831_v47 = vmul.f32 %v829_v43, %v12932_v22 }
 0xf48   :  { %v820_v44 = vadd.f32 %v819_v40, %v814_v39 }
 0xf4a   :  { %v823_v42 = vpop.permute.xlu1 %822  ;;  %v847_v50 = vpop.permute.xlu0 %846 }
 0xf4b   :  { %v825_v45 = vmul.f32 %v823_v42, %v12928_v19  ;;  %v849_v56 = vmul.f32 %v847_v50, %v12944_v35 }
 0xf4d   :  { %v826_v46 = vadd.f32 %v825_v45, %v820_v44 }
 0xf4f   :  { %v835_v48 = vpop.permute.xlu1 %834  ;;  %v832_v12 = vadd.f32 %v831_v47, %v826_v46 }
 0xf50   :  { %v837_v31 = vmul.f32 %v835_v48, %v12936_v26 }
 0xf52   :  { %v838_v55 = vadd.f32 %v837_v31, %v832_v12 }
 0xf54   :  { %v841_v54 = vpop.permute.xlu1 %840 }
 0xf55   :  { %v843_v51 = vmul.f32 %v841_v54, %v12941_v32 }
 0xf57   :  { %v844_v63 = vadd.f32 %v843_v51, %v838_v55 }
 0xf59   :  { %v850_v0 = vadd.f32 %v849_v56, %v844_v63 }
 0xf5b   :  { %12671 = vtanh.f32 %v850_v0  ;;  %v11690_v1 = vmul.f32 -1.442695, %v850_v0 }
 0xf5d   :  { %12673 = vpow2.f32 %v11690_v1 }
 0xf65   :  { %v12672_v41 = vpop.eup %12671 }
 0xf66   :  { %860 = vrot.lane.b32.xlu1 %v12672_v41, %s12759_s24 }
 0xf67   :  { %v12674_v2 = vpop.eup %12673 }
 0xf68   :  { %v854_v3 = vadd.f32 1.0, %v12674_v2 }
 0xf6a   :  { %12675 = vrcp.f32 %v854_v3 }
 0xf74   :  { %v12676_v6 = vpop.eup %12675 }
 0xf75   :  { %v858_v16 = vmul.f32 %v12676_v6, %v13117_v13  ;;  %v13164_v13 = vld [vmem:[%s17185_s0] ss:$0 sm:$0xff] }
 0xf76   :  { %v253_v27 = vadd.f32 %v13164_v13, %v252_v23 }
 0xfd8   :  { %v861_v9 = vpop.permute.xlu1 %860 }
 0xfd9   :  { %v863_v11 = vmul.f32 %v12676_v6, %v861_v9 }
 0xfdb   :  { %865 = vrot.lane.b32.xlu1 %v863_v11, %s12760_s3 }
0x104d   :  { %v866_v17 = vpop.permute.xlu1 %865 }
0x104e   :  { %v868_v18 = vadd.f32 %v866_v17, %v858_v16 }
0x1050   :  { %12677 = vtanh.f32 %v868_v18 }
0x105a   :  { %v12678_v20 = vpop.eup %12677 }
0x105b   :  { %871 = vrot.lane.b32.xlu0 %v12678_v20, %s12760_s3  ;;  %v258_v20 = vadd.f32 %v13164_v13, %v13151_v21 }
0x10cd   :  { %v872_v24 = vpop.permute.xlu0 %871 }
0x10ce   :  { %v874_v25 = vmul.f32 %v12676_v6, %v872_v24 }
0x10d0   :  { %883 = vperm.xlu0 %12347, %v874_v25   ;;  %877 = vperm.xlu1 %12346, %v874_v25  }
0x10d4   :  { %12350 = vset.pattern.permute.xlu0 %v17036_v57  ;;  %12348 = vset.pattern.permute.xlu1 %v17034_v58 }
0x10d5   :  { %901 = vperm.xlu0 %12350, %v874_v25   ;;  %889 = vperm.xlu1 %12348, %v874_v25  }
0x10d9   :  { %12353 = vset.pattern.permute.xlu0 %v17032_v59  ;;  %12349 = vset.pattern.permute.xlu1 %v17030_v60 }
0x10da   :  { %919 = vperm.xlu0 %12353, %v874_v25   ;;  %895 = vperm.xlu1 %12349, %v874_v25  }
0x10de   :  { %12351 = vset.pattern.permute.xlu1 %v17028_v61  ;;  %12355 = vset.pattern.permute.xlu0 %v17026_v52 }
0x10df   :  { %907 = vperm.xlu1 %12351, %v874_v25  }
0x10e3   :  { %12352 = vset.pattern.permute.xlu1 %v17024_v62 }
0x10e4   :  { %913 = vperm.xlu1 %12352, %v874_v25  }
0x10e8   :  { %12354 = vset.pattern.permute.xlu1 %v17022_v53 }
0x114f   :  { %v878_v28 = vpop.permute.xlu1 %877  ;;  %v884_v30 = vpop.permute.xlu0 %883 }
0x1150   :  { %v880_v29 = vmul.f32 %v878_v28, %v12909_v8  ;;  %v886_v36 = vmul.f32 %v884_v30, %v12913_v10 }
0x1152   :  { %v881_v33 = vadd.f32 %v880_v29, %v253_v27 }
0x1154   :  { %v890_v37 = vpop.permute.xlu1 %889  ;;  %v887_v34 = vadd.f32 %v886_v36, %v881_v33  ;;  %v902_v44 = vpop.permute.xlu0 %901 }
0x1155   :  { %v892_v38 = vmul.f32 %v890_v37, %v12923_v14  ;;  %v904_v43 = vmul.f32 %v902_v44, %v12932_v22 }
0x1157   :  { %v893_v40 = vadd.f32 %v892_v38, %v887_v34 }
0x1159   :  { %v896_v39 = vpop.permute.xlu1 %895  ;;  %v920_v12 = vpop.permute.xlu0 %919 }
0x115a   :  { %v898_v42 = vmul.f32 %v896_v39, %v12928_v19  ;;  %v922_v55 = vmul.f32 %v920_v12, %v12944_v35 }
0x115c   :  { %v899_v45 = vadd.f32 %v898_v42, %v893_v40 }
0x115e   :  { %v908_v46 = vpop.permute.xlu1 %907  ;;  %v905_v47 = vadd.f32 %v904_v43, %v899_v45 }
0x115f   :  { %v910_v48 = vmul.f32 %v908_v46, %v12936_v26 }
0x1161   :  { %v911_v50 = vadd.f32 %v910_v48, %v905_v47 }
0x1163   :  { %v914_v31 = vpop.permute.xlu1 %913 }
0x1164   :  { %v916_v54 = vmul.f32 %v914_v31, %v12941_v32 }
0x1166   :  { %v917_v51 = vadd.f32 %v916_v54, %v911_v50 }
0x1168   :  { %v923_v56 = vadd.f32 %v922_v55, %v917_v51 }
0x116a   :  { %12679 = vtanh.f32 %v923_v56  ;;  %v11691_v0 = vmul.f32 -1.442695, %v923_v56 }
0x116c   :  { %12681 = vpow2.f32 %v11691_v0  ;;  %v79_v0 = vld [vmem:[%s17179_s28 + $0x50] sm:$0xff] }
0x116d   :  { %12166 = vmatprep.mubr.msk.f32.mxu0 %vm93_vm1, %v79_v0 }
0x1174   :  { %v12680_v63 = vpop.eup %12679 }
0x1175   :  { %933 = vrot.lane.b32.xlu1 %v12680_v63, %s12759_s24 }
0x1176   :  { %v12682_v41 = vpop.eup %12681 }
0x1177   :  { %v927_v1 = vadd.f32 1.0, %v12682_v41  ;;  %v80_v41 = vld [vmem:[%s17179_s28 + $0x58] sm:$0xff] }
0x1178   :  { %12167 = vmatmul.mubr.msk.f32.gmra.mrb[10].mxu0 %vm93_vm1, %v80_v41 }
0x1179   :  { %12683 = vrcp.f32 %v927_v1  ;;  %v17038_v1 = vmov 0.0  }
0x117a   :  { %12175 = vmatprep.subr.bf16.mxu1 %v17038_v1  ;;  %12199 = vmatprep.subr.bf16.mxu0 %v17038_v1 }
0x117b   :  { %12179 = vmatprep.mubr.msk.bf16.mxu1 %vm12770_vm2, %v17038_v1 }
0x1183   :  { %v12684_v2 = vpop.eup %12683 }
0x1184   :  { %v931_v9 = vmul.f32 %v12684_v2, %v868_v18 }
0x11e7   :  { %v934_v3 = vpop.permute.xlu1 %933 }
0x11e8   :  { %v936_v6 = vmul.f32 %v12684_v2, %v934_v3 }
0x11ea   :  { %938 = vrot.lane.b32.xlu1 %v936_v6, %s12760_s3  ;;  %v12411_v6 = vld [vmem:[%s17192_s27 + $0x8] sm:$0xff]  }
0x125c   :  { %v939_v11 = vpop.permute.xlu1 %938 }
0x125d   :  { %v13177_v15 = vadd.f32 %v939_v11, %v931_v9 }
0x125f   :  { %12685 = vtanh.f32 %v13177_v15 }
0x1269   :  { %v12686_v49 = vpop.eup %12685 }
0x126a   :  { %944 = vrot.lane.b32.xlu0 %v12686_v49, %s12760_s3  ;;  %v1459_v49 = vld [vmem:[%s17193_s30] sm:$0xff] }
0x12dc   :  { %v945_v16 = vpop.permute.xlu0 %944 }
0x12dd   :  { %v947_v17 = vmul.f32 %v12684_v2, %v945_v16  ;;  %v12410_v2 = vld [vmem:[%s17192_s27] sm:$0xff]   ;;  %v1460_v16 = vld [vmem:[%s17193_s30 + $0x8] sm:$0xff] }
0x12de   :  { %12176 = vmatpush3.bf16.msra.mxu1 %v12410_v2 }
0x12df   :  { %956 = vperm.xlu0 %12355, %v947_v17   ;;  %950 = vperm.xlu1 %12354, %v947_v17  }
0x12e0   :  { %12177 = vmatprep.subr.bf16.mxu1 %v17038_v1 }
0x12e2   :  { %12178 = vmatpush3.bf16.msra.mxu1 %v12411_v6 }
0x12e3   :  { %12358 = vset.pattern.permute.xlu0 %v17036_v57  ;;  %12356 = vset.pattern.permute.xlu1 %v17034_v58 }
0x12e4   :  { %974 = vperm.xlu0 %12358, %v947_v17   ;;  %962 = vperm.xlu1 %12356, %v947_v17  }
0x12e8   :  { %12361 = vset.pattern.permute.xlu0 %v17032_v59  ;;  %12357 = vset.pattern.permute.xlu1 %v17030_v60 }
0x12e9   :  { %992 = vperm.xlu0 %12361, %v947_v17   ;;  %968 = vperm.xlu1 %12357, %v947_v17  }
0x12ed   :  { %12359 = vset.pattern.permute.xlu1 %v17028_v61  ;;  %12363 = vset.pattern.permute.xlu0 %v17026_v52 }
0x12ee   :  { %980 = vperm.xlu1 %12359, %v947_v17  }
0x12f2   :  { %12360 = vset.pattern.permute.xlu1 %v17024_v62 }
0x12f3   :  { %986 = vperm.xlu1 %12360, %v947_v17   ;;  %v1461_v17 = vld [vmem:[%s17193_s30 + $0x10] sm:$0xff] }
0x12f7   :  { %12362 = vset.pattern.permute.xlu1 %v17022_v53 }
0x135e   :  { %v951_v18 = vpop.permute.xlu1 %950  ;;  %v957_v24 = vpop.permute.xlu0 %956 }
0x135f   :  { %v953_v23 = vmul.f32 %v951_v18, %v12909_v8  ;;  %v959_v27 = vmul.f32 %v957_v24, %v12913_v10  ;;  %v1462_v18 = vld [vmem:[%s17193_s30 + $0x18] sm:$0xff]  ;;  %v1463_v24 = vld [vmem:[%s17193_s30 + $0x20] sm:$0xff] }
0x1361   :  { %v954_v25 = vadd.f32 %v953_v23, %v258_v20  ;;  %v1469_v20 = vpack.c.bf16 %v1462_v18, %v1461_v17 }
0x1363   :  { %v963_v28 = vpop.permute.xlu1 %962  ;;  %v960_v29 = vadd.f32 %v959_v27, %v954_v25  ;;  %v975_v34 = vpop.permute.xlu0 %974  ;;  %v1464_v25 = vld [vmem:[%s17193_s30 + $0x28] sm:$0xff] }
0x1364   :  { %v965_v30 = vmul.f32 %v963_v28, %v12923_v14  ;;  %v977_v39 = vmul.f32 %v975_v34, %v12932_v22  ;;  %v1470_v27 = vpack.c.bf16 %v1464_v25, %v1463_v24  ;;  %v1465_v28 = vld [vmem:[%s17193_s30 + $0x30] sm:$0xff] }
0x1366   :  { %v966_v36 = vadd.f32 %v965_v30, %v960_v29  ;;  %v1466_v29 = vld [vmem:[%s17193_s30 + $0x38] sm:$0xff] }
0x1367   :  { %v1471_v30 = vpack.c.bf16 %v1466_v29, %v1465_v28 }
0x1368   :  { %v969_v33 = vpop.permute.xlu1 %968  ;;  %v993_v44 = vpop.permute.xlu0 %992 }
0x1369   :  { %v971_v37 = vmul.f32 %v969_v33, %v12928_v19  ;;  %v995_v47 = vmul.f32 %v993_v44, %v12944_v35  ;;  %v1467_v33 = vld [vmem:[%s17193_s30 + $0x40] sm:$0xff]  ;;  %v12415_v44 = vld [vmem:[%s17002_s8 + $0x18] sm:$0xff]  }
0x136b   :  { %v972_v38 = vadd.f32 %v971_v37, %v966_v36  ;;  %v1472_v36 = vpack.c.bf16 %v1467_v33, %v1467_v33  ;;  %v13265_v37 = vpop.f32.mrb[10].mxu0 }
0x136c   :  { %v13267_v34 = vpop.f32.mrb[11].mxu0 }
0x136d   :  { %v981_v40 = vpop.permute.xlu1 %980  ;;  %v978_v21 = vadd.f32 %v977_v39, %v972_v38 }
0x136e   :  { %v983_v42 = vmul.f32 %v981_v40, %v12936_v26  ;;  %v12412_v40 = vld [vmem:[%s17002_s8] sm:$0xff]  }
0x136f   :  { %12200 = vmatpush3.bf16.msra.mxu0 %v12412_v40 }
0x1370   :  { %v984_v43 = vadd.f32 %v983_v42, %v978_v21  ;;  %v12413_v21 = vld [vmem:[%s17002_s8 + $0x8] sm:$0xff]   ;;  %12201 = vmatprep.subr.bf16.mxu0 %v17038_v1  ;;  %v12414_v42 = vld [vmem:[%s17002_s8 + $0x10] sm:$0xff]  }
0x1372   :  { %v987_v45 = vpop.permute.xlu1 %986 }
0x1373   :  { %v989_v46 = vmul.f32 %v987_v45, %v12941_v32  ;;  %12202 = vmatpush3.bf16.msra.mxu0 %v12413_v21  ;;  %v12416_v45 = vld [vmem:[%s17002_s8 + $0x20] sm:$0xff]  }
0x1374   :  { %12203 = vmatprep.subr.bf16.mxu0 %v17038_v1 }
0x1375   :  { %v990_v48 = vadd.f32 %v989_v46, %v984_v43  ;;  %v12771_v43 = vmov 1966171168  }
0x1376   :  { %v1629_v46 = vunpack.c.l.s4 %v12771_v43 }
0x1377   :  { %v996_v12 = vadd.f32 %v995_v47, %v990_v48  ;;  %12204 = vmatpush3.bf16.msra.mxu0 %v12414_v42  ;;  %v13300_v48 = vld [vmem:[%s17003_s6] ss:$0 sm:$0xff] }
0x1378   :  { %12205 = vmatprep.subr.bf16.mxu0 %v17038_v1 }
0x1379   :  { %12687 = vtanh.f32 %v996_v12  ;;  %v11692_v50 = vmul.f32 -1.442695, %v996_v12  ;;  %v1630_v12 = vunpack.c.0.s8 %v1629_v46 }
0x137b   :  { %12689 = vpow2.f32 %v11692_v50  ;;  %12206 = vmatpush3.bf16.msra.mxu0 %v12415_v44  ;;  %v13311_v0 = vsub.s32 %v1630_v12, %v12897_v4 }
0x137c   :  { %12207 = vmatprep.subr.bf16.mxu0 %v17038_v1 }
0x137f   :  { %12208 = vmatpush3.bf16.msra.mxu0 %v12416_v45 }
0x1380   :  { %12209 = vmatprep.subr.bf16.mxu0 %v17038_v1 }
0x1383   :  { %v12688_v31 = vpop.eup %12687 }
0x1384   :  { %1006 = vrot.lane.b32.xlu1 %v12688_v31, %s12759_s24 }
0x1385   :  { %v12690_v54 = vpop.eup %12689 }
0x1386   :  { %v1000_v55 = vadd.f32 1.0, %v12690_v54  ;;  %v13306_v54 = vld [vmem:[%s17004_s7] ss:$0 sm:$0xff] }
0x1388   :  { %12691 = vrcp.f32 %v1000_v55 }
0x1392   :  { %v12692_v51 = vpop.eup %12691 }
0x1393   :  { %v1004_v3 = vmul.f32 %v12692_v51, %v13177_v15  ;;  %v1468_v15 = vpack.c.bf16 %v1460_v16, %v1459_v49 }
0x1395   :  { %12180 = vmatmul.mubr.msk.bf16.vlgmr.msra.gmra.mrb[0].mxu1 %vm1489_vm3, %v1468_v15 }
0x1396   :  { %12183 = vmatprep.mubr.msk.bf16.mxu1 %vm12770_vm2, %v17038_v1 }
0x139d   :  { %12184 = vmatmul.mubr.msk.bf16.gmra.mrb[4].mxu1 %vm1489_vm3, %v1469_v20 }
0x139e   :  { %12187 = vmatprep.mubr.msk.bf16.mxu1 %vm12770_vm2, %v17038_v1 }
0x13a5   :  { %12188 = vmatmul.mubr.msk.bf16.gmra.mrb[8].mxu1 %vm1489_vm3, %v1470_v27 }
0x13a6   :  { %12191 = vmatprep.mubr.msk.bf16.mxu1 %vm12770_vm2, %v17038_v1 }
0x13ad   :  { %12192 = vmatmul.mubr.msk.bf16.gmra.mrb[12].mxu1 %vm1489_vm3, %v1471_v30 }
0x13ae   :  { %12195 = vmatprep.mubr.msk.bf16.mxu1 %vm12770_vm2, %v17038_v1 }
0x13b5   :  { %12196 = vmatmul.mubr.msk.bf16.gmra.mrb[16].mxu1 %vm1489_vm3, %v1472_v36 }
0x13f6   :  { %v1007_v56 = vpop.permute.xlu1 %1006 }
0x13f7   :  { %v1009_v63 = vmul.f32 %v12692_v51, %v1007_v56 }
0x13f9   :  { %1011 = vrot.lane.b32.xlu1 %v1009_v63, %s12760_s3 }
0x1468   :  { %v1539_v47 = vpop.f32.mrb[0].mxu1 }
0x1469   :  { %v1584_v31 = vmul.f32 %v13300_v48, %v1539_v47  ;;  %v12181_v50 = vpop.f32.mrb[1].mxu1 }
0x146a   :  { %v1542_v55 = vpop.f32.mrb[2].mxu1 }
0x146b   :  { %v1012_v9 = vpop.permute.xlu1 %1011  ;;  %v1585_v56 = vmul.f32 %v13300_v48, %v1542_v55  ;;  %v12182_v63 = vpop.f32.mrb[3].mxu1 }
0x146c   :  { %v13219_v11 = vadd.f32 %v1012_v9, %v1004_v3 }
0x146d   :  { %v1601_v2 = vadd.f32 %v13306_v54, %v1585_v56 }
0x146e   :  { %12693 = vtanh.f32 %v13219_v11 }
0x146f   :  { %v1610_v9 = vmax.f32 %v1601_v2, 0.0 }
0x1470   :  { %v1547_v49 = vpop.f32.mrb[4].mxu1 }
0x1471   :  { %v1676_v18 = vcombine.high %v1610_v9, %v1610_v9  ;;  %v12185_v20 = vpop.f32.mrb[5].mxu1  ;;  %v1586_v28 = vmul.f32 %v13300_v48, %v1547_v49 }
0x1472   :  { %v1550_v4 = vpop.f32.mrb[6].mxu1 }
0x1473   :  { %v12186_v29 = vpop.f32.mrb[7].mxu1  ;;  %v1690_v30 = vrot.slane %v1676_v18, %v13311_v0  ;;  %v1602_v45 = vadd.f32 %v13306_v54, %v1586_v28  ;;  %v1587_v49 = vmul.f32 %v13300_v48, %v1550_v4 }
0x1475   :  { %v1692_v40 = vcombine.high %v1690_v30, %v1690_v30  ;;  %v13344_v43 = vrot.slane %v1690_v30, %v13311_v0  ;;  %v1611_v2 = vmax.f32 %v1602_v45, 0.0  ;;  %v1603_v28 = vadd.f32 %v13306_v54, %v1587_v49 }
0x1477   :  { %17194 = vst [vmem:[#allocation12_spill] sm:$0xff] %v13344_v43  ;;  %v13354_v56 = vrot.slane %v1692_v40, %v13311_v0  ;;  %v1725_v18 = vcombine.high %v1611_v2, %v1611_v2 }
0x1478   :  { %v12694_v23 = vpop.eup %12693  ;;  %v1555_v47 = vpop.f32.mrb[8].mxu1 }
0x1479   :  { %1017 = vrot.lane.b32.xlu0 %v12694_v23, %s12760_s3  ;;  %v1683_v23 = vrot.slane %v1610_v9, %v13311_v0  ;;  %v12189_v50 = vpop.f32.mrb[9].mxu1  ;;  %17195 = vst [vmem:[#allocation13_spill] sm:$0xff] %v13354_v56  ;;  %v1739_v30 = vrot.slane %v1725_v18, %v13311_v0 }
0x147a   :  { %v13356_v63 = vpop.f32.mrb[10].mxu1 }
0x147b   :  { %v1691_v33 = vcombine.high %v1683_v23, %v1683_v23  ;;  %v13340_v44 = vrot.slane %v1683_v23, %v13311_v0  ;;  %v13375_v23 = vcombine.high %v13354_v56, %v13354_v56 }
0x147d   :  { %v13347_v46 = vrot.slane %v1691_v33, %v13311_v0  ;;  %17197 = vst [vmem:[#allocation15_spill] sm:$0xff] %v13375_v23 }
0x147f   :  { %v13368_v9 = vcombine.high %v13347_v46, %v13347_v46 }
0x1481   :  { %v2204_v4 = vcombine.low %v13368_v9, %v13344_v43 }
0x14eb   :  { %v1018_v38 = vpop.permute.xlu0 %1017 }
0x14ec   :  { %v1020_v39 = vmul.f32 %v12692_v51, %v1018_v38  ;;  %v1600_v51 = vadd.f32 %v13306_v54, %v1584_v31 }
0x14ee   :  { %1029 = vperm.xlu0 %12363, %v1020_v39   ;;  %1023 = vperm.xlu1 %12362, %v1020_v39   ;;  %v1609_v41 = vmax.f32 %v1600_v51, 0.0 }
0x14f0   :  { %v1627_v3 = vcombine.high %v1609_v41, %v1609_v41  ;;  %v1634_v6 = vrot.slane %v1609_v41, %v13311_v0  ;;  %v13360_v41 = vcombine.high %v13340_v44, %v13340_v44 }
0x14f2   :  { %12366 = vset.pattern.permute.xlu0 %v17036_v57  ;;  %12364 = vset.pattern.permute.xlu1 %v17034_v58  ;;  %v1641_v16 = vrot.slane %v1627_v3, %v13311_v0  ;;  %v1642_v15 = vcombine.high %v1634_v6, %v1634_v6  ;;  %v13317_v17 = vrot.slane %v1634_v6, %v13311_v0  ;;  %v12190_v3 = vpop.f32.mrb[11].mxu1 }
0x14f3   :  { %1047 = vperm.xlu0 %12366, %v1020_v39   ;;  %1035 = vperm.xlu1 %12364, %v1020_v39   ;;  %v13364_v6 = vcombine.high %v13344_v43, %v13344_v43  ;;  %v2203_v29 = vcombine.low %v13347_v46, %v13360_v41  ;;  %v13389_v40 = vpop.f32.mrb[12].mxu1  ;;  %v1741_v3 = vcombine.high %v1739_v30, %v1739_v30 }
0x14f4   :  { %v1643_v24 = vcombine.high %v1641_v16, %v1641_v16  ;;  %v13321_v25 = vrot.slane %v1641_v16, %v13311_v0  ;;  %v13324_v27 = vrot.slane %v1642_v15, %v13311_v0  ;;  %v2195_v15 = vrot.slane %v13340_v44, %v13311_v0  ;;  %v12193_v45 = vpop.f32.mrb[13].mxu1 }
0x14f5   :  { %17196 = vst [vmem:[#allocation14_spill] sm:$0xff] %v13364_v6  ;;  %v2205_v33 = vcombine.low %v13354_v56, %v13364_v6 }
0x14f6   :  { %v13329_v36 = vrot.slane %v1643_v24, %v13311_v0  ;;  %v2140_v38 = vcombine.low %v13317_v17, %v13324_v27  ;;  %v1732_v24 = vrot.slane %v1611_v2, %v13311_v0  ;;  %v2213_v2 = vrot.slane %v2203_v29, %v13311_v0 }
0x14f7   :  { %12369 = vset.pattern.permute.xlu0 %v17032_v59  ;;  %12365 = vset.pattern.permute.xlu1 %v17030_v60 }
0x14f8   :  { %1065 = vperm.xlu0 %12369, %v1020_v39   ;;  %1041 = vperm.xlu1 %12365, %v1020_v39   ;;  %v2142_v21 = vcombine.low %v13321_v25, %v13329_v36  ;;  %v11709_v42 = vcombine.high %v13321_v25, %v13329_v36  ;;  %v2150_v12 = vrot.slane %v2140_v38, %v13311_v0 }
0x14f9   :  { %v13387_v38 = vrot.slane %v1732_v24, %v13311_v0 }
0x14fa   :  { %v2164_v55 = vrot.slane %v2142_v21, %v13311_v0  ;;  %v2171_v51 = vrot.slane %v11709_v42, %v13311_v0  ;;  %v2202_v21 = vrot.slane %v2195_v15, %v13311_v0  ;;  %v1740_v42 = vcombine.high %v1732_v24, %v1732_v24 }
0x14fb   :  { %v2206_v50 = vcombine.low %v13375_v23, %v13387_v38  ;;  %v2220_v15 = vrot.slane %v2204_v4, %v13311_v0  ;;  %v2227_v24 = vrot.slane %v2205_v33, %v13311_v0 }
0x14fc   :  { %12367 = vset.pattern.permute.xlu1 %v17028_v61  ;;  %12371 = vset.pattern.permute.xlu0 %v17026_v52  ;;  %v2173_v20 = vcombine.low %v2164_v55, %v2171_v51  ;;  %v13396_v51 = vpop.f32.mrb[14].mxu1 }
0x14fd   :  { %1053 = vperm.xlu1 %12367, %v1020_v39   ;;  %v12194_v18 = vpop.f32.mrb[15].mxu1 }
0x1501   :  { %12368 = vset.pattern.permute.xlu1 %v17024_v62  ;;  %v13410_v62 = vrot.slane %v1739_v30, %v13311_v0 }
0x1502   :  { %1059 = vperm.xlu1 %12368, %v1020_v39   ;;  %v11708_v39 = vcombine.high %v13317_v17, %v13324_v27 }
0x1504   :  { %v2157_v31 = vrot.slane %v11708_v39, %v13311_v0  ;;  %v1612_v39 = vmax.f32 %v1603_v28, 0.0  ;;  %v13405_v28 = vrot.slane %v1740_v42, %v13311_v0 }
0x1506   :  { %12370 = vset.pattern.permute.xlu1 %v17022_v53  ;;  %v2172_v16 = vcombine.low %v2150_v12, %v2157_v31  ;;  %v2187_v31 = vrot.slane %v2173_v20, %v13311_v0  ;;  %v1774_v55 = vcombine.high %v1612_v39, %v1612_v39  ;;  %v1781_v49 = vrot.slane %v1612_v39, %v13311_v0 }
0x1507   :  { %v1588_v20 = vmul.f32 %v13300_v48, %v1555_v47  ;;  %v2661_v53 = vsel %vm2660_vm4, %v2202_v21, 0.0  ;;  %v13413_v39 = vrot.slane %v1741_v3, %v13311_v0  ;;  %v2258_v4 = vrot.slane %v13405_v28, %v13311_v0  ;;  %v13421_v21 = vpop.f32.mrb[16].mxu1 }
0x1508   :  { %v2180_v12 = vrot.slane %v2172_v16, %v13311_v0  ;;  %v2234_v16 = vrot.slane %v2206_v50, %v13311_v0  ;;  %v1788_v29 = vrot.slane %v1774_v55, %v13311_v0  ;;  %v1789_v33 = vcombine.high %v1781_v49, %v1781_v49  ;;  %v12197_v55 = vpop.f32.mrb[17].mxu1 }
0x1509   :  { %v2235_v50 = vcombine.low %v2213_v2, %v2220_v15  ;;  %v1574_v52 = vpop.f32.mrb[18].mxu1  ;;  %v2265_v2 = vrot.slane %v2258_v4, %v13311_v0  ;;  %v11710_v15 = vcombine.high %v13387_v38, %v13405_v28 }
0x150a   :  { %v2188_v45 = vcombine.low %v2180_v12, %v2187_v31  ;;  %v2236_v47 = vcombine.low %v2227_v24, %v2234_v16  ;;  %v13418_v42 = vrot.slane %v1788_v29, %v13311_v0  ;;  %v1604_v12 = vadd.f32 %v13306_v54, %v1588_v20  ;;  %v12198_v16 = vpop.f32.mrb[19].mxu1 }
0x150b   :  { %v13424_v31 = vrot.slane %v1781_v49, %v13311_v0  ;;  %v13427_v30 = vrot.slane %v1789_v33, %v13311_v0  ;;  %v1790_v18 = vcombine.high %v1788_v29, %v1788_v29  ;;  %v2267_v24 = vcombine.low %v13410_v62, %v13413_v39 }
0x150c   :  { %17198 = vst [vmem:[#allocation16_spill] sm:$0xff] %v13418_v42  ;;  %v2662_v3 = vadd.f32 %v2661_v53, %v2188_v45  ;;  %v2243_v20 = vrot.slane %v2235_v50, %v13311_v0  ;;  %v2250_v49 = vrot.slane %v2236_v47, %v13311_v0  ;;  %v13438_v33 = vcombine.high %v13418_v42, %v13418_v42 }
0x150d   :  { %17199 = vst [vmem:[#allocation17_spill] sm:$0xff] %v13424_v31  ;;  %17200 = vst [vmem:[#allocation18_spill] sm:$0xff] %v13427_v30  ;;  %v1613_v53 = vmax.f32 %v1604_v12, 0.0  ;;  %v11711_v52 = vcombine.high %v13410_v62, %v13413_v39  ;;  %v13444_v45 = vcombine.high %v13427_v30, %v13427_v30  ;;  %v2269_v29 = vcombine.low %v13424_v31, %v13427_v30 }
0x150e   :  { %17201 = vst [vmem:[#allocation19_spill] sm:$0xff] %v13438_v33  ;;  %v2663_v4 = vrot.slane %v2662_v3, 4  ;;  %v13449_v50 = vrot.slane %v1790_v18, %v13311_v0  ;;  %v2276_v55 = vrot.slane %v11710_v15, %v13311_v0  ;;  %v2283_v16 = vrot.slane %v2267_v24, %v13311_v0 }
0x150f   :  { %17202 = vst [vmem:[#allocation20_spill] sm:$0xff] %v13444_v45  ;;  %v1823_v47 = vcombine.high %v1613_v53, %v1613_v53  ;;  %v2669_v12 = vsel %vm2660_vm4, %v2265_v2, 0.0  ;;  %v1830_v61 = vrot.slane %v1613_v53, %v13311_v0  ;;  %v2251_v60 = vcombine.low %v2243_v20, %v2250_v49 }
0x1510   :  { %17203 = vst [vmem:[#allocation21_spill] sm:$0xff] %v13449_v50  ;;  %v13457_v59 = vcombine.high %v13424_v31, %v13424_v31  ;;  %v2330_v58 = vcombine.low %v13449_v50, %v13438_v33  ;;  %v2290_v57 = vrot.slane %v11711_v52, %v13311_v0  ;;  %v2297_v15 = vrot.slane %v2269_v29, %v13311_v0 }
0x1511   :  { %v1837_v18 = vrot.slane %v1823_v47, %v13311_v0  ;;  %v2329_v24 = vcombine.low %v13444_v45, %v13418_v42  ;;  %v1838_v2 = vcombine.high %v1830_v61, %v1830_v61  ;;  %v263_v20 = vadd.f32 %v13164_v13, %v13267_v34 }
0x1512   :  { %17204 = vst [vmem:[#allocation22_spill] sm:$0xff] %v13457_v59  ;;  %v13470_v49 = vcombine.high %v13449_v50, %v13449_v50  ;;  %v13473_v1 = vrot.slane %v1830_v61, %v13311_v0  ;;  %v2664_v7 = vadd.f32 %v2663_v4, %v2662_v3  ;;  %v2298_v52 = vcombine.low %v2276_v55, %v2283_v16 }
0x1513   :  { %v1839_v53 = vcombine.high %v1837_v18, %v1837_v18  ;;  %v13476_v29 = vrot.slane %v1838_v2, %v13311_v0  ;;  %v1589_v33 = vmul.f32 %v13300_v48, %v13356_v63  ;;  %v2670_v13 = vadd.f32 %v2669_v12, %v2251_v60 }
0x1514   :  { %17205 = vst [vmem:[#allocation23_spill] sm:$0xff] %v13470_v49  ;;  %17206 = vst [vmem:[#allocation24_spill] sm:$0xff] %v13473_v1  ;;  %v2321_v34 = vrot.slane %v13457_v59, %v13311_v0  ;;  %v2346_v50 = vrot.slane %v2330_v58, %v13311_v0  ;;  %v2299_v61 = vcombine.low %v2290_v57, %v2297_v15  ;;  %v2665_v58 = vrot.slane %v2664_v7, 2 }
0x1515   :  { %17207 = vst [vmem:[#allocation25_spill] sm:$0xff] %v13476_v29  ;;  %v2339_v23 = vrot.slane %v2329_v24, %v13311_v0  ;;  %v13486_v3 = vrot.slane %v1837_v18, %v13311_v0  ;;  %v13490_v4 = vcombine.high %v13473_v1, %v13473_v1  ;;  %v13493_v55 = vrot.slane %v1839_v53, %v13311_v0 }
0x1516   :  { %v13497_v60 = vcombine.high %v13476_v29, %v13476_v29  ;;  %v2331_v57 = vcombine.low %v13470_v49, %v13473_v1  ;;  %v1605_v12 = vadd.f32 %v13306_v54, %v1589_v33  ;;  %v2328_v24 = vrot.slane %v2321_v34, %v13311_v0 }
0x1517   :  { %17208 = vst [vmem:[#allocation26_spill] sm:$0xff] %v13490_v4  ;;  %v2332_v16 = vcombine.low %v13476_v29, %v13490_v4  ;;  %v2313_v53 = vrot.slane %v2299_v61, %v13311_v0  ;;  %v11712_v34 = vcombine.high %v13486_v3, %v13493_v55 }
0x1518   :  { %17209 = vst [vmem:[#allocation27_spill] sm:$0xff] %v13497_v60  ;;  %v2353_v2 = vrot.slane %v2331_v57, %v13311_v0  ;;  %v2384_v33 = vrot.slane %v13497_v60, %v13311_v0  ;;  %v1614_v57 = vmax.f32 %v1605_v12, 0.0 }
0x1519   :  { %v2360_v59 = vrot.slane %v2332_v16, %v13311_v0 }
0x151a   :  { %v1872_v60 = vcombine.high %v1614_v57, %v1614_v57 }
0x151b   :  { %v2362_v29 = vcombine.low %v2353_v2, %v2360_v59  ;;  %v1879_v59 = vrot.slane %v1614_v57, %v13311_v0 }
0x156d   :  { %v1024_v47 = vpop.permute.xlu1 %1023  ;;  %v1030_v31 = vpop.permute.xlu0 %1029 }
0x156e   :  { %v1026_v30 = vmul.f32 %v1024_v47, %v12909_v8  ;;  %v1032_v18 = vmul.f32 %v1030_v31, %v12913_v10  ;;  %v2361_v47 = vcombine.low %v2339_v23, %v2346_v50  ;;  %v2392_v31 = vcombine.low %v13486_v3, %v13493_v55 }
0x156f   :  { %v2677_v23 = vsel %vm2660_vm4, %v2328_v24, 0.0  ;;  %v1590_v50 = vmul.f32 %v13300_v48, %v13389_v40  ;;  %v1886_v40 = vrot.slane %v1872_v60, %v13311_v0  ;;  %v1887_v24 = vcombine.high %v1879_v59, %v1879_v59 }
0x1570   :  { %v1027_v63 = vadd.f32 %v1026_v30, %v263_v20  ;;  %v2671_v30 = vrot.slane %v2670_v13, 4  ;;  %v2306_v20 = vrot.slane %v2298_v52, %v13311_v0  ;;  %v13517_v52 = vadd.f32 %v2665_v58, %v2664_v7 }
0x1571   :  { %v2391_v7 = vrot.slane %v2384_v33, %v13311_v0  ;;  %v2376_v58 = vrot.slane %v2362_v29, %v13311_v0  ;;  %v13538_v33 = vrot.slane %v1886_v40, %v13311_v0  ;;  %v13543_v60 = vrot.slane %v1887_v24, %v13311_v0 }
0x1572   :  { %v1036_v15 = vpop.permute.xlu1 %1035  ;;  %v1033_v6 = vadd.f32 %v1032_v18, %v1027_v63  ;;  %v13519_v61 = vadd.f32 %v2671_v30, %v2670_v13  ;;  %v1048_v63 = vpop.permute.xlu0 %1047  ;;  %v2314_v18 = vcombine.low %v2306_v20, %v2313_v53  ;;  %v2402_v13 = vrot.slane %v2392_v31, %v13311_v0 }
0x1573   :  { %v1038_v4 = vmul.f32 %v1036_v15, %v12923_v14  ;;  %v2369_v15 = vrot.slane %v2361_v47, %v13311_v0  ;;  %v2409_v30 = vrot.slane %v11712_v34, %v13311_v0  ;;  %v13533_v53 = vrot.slane %v1879_v59, %v13311_v0  ;;  %17210 = vst [vmem:[#allocation28_spill] sm:$0xff] %v13538_v33 }
0x1574   :  { %v1606_v47 = vadd.f32 %v13306_v54, %v1590_v50  ;;  %v1050_v31 = vmul.f32 %v1048_v63, %v12932_v22  ;;  %v2678_v57 = vadd.f32 %v2677_v23, %v2314_v18  ;;  %17211 = vst [vmem:[#allocation29_spill] sm:$0xff] %v13543_v60  ;;  %v2685_v50 = vsel %vm2660_vm4, %v2391_v7, 0.0 }
0x1575   :  { %v1039_v2 = vadd.f32 %v1038_v4, %v1033_v6  ;;  %v1888_v4 = vcombine.high %v1886_v40, %v1886_v40  ;;  %v2377_v59 = vcombine.low %v2369_v15, %v2376_v58  ;;  %v2394_v40 = vcombine.low %v13533_v53, %v13543_v60 }
0x1576   :  { %v11713_v63 = vcombine.high %v13533_v53, %v13543_v60  ;;  %v13556_v18 = vcombine.high %v13538_v33, %v13538_v33  ;;  %v2447_v15 = vrot.slane %v13538_v33, %v13311_v0  ;;  %v1591_v7 = vmul.f32 %v13300_v48, %v13396_v51 }
0x1577   :  { %v1042_v16 = vpop.permute.xlu1 %1041  ;;  %v13552_v23 = vrot.slane %v1888_v4, %v13311_v0  ;;  %v2679_v58 = vrot.slane %v2678_v57, 4 }
0x1578   :  { %v1044_v12 = vmul.f32 %v1042_v16, %v12928_v19  ;;  %v1066_v16 = vpop.permute.xlu0 %1065  ;;  %17213 = vst [vmem:[#allocation31_spill] sm:$0xff] %v13556_v18  ;;  %v2423_v24 = vrot.slane %v11713_v63, %v13311_v0 }
0x1579   :  { %17212 = vst [vmem:[#allocation30_spill] sm:$0xff] %v13552_v23 }
0x157a   :  { %v1045_v20 = vadd.f32 %v1044_v12, %v1039_v2  ;;  %v2424_v2 = vcombine.low %v2402_v13, %v2409_v30  ;;  %v1615_v12 = vmax.f32 %v1606_v47, 0.0  ;;  %v1068_v13 = vmul.f32 %v1066_v16, %v12944_v35 }
0x157b   :  { %v2416_v30 = vrot.slane %v2394_v40, %v13311_v0  ;;  %v2686_v47 = vadd.f32 %v2685_v50, %v2377_v59  ;;  %v2455_v16 = vcombine.low %v13552_v23, %v13556_v18  ;;  %v13573_v40 = vcombine.high %v13552_v23, %v13552_v23 }
0x157c   :  { %v1054_v29 = vpop.permute.xlu1 %1053  ;;  %v1051_v6 = vadd.f32 %v1050_v31, %v1045_v20  ;;  %v2432_v4 = vrot.slane %v2424_v2, %v13311_v0  ;;  %v2454_v31 = vrot.slane %v2447_v15, %v13311_v0  ;;  %v1928_v51 = vrot.slane %v1615_v12, %v13311_v0 }
0x157d   :  { %v1056_v1 = vmul.f32 %v1054_v29, %v12936_v26  ;;  %v1921_v29 = vcombine.high %v1615_v12, %v1615_v12  ;;  %v2425_v49 = vcombine.low %v2416_v30, %v2423_v24  ;;  %17214 = vst [vmem:[#allocation32_spill] sm:$0xff] %v13573_v40  ;;  %v1607_v2 = vadd.f32 %v13306_v54, %v1591_v7 }
0x157e   :  { %v13581_v15 = vadd.f32 %v2679_v58, %v2678_v57  ;;  %v2693_v12 = vsel %vm2660_vm4, %v2454_v31, 0.0  ;;  %v2465_v31 = vrot.slane %v2455_v16, %v13311_v0  ;;  %v12418_v16 = vld [vmem:[%s17002_s8 + $0x30] sm:$0xff]  }
0x157f   :  { %v1057_v34 = vadd.f32 %v1056_v1, %v1051_v6  ;;  %v1935_v59 = vrot.slane %v1921_v29, %v13311_v0  ;;  %v2439_v63 = vrot.slane %v2425_v49, %v13311_v0  ;;  %v1936_v1 = vcombine.high %v1928_v51, %v1928_v51 }
0x1580   :  { %v13579_v6 = vrot.slane %v1928_v51, %v13311_v0  ;;  %v1616_v29 = vmax.f32 %v1607_v2, 0.0 }
0x1581   :  { %v1060_v20 = vpop.permute.xlu1 %1059  ;;  %v1937_v30 = vcombine.high %v1935_v59, %v1935_v59  ;;  %v13585_v24 = vrot.slane %v1935_v59, %v13311_v0  ;;  %v13593_v49 = vrot.slane %v1936_v1, %v13311_v0  ;;  %v81_v59 = vld [vmem:[%s17179_s28 + $0x60] sm:$0xff] }
0x1582   :  { %v1062_v33 = vmul.f32 %v1060_v20, %v12941_v32  ;;  %17215 = vst [vmem:[#allocation33_spill] sm:$0xff] %v13579_v6  ;;  %v12417_v20 = vld [vmem:[%s17002_s8 + $0x28] sm:$0xff]   ;;  %v2456_v58 = vcombine.low %v13573_v40, %v13579_v6  ;;  %12169 = vmatprep.mubr.msk.f32.mxu0 %vm93_vm1, %v81_v59  ;;  %v1970_v18 = vcombine.high %v1616_v29, %v1616_v29 }
0x1583   :  { %17216 = vst [vmem:[#allocation34_spill] sm:$0xff] %v13593_v49  ;;  %v13600_v57 = vrot.slane %v1937_v30, %v13311_v0  ;;  %12210 = vmatpush3.bf16.msra.mxu0 %v12417_v20  ;;  %v13608_v51 = vcombine.high %v13593_v49, %v13593_v49  ;;  %v83_v30 = vld [vmem:[%s17179_s28 + $0x70] sm:$0xff]  ;;  %v17220_v20 = vrot.slane %v13517_v52, 1 }
0x1584   :  { %v1063_v50 = vadd.f32 %v1062_v33, %v1057_v34  ;;  %v2440_v33 = vcombine.low %v2432_v4, %v2439_v63  ;;  %v13597_v34 = vcombine.high %v13579_v6, %v13579_v6  ;;  %v17219_v63 = vmov 0.0  }
0x1585   :  { %17218 = vst [vmem:[#allocation36_spill] sm:$0xff] %v13608_v51  ;;  %12211 = vmatprep.subr.bf16.mxu0 %v17219_v63  ;;  %v2472_v1 = vrot.slane %v2456_v58, %v13311_v0  ;;  %v17221_v6 = vrot.slane %v13519_v61, 2  ;;  %v2458_v58 = vcombine.low %v13608_v51, %v13585_v24 }
0x1586   :  { %v13590_v7 = vadd.f32 %v1068_v13, %v1063_v50  ;;  %17217 = vst [vmem:[#allocation35_spill] sm:$0xff] %v13597_v34  ;;  %v2687_v13 = vrot.slane %v2686_v47, 4  ;;  %v2694_v4 = vadd.f32 %v2693_v12, %v2440_v33  ;;  %v82_v50 = vld [vmem:[%s17179_s28 + $0x68] sm:$0xff]  ;;  %v2457_v2 = vcombine.low %v13593_v49, %v13597_v34 }
0x1587   :  { %v2510_v12 = vrot.slane %v13600_v57, %v13311_v0  ;;  %v2668_v33 = vadd.f32 %v17220_v20, %v13517_v52  ;;  %v2674_v40 = vadd.f32 %v17221_v6, %v13519_v61  ;;  %12170 = vmatmul.mubr.msk.f32.gmra.mrb[12].mxu0 %vm93_vm1, %v82_v50  ;;  %v2681_v34 = vrot.slane %v13581_v15, 2  ;;  %v84_v52 = vld [vmem:[%s17179_s28 + $0x78] sm:$0xff] }
0x1588   :  { %12695 = vtanh.f32 %v13590_v7  ;;  %v2479_v59 = vrot.slane %v2457_v2, %v13311_v0  ;;  %v2487_v49 = vcombine.low %v2465_v31, %v2472_v1  ;;  %12212 = vmatpush3.bf16.msra.mxu0 %v12418_v16  ;;  %v12419_v61 = vld [vmem:[%s17002_s8 + $0x38] sm:$0xff]   ;;  %v2688_v6 = vadd.f32 %v2687_v13, %v2686_v47  ;;  %12172 = vmatprep.mubr.msk.f32.mxu0 %vm93_vm1, %v83_v30 }
0x1589   :  { %v2695_v20 = vrot.slane %v2694_v4, 4  ;;  %v2486_v51 = vrot.slane %v2458_v58, %v13311_v0  ;;  %v1977_v50 = vrot.slane %v1616_v29, %v13311_v0  ;;  %v2517_v31 = vrot.slane %v2510_v12, %v13311_v0  ;;  %12213 = vmatprep.subr.bf16.mxu0 %v17219_v63 }
0x158a   :  { %v11714_v16 = vcombine.high %v13585_v24, %v13600_v57  ;;  %v1984_v2 = vrot.slane %v1970_v18, %v13311_v0  ;;  %v1592_v1 = vmul.f32 %v13300_v48, %v13421_v21  ;;  %v2495_v13 = vrot.slane %v2487_v49, %v13311_v0 }
0x158b   :  { %v2488_v47 = vcombine.low %v2479_v59, %v2486_v51  ;;  %v1985_v58 = vcombine.high %v1977_v50, %v1977_v50  ;;  %v13658_v29 = vrot.slane %v1977_v50, %v13311_v0  ;;  %12173 = vmatmul.mubr.msk.f32.gmra.mrb[14].mxu0 %vm93_vm1, %v84_v52  ;;  %v13661_v12 = vmul.f32 0.11111111, %v2668_v33 }
0x158c   :  { %v1986_v30 = vcombine.high %v1984_v2, %v1984_v2  ;;  %v13664_v23 = vrot.slane %v1984_v2, %v13311_v0  ;;  %v1608_v18 = vadd.f32 %v13306_v54, %v1592_v1  ;;  %12214 = vmatpush3.bf16.msra.mxu0 %v12419_v61  ;;  %12215 = vmatprep.mubr.msk.bf16.mxu0 %vm12770_vm2, %v17219_v63  ;;  %v2675_v48 = vrot.slane %v2674_v40, 1 }
0x158d   :  { %v2696_v21 = vadd.f32 %v2695_v20, %v2694_v4  ;;  %v2502_v49 = vrot.slane %v2488_v47, %v13311_v0  ;;  %v13671_v51 = vrot.slane %v1985_v58, %v13311_v0  ;;  %12219 = vmatprep.subr.bf16.mxu0 %v17219_v63  ;;  %v2701_v33 = vsel %vm2660_vm4, %v2517_v31, 0.0 }
0x158e   :  { %17222 = vst [vmem:[#allocation37_spill] sm:$0xff] %v13664_v23  ;;  %v13676_v59 = vrot.slane %v1986_v30, %v13311_v0  ;;  %v13680_v54 = vcombine.high %v13664_v23, %v13664_v23  ;;  %v1617_v52 = vmax.f32 %v1608_v18, 0.0  ;;  %v2682_v4 = vadd.f32 %v2681_v34, %v13581_v15 }
0x158f   :  { %17223 = vst [vmem:[#allocation38_spill] sm:$0xff] %v13671_v51  ;;  %v2503_v20 = vcombine.low %v2495_v13, %v2502_v49  ;;  %v2528_v50 = vrot.slane %v11714_v16, %v13311_v0  ;;  %v2519_v2 = vcombine.low %v13658_v29, %v13671_v51  ;;  %v2689_v31 = vrot.slane %v2688_v6, 2 }
0x1590   :  { %17224 = vst [vmem:[#allocation39_spill] sm:$0xff] %v13676_v59  ;;  %17225 = vst [vmem:[#allocation40_spill] sm:$0xff] %v13680_v54  ;;  %v11715_v1 = vcombine.high %v13658_v29, %v13671_v51  ;;  %v2521_v47 = vcombine.low %v13664_v23, %v13676_v59  ;;  %v2573_v58 = vrot.slane %v13680_v54, %v13311_v0  ;;  %v2697_v13 = vrot.slane %v2696_v21, 2 }
0x1591   :  { %v2676_v30 = vadd.f32 %v2675_v48, %v2674_v40  ;;  %v2702_v15 = vadd.f32 %v2701_v33, %v2503_v20  ;;  %v2535_v34 = vrot.slane %v2519_v2, %v13311_v0  ;;  %v2019_v16 = vcombine.high %v1617_v52, %v1617_v52 }
0x1592   :  { %v12696_v61 = vpop.eup %12695  ;;  %v2542_v18 = vrot.slane %v11715_v1, %v13311_v0  ;;  %v2549_v49 = vrot.slane %v2521_v47, %v13311_v0  ;;  %v2026_v56 = vrot.slane %v1617_v52, %v13311_v0  ;;  %v2683_v43 = vrot.slane %v2682_v4, 1 }
0x1593   :  { %1079 = vrot.lane.b32.xlu1 %v12696_v61, %s12759_s24  ;;  %v2580_v61 = vrot.slane %v2573_v58, %v13311_v0  ;;  %v2703_v42 = vrot.slane %v2702_v15, 4  ;;  %v2550_v45 = vcombine.low %v2528_v50, %v2535_v34  ;;  %v2033_v23 = vrot.slane %v2019_v16, %v13311_v0 }
0x1594   :  { %v2690_v54 = vadd.f32 %v2689_v31, %v2688_v6  ;;  %v2551_v40 = vcombine.low %v2542_v18, %v2549_v49  ;;  %v13701_v48 = vcombine.high %v13676_v59, %v13676_v59  ;;  %v2034_v2 = vcombine.high %v2026_v56, %v2026_v56 }
0x1595   :  { %v2704_v33 = vadd.f32 %v2703_v42, %v2702_v15  ;;  %v2558_v20 = vrot.slane %v2550_v45, %v13311_v0  ;;  %v2035_v1 = vcombine.high %v2033_v23, %v2033_v23  ;;  %v2698_v47 = vadd.f32 %v2697_v13, %v2696_v21 }
0x1596   :  { %17226 = vst [vmem:[#allocation41_spill] sm:$0xff] %v13701_v48  ;;  %v2565_v58 = vrot.slane %v2551_v40, %v13311_v0  ;;  %v13706_v50 = vrot.slane %v2026_v56, %v13311_v0  ;;  %v13709_v52 = vrot.slane %v2033_v23, %v13311_v0  ;;  %v2709_v31 = vsel %vm2660_vm4, %v2580_v61, 0.0 }
0x1597   :  { %v2705_v6 = vrot.slane %v2704_v33, 2  ;;  %v13713_v34 = vrot.slane %v2034_v2, %v13311_v0  ;;  %v13716_v42 = vrot.slane %v2035_v1, %v13311_v0  ;;  %v2684_v15 = vadd.f32 %v2683_v43, %v2682_v4 }
0x1598   :  { %17227 = vst [vmem:[#allocation42_spill] sm:$0xff] %v13706_v50  ;;  %17228 = vst [vmem:[#allocation43_spill] sm:$0xff] %v13709_v52  ;;  %v2566_v45 = vcombine.low %v2558_v20, %v2565_v58  ;;  %v13720_v21 = vcombine.high %v13706_v50, %v13706_v50  ;;  %v13724_v56 = vcombine.high %v13709_v52, %v13709_v52  ;;  %v2691_v16 = vrot.slane %v2690_v54, 1 }
0x1599   :  { %17229 = vst [vmem:[#allocation44_spill] sm:$0xff] %v13713_v34  ;;  %17230 = vst [vmem:[#allocation45_spill] sm:$0xff] %v13716_v42  ;;  %v2581_v23 = vcombine.low %v13701_v48, %v13706_v50  ;;  %v13730_v13 = vcombine.high %v13713_v34, %v13713_v34  ;;  %v13734_v18 = vcombine.high %v13716_v42, %v13716_v42  ;;  %v2727_v2 = vmul.f32 0.11111111, %v2676_v30 }
0x159a   :  { %17231 = vst [vmem:[#allocation46_spill] sm:$0xff] %v13720_v21  ;;  %17232 = vst [vmem:[#allocation47_spill] sm:$0xff] %v13724_v56  ;;  %v2710_v49 = vadd.f32 %v2709_v31, %v2566_v45  ;;  %v2582_v61 = vcombine.low %v13713_v34, %v13720_v21  ;;  %v2584_v40 = vcombine.low %v13716_v42, %v13724_v56  ;;  %v2699_v58 = vrot.slane %v2698_v47, 1 }
0x159b   :  { %17233 = vst [vmem:[#allocation48_spill] sm:$0xff] %v13730_v13  ;;  %17234 = vst [vmem:[#allocation49_spill] sm:$0xff] %v13734_v18  ;;  %v2591_v20 = vrot.slane %v2581_v23, %v13311_v0  ;;  %v2583_v43 = vcombine.low %v13730_v13, %v13709_v52  ;;  %v2636_v4 = vrot.slane %v13734_v18, %v13311_v0  ;;  %v2728_v56 = vmul.f32 0.11111111, %v2684_v15 }
0x159c   :  { %v2706_v1 = vadd.f32 %v2705_v6, %v2704_v33  ;;  %v2711_v50 = vrot.slane %v2710_v49, 4  ;;  %v2598_v31 = vrot.slane %v2582_v61, %v13311_v0  ;;  %v2612_v45 = vrot.slane %v2584_v40, %v13311_v0 }
0x159d   :  { %v2692_v21 = vadd.f32 %v2691_v16, %v2690_v54  ;;  %v2605_v34 = vrot.slane %v2583_v43, %v13311_v0  ;;  %v2643_v30 = vrot.slane %v2636_v4, %v13311_v0  ;;  %v2734_v52 = vpack.c.bf16 %v13661_v12, %v13661_v12 }
0x159e   :  { %v2712_v42 = vadd.f32 %v2711_v50, %v2710_v49  ;;  %v2613_v23 = vcombine.low %v2591_v20, %v2598_v31  ;;  %v2735_v13 = vpack.c.bf16 %v2727_v2, %v2727_v2  ;;  %v2707_v33 = vrot.slane %v2706_v1, 1 }
0x159f   :  { %v2614_v18 = vcombine.low %v2605_v34, %v2612_v45  ;;  %v2700_v6 = vadd.f32 %v2699_v58, %v2698_v47  ;;  %v2729_v54 = vmul.f32 0.11111111, %v2692_v21  ;;  %v2736_v16 = vpack.c.bf16 %v2728_v56, %v2728_v56 }
0x15a0   :  { %v2621_v48 = vrot.slane %v2613_v23, %v13311_v0  ;;  %v2713_v61 = vrot.slane %v2712_v42, 2  ;;  %v2717_v15 = vsel %vm2660_vm4, %v2643_v30, 0.0  ;;  %v2766_v49 = vunpack.c.l.b16 %v2734_v52 }
0x15a1   :  { %v2628_v40 = vrot.slane %v2614_v18, %v13311_v0  ;;  %v2767_v20 = vunpack.c.l.b16 %v2735_v13  ;;  %v2708_v4 = vadd.f32 %v2707_v33, %v2706_v1  ;;  %v2730_v12 = vmul.f32 0.11111111, %v2700_v6 }
0x15a2   :  { %v2714_v50 = vadd.f32 %v2713_v61, %v2712_v42  ;;  %v2737_v2 = vpack.c.bf16 %v2729_v54, %v2729_v54  ;;  %v2768_v47 = vunpack.c.l.b16 %v2736_v16 }
0x15a3   :  { %v2629_v43 = vcombine.low %v2621_v48, %v2628_v40  ;;  %v2731_v23 = vmul.f32 0.11111111, %v2708_v4  ;;  %v2775_v18 = vsel %vm2774_vm5, %v2767_v20, %v2766_v49  ;;  %v2738_v21 = vpack.c.bf16 %v2730_v12, %v2730_v12 }
0x15a4   :  { %v2715_v31 = vrot.slane %v2714_v50, 1  ;;  %v2769_v30 = vunpack.c.l.b16 %v2737_v2  ;;  %v2777_v52 = vsel %vm2776_vm6, %v2768_v47, %v2775_v18  ;;  %v11693_v2 = vmul.f32 -1.442695, %v13590_v7 }
0x15a5   :  { %v2718_v34 = vadd.f32 %v2717_v15, %v2629_v43  ;;  %v2739_v13 = vpack.c.bf16 %v2731_v23, %v2731_v23  ;;  %v2770_v1 = vunpack.c.l.b16 %v2738_v21  ;;  %v2880_v21 = vld [vmem:[%s17005_s9] sm:$0xf] }
0x15a6   :  { %v2716_v58 = vadd.f32 %v2715_v31, %v2714_v50  ;;  %v2779_v6 = vsel %vm2778_vm7, %v2769_v30, %v2777_v52  ;;  %12697 = vpow2.f32 %v11693_v2  ;;  %v17247_v2 = vmov 16  }
0x15a7   :  { %v2719_v45 = vrot.slane %v2718_v34, 4  ;;  %v2771_v54 = vunpack.c.l.b16 %v2739_v13  ;;  %v2781_v16 = vsel %vm2780_vm8, %v2770_v1, %v2779_v6 }
0x15a8   :  { %v2732_v42 = vmul.f32 0.11111111, %v2716_v58 }
0x15a9   :  { %v2720_v56 = vadd.f32 %v2719_v45, %v2718_v34  ;;  %v2783_v20 = vsel %vm2782_vm9, %v2771_v54, %v2781_v16 }
0x15aa   :  { %v2740_v61 = vpack.c.bf16 %v2732_v42, %v2732_v42 }
0x15ab   :  { %v2721_v48 = vrot.slane %v2720_v56, 2 }
0x15ac   :  { %v2772_v50 = vunpack.c.l.b16 %v2740_v61 }
0x15ad   :  { %v2722_v33 = vadd.f32 %v2721_v48, %v2720_v56  ;;  %v2886_v56 = vsel %vm142_vm0, %v2880_v21, 0  ;;  %v12426_v21 = vld [vmem:[%s17006_s10 + $0x20] ss:$8 sps:$4 sm:$0xff]  }
0x15ae   :  { %v2785_v4 = vsel %vm2784_vm10, %v2772_v50, %v2783_v20  ;;  %v17241_v20 = vmov 18  }
0x15af   :  { %v2723_v40 = vrot.slane %v2722_v33, 1 }
0x15b0   :  { %v12698_v47 = vpop.eup %12697 }
0x15b1   :  { %v2724_v15 = vadd.f32 %v2723_v40, %v2722_v33  ;;  %v1073_v58 = vadd.f32 1.0, %v12698_v47  ;;  %v12420_v47 = vld [vmem:[%s17006_s10] ss:$8 sps:$4 sm:$0xff]  }
0x15b3   :  { %v2733_v49 = vmul.f32 0.11111111, %v2724_v15  ;;  %12699 = vrcp.f32 %v1073_v58  ;;  %v12422_v58 = vld [vmem:[%s17006_s10 + $0x4] ss:$8 sps:$4 sm:$0xff]  }
0x15b4   :  { %6873 = vmatprep.subr.bf16.mxu1 %v12422_v58  ;;  %v12447_v58 = vld [vmem:[%s17006_s10 + $0x90] ss:$8 sps:$4 sm:$0xff]  }
0x15b5   :  { %v2741_v43 = vpack.c.bf16 %v2733_v49, %v2733_v49  ;;  %6874 = vmatpush1.bf16.msra.mxu1 %v12420_v47  ;;  %v12449_v47 = vld [vmem:[%s17006_s10 + $0x94] ss:$8 sps:$4 sm:$0xff]  }
0x15b7   :  { %v2773_v31 = vunpack.c.l.b16 %v2741_v43  ;;  %v17242_v43 = vmov 23  }
0x15b9   :  { %v2787_v12 = vsel %vm2786_vm11, %v2773_v31, %v2785_v4  ;;  %v17243_v4 = vmov 19   ;;  %v17244_v31 = vmov 21  }
0x15ba   :  { %v2788_v34 = vpack.c.b16 %v2787_v12, %v2787_v12  ;;  %v17245_v12 = vmov 17  }
0x15bc   :  { %12216 = vmatmul.mubr.bf16.vlgmr.msra.gmra.mrb[16].mxu0 %v2788_v34  ;;  %v17246_v34 = vmov 22  }
0x15bd   :  { %12221 = vmatprep.mubr.msk.bf16.mxu0 %vm12770_vm2, %v17219_v63  ;;  %v12700_v45 = vpop.eup %12699  ;;  %12220 = vmatpush3.bf16.msra.mxu0 %v2886_v56  ;;  %v12431_v56 = vld [vmem:[%s17006_s10 + $0x34] ss:$8 sps:$4 sm:$0xff]   ;;  %v17259_v63 = vcombine.high %v13324_v27, %v13324_v27 }
0x15be   :  { %v1077_v48 = vmul.f32 %v12700_v45, %v13219_v11  ;;  %v17240_v11 = vmov 20  }
0x1605   :  { %v1080_v23 = vpop.permute.xlu1 %1079 }
0x1606   :  { %v1082_v18 = vmul.f32 %v12700_v45, %v1080_v23  ;;  %v12423_v23 = vld [vmem:[%s17006_s10 + $0x10] ss:$8 sps:$4 sm:$0xff]  }
0x1608   :  { %1084 = vrot.lane.b32.xlu1 %v1082_v18, %s12760_s3  ;;  %v12428_v18 = vld [vmem:[%s17006_s10 + $0x24] ss:$8 sps:$4 sm:$0xff]  }
0x165a   :  { %v13769_v30 = vpop.f32.mrb[12].mxu0 }
0x165b   :  { %17235 = vst [vmem:[#allocation50_spill] sm:$0xff] %v13769_v30  ;;  %v13771_v42 = vpop.f32.mrb[13].mxu0 }
0x165c   :  { %17236 = vst [vmem:[#allocation51_spill] sm:$0xff] %v13771_v42 }
0x165e   :  { %v13773_v7 = vpop.f32.mrb[14].mxu0 }
0x165f   :  { %17237 = vst [vmem:[#allocation52_spill] sm:$0xff] %v13773_v7  ;;  %v13775_v52 = vpop.f32.mrb[15].mxu0 }
0x1660   :  { %17238 = vst [vmem:[#allocation53_spill] sm:$0xff] %v13775_v52 }
0x167a   :  { %v1085_v13 = vpop.permute.xlu1 %1084 }
0x167b   :  { %v13778_v1 = vadd.f32 %v1085_v13, %v1077_v48  ;;  %v12429_v48 = vld [vmem:[%s17006_s10 + $0x30] ss:$8 sps:$4 sm:$0xff]   ;;  %v12434_v13 = vld [vmem:[%s17006_s10 + $0x44] ss:$8 sps:$4 sm:$0xff]  }
0x167d   :  { %17239 = vst [vmem:[#allocation54_spill] sm:$0xff] %v13778_v1  ;;  %12701 = vtanh.f32 %v13778_v1 }
0x1687   :  { %v12702_v33 = vpop.eup %12701 }
0x1688   :  { %1090 = vrot.lane.b32.xlu0 %v12702_v33, %s12760_s3  ;;  %v12432_v33 = vld [vmem:[%s17006_s10 + $0x40] ss:$8 sps:$4 sm:$0xff]  }
0x168f   :  { %v2872_v6 = vpop.f32.mrb[16].mxu0 }
0x1690   :  { %v2878_v61 = vmax.f32 %v2872_v6, 0.0  ;;  %v12217_v40 = vpop.f32.mrb[17].mxu0  ;;  %v12437_v6 = vld [vmem:[%s17006_s10 + $0x54] ss:$8 sps:$4 sm:$0xff]  }
0x1691   :  { %v2875_v54 = vpop.f32.mrb[18].mxu0  ;;  %v12440_v40 = vld [vmem:[%s17006_s10 + $0x64] ss:$8 sps:$4 sm:$0xff]  }
0x1692   :  { %v2879_v16 = vpack.c.bf16 %v2878_v61, %v2878_v61  ;;  %v12218_v15 = vpop.f32.mrb[19].mxu0  ;;  %v12435_v61 = vld [vmem:[%s17006_s10 + $0x50] ss:$8 sps:$4 sm:$0xff]   ;;  %v12438_v54 = vld [vmem:[%s17006_s10 + $0x60] ss:$8 sps:$4 sm:$0xff]  }
0x1693   :  { %v12441_v15 = vld [vmem:[%s17006_s10 + $0x70] ss:$8 sps:$4 sm:$0xff]  }
0x1694   :  { %12222 = vmatmul.mubr.msk.bf16.vlgmr.msra.gmra.mrb[20].mxu0 %vm2881_vm12, %v2879_v16  ;;  %v12443_v16 = vld [vmem:[%s17006_s10 + $0x74] ss:$8 sps:$4 sm:$0xff]  }
0x16fa   :  { %v1091_v50 = vpop.permute.xlu0 %1090 }
0x16fb   :  { %v1093_v49 = vmul.f32 %v12700_v45, %v1091_v50  ;;  %v12425_v45 = vld [vmem:[%s17006_s10 + $0x14] ss:$8 sps:$4 sm:$0xff]   ;;  %v12446_v50 = vld [vmem:[%s17006_s10 + $0x84] ss:$8 sps:$4 sm:$0xff]  }
0x16fc   :  { %6875 = vmatprep.subr.bf16.mxu1 %v12425_v45  ;;  %v12452_v45 = vld [vmem:[%s17006_s10 + $0xa4] ss:$8 sps:$4 sm:$0xff]  }
0x16fd   :  { %1102 = vperm.xlu0 %12371, %v1093_v49   ;;  %1096 = vperm.xlu1 %12370, %v1093_v49  }
0x16fe   :  { %6876 = vmatpush1.bf16.msra.mxu1 %v12423_v23  ;;  %v12450_v23 = vld [vmem:[%s17006_s10 + $0xa0] ss:$8 sps:$4 sm:$0xff]  }
0x16ff   :  { %6877 = vmatprep.subr.bf16.mxu1 %v12428_v18  ;;  %v12455_v18 = vld [vmem:[%s17006_s10 + $0xb4] ss:$8 sps:$4 sm:$0xff]  }
0x1701   :  { %12374 = vset.pattern.permute.xlu0 %v17240_v11  ;;  %12372 = vset.pattern.permute.xlu1 %v17241_v20 }
0x1702   :  { %1120 = vperm.xlu0 %12374, %v1093_v49   ;;  %1108 = vperm.xlu1 %12372, %v1093_v49  }
0x1703   :  { %6878 = vmatpush1.bf16.msra.mxu1 %v12426_v21  ;;  %v12453_v21 = vld [vmem:[%s17006_s10 + $0xb0] ss:$8 sps:$4 sm:$0xff]  }
0x1704   :  { %6879 = vmatprep.subr.bf16.mxu1 %v12431_v56  ;;  %v12458_v56 = vld [vmem:[%s17006_s10 + $0xc4] ss:$8 sps:$4 sm:$0xff]  }
0x1706   :  { %12377 = vset.pattern.permute.xlu0 %v17242_v43  ;;  %12373 = vset.pattern.permute.xlu1 %v17243_v4 }
0x1707   :  { %1138 = vperm.xlu0 %12377, %v1093_v49   ;;  %1114 = vperm.xlu1 %12373, %v1093_v49  }
0x1708   :  { %6880 = vmatpush1.bf16.msra.mxu1 %v12429_v48  ;;  %v12456_v48 = vld [vmem:[%s17006_s10 + $0xc0] ss:$8 sps:$4 sm:$0xff]  }
0x1709   :  { %6881 = vmatprep.subr.bf16.mxu1 %v12434_v13  ;;  %v12461_v13 = vld [vmem:[%s17006_s10 + $0xd4] ss:$8 sps:$4 sm:$0xff]  }
0x170b   :  { %12375 = vset.pattern.permute.xlu1 %v17244_v31  ;;  %12379 = vset.pattern.permute.xlu0 %v17245_v12 }
0x170c   :  { %1126 = vperm.xlu1 %12375, %v1093_v49   ;;  %6882 = vmatpush1.bf16.msra.mxu1 %v12432_v33  ;;  %v12459_v33 = vld [vmem:[%s17006_s10 + $0xd0] ss:$8 sps:$4 sm:$0xff]  }
0x170d   :  { %6883 = vmatprep.subr.bf16.mxu1 %v12437_v6  ;;  %v12464_v6 = vld [vmem:[%s17006_s10 + $0xe4] ss:$8 sps:$4 sm:$0xff]  }
0x1710   :  { %12376 = vset.pattern.permute.xlu1 %v17246_v34  ;;  %6884 = vmatpush1.bf16.msra.mxu1 %v12435_v61 }
0x1711   :  { %1132 = vperm.xlu1 %12376, %v1093_v49   ;;  %6885 = vmatprep.subr.bf16.mxu1 %v12440_v40  ;;  %v12444_v49 = vld [vmem:[%s17006_s10 + $0x80] ss:$8 sps:$4 sm:$0xff]  }
0x1712   :  { %v12462_v40 = vld [vmem:[%s17006_s10 + $0xe0] ss:$8 sps:$4 sm:$0xff]  }
0x1714   :  { %6886 = vmatpush1.bf16.msra.mxu1 %v12438_v54 }
0x1715   :  { %12378 = vset.pattern.permute.xlu1 %v17247_v2  ;;  %6887 = vmatprep.subr.bf16.mxu1 %v12443_v16  ;;  %v12467_v16 = vld [vmem:[%s17006_s10 + $0xf4] ss:$8 sps:$4 sm:$0xff]  }
0x1718   :  { %6888 = vmatpush1.bf16.msra.mxu1 %v12441_v15 }
0x1719   :  { %6889 = vmatprep.subr.bf16.mxu1 %v12446_v50 }
0x171c   :  { %6890 = vmatpush1.bf16.msra.mxu1 %v12444_v49 }
0x171d   :  { %6891 = vmatprep.subr.bf16.mxu1 %v12449_v47  ;;  %v12465_v47 = vld [vmem:[%s17006_s10 + $0xf0] ss:$8 sps:$4 sm:$0xff]  }
0x1720   :  { %6892 = vmatpush1.bf16.msra.mxu1 %v12447_v58  ;;  %v12470_v58 = vld [vmem:[%s17006_s10 + $0x104] ss:$8 sps:$4 sm:$0xff]  }
0x1721   :  { %6893 = vmatprep.subr.bf16.mxu1 %v12452_v45 }
0x1724   :  { %6894 = vmatpush1.bf16.msra.mxu1 %v12450_v23 }
0x1725   :  { %6895 = vmatprep.subr.bf16.mxu1 %v12455_v18 }
0x1728   :  { %6896 = vmatpush1.bf16.msra.mxu1 %v12453_v21  ;;  %v12756_v21 = vld [vmem:[%s17185_s0] ss:$0 sm:$0xff] }
0x1729   :  { %6897 = vmatprep.subr.bf16.mxu1 %v12458_v56  ;;  %v268_v56 = vadd.f32 %v12756_v21, %v13265_v37 }
0x172c   :  { %6898 = vmatpush1.bf16.msra.mxu1 %v12456_v48 }
0x172d   :  { %6899 = vmatprep.subr.bf16.mxu1 %v12461_v13 }
0x1730   :  { %6900 = vmatpush1.bf16.msra.mxu1 %v12459_v33 }
0x1731   :  { %6901 = vmatprep.subr.bf16.mxu1 %v12464_v6 }
0x1734   :  { %6902 = vmatpush1.bf16.msra.mxu1 %v12462_v40 }
0x1735   :  { %6903 = vmatprep.subr.bf16.mxu1 %v12467_v16 }
0x1738   :  { %6904 = vmatpush1.bf16.msra.mxu1 %v12465_v47 }
0x1739   :  { %6934 = vmatprep.subr.bf16.mxu1 %v12470_v58 }
0x1767   :  { %v2922_v61 = vpop.f32.mrb[20].mxu0 }
0x1768   :  { %v11725_v54 = vmul.f32 -1.442695, %v2922_v61  ;;  %v12223_v15 = vpop.f32.mrb[21].mxu0 }
0x1769   :  { %v2925_v50 = vpop.f32.mrb[22].mxu0 }
0x176a   :  { %12703 = vpow2.f32 %v11725_v54  ;;  %v12224_v49 = vpop.f32.mrb[23].mxu0 }
0x1774   :  { %v12704_v45 = vpop.eup %12703 }
0x1775   :  { %v2931_v23 = vadd.f32 1.0, %v12704_v45 }
0x1777   :  { %12705 = vrcp.f32 %v2931_v23 }
0x177c   :  { %v1097_v18 = vpop.permute.xlu1 %1096  ;;  %v1103_v13 = vpop.permute.xlu0 %1102 }
0x177d   :  { %v1099_v48 = vmul.f32 %v1097_v18, %v12909_v8  ;;  %v1105_v6 = vmul.f32 %v1103_v13, %v12913_v10 }
0x177f   :  { %v1100_v33 = vadd.f32 %v1099_v48, %v268_v56 }
0x1781   :  { %v1109_v61 = vpop.permute.xlu1 %1108  ;;  %v1106_v40 = vadd.f32 %v1105_v6, %v1100_v33  ;;  %v12706_v16 = vpop.eup %12705 }
0x1782   :  { %v1111_v54 = vmul.f32 %v1109_v61, %v12923_v14  ;;  %v1121_v47 = vpop.permute.xlu0 %1120  ;;  %v2935_v23 = vcombine.high %v12706_v16, %v12706_v16  ;;  %v2942_v18 = vrot.slane %v12706_v16, %v13311_v0 }
0x1783   :  { %v1123_v56 = vmul.f32 %v1121_v47, %v12932_v22 }
0x1784   :  { %v1112_v6 = vadd.f32 %v1111_v54, %v1106_v40  ;;  %v2949_v49 = vrot.slane %v2935_v23, %v13311_v0  ;;  %v2950_v45 = vcombine.high %v2942_v18, %v2942_v18  ;;  %v2958_v48 = vrot.slane %v2942_v18, %v13311_v0 }
0x1786   :  { %v1115_v33 = vpop.permute.xlu1 %1114  ;;  %v2951_v50 = vcombine.high %v2949_v49, %v2949_v49  ;;  %v2965_v13 = vrot.slane %v2949_v49, %v13311_v0  ;;  %v2972_v40 = vrot.slane %v2950_v45, %v13311_v0  ;;  %v2980_v16 = vcombine.high %v2958_v48, %v2958_v48 }
0x1787   :  { %v1117_v61 = vmul.f32 %v1115_v33, %v12928_v19  ;;  %v1139_v33 = vpop.permute.xlu0 %1138  ;;  %v2987_v21 = vrot.slane %v2958_v48, %v12900_v5 }
0x1788   :  { %v2982_v49 = vcombine.high %v2972_v40, %v2972_v40  ;;  %v2991_v37 = vrot.slane %v2972_v40, %v12900_v5  ;;  %v2995_v23 = vrot.slane %v2980_v16, %v12900_v5  ;;  %v1141_v15 = vmul.f32 %v1139_v33, %v12944_v35 }
0x1789   :  { %v1118_v58 = vadd.f32 %v1117_v61, %v1112_v6  ;;  %v2979_v61 = vrot.slane %v2951_v50, %v13311_v0  ;;  %v2981_v48 = vcombine.high %v2965_v13, %v2965_v13  ;;  %v3003_v47 = vrot.slane %v2965_v13, %v12900_v5 }
0x178a   :  { %v3023_v50 = vrot.slane %v2987_v21, %v13311_v0  ;;  %v3065_v52 = vcombine.high %v2991_v37, %v2991_v37  ;;  %v3072_v40 = vrot.slane %v2991_v37, %v13311_v0 }
0x178b   :  { %v1124_v18 = vadd.f32 %v1123_v56, %v1118_v58  ;;  %v1127_v6 = vpop.permute.xlu1 %1126  ;;  %v2983_v7 = vcombine.high %v2979_v61, %v2979_v61  ;;  %v2999_v58 = vrot.slane %v2982_v49, %v12900_v5  ;;  %v3016_v56 = vcombine.high %v2987_v21, %v2987_v21 }
0x178c   :  { %v1129_v54 = vmul.f32 %v1127_v6, %v12936_v26  ;;  %v13946_v45 = vrot.slane %v2979_v61, %v12900_v5  ;;  %v3114_v6 = vcombine.high %v2995_v23, %v2995_v23  ;;  %v3031_v35 = vcombine.high %v3023_v50, %v3023_v50 }
0x178d   :  { %v3030_v33 = vrot.slane %v3016_v56, %v13311_v0  ;;  %v13951_v26 = vrot.slane %v3023_v50, %v13311_v0  ;;  %v3079_v13 = vrot.slane %v3065_v52, %v13311_v0  ;;  %v3080_v21 = vcombine.high %v3072_v40, %v3072_v40 }
0x178e   :  { %v1130_v30 = vadd.f32 %v1129_v54, %v1124_v18  ;;  %v13956_v54 = vrot.slane %v3072_v40, %v13311_v0  ;;  %v3121_v18 = vrot.slane %v2995_v23, %v13311_v0  ;;  %v13963_v56 = vrot.slane %v3031_v35, %v13311_v0 }
0x178f   :  { %v3032_v61 = vcombine.high %v3030_v33, %v3030_v33  ;;  %v13960_v37 = vrot.slane %v3030_v33, %v13311_v0  ;;  %v3128_v50 = vrot.slane %v3114_v6, %v13311_v0  ;;  %v3081_v19 = vcombine.high %v3079_v13, %v3079_v13 }
0x1790   :  { %v1133_v16 = vpop.permute.xlu1 %1132  ;;  %v13967_v52 = vrot.slane %v3079_v13, %v13311_v0  ;;  %v3011_v40 = vrot.slane %v2981_v48, %v12900_v5  ;;  %v13974_v23 = vrot.slane %v2983_v7, %v12900_v5  ;;  %v13997_v13 = vrot.slane %v3121_v18, %v13311_v0 }
0x1791   :  { %v1135_v49 = vmul.f32 %v1133_v16, %v12941_v32  ;;  %v13970_v16 = vrot.slane %v3080_v21, %v13311_v0  ;;  %v13977_v33 = vrot.slane %v3032_v61, %v13311_v0  ;;  %v13988_v48 = vrot.slane %v3081_v19, %v13311_v0 }
0x1792   :  { %v3129_v21 = vcombine.high %v3121_v18, %v3121_v18  ;;  %v3130_v61 = vcombine.high %v3128_v50, %v3128_v50  ;;  %17248 = vst [vmem:[#allocation55_spill] sm:$0xff] %v13997_v13  ;;  %v14000_v19 = vrot.slane %v3128_v50, %v13311_v0  ;;  %v3212_v35 = vcombine.high %v3003_v47, %v3003_v47 }
0x1793   :  { %v1136_v22 = vadd.f32 %v1135_v49, %v1130_v30  ;;  %v3170_v49 = vrot.slane %v2999_v58, %v13311_v0  ;;  %v3219_v18 = vrot.slane %v3003_v47, %v13311_v0  ;;  %v3310_v5 = vcombine.high %v3011_v40, %v3011_v40 }
0x1794   :  { %v14004_v7 = vrot.slane %v3129_v21, %v13311_v0  ;;  %v3366_v1 = vrot.slane %v13974_v23, %v13311_v0  ;;  %v17258_v11 = vcombine.high %v13951_v26, %v13951_v26  ;;  %v17260_v59 = vcombine.high %v13963_v56, %v13963_v56 }
0x1795   :  { %v1142_v6 = vadd.f32 %v1141_v15, %v1136_v22  ;;  %v3163_v15 = vcombine.high %v2999_v58, %v2999_v58  ;;  %v14008_v22 = vrot.slane %v3130_v61, %v13311_v0  ;;  %v3178_v14 = vcombine.high %v3170_v49, %v3170_v49 }
0x1796   :  { %v14011_v30 = vrot.slane %v3170_v49, %v13311_v0  ;;  %v3261_v58 = vcombine.high %v13946_v45, %v13946_v45  ;;  %v14026_v49 = vrot.slane %v3219_v18, %v13311_v0 }
0x1797   :  { %v11694_v32 = vmul.f32 -1.442695, %v1142_v6  ;;  %12707 = vtanh.f32 %v1142_v6  ;;  %v3177_v6 = vrot.slane %v3163_v15, %v13311_v0  ;;  %v14023_v61 = vrot.slane %v3178_v14, %v13311_v0 }
0x1798   :  { %v3227_v15 = vcombine.high %v3219_v18, %v3219_v18  ;;  %17249 = vst [vmem:[#allocation56_spill] sm:$0xff] %v14026_v49  ;;  %v3268_v18 = vrot.slane %v13946_v45, %v13311_v0  ;;  %v3257_v8 = vcombine.high %v14026_v49, %v14026_v49 }
0x1799   :  { %12709 = vpow2.f32 %v11694_v32  ;;  %v3179_v50 = vcombine.high %v3177_v6, %v3177_v6  ;;  %v14015_v10 = vrot.slane %v3177_v6, %v13311_v0  ;;  %v3226_v32 = vrot.slane %v3212_v35, %v13311_v0 }
0x179a   :  { %v14047_v6 = vrot.slane %v3227_v15, %v13311_v0  ;;  %v3276_v14 = vcombine.high %v3268_v18, %v3268_v18  ;;  %v14053_v2 = vrot.slane %v3268_v18, %v13311_v0  ;;  %v3324_v15 = vrot.slane %v3310_v5, %v13311_v0 }
0x179b   :  { %v14033_v35 = vrot.slane %v3179_v50, %v13311_v0  ;;  %v3228_v21 = vcombine.high %v3226_v32, %v3226_v32  ;;  %v14040_v42 = vrot.slane %v3226_v32, %v13311_v0  ;;  %v3275_v50 = vrot.slane %v3261_v58, %v13311_v0 }
0x179c   :  { %v3317_v32 = vrot.slane %v3011_v40, %v13311_v0  ;;  %v3359_v58 = vcombine.high %v13974_v23, %v13974_v23  ;;  %v14067_v18 = vrot.slane %v3276_v14, %v13311_v0  ;;  %v3259_v5 = vcombine.high %v14047_v6, %v14047_v6 }
0x179d   :  { %v3277_v45 = vcombine.high %v3275_v50, %v3275_v50  ;;  %v14057_v12 = vrot.slane %v3275_v50, %v13311_v0  ;;  %v14064_v47 = vrot.slane %v3228_v21, %v13311_v0  ;;  %v3326_v43 = vcombine.high %v3324_v15, %v3324_v15 }
0x179e   :  { %v3325_v31 = vcombine.high %v3317_v32, %v3317_v32  ;;  %v14070_v40 = vrot.slane %v3317_v32, %v13311_v0  ;;  %v3374_v14 = vcombine.high %v3366_v1, %v3366_v1  ;;  %v3472_v50 = vmul.f32 %v13951_v26, %v13317_v17 }
0x179f   :  { %17250 = vst [vmem:[#allocation57_spill] sm:$0xff] %v14057_v12  ;;  %v14078_v21 = vrot.slane %v3277_v45, %v13311_v0  ;;  %v14095_v45 = vrot.slane %v3326_v43, %v13311_v0  ;;  %v14105_v23 = vmul.f32 %v13963_v56, %v13324_v27  ;;  %v14110_v43 = vrot.slane %v3366_v1, %v13311_v0 }
0x17a0   :  { %17251 = vst [vmem:[#allocation58_spill] sm:$0xff] %v14070_v40  ;;  %v14083_v32 = vrot.slane %v3325_v31, %v13311_v0  ;;  %v14126_v12 = vmul.f32 %v17260_v59, %v17259_v63  ;;  %v14133_v1 = vmul.f32 %v13960_v37, %v13321_v25  ;;  %v17263_v27 = vcombine.high %v13960_v37, %v13960_v37  ;;  %v17266_v37 = vld [vmem:[#allocation12_spill] sm:$0xff] }
0x17a1   :  { %v12708_v34 = vpop.eup %12707  ;;  %17252 = vst [vmem:[#allocation59_spill] sm:$0xff] %v14078_v21  ;;  %17255 = vst [vmem:[#allocation62_spill] sm:$0xff] %v14095_v45  ;;  %v14149_v63 = vmul.f32 %v13951_v26, %v13340_v44  ;;  %v3481_v59 = vmul.f32 %v13956_v54, %v13347_v46  ;;  %v17268_v26 = vld [vmem:[#allocation13_spill] sm:$0xff]  ;;  %v14175_v46 = vmul.f32 %v13956_v54, %v13405_v28 }
0x17a2   :  { %1152 = vrot.lane.b32.xlu1 %v12708_v34, %s12759_s24  ;;  %v3340_v34 = vrot.slane %v3324_v15, %v13311_v0  ;;  %17253 = vst [vmem:[#allocation60_spill] sm:$0xff] %v14083_v32  ;;  %17256 = vst [vmem:[#allocation63_spill] sm:$0xff] %v14110_v43  ;;  %v14171_v44 = vmul.f32 %v13967_v52, %v17268_v26 }
0x17a3   :  { %v12710_v4 = vpop.eup %12709  ;;  %17264 = vst [vmem:[#allocation65_spill] sm:$0xff] %v14149_v63 }
0x17a4   :  { %v1146_v20 = vadd.f32 1.0, %v12710_v4  ;;  %v14092_v4 = vrot.slane %v3359_v58, %v13311_v0  ;;  %v3356_v15 = vcombine.high %v3340_v34, %v3340_v34  ;;  %v17257_v58 = vcombine.high %v13317_v17, %v13317_v17 }
0x17a5   :  { %v14137_v17 = vmul.f32 %v13977_v33, %v13329_v36 }
0x17a6   :  { %17254 = vst [vmem:[#allocation61_spill] sm:$0xff] %v14092_v4  ;;  %12711 = vrcp.f32 %v1146_v20  ;;  %v14118_v31 = vmul.f32 %v17258_v11, %v17257_v58  ;;  %v14129_v20 = vrot.slane %v3374_v14, %v13311_v0  ;;  %v17262_v11 = vcombine.high %v13321_v25, %v13321_v25  ;;  %v17279_v4 = vld [vmem:[#allocation25_spill] sm:$0xff] }
0x17a7   :  { %v14155_v14 = vmul.f32 %v13970_v16, %v13360_v41  ;;  %v17265_v25 = vcombine.high %v13956_v54, %v13956_v54  ;;  %v17269_v41 = vcombine.high %v13387_v38, %v13387_v38  ;;  %v17272_v54 = vcombine.high %v14004_v7, %v14004_v7 }
0x17a8   :  { %17261 = vst [vmem:[#allocation64_spill] sm:$0xff] %v14129_v20  ;;  %v14145_v56 = vmul.f32 %v17263_v27, %v17262_v11  ;;  %v17267_v11 = vcombine.high %v13970_v16, %v13970_v16  ;;  %v17275_v20 = vld [vmem:[#allocation16_spill] sm:$0xff] }
0x17a9   :  { %v14161_v58 = vmul.f32 %v17265_v25, %v13368_v9  ;;  %v3490_v9 = vmul.f32 %v13997_v13, %v17269_v41  ;;  %v17270_v25 = vcombine.high %v13405_v28, %v13405_v28  ;;  %v14197_v26 = vmul.f32 %v17272_v54, %v13413_v39 }
0x17aa   :  { %v14167_v27 = vmul.f32 %v17267_v11, %v17266_v37  ;;  %v17271_v37 = vcombine.high %v13997_v13, %v13997_v13  ;;  %v17273_v41 = vcombine.high %v13410_v62, %v13410_v62  ;;  %v14209_v13 = vmul.f32 %v14023_v61, %v17275_v20 }
0x17ab   :  { %v14185_v16 = vmul.f32 %v14004_v7, %v17270_v25  ;;  %v17274_v25 = vld [vmem:[#allocation20_spill] sm:$0xff]  ;;  %v14231_v20 = vmul.f32 %v14047_v6, %v13493_v55  ;;  %v17290_v6 = vld [vmem:[#allocation31_spill] sm:$0xff] }
0x17ac   :  { %v14191_v11 = vmul.f32 %v17271_v37, %v13410_v62  ;;  %v14203_v28 = vmul.f32 %v14000_v19, %v17273_v41  ;;  %v3499_v63 = vmul.f32 %v14011_v30, %v17274_v25  ;;  %v17276_v37 = vld [vmem:[#allocation23_spill] sm:$0xff]  ;;  %v17278_v7 = vld [vmem:[#allocation24_spill] sm:$0xff]  ;;  %v17280_v62 = vcombine.high %v14015_v10, %v14015_v10 }
0x17ad   :  { %v14213_v43 = vmul.f32 %v14015_v10, %v17276_v37  ;;  %v14217_v54 = vmul.f32 %v14033_v35, %v17278_v7  ;;  %v14227_v25 = vmul.f32 %v14026_v49, %v13486_v3  ;;  %17282 = vst [vmem:[#allocation20_spill] sm:$0xff] %v14231_v20  ;;  %v17283_v37 = vcombine.high %v13486_v3, %v13486_v3 }
0x17ae   :  { %v14223_v41 = vmul.f32 %v17280_v62, %v17279_v4  ;;  %v17285_v7 = vcombine.high %v13493_v55, %v13493_v55  ;;  %v14245_v10 = vmul.f32 %v14040_v42, %v13533_v53  ;;  %v17288_v4 = vld [vmem:[#allocation30_spill] sm:$0xff]  ;;  %v14253_v49 = vmul.f32 %v14067_v18, %v17290_v6 }
0x17af   :  { %17277 = vst [vmem:[#allocation12_spill] sm:$0xff] %v14213_v43  ;;  %17281 = vst [vmem:[#allocation13_spill] sm:$0xff] %v14227_v25  ;;  %v14236_v60 = vmul.f32 %v3257_v8, %v17283_v37  ;;  %v14249_v62 = vmul.f32 %v14053_v2, %v17288_v4  ;;  %v17293_v8 = vcombine.high %v13585_v24, %v13585_v24 }
0x17b0   :  { %v14241_v21 = vmul.f32 %v3259_v5, %v17285_v7  ;;  %17287 = vst [vmem:[#allocation24_spill] sm:$0xff] %v14245_v10  ;;  %17291 = vst [vmem:[#allocation30_spill] sm:$0xff] %v14253_v49  ;;  %v14255_v3 = vpop.eup %12711  ;;  %v17295_v5 = vcombine.high %v13600_v57, %v13600_v57  ;;  %v17297_v7 = vcombine.high %v13658_v29, %v13658_v29 }
0x17b1   :  { %17284 = vst [vmem:[#allocation16_spill] sm:$0xff] %v14236_v60  ;;  %17289 = vst [vmem:[#allocation25_spill] sm:$0xff] %v14249_v62  ;;  %v14261_v55 = vmul.f32 %v14070_v40, %v17293_v8  ;;  %v3584_v6 = vcombine.low %v3472_v50, %v14105_v23  ;;  %v17301_v8 = vld [vmem:[#allocation37_spill] sm:$0xff]  ;;  %v17303_v50 = vcombine.high %v13329_v36, %v13329_v36 }
0x17b2   :  { %17286 = vst [vmem:[#allocation23_spill] sm:$0xff] %v14241_v21  ;;  %17292 = vst [vmem:[#allocation31_spill] sm:$0xff] %v14255_v3  ;;  %v14267_v37 = vmul.f32 %v14083_v32, %v17295_v5  ;;  %v14272_v4 = vmul.f32 %v3340_v34, %v17297_v7  ;;  %v17299_v3 = vcombine.high %v13671_v51, %v13671_v51 }
0x17b3   :  { %17294 = vst [vmem:[#allocation66_spill] sm:$0xff] %v14261_v55  ;;  %v14282_v55 = vmul.f32 %v3356_v15, %v17301_v8  ;;  %v3904_v5 = vcombine.low %v14105_v23, %v14118_v31  ;;  %v3162_v34 = vcombine.high %v14008_v22, %v14008_v22  ;;  %v17304_v7 = vcombine.high %v13977_v33, %v13977_v33  ;;  %v17306_v8 = vld [vmem:[#allocation15_spill] sm:$0xff] }
0x17b4   :  { %17296 = vst [vmem:[#allocation67_spill] sm:$0xff] %v14267_v37  ;;  %17298 = vst [vmem:[#allocation68_spill] sm:$0xff] %v14272_v4  ;;  %v14279_v62 = vmul.f32 %v14095_v45, %v17299_v3  ;;  %v3113_v37 = vcombine.high %v13988_v48, %v13988_v48  ;;  %v17305_v45 = vld [vmem:[#allocation14_spill] sm:$0xff]  ;;  %v17307_v23 = vcombine.high %v13967_v52, %v13967_v52 }
0x17b5   :  { %17302 = vst [vmem:[#allocation37_spill] sm:$0xff] %v14282_v55  ;;  %v14296_v3 = vmul.f32 %v17304_v7, %v17303_v50  ;;  %v14300_v15 = vmul.f32 %v13988_v48, %v17305_v45  ;;  %v17308_v36 = vcombine.high %v13413_v39, %v13413_v39  ;;  %v17309_v50 = vld [vmem:[#allocation17_spill] sm:$0xff]  ;;  %v17310_v48 = vcombine.high %v14000_v19, %v14000_v19 }
0x17b6   :  { %17300 = vst [vmem:[#allocation69_spill] sm:$0xff] %v14279_v62  ;;  %v14306_v55 = vmul.f32 %v17307_v23, %v17306_v8  ;;  %v14309_v62 = vmul.f32 %v3113_v37, %v13387_v38  ;;  %v17311_v7 = vld [vmem:[#allocation21_spill] sm:$0xff]  ;;  %v17312_v52 = vcombine.high %v14011_v30, %v14011_v30  ;;  %v17313_v23 = vld [vmem:[#allocation18_spill] sm:$0xff]  ;;  %v17314_v37 = vld [vmem:[#allocation19_spill] sm:$0xff]  ;;  %v17315_v39 = vcombine.high %v14023_v61, %v14023_v61 }
0x17b7   :  { %v14315_v33 = vmul.f32 %v14008_v22, %v17308_v36  ;;  %v14321_v45 = vmul.f32 %v17310_v48, %v17309_v50  ;;  %v14328_v38 = vmul.f32 %v3162_v34, %v17313_v23  ;;  %v3585_v36 = vcombine.low %v14118_v31, %v14126_v12 }
0x17b8   :  { %v3501_v8 = vmul.f32 %v17312_v52, %v17311_v7  ;;  %v3502_v22 = vmul.f32 %v17315_v39, %v17314_v37  ;;  %v3592_v19 = vrot.slane %v3584_v6, %v13311_v0  ;;  %v3606_v50 = vrot.slane %v14133_v1, %v13311_v0 }
0x17b9   :  { %v3623_v48 = vcombine.low %v3481_v59, %v14155_v14  ;;  %v3624_v7 = vcombine.low %v14161_v58, %v14167_v27  ;;  %v3645_v34 = vrot.slane %v14171_v44, %v13311_v0  ;;  %v14345_v52 = vrot.slane %v3585_v36, %v13311_v0 }
0x17ba   :  { %v3662_v61 = vcombine.low %v3490_v9, %v14185_v16  ;;  %v3663_v31 = vcombine.low %v14191_v11, %v14197_v26  ;;  %v3684_v6 = vrot.slane %v14203_v28, %v13311_v0  ;;  %v14353_v23 = vrot.slane %v3606_v50, %v13311_v0 }
0x17bb   :  { %v3631_v59 = vrot.slane %v3623_v48, %v13311_v0  ;;  %v14357_v37 = vrot.slane %v3624_v7, %v13311_v0  ;;  %v14360_v39 = vrot.slane %v3645_v34, %v13311_v0  ;;  %v3607_v36 = vcombine.low %v3592_v19, %v14345_v52 }
0x17bc   :  { %v3670_v9 = vrot.slane %v3662_v61, %v13311_v0  ;;  %v14365_v4 = vrot.slane %v3663_v31, %v13311_v0  ;;  %v14368_v49 = vrot.slane %v3684_v6, %v13311_v0  ;;  %v3701_v48 = vcombine.low %v3499_v63, %v14209_v13 }
0x17bd   :  { %v3646_v50 = vcombine.low %v3631_v59, %v14357_v37  ;;  %v3702_v10 = vcombine.low %v3501_v8, %v3502_v22  ;;  %v3905_v7 = vcombine.low %v14126_v12, %v14133_v1  ;;  %v14375_v34 = vrot.slane %v3607_v36, %v13311_v0 }
0x17be   :  { %v3685_v19 = vcombine.low %v3670_v9, %v14365_v4  ;;  %v3912_v61 = vrot.slane %v3904_v5, %v13311_v0  ;;  %v3926_v31 = vrot.slane %v14137_v17, %v13311_v0  ;;  %v3709_v59 = vrot.slane %v3701_v48, %v13311_v0 }
0x17bf   :  { %v14382_v6 = vrot.slane %v3646_v50, %v13311_v0  ;;  %v14386_v63 = vrot.slane %v3702_v10, %v13311_v0  ;;  %v14389_v12 = vrot.slane %v3905_v7, %v13311_v0  ;;  %v3943_v5 = vcombine.low %v14155_v14, %v14161_v58 }
0x17c0   :  { %v14392_v36 = vrot.slane %v3685_v19, %v13311_v0  ;;  %v14395_v9 = vrot.slane %v3926_v31, %v13311_v0  ;;  %v3944_v50 = vcombine.low %v14167_v27, %v14171_v44  ;;  %v3965_v7 = vrot.slane %v14300_v15, %v13311_v0 }
0x17c1   :  { %v3724_v48 = vcombine.low %v3709_v59, %v14386_v63  ;;  %v3927_v10 = vcombine.low %v3912_v61, %v14389_v12  ;;  %v3982_v19 = vcombine.low %v14185_v16, %v14191_v11  ;;  %v3951_v60 = vrot.slane %v3943_v5, %v13311_v0 }
0x17c2   :  { %v14409_v31 = vrot.slane %v3944_v50, %v13311_v0  ;;  %v3983_v14 = vcombine.low %v14197_v26, %v14203_v28  ;;  %v4004_v58 = vrot.slane %v14315_v33, %v13311_v0  ;;  %v14422_v59 = vrot.slane %v3965_v7, %v13311_v0 }
0x17c3   :  { %v14416_v27 = vrot.slane %v3724_v48, %v13311_v0  ;;  %v14419_v61 = vrot.slane %v3927_v10, %v13311_v0  ;;  %v3990_v16 = vrot.slane %v3982_v19, %v13311_v0  ;;  %v4021_v50 = vcombine.low %v14209_v13, %v3501_v8 }
0x17c4   :  { %v3966_v11 = vcombine.low %v3951_v60, %v14409_v31  ;;  %v3997_v5 = vrot.slane %v3983_v14, %v13311_v0  ;;  %v14428_v26 = vrot.slane %v4004_v58, %v13311_v0  ;;  %v4022_v48 = vcombine.low %v3502_v22, %v14213_v43 }
0x17c5   :  { %v4224_v10 = vcombine.low %v14133_v1, %v14137_v17  ;;  %v4238_v7 = vrot.slane %v14145_v56, %v13311_v0  ;;  %v4255_v19 = vcombine.low %v14171_v44, %v14300_v15  ;;  %v4029_v58 = vrot.slane %v4021_v50, %v13311_v0 }
0x17c6   :  { %v14439_v60 = vrot.slane %v3966_v11, %v13311_v0  ;;  %v4005_v14 = vcombine.low %v3990_v16, %v3997_v5  ;;  %v4269_v13 = vrot.slane %v14306_v55, %v13311_v0  ;;  %v4036_v8 = vrot.slane %v4022_v48, %v13311_v0 }
0x17c7   :  { %v14446_v22 = vrot.slane %v4224_v10, %v13311_v0  ;;  %v14449_v1 = vrot.slane %v4238_v7, %v13311_v0  ;;  %v4262_v21 = vrot.slane %v4255_v19, %v13311_v0  ;;  %v4286_v11 = vcombine.low %v14203_v28, %v14315_v33 }
0x17c8   :  { %v14453_v44 = vrot.slane %v4005_v14, %v13311_v0  ;;  %v14456_v16 = vrot.slane %v4269_v13, %v13311_v0  ;;  %v4300_v50 = vrot.slane %v14321_v45, %v13311_v0  ;;  %v4044_v48 = vcombine.low %v4029_v58, %v4036_v8 }
0x17c9   :  { %v4239_v10 = vcombine.low %v14345_v52, %v14446_v22  ;;  %v4270_v7 = vcombine.low %v14357_v37, %v4262_v21  ;;  %v4317_v19 = vcombine.low %v14213_v43, %v14217_v54  ;;  %v14468_v14 = vrot.slane %v4286_v11, %v13311_v0 }
0x17ca   :  { %v14471_v13 = vrot.slane %v4300_v50, %v13311_v0  ;;  %v4480_v28 = vcombine.low %v14137_v17, %v14145_v56  ;;  %v4494_v58 = vrot.slane %v14296_v3, %v13311_v0  ;;  %v14478_v25 = vrot.slane %v4044_v48, %v13311_v0 }
0x17cb   :  { %v4246_v52 = vrot.slane %v4239_v10, %v13311_v0  ;;  %v4277_v37 = vrot.slane %v4270_v7, %v13311_v0  ;;  %v14483_v20 = vrot.slane %v4317_v19, %v13311_v0  ;;  %v4301_v11 = vcombine.low %v14365_v4, %v14468_v14 }
0x17cc   :  { %v4487_v50 = vrot.slane %v4480_v28, %v13311_v0  ;;  %v4509_v17 = vrot.slane %v4494_v58, %v13311_v0  ;;  %v4511_v43 = vcombine.low %v14300_v15, %v14306_v55  ;;  %v4525_v10 = vrot.slane %v14309_v62, %v13311_v0 }
0x17cd   :  { %17316 = vst [vmem:[#allocation14_spill] sm:$0xff] %v14483_v20  ;;  %v4332_v48 = vcombine.low %v14386_v63, %v14483_v20  ;;  %v4542_v7 = vcombine.low %v14315_v33, %v14321_v45  ;;  %v4556_v19 = vrot.slane %v14328_v38, %v13311_v0  ;;  %v14500_v4 = vrot.slane %v4301_v11, %v13311_v0 }
0x17ce   :  { %v4495_v28 = vcombine.low %v14389_v12, %v4487_v50  ;;  %v4518_v58 = vrot.slane %v4511_v43, %v13311_v0  ;;  %v4573_v15 = vcombine.low %v14217_v54, %v14223_v41  ;;  %v4540_v20 = vrot.slane %v4525_v10, %v13311_v0 }
0x17cf   :  { %v14507_v63 = vrot.slane %v4332_v48, %v13311_v0  ;;  %v4549_v33 = vrot.slane %v4542_v7, %v13311_v0  ;;  %v14512_v32 = vrot.slane %v4556_v19, %v13311_v0  ;;  %v4736_v43 = vcombine.low %v14145_v56, %v14296_v3 }
0x17d0   :  { %v4502_v11 = vrot.slane %v4495_v28, %v13311_v0  ;;  %v4526_v51 = vcombine.low %v14409_v31, %v4518_v58  ;;  %v4580_v12 = vrot.slane %v4573_v15, %v13311_v0  ;;  %v4767_v48 = vcombine.low %v14306_v55, %v14309_v62 }
0x17d1   :  { %v4557_v50 = vcombine.low %v3997_v5, %v4549_v33  ;;  %v4781_v10 = vrot.slane %v14175_v46, %v13311_v0  ;;  %v4798_v7 = vcombine.low %v14321_v45, %v14328_v38  ;;  %v14527_v31 = vrot.slane %v4736_v43, %v13311_v0 }
0x17d2   :  { %v4533_v19 = vrot.slane %v4526_v51, %v13311_v0  ;;  %v4588_v28 = vcombine.low %v4036_v8, %v4580_v12  ;;  %v11726_v58 = vcombine.low %v14375_v34, %v14419_v61  ;;  %v4774_v3 = vrot.slane %v4767_v48, %v13311_v0 }
0x17d3   :  { %v4564_v56 = vrot.slane %v4557_v50, %v13311_v0  ;;  %v4796_v62 = vrot.slane %v4781_v10, %v13311_v0  ;;  %v14535_v46 = vrot.slane %v4798_v7, %v13311_v0  ;;  %v11727_v45 = vcombine.low %v14353_v23, %v14395_v9 }
0x17d4   :  { %v4595_v55 = vrot.slane %v4588_v28, %v13311_v0  ;;  %v11728_v38 = vcombine.low %v4246_v52, %v4502_v11  ;;  %v4782_v5 = vcombine.low %v4262_v21, %v4774_v3  ;;  %v11729_v61 = vcombine.low %v14449_v1, %v4509_v17 }
0x17d5   :  { %v4995_v8 = vrot.slane %v11726_v58, %v13311_v0  ;;  %v5002_v15 = vrot.slane %v11727_v45, %v13311_v0  ;;  %v11731_v12 = vcombine.low %v14382_v6, %v14439_v60  ;;  %v11732_v43 = vcombine.low %v14360_v39, %v14422_v59 }
0x17d6   :  { %v5009_v33 = vrot.slane %v11728_v38, %v13311_v0  ;;  %v4789_v23 = vrot.slane %v4782_v5, %v13311_v0  ;;  %v5016_v21 = vrot.slane %v11729_v61, %v13311_v0  ;;  %v11733_v9 = vcombine.low %v4277_v37, %v4533_v19 }
0x17d7   :  { %v11734_v52 = vcombine.low %v14456_v16, %v4540_v20  ;;  %v11735_v11 = vcombine.low %v4796_v62, %v4796_v62  ;;  %v5093_v50 = vrot.slane %v11731_v12, %v13311_v0  ;;  %v5100_v7 = vrot.slane %v11732_v43, %v13311_v0 }
0x17d8   :  { %v5031_v1 = vcombine.low %v4995_v8, %v5009_v33  ;;  %v5032_v17 = vcombine.high %v4995_v8, %v5009_v33  ;;  %v4797_v48 = vcombine.low %v4789_v23, %v4796_v62  ;;  %v5033_v10 = vcombine.low %v5002_v15, %v5016_v21 }
0x17d9   :  { %v5107_v6 = vrot.slane %v11733_v9, %v13311_v0  ;;  %v5114_v60 = vrot.slane %v11734_v52, %v13311_v0  ;;  %v5128_v37 = vrot.slane %v11735_v11, %v13311_v0  ;;  %v11736_v62 = vcombine.low %v14392_v36, %v14453_v44 }
0x17da   :  { %v5041_v39 = vrot.slane %v5031_v1, %v13311_v0  ;;  %v5055_v59 = vrot.slane %v5032_v17, %v13311_v0  ;;  %v5048_v20 = vrot.slane %v5033_v10, %v13311_v0  ;;  %v5121_v16 = vrot.slane %v4797_v48, %v13311_v0 }
0x17db   :  { %v5129_v19 = vcombine.low %v5093_v50, %v5107_v6  ;;  %v5130_v28 = vcombine.high %v5093_v50, %v5107_v6  ;;  %v5131_v58 = vcombine.low %v5100_v7, %v5114_v60  ;;  %v5167_v3 = vrot.slane %v5128_v37, %v13311_v0 }
0x17dc   :  { %v11737_v45 = vcombine.low %v14368_v49, %v14428_v26  ;;  %v5132_v38 = vcombine.high %v5121_v16, %v5121_v16  ;;  %v14574_v8 = vrot.slane %v5121_v16, %v13311_v0  ;;  %v11738_v33 = vcombine.low %v14500_v4, %v4564_v56 }
0x17dd   :  { %v5139_v5 = vrot.slane %v5129_v19, %v13311_v0  ;;  %v14571_v61 = vrot.slane %v5130_v28, %v13311_v0  ;;  %v5146_v15 = vrot.slane %v5131_v58, %v13311_v0  ;;  %v11739_v12 = vcombine.low %v14471_v13, %v14512_v32 }
0x17de   :  { %v5191_v36 = vrot.slane %v11736_v62, %v13311_v0  ;;  %v14582_v49 = vrot.slane %v5132_v38, %v13311_v0  ;;  %v5198_v44 = vrot.slane %v11737_v45, %v13311_v0  ;;  %v11741_v43 = vcombine.low %v14416_v27, %v14478_v25 }
0x17df   :  { %v5176_v26 = vcombine.high %v5139_v5, %v14574_v8  ;;  %v14588_v23 = vcombine.low %v5146_v15, %v5167_v3  ;;  %v5205_v21 = vrot.slane %v11738_v33, %v13311_v0  ;;  %v5212_v4 = vrot.slane %v11739_v12, %v13311_v0 }
0x17e0   :  { %17317 = vst [vmem:[#allocation15_spill] sm:$0xff] %v14582_v49  ;;  %v11743_v32 = vcombine.low %v14507_v63, %v4595_v55  ;;  %v5179_v56 = vcombine.high %v14571_v61, %v14582_v49  ;;  %v14598_v9 = vrot.slane %v11741_v43, %v13311_v0  ;;  %v11766_v52 = vcombine.low %v5041_v39, %v5055_v59 }
0x17e1   :  { %17318 = vst [vmem:[#allocation17_spill] sm:$0xff] %v14588_v23  ;;  %v5227_v1 = vcombine.low %v5191_v36, %v5205_v21  ;;  %v5228_v25 = vcombine.high %v5191_v36, %v5205_v21  ;;  %v5229_v27 = vcombine.low %v5198_v44, %v5212_v4  ;;  %v11768_v11 = vcombine.high %v5041_v39, %v5055_v59 }
0x17e2   :  { %v14601_v17 = vrot.slane %v11743_v32, %v13311_v0  ;;  %v11770_v50 = vcombine.low %v5048_v20, %v5139_v5  ;;  %v11772_v63 = vcombine.low %v14571_v61, %v5176_v26  ;;  %v5782_v55 = vrot.slane %v11766_v52, %v13311_v0 }
0x17e3   :  { %v5237_v48 = vrot.slane %v5227_v1, %v13311_v0  ;;  %v5244_v10 = vrot.slane %v5229_v27, %v13311_v0  ;;  %v5251_v7 = vrot.slane %v5228_v25, %v13311_v0  ;;  %v5796_v60 = vrot.slane %v11768_v11, %v13311_v0  ;;  %v17319_v25 = vld [vmem:[#allocation59_spill] sm:$0xff] }
0x17e4   :  { %v5325_v6 = vcombine.low %v14598_v9, %v14601_v17  ;;  %v5810_v37 = vrot.slane %v11770_v50, %v13311_v0  ;;  %v5824_v39 = vrot.slane %v11772_v63, %v13311_v0  ;;  %v11774_v59 = vcombine.low %v5179_v56, %v5146_v15 }
0x17e5   :  { %v11776_v19 = vcombine.low %v5237_v48, %v5251_v7  ;;  %v11778_v28 = vcombine.high %v5237_v48, %v5251_v7  ;;  %v5832_v58 = vcombine.low %v5782_v55, %v5796_v60  ;;  %v5833_v3 = vcombine.high %v5782_v55, %v5796_v60 }
0x17e6   :  { %v14614_v20 = vrot.slane %v5325_v6, %v13311_v0  ;;  %v5835_v62 = vcombine.low %v5810_v37, %v5824_v39  ;;  %v5836_v45 = vcombine.high %v5810_v37, %v5824_v39  ;;  %v5899_v5 = vrot.slane %v11774_v59, %v13311_v0  ;;  %v17322_v6 = vld [vmem:[#allocation29_spill] sm:$0xff] }
0x17e7   :  { %v5913_v33 = vrot.slane %v11776_v19, %v13311_v0  ;;  %v5927_v15 = vrot.slane %v11778_v28, %v13311_v0  ;;  %v14623_v12 = vrot.slane %v5833_v3, %v13311_v0  ;;  %v14629_v26 = vrot.slane %v5832_v58, %v13311_v0 }
0x17e8   :  { %v11780_v38 = vcombine.low %v5244_v10, %v14614_v20  ;;  %v14626_v36 = vrot.slane %v5836_v45, %v13311_v0  ;;  %v14632_v44 = vrot.slane %v5835_v62, %v13311_v0  ;;  %v3211_v32 = vcombine.high %v14033_v35, %v14033_v35  ;;  %v17320_v35 = vld [vmem:[#allocation26_spill] sm:$0xff]  ;;  %v17321_v10 = vld [vmem:[#allocation27_spill] sm:$0xff]  ;;  %v17330_v62 = vld [vmem:[#allocation33_spill] sm:$0xff] }
0x17e9   :  { %v5949_v21 = vcombine.low %v5899_v5, %v5913_v33  ;;  %v5950_v4 = vcombine.high %v5899_v5, %v5913_v33  ;;  %v3260_v1 = vcombine.high %v14064_v47, %v14064_v47  ;;  %v3309_v27 = vcombine.high %v17319_v25, %v17319_v25  ;;  %v17333_v5 = vld [vmem:[#allocation57_spill] sm:$0xff] }
0x17ea   :  { %v5941_v43 = vrot.slane %v11780_v38, %v13311_v0  ;;  %v5883_v56 = vcombine.low %v14623_v12, %v14626_v36  ;;  %v5880_v52 = vcombine.low %v14629_v26, %v14632_v44  ;;  %v14652_v48 = vmul.f32 %v3211_v32, %v17320_v35  ;;  %v17332_v38 = vld [vmem:[#allocation34_spill] sm:$0xff] }
0x17eb   :  { %v14646_v63 = vrot.slane %v5950_v4, %v13311_v0  ;;  %v14649_v55 = vrot.slane %v5949_v21, %v13311_v0  ;;  %v14656_v7 = vmul.f32 %v14011_v30, %v17321_v10  ;;  %v14660_v60 = vmul.f32 %v14064_v47, %v17322_v6  ;;  %v17328_v47 = vld [vmem:[#allocation32_spill] sm:$0xff]  ;;  %v17338_v10 = vld [vmem:[#allocation38_spill] sm:$0xff] }
0x17ec   :  { %v5952_v11 = vcombine.low %v5927_v15, %v5941_v43  ;;  %v5953_v50 = vcombine.high %v5927_v15, %v5941_v43  ;;  %v17323_v37 = vcombine.high %v13533_v53, %v13533_v53  ;;  %v17324_v39 = vcombine.high %v14040_v42, %v14040_v42  ;;  %v17334_v15 = vld [vmem:[#allocation35_spill] sm:$0xff]  ;;  %v17335_v21 = vld [vmem:[#allocation36_spill] sm:$0xff] }
0x17ed   :  { %v17326_v30 = vcombine.high %v17322_v6, %v17322_v6  ;;  %v17329_v53 = vcombine.high %v14053_v2, %v14053_v2  ;;  %v17331_v42 = vcombine.high %v14067_v18, %v14067_v18  ;;  %v14693_v33 = vmul.f32 %v17333_v5, %v17332_v38  ;;  %v17339_v6 = vld [vmem:[#allocation60_spill] sm:$0xff] }
0x17ee   :  { %v14668_v59 = vmul.f32 %v17324_v39, %v17323_v37  ;;  %v14671_v19 = vrot.slane %v5953_v50, %v13311_v0  ;;  %v14674_v28 = vrot.slane %v5952_v11, %v13311_v0  ;;  %v14697_v43 = vmul.f32 %v17319_v25, %v17334_v15  ;;  %v17345_v38 = vld [vmem:[#allocation16_spill] sm:$0xff] }
0x17ef   :  { %v14679_v58 = vmul.f32 %v3260_v1, %v17326_v30  ;;  %v3519_v3 = vmul.f32 %v17329_v53, %v17328_v47  ;;  %v14689_v45 = vmul.f32 %v17331_v42, %v17330_v62  ;;  %v17336_v4 = vcombine.high %v17333_v5, %v17333_v5  ;;  %v17341_v30 = vld [vmem:[#allocation12_spill] sm:$0xff]  ;;  %v17344_v42 = vld [vmem:[#allocation23_spill] sm:$0xff] }
0x17f0   :  { %17325 = vst [vmem:[#allocation21_spill] sm:$0xff] %v14668_v59  ;;  %v6000_v1 = vcombine.low %v14646_v63, %v14671_v19  ;;  %v5997_v18 = vcombine.low %v14649_v55, %v14674_v28  ;;  %v14710_v11 = vmul.f32 %v3309_v27, %v13585_v24  ;;  %v14714_v50 = vmul.f32 %v14053_v2, %v13600_v57  ;;  %v17342_v53 = vld [vmem:[#allocation20_spill] sm:$0xff]  ;;  %v17343_v24 = vld [vmem:[#allocation13_spill] sm:$0xff]  ;;  %v12468_v57 = vld [vmem:[%s17006_s10 + $0x100] ss:$8 sps:$4 sm:$0xff]  }
0x17f1   :  { %17327 = vst [vmem:[#allocation18_spill] sm:$0xff] %v14679_v58  ;;  %v14703_v32 = vmul.f32 %v17336_v4, %v17335_v21  ;;  %v17337_v25 = vcombine.high %v14070_v40, %v14070_v40  ;;  %v17340_v37 = vcombine.high %v17339_v6, %v17339_v6  ;;  %v3723_v47 = vrot.slane %v17341_v30, %v13311_v0  ;;  %v17346_v5 = vld [vmem:[#allocation24_spill] sm:$0xff]  ;;  %v17349_v30 = vld [vmem:[#allocation67_spill] sm:$0xff] }
0x17f2   :  { %v3740_v27 = vcombine.low %v17343_v24, %v17342_v53  ;;  %v6379_v62 = vpack.c.bf16 %v6000_v1, %v5883_v56  ;;  %v6378_v2 = vpack.c.bf16 %v5997_v18, %v5880_v52  ;;  %v3762_v15 = vrot.slane %v17346_v5, %v13311_v0  ;;  %v12473_v21 = vld [vmem:[%s17006_s10 + $0x114] ss:$8 sps:$4 sm:$0xff]   ;;  %v17347_v1 = vld [vmem:[#allocation30_spill] sm:$0xff] }
0x17f3   :  { %v3528_v35 = vmul.f32 %v17337_v25, %v13658_v29  ;;  %v3529_v39 = vmul.f32 %v17340_v37, %v17338_v10  ;;  %v3741_v29 = vcombine.low %v17345_v38, %v17344_v42  ;;  %v14739_v4 = vrot.slane %v3723_v47, %v13311_v0  ;;  %v17348_v25 = vld [vmem:[#allocation25_spill] sm:$0xff]  ;;  %v17350_v47 = vld [vmem:[#allocation66_spill] sm:$0xff] }
0x17f4   :  { %v3748_v56 = vrot.slane %v3740_v27, %v13311_v0  ;;  %v3779_v10 = vcombine.low %v17348_v25, %v17347_v1  ;;  %v3780_v52 = vcombine.low %v3519_v3, %v14689_v45  ;;  %6905 = vmatprep.mubr.bf16.mxu1 %v6379_v62  ;;  %v14749_v6 = vrot.slane %v3762_v15, %v13311_v0 }
0x17f5   :  { %v14746_v18 = vrot.slane %v3741_v29, %v13311_v0  ;;  %v3801_v37 = vrot.slane %v14693_v33, %v13311_v0  ;;  %v3818_v24 = vcombine.low %v17350_v47, %v17349_v30  ;;  %6906 = vmatmul.mubr.bf16.vlgmr.msra.gmra.mrb[20].mxu1 %v6378_v2  ;;  %v3819_v16 = vcombine.low %v3528_v35, %v3529_v39  ;;  %v12471_v29 = vld [vmem:[%s17006_s10 + $0x110] ss:$8 sps:$4 sm:$0xff]  }
0x17f6   :  { %v3787_v27 = vrot.slane %v3779_v10, %v13311_v0  ;;  %v14757_v25 = vrot.slane %v3780_v52, %v13311_v0  ;;  %v4043_v62 = vrot.slane %v14217_v54, %v13311_v0  ;;  %6935 = vmatpush1.bf16.msra.mxu1 %v12468_v57  ;;  %v4060_v10 = vcombine.low %v17342_v53, %v17345_v38  ;;  %v12476_v54 = vld [vmem:[%s17006_s10 + $0x124] ss:$8 sps:$4 sm:$0xff]  }
0x17f7   :  { %v3763_v15 = vcombine.low %v3748_v56, %v14746_v18  ;;  %v14766_v13 = vrot.slane %v3801_v37, %v13311_v0  ;;  %v3826_v2 = vrot.slane %v3818_v24, %v13311_v0  ;;  %6936 = vmatprep.subr.bf16.mxu1 %v12473_v21  ;;  %v14776_v52 = vrot.slane %v3819_v16, %v13311_v0 }
0x17f8   :  { %v3802_v57 = vcombine.low %v3787_v27, %v14757_v25  ;;  %v14779_v56 = vrot.slane %v4043_v62, %v13311_v0  ;;  %v4061_v37 = vcombine.low %v17344_v42, %v17346_v5  ;;  %v4068_v53 = vrot.slane %v4060_v10, %v13311_v0  ;;  %v12474_v62 = vld [vmem:[%s17006_s10 + $0x120] ss:$8 sps:$4 sm:$0xff]  }
0x17f9   :  { %v14784_v47 = vrot.slane %v3763_v15, %v13311_v0  ;;  %v4082_v38 = vrot.slane %v14660_v60, %v13311_v0  ;;  %v4099_v21 = vcombine.low %v17347_v1, %v3519_v3  ;;  %v3841_v16 = vcombine.low %v3826_v2, %v14776_v52 }
0x17fa   :  { %v14791_v24 = vrot.slane %v3802_v57, %v13311_v0  ;;  %v14795_v27 = vrot.slane %v4061_v37, %v13311_v0  ;;  %v4100_v42 = vcombine.low %v14689_v45, %v14693_v33  ;;  %6937 = vmatpush1.bf16.msra.mxu1 %v12471_v29  ;;  %v4121_v1 = vrot.slane %v14697_v43, %v13311_v0  ;;  %v12479_v45 = vld [vmem:[%s17006_s10 + $0x134] ss:$8 sps:$4 sm:$0xff]  }
0x17fb   :  { %v14803_v15 = vrot.slane %v4082_v38, %v13311_v0  ;;  %v4107_v3 = vrot.slane %v4099_v21, %v13311_v0  ;;  %v4138_v2 = vcombine.low %v17349_v30, %v3528_v35  ;;  %6938 = vmatprep.subr.bf16.mxu1 %v12476_v54  ;;  %v14813_v29 = vrot.slane %v3841_v16, %v13311_v0  ;;  %v17351_v37 = vld [vmem:[#allocation68_spill] sm:$0xff] }
0x17fc   :  { %v4083_v10 = vcombine.low %v4068_v53, %v14795_v27  ;;  %v14817_v57 = vrot.slane %v4100_v42, %v13311_v0  ;;  %v4139_v38 = vcombine.low %v3529_v39, %v17351_v37  ;;  %v14821_v21 = vrot.slane %v4121_v1, %v13311_v0  ;;  %v12477_v1 = vld [vmem:[%s17006_s10 + $0x130] ss:$8 sps:$4 sm:$0xff]  }
0x17fd   :  { %v4146_v35 = vrot.slane %v4138_v2, %v13311_v0  ;;  %v4331_v30 = vrot.slane %v14223_v41, %v13311_v0  ;;  %v4348_v54 = vcombine.low %v17346_v5, %v14660_v60  ;;  %v4362_v39 = vrot.slane %v14668_v59, %v13311_v0 }
0x17fe   :  { %v14829_v16 = vrot.slane %v4083_v10, %v13311_v0  ;;  %v4122_v53 = vcombine.low %v4107_v3, %v14817_v57  ;;  %v14833_v42 = vrot.slane %v4139_v38, %v13311_v0  ;;  %6939 = vmatpush1.bf16.msra.mxu1 %v12474_v62  ;;  %v4379_v3 = vcombine.low %v14693_v33, %v14697_v43  ;;  %v12482_v62 = vld [vmem:[%s17006_s10 + $0x144] ss:$8 sps:$4 sm:$0xff]  }
0x17ff   :  { %v14841_v2 = vrot.slane %v4331_v30, %v13311_v0  ;;  %v14844_v5 = vrot.slane %v4348_v54, %v13311_v0  ;;  %v4393_v10 = vrot.slane %v14703_v32, %v13311_v0  ;;  %6940 = vmatprep.subr.bf16.mxu1 %v12479_v45  ;;  %v14858_v34 = vrot.slane %v4362_v39, %v13311_v0  ;;  %v17353_v54 = vld [vmem:[#allocation69_spill] sm:$0xff] }
0x1800   :  { %v14854_v38 = vrot.slane %v4122_v53, %v13311_v0  ;;  %v4161_v30 = vcombine.low %v4146_v35, %v14833_v42  ;;  %v4410_v51 = vcombine.low %v17351_v37, %v17353_v54  ;;  %v4386_v45 = vrot.slane %v4379_v3, %v13311_v0  ;;  %v12480_v3 = vld [vmem:[%s17006_s10 + $0x140] ss:$8 sps:$4 sm:$0xff]  }
0x1801   :  { %17352 = vst [vmem:[#allocation19_spill] sm:$0xff] %v14844_v5  ;;  %v4363_v33 = vcombine.low %v14746_v18, %v14844_v5  ;;  %v14866_v40 = vrot.slane %v4393_v10, %v13311_v0  ;;  %v4587_v53 = vrot.slane %v14652_v48, %v13311_v0  ;;  %v4604_v39 = vcombine.low %v14660_v60, %v14668_v59  ;;  %v12485_v60 = vld [vmem:[%s17006_s10 + $0x154] ss:$8 sps:$4 sm:$0xff]  }
0x1802   :  { %v14871_v23 = vrot.slane %v4161_v30, %v13311_v0  ;;  %v14874_v35 = vrot.slane %v4410_v51, %v13311_v0  ;;  %v4618_v18 = vrot.slane %v14679_v58, %v13311_v0  ;;  %6941 = vmatpush1.bf16.msra.mxu1 %v12477_v1  ;;  %v4394_v5 = vcombine.low %v14757_v25, %v4386_v45 }
0x1803   :  { %v4370_v10 = vrot.slane %v4363_v33, %v13311_v0  ;;  %v4602_v30 = vrot.slane %v4587_v53, %v13311_v0  ;;  %v4635_v51 = vcombine.low %v14697_v43, %v14703_v32  ;;  %6942 = vmatprep.subr.bf16.mxu1 %v12482_v62  ;;  %v4611_v59 = vrot.slane %v4604_v39, %v13311_v0  ;;  %v17355_v62 = vld [vmem:[#allocation37_spill] sm:$0xff] }
0x1804   :  { %17354 = vst [vmem:[#allocation59_spill] sm:$0xff] %v14874_v35  ;;  %v4425_v1 = vcombine.low %v14776_v52, %v14874_v35  ;;  %v4633_v58 = vrot.slane %v4618_v18, %v13311_v0  ;;  %v4649_v25 = vrot.slane %v14710_v11, %v13311_v0  ;;  %v14898_v33 = vrot.slane %v4394_v5, %v13311_v0 }
0x1805   :  { %v4642_v43 = vrot.slane %v4635_v51, %v13311_v0  ;;  %v4666_v53 = vcombine.low %v17353_v54, %v17355_v62  ;;  %v4829_v49 = vcombine.low %v14223_v41, %v14652_v48  ;;  %v4619_v39 = vcombine.low %v14795_v27, %v4611_v59  ;;  %v12483_v51 = vld [vmem:[%s17006_s10 + $0x150] ss:$8 sps:$4 sm:$0xff]   ;;  %v12488_v27 = vld [vmem:[%s17006_s10 + $0x164] ss:$8 sps:$4 sm:$0xff]  }
0x1806   :  { %v14906_v52 = vrot.slane %v4425_v1, %v13311_v0  ;;  %v14910_v18 = vrot.slane %v4649_v25, %v13311_v0  ;;  %v4843_v5 = vrot.slane %v14656_v7, %v13311_v0  ;;  %6943 = vmatpush1.bf16.msra.mxu1 %v12480_v3  ;;  %v4891_v59 = vcombine.low %v14703_v32, %v14710_v11  ;;  %v17356_v11 = vld [vmem:[#allocation14_spill] sm:$0xff] }
0x1807   :  { %v4650_v35 = vcombine.low %v14817_v57, %v4642_v43  ;;  %v4673_v41 = vrot.slane %v4666_v53, %v13311_v0  ;;  %v4836_v48 = vrot.slane %v4829_v49, %v13311_v0  ;;  %6944 = vmatprep.subr.bf16.mxu1 %v12485_v60  ;;  %v4626_v7 = vrot.slane %v4619_v39, %v13311_v0 }
0x1808   :  { %v14927_v3 = vrot.slane %v4843_v5, %v13311_v0  ;;  %v4905_v57 = vrot.slane %v14714_v50, %v13311_v0  ;;  %v11742_v1 = vcombine.low %v14739_v4, %v14779_v56  ;;  %v4898_v25 = vrot.slane %v4891_v59, %v13311_v0  ;;  %v12486_v4 = vld [vmem:[%s17006_s10 + $0x160] ss:$8 sps:$4 sm:$0xff]  }
0x1809   :  { %v4657_v49 = vrot.slane %v4650_v35, %v13311_v0  ;;  %v4681_v32 = vcombine.low %v14833_v42, %v4673_v41  ;;  %v4844_v60 = vcombine.low %v17356_v11, %v4836_v48  ;;  %v11744_v53 = vcombine.low %v14841_v2, %v4602_v30  ;;  %v12491_v2 = vld [vmem:[%s17006_s10 + $0x174] ss:$8 sps:$4 sm:$0xff]  }
0x180a   :  { %v14938_v43 = vrot.slane %v4905_v57, %v13311_v0  ;;  %v5296_v39 = vrot.slane %v11742_v1, %v13311_v0  ;;  %v5326_v50 = vcombine.high %v14598_v9, %v14601_v17  ;;  %6945 = vmatpush1.bf16.msra.mxu1 %v12483_v51  ;;  %v4906_v35 = vcombine.low %v4386_v45, %v4898_v25 }
0x180b   :  { %v14948_v56 = vrot.slane %v4681_v32, %v13311_v0  ;;  %v4851_v42 = vrot.slane %v4844_v60, %v13311_v0  ;;  %v11746_v5 = vcombine.low %v14784_v47, %v14829_v16  ;;  %6946 = vmatprep.subr.bf16.mxu1 %v12488_v27  ;;  %v5310_v9 = vrot.slane %v11744_v53, %v13311_v0 }
0x180c   :  { %v14958_v17 = vrot.slane %v5326_v50, %v13311_v0  ;;  %v11747_v30 = vcombine.low %v14749_v6, %v14803_v15  ;;  %v11748_v51 = vcombine.low %v4370_v10, %v4626_v7  ;;  %v4913_v45 = vrot.slane %v4906_v35, %v13311_v0  ;;  %v12489_v6 = vld [vmem:[%s17006_s10 + $0x170] ss:$8 sps:$4 sm:$0xff]   ;;  %v12494_v7 = vld [vmem:[%s17006_s10 + $0x184] ss:$8 sps:$4 sm:$0xff]  }
0x180d   :  { %v4859_v41 = vcombine.low %v4851_v42, %v14927_v3  ;;  %v11749_v47 = vcombine.low %v14858_v34, %v4633_v58  ;;  %v5387_v16 = vrot.slane %v11746_v5, %v13311_v0  ;;  %v5327_v48 = vcombine.low %v5296_v39, %v5310_v9  ;;  %v12497_v42 = vld [vmem:[%s17006_s10 + $0x194] ss:$8 sps:$4 sm:$0xff]  }
0x180e   :  { %v5394_v59 = vrot.slane %v11747_v30, %v13311_v0  ;;  %v5401_v27 = vrot.slane %v11748_v51, %v13311_v0  ;;  %v11751_v57 = vcombine.low %v14791_v24, %v14854_v38  ;;  %6947 = vmatpush1.bf16.msra.mxu1 %v12486_v4  ;;  %v4921_v15 = vcombine.low %v4913_v45, %v14938_v43 }
0x180f   :  { %v5317_v10 = vrot.slane %v4859_v41, %v13311_v0  ;;  %v5408_v34 = vrot.slane %v11749_v47, %v13311_v0  ;;  %v11752_v58 = vcombine.low %v14766_v13, %v14821_v21  ;;  %6948 = vmatprep.subr.bf16.mxu1 %v12491_v2  ;;  %v14982_v24 = vrot.slane %v5327_v48, %v13311_v0 }
0x1810   :  { %v5423_v38 = vcombine.low %v5387_v16, %v5401_v27  ;;  %v5424_v1 = vcombine.high %v5387_v16, %v5401_v27  ;;  %v11753_v32 = vcombine.low %v14898_v33, %v4657_v49  ;;  %v11754_v13 = vcombine.low %v14866_v40, %v14910_v18  ;;  %v12492_v33 = vld [vmem:[%s17006_s10 + $0x180] ss:$8 sps:$4 sm:$0xff]   ;;  %v12500_v27 = vld [vmem:[%s17006_s10 + $0x1a4] ss:$8 sps:$4 sm:$0xff]  }
0x1811   :  { %17357 = vst [vmem:[#allocation26_spill] sm:$0xff] %v14982_v24  ;;  %v5328_v11 = vcombine.high %v5317_v10, %v5317_v10  ;;  %v14986_v60 = vrot.slane %v5317_v10, %v13311_v0  ;;  %v5425_v25 = vcombine.low %v5394_v59, %v5408_v34  ;;  %v5485_v39 = vrot.slane %v11751_v57, %v13311_v0 }
0x1812   :  { %v5433_v21 = vrot.slane %v5423_v38, %v13311_v0  ;;  %v5447_v53 = vrot.slane %v5424_v1, %v13311_v0  ;;  %v5492_v50 = vrot.slane %v11752_v58, %v13311_v0  ;;  %6949 = vmatpush1.bf16.msra.mxu1 %v12489_v6  ;;  %v5499_v18 = vrot.slane %v11753_v32, %v13311_v0  ;;  %v17360_v32 = vld [vmem:[#allocation31_spill] sm:$0xff] }
0x1813   :  { %v14998_v49 = vrot.slane %v5328_v11, %v13311_v0  ;;  %v5372_v4 = vcombine.high %v14614_v20, %v14986_v60  ;;  %v5440_v40 = vrot.slane %v5425_v25, %v13311_v0  ;;  %6950 = vmatprep.subr.bf16.mxu1 %v12494_v7  ;;  %v5506_v35 = vrot.slane %v11754_v13, %v13311_v0 }
0x1814   :  { %v5513_v5 = vrot.slane %v4921_v15, %v13311_v0  ;;  %v11756_v2 = vcombine.low %v14813_v29, %v14871_v23  ;;  %v11758_v9 = vcombine.low %v14906_v52, %v14948_v56  ;;  %v5521_v30 = vcombine.low %v5485_v39, %v5499_v18  ;;  %v12495_v23 = vld [vmem:[%s17006_s10 + $0x190] ss:$8 sps:$4 sm:$0xff]   ;;  %v1153_v34 = vpop.permute.xlu1 %1152 }
0x1815   :  { %v5375_v20 = vcombine.high %v14958_v17, %v14998_v49  ;;  %v5522_v51 = vcombine.high %v5485_v39, %v5499_v18  ;;  %v11782_v41 = vcombine.low %v14958_v17, %v5372_v4  ;;  %v5523_v45 = vcombine.low %v5492_v50, %v5506_v35  ;;  %v12503_v18 = vld [vmem:[%s17006_s10 + $0x1b4] ss:$8 sps:$4 sm:$0xff]  }
0x1816   :  { %v5524_v47 = vcombine.high %v5513_v5, %v5513_v5  ;;  %v15017_v16 = vrot.slane %v5513_v5, %v13311_v0  ;;  %v5583_v48 = vrot.slane %v11756_v2, %v13311_v0  ;;  %6951 = vmatpush1.bf16.msra.mxu1 %v12492_v33  ;;  %v5531_v29 = vrot.slane %v5521_v30, %v13311_v0 }
0x1817   :  { %v15025_v52 = vrot.slane %v5522_v51, %v13311_v0  ;;  %v5597_v56 = vrot.slane %v11758_v9, %v13311_v0  ;;  %v11784_v59 = vcombine.low %v5375_v20, %v14982_v24  ;;  %6952 = vmatprep.subr.bf16.mxu1 %v12497_v42  ;;  %v15033_v57 = vrot.slane %v5523_v45, %v13311_v0 }
0x1818   :  { %17358 = vst [vmem:[#allocation27_spill] sm:$0xff] %v15017_v16  ;;  %v15036_v6 = vrot.slane %v5524_v47, %v13311_v0  ;;  %v11786_v15 = vcombine.low %v5433_v21, %v5447_v53  ;;  %v11788_v10 = vcombine.high %v5433_v21, %v5447_v53  ;;  %v5568_v58 = vcombine.high %v5531_v29, %v15017_v16  ;;  %v12498_v21 = vld [vmem:[%s17006_s10 + $0x1a0] ss:$8 sps:$4 sm:$0xff]   ;;  %v12501_v47 = vld [vmem:[%s17006_s10 + $0x1b0] ss:$8 sps:$4 sm:$0xff]  }
0x1819   :  { %17359 = vst [vmem:[#allocation29_spill] sm:$0xff] %v15033_v57  ;;  %v5619_v7 = vcombine.low %v5583_v48, %v5597_v56  ;;  %v5620_v38 = vcombine.high %v5583_v48, %v5597_v56  ;;  %v6016_v1 = vrot.slane %v11782_v41, %v13311_v0  ;;  %v1155_v11 = vmul.f32 %v17360_v32, %v1153_v34  ;;  %v17362_v56 = vld [vmem:[#allocation62_spill] sm:$0xff]  ;;  %v17374_v32 = vld [vmem:[#allocation48_spill] sm:$0xff] }
0x181a   :  { %v5571_v25 = vcombine.high %v15025_v52, %v15036_v6  ;;  %v6030_v13 = vrot.slane %v11784_v59, %v13311_v0  ;;  %v6044_v39 = vrot.slane %v11786_v15, %v13311_v0  ;;  %6953 = vmatpush1.bf16.msra.mxu1 %v12495_v23  ;;  %v6058_v33 = vrot.slane %v11788_v10, %v13311_v0  ;;  %v12506_v15 = vld [vmem:[%s17006_s10 + $0x1c4] ss:$8 sps:$4 sm:$0xff]  }
0x181b   :  { %v15049_v53 = vrot.slane %v5619_v7, %v13311_v0  ;;  %v15052_v50 = vrot.slane %v5620_v38, %v13311_v0  ;;  %v11790_v4 = vcombine.low %v5440_v40, %v5531_v29  ;;  %1157 = vrot.lane.b32.xlu1 %v1155_v11, %s12760_s3  ;;  %6954 = vmatprep.subr.bf16.mxu1 %v12500_v27 }
0x181c   :  { %v6067_v42 = vcombine.high %v6016_v1, %v6030_v13  ;;  %v11792_v35 = vcombine.low %v15025_v52, %v5568_v58  ;;  %v11794_v5 = vcombine.low %v5571_v25, %v15033_v57  ;;  %v6070_v2 = vcombine.high %v6044_v39, %v6058_v33  ;;  %v17364_v58 = vld [vmem:[#allocation61_spill] sm:$0xff] }
0x181d   :  { %v11796_v9 = vcombine.low %v15049_v53, %v15052_v50  ;;  %v6133_v20 = vrot.slane %v11790_v4, %v13311_v0  ;;  %v6066_v30 = vcombine.low %v6016_v1, %v6030_v13  ;;  %v6069_v45 = vcombine.low %v6044_v39, %v6058_v33  ;;  %v17367_v4 = vld [vmem:[#allocation63_spill] sm:$0xff] }
0x181e   :  { %v15065_v40 = vrot.slane %v6067_v42, %v13311_v0  ;;  %v6147_v51 = vrot.slane %v11792_v35, %v13311_v0  ;;  %v6161_v41 = vrot.slane %v11794_v5, %v13311_v0  ;;  %6955 = vmatpush1.bf16.msra.mxu1 %v12498_v21  ;;  %v15073_v48 = vrot.slane %v6070_v2, %v13311_v0  ;;  %v12504_v35 = vld [vmem:[%s17006_s10 + $0x1c0] ss:$8 sps:$4 sm:$0xff]  }
0x181f   :  { %v6175_v23 = vrot.slane %v11796_v9, %v13311_v0  ;;  %v15077_v29 = vrot.slane %v6066_v30, %v13311_v0  ;;  %v3358_v59 = vcombine.high %v17362_v56, %v17362_v56  ;;  %6956 = vmatprep.subr.bf16.mxu1 %v12503_v18  ;;  %v15085_v10 = vrot.slane %v6069_v45, %v13311_v0  ;;  %v17368_v9 = vld [vmem:[#allocation64_spill] sm:$0xff]  ;;  %v17371_v56 = vld [vmem:[#allocation42_spill] sm:$0xff] }
0x1820   :  { %v6184_v27 = vcombine.high %v6133_v20, %v6147_v51  ;;  %v6183_v34 = vcombine.low %v6133_v20, %v6147_v51  ;;  %v3389_v7 = vrot.slane %v17364_v58, %v13311_v0  ;;  %v6117_v38 = vcombine.low %v15065_v40, %v15073_v48  ;;  %v12509_v30 = vld [vmem:[%s17006_s10 + $0x1d4] ss:$8 sps:$4 sm:$0xff]  }
0x1821   :  { %17361 = vst [vmem:[#allocation32_spill] sm:$0xff] %v15077_v29  ;;  %17363 = vst [vmem:[#allocation33_spill] sm:$0xff] %v15085_v10  ;;  %v6187_v1 = vcombine.high %v6161_v41, %v6175_v23  ;;  %v6186_v11 = vcombine.low %v6161_v41, %v6175_v23  ;;  %v17365_v25 = vcombine.high %v17364_v58, %v17364_v58  ;;  %v17369_v41 = vld [vmem:[#allocation39_spill] sm:$0xff]  ;;  %v17372_v58 = vld [vmem:[#allocation44_spill] sm:$0xff] }
0x1822   :  { %v15096_v39 = vrot.slane %v6184_v27, %v13311_v0  ;;  %v6114_v21 = vcombine.low %v15077_v29, %v15085_v10  ;;  %v15101_v33 = vrot.slane %v6183_v34, %v13311_v0  ;;  %v3404_v18 = vcombine.high %v17367_v4, %v17367_v4  ;;  %6957 = vmatpush1.bf16.msra.mxu1 %v12501_v47  ;;  %v17370_v47 = vld [vmem:[#allocation41_spill] sm:$0xff] }
0x1823   :  { %v3403_v13 = vrot.slane %v17365_v25, %v13311_v0  ;;  %v15106_v42 = vrot.slane %v6187_v1, %v13311_v0  ;;  %v15112_v5 = vrot.slane %v6186_v11, %v13311_v0  ;;  %v3405_v2 = vcombine.high %v3389_v7, %v3389_v7  ;;  %6958 = vmatprep.subr.bf16.mxu1 %v12506_v15  ;;  %v17373_v11 = vld [vmem:[#allocation46_spill] sm:$0xff]  ;;  %v17376_v29 = vld [vmem:[#allocation45_spill] sm:$0xff] }
0x1824   :  { %17366 = vst [vmem:[#allocation34_spill] sm:$0xff] %v15101_v33  ;;  %v3406_v20 = vcombine.high %v17368_v9, %v17368_v9  ;;  %v15120_v45 = vmul.f32 %v3358_v59, %v17369_v41  ;;  %v3535_v23 = vmul.f32 %v17367_v4, %v17370_v47  ;;  %v3536_v27 = vmul.f32 %v17368_v9, %v17371_v56  ;;  %v17375_v59 = vld [vmem:[#allocation43_spill] sm:$0xff]  ;;  %v12507_v56 = vld [vmem:[%s17006_s10 + $0x1d0] ss:$8 sps:$4 sm:$0xff]  }
0x1825   :  { %v3407_v51 = vcombine.high %v3403_v13, %v3403_v13  ;;  %v6234_v34 = vcombine.low %v15096_v39, %v15106_v42  ;;  %v6231_v15 = vcombine.low %v15101_v33, %v15112_v5  ;;  %v3537_v1 = vmul.f32 %v3404_v18, %v17372_v58  ;;  %v17377_v47 = vld [vmem:[#allocation47_spill] sm:$0xff]  ;;  %v17378_v33 = vld [vmem:[#allocation49_spill] sm:$0xff] }
0x1826   :  { %v3538_v25 = vmul.f32 %v3406_v20, %v17373_v11  ;;  %v3539_v57 = vmul.f32 %v3389_v7, %v17374_v32  ;;  %v3540_v41 = vmul.f32 %v3403_v13, %v17375_v59  ;;  %v3541_v10 = vmul.f32 %v3405_v2, %v17376_v29  ;;  %6959 = vmatpush1.bf16.msra.mxu1 %v12504_v35  ;;  %v12512_v13 = vld [vmem:[%s17006_s10 + $0x1e4] ss:$8 sps:$4 sm:$0xff]  }
0x1827   :  { %v3542_v16 = vmul.f32 %v3407_v51, %v17377_v47  ;;  %v6384_v24 = vpack.c.bf16 %v6234_v34, %v6117_v38  ;;  %v6383_v9 = vpack.c.bf16 %v6231_v15, %v6114_v21  ;;  %v3543_v18 = vmul.f32 %v17367_v4, %v17378_v33  ;;  %6960 = vmatprep.subr.bf16.mxu1 %v12509_v30  ;;  %v12510_v34 = vld [vmem:[%s17006_s10 + $0x1e0] ss:$8 sps:$4 sm:$0xff]  }
0x1828   :  { %v3840_v20 = vrot.slane %v17351_v37, %v13311_v0  ;;  %v3857_v32 = vcombine.low %v3535_v23, %v3536_v27  ;;  %v3858_v7 = vcombine.low %v3537_v1, %v3538_v25  ;;  %v3879_v29 = vrot.slane %v3539_v57, %v13311_v0 }
0x1829   :  { %v4160_v38 = vrot.slane %v17353_v54, %v13311_v0  ;;  %6915 = vmatprep.mubr.bf16.mxu1 %v6384_v24  ;;  %v4177_v35 = vcombine.low %v3536_v27, %v3537_v1  ;;  %v4178_v33 = vcombine.low %v3538_v25, %v3539_v57  ;;  %v4199_v4 = vrot.slane %v3540_v41, %v13311_v0  ;;  %v12515_v25 = vld [vmem:[%s17006_s10 + $0x1f4] ss:$8 sps:$4 sm:$0xff]  }
0x182a   :  { %v3855_v21 = vrot.slane %v3840_v20, %v13311_v0  ;;  %6916 = vmatmul.mubr.bf16.gmra.mrb[24].mxu1 %v6383_v9  ;;  %v3865_v37 = vrot.slane %v3857_v32, %v13311_v0  ;;  %v3872_v2 = vrot.slane %v3858_v7, %v13311_v0  ;;  %v3894_v30 = vrot.slane %v3879_v29, %v13311_v0 }
0x182b   :  { %v4175_v54 = vrot.slane %v4160_v38, %v13311_v0  ;;  %6961 = vmatpush1.bf16.msra.mxu1 %v12507_v56  ;;  %v4185_v51 = vrot.slane %v4177_v35, %v13311_v0  ;;  %v4192_v24 = vrot.slane %v4178_v33, %v13311_v0  ;;  %v4214_v23 = vrot.slane %v4199_v4, %v13311_v0 }
0x182c   :  { %v4424_v27 = vrot.slane %v17355_v62, %v13311_v0  ;;  %v3880_v15 = vcombine.low %v3865_v37, %v3872_v2  ;;  %v4441_v58 = vcombine.low %v3539_v57, %v3540_v41  ;;  %v4455_v1 = vrot.slane %v3541_v10, %v13311_v0  ;;  %6962 = vmatprep.subr.bf16.mxu1 %v12512_v13 }
0x182d   :  { %v4680_v11 = vrot.slane %v15120_v45, %v13311_v0  ;;  %v4200_v59 = vcombine.low %v4185_v51, %v4192_v24  ;;  %v4697_v9 = vcombine.low %v3540_v41, %v3541_v10  ;;  %v4711_v56 = vrot.slane %v3542_v16, %v13311_v0  ;;  %v12513_v41 = vld [vmem:[%s17006_s10 + $0x1f0] ss:$8 sps:$4 sm:$0xff]  }
0x182e   :  { %v4439_v47 = vrot.slane %v4424_v27, %v13311_v0  ;;  %v3887_v20 = vrot.slane %v3880_v15, %v13311_v0  ;;  %v4448_v57 = vrot.slane %v4441_v58, %v13311_v0  ;;  %v4470_v32 = vrot.slane %v4455_v1, %v13311_v0  ;;  %v12518_v27 = vld [vmem:[%s17006_s10 + $0x204] ss:$8 sps:$4 sm:$0xff]  }
0x182f   :  { %v4695_v7 = vrot.slane %v4680_v11, %v13311_v0  ;;  %v4207_v29 = vrot.slane %v4200_v59, %v13311_v0  ;;  %v4704_v38 = vrot.slane %v4697_v9, %v13311_v0  ;;  %v4726_v13 = vrot.slane %v4711_v56, %v13311_v0  ;;  %6963 = vmatpush1.bf16.msra.mxu1 %v12510_v34  ;;  %v17380_v34 = vld [vmem:[#allocation55_spill] sm:$0xff] }
0x1830   :  { %v4953_v35 = vcombine.low %v3541_v10, %v3542_v16  ;;  %v4456_v33 = vcombine.low %v3872_v2, %v4448_v57  ;;  %v4967_v4 = vrot.slane %v3543_v18, %v13311_v0  ;;  %v11757_v37 = vcombine.low %v3855_v21, %v4175_v54  ;;  %6964 = vmatprep.subr.bf16.mxu1 %v12515_v25  ;;  %v17379_v10 = vld [vmem:[#allocation22_spill] sm:$0xff] }
0x1831   :  { %v11759_v51 = vcombine.low %v4439_v47, %v4695_v7  ;;  %v4712_v15 = vcombine.low %v4192_v24, %v4704_v38  ;;  %v11761_v1 = vcombine.low %v3887_v20, %v4207_v29  ;;  %v11762_v16 = vcombine.low %v3894_v30, %v4214_v23 }
0x1832   :  { %v4960_v58 = vrot.slane %v4953_v35, %v13311_v0  ;;  %v3498_v11 = vmul.f32 %v17380_v34, %v17379_v10  ;;  %v4463_v59 = vrot.slane %v4456_v33, %v13311_v0  ;;  %v5590_v2 = vrot.slane %v11757_v37, %v13311_v0 }
0x1833   :  { %v5604_v18 = vrot.slane %v11759_v51, %v13311_v0  ;;  %v4719_v21 = vrot.slane %v4712_v15, %v13311_v0  ;;  %v15193_v25 = vrot.slane %v4967_v4, %v13311_v0  ;;  %v11764_v24 = vcombine.low %v4470_v32, %v4726_v13  ;;  %6965 = vmatpush1.bf16.msra.mxu1 %v12513_v41 }
0x1834   :  { %v4968_v54 = vcombine.low %v4448_v57, %v4960_v58  ;;  %v5688_v30 = vrot.slane %v11762_v16, %v13311_v0  ;;  %v11798_v23 = vcombine.high %v15049_v53, %v15052_v50  ;;  %6995 = vmatprep.subr.bf16.mxu1 %v12518_v27  ;;  %v5681_v20 = vrot.slane %v11761_v1, %v13311_v0  ;;  %v17381_v57 = vld [vmem:[#allocation65_spill] sm:$0xff] }
0x1835   :  { %v5621_v47 = vcombine.low %v5590_v2, %v5604_v18  ;;  %v11763_v56 = vcombine.low %v4463_v59, %v4719_v21  ;;  %v5702_v7 = vrot.slane %v11764_v24, %v13311_v0  ;;  %v4750_v29 = vrot.slane %v17381_v57, %v13311_v0  ;;  %v17384_v57 = vld [vmem:[#allocation15_spill] sm:$0xff] }
0x1836   :  { %v4975_v9 = vrot.slane %v4968_v54, %v13311_v0  ;;  %v4812_v32 = vrot.slane %v3498_v11, %v13311_v0  ;;  %v5884_v53 = vcombine.high %v14623_v12, %v14626_v36  ;;  %v6001_v50 = vcombine.high %v14646_v63, %v14671_v19 }
0x1837   :  { %v5695_v13 = vrot.slane %v11763_v56, %v13311_v0  ;;  %v5636_v35 = vrot.slane %v5621_v47, %v13311_v0  ;;  %v5719_v41 = vcombine.low %v5688_v30, %v5702_v7  ;;  %v6250_v33 = vrot.slane %v11798_v23, %v13311_v0 }
0x1838   :  { %v4983_v38 = vcombine.low %v4975_v9, %v15193_v25  ;;  %v5881_v4 = vcombine.high %v14629_v26, %v14632_v44  ;;  %v5998_v15 = vcombine.high %v14649_v55, %v14674_v28  ;;  %v6118_v58 = vcombine.high %v15065_v40, %v15073_v48  ;;  %v17390_v26 = vld [vmem:[#allocation40_spill] sm:$0xff]  ;;  %v17391_v44 = vld [vmem:[#allocation58_spill] sm:$0xff] }
0x1839   :  { %v5717_v51 = vcombine.low %v5681_v20, %v5695_v13  ;;  %v5718_v27 = vcombine.high %v5681_v20, %v5695_v13  ;;  %v6235_v1 = vcombine.high %v15096_v39, %v15106_v42  ;;  %v17382_v16 = vcombine.low %v14446_v22, %v14527_v31  ;;  %v17392_v28 = vld [vmem:[#allocation18_spill] sm:$0xff] }
0x183a   :  { %v5709_v37 = vrot.slane %v4983_v38, %v13311_v0  ;;  %v4765_v34 = vrot.slane %v4750_v29, %v13311_v0  ;;  %v15234_v21 = vrot.slane %v5719_v41, %v13311_v0  ;;  %v17383_v22 = vcombine.low %v14468_v14, %v14535_v46 }
0x183b   :  { %v4758_v10 = vrot.slane %v17382_v16, %v13311_v0  ;;  %v5727_v59 = vrot.slane %v5717_v51, %v13311_v0  ;;  %v15228_v2 = vrot.slane %v5718_v27, %v13311_v0  ;;  %v4827_v24 = vrot.slane %v4812_v32, %v13311_v0 }
0x183c   :  { %v5720_v11 = vcombine.high %v5709_v37, %v5709_v37  ;;  %v15231_v18 = vrot.slane %v5709_v37, %v13311_v0  ;;  %v4820_v31 = vrot.slane %v17383_v22, %v13311_v0  ;;  %v11730_v9 = vcombine.low %v4765_v34, %v4765_v34 }
0x183d   :  { %v4766_v54 = vcombine.low %v4758_v10, %v4765_v34  ;;  %v11800_v23 = vcombine.low %v5636_v35, %v5727_v59  ;;  %v11740_v7 = vcombine.low %v4827_v24, %v4827_v24  ;;  %v17385_v29 = vcombine.low %v14571_v61, %v17384_v57 }
0x183e   :  { %v15242_v47 = vrot.slane %v5720_v11, %v13311_v0  ;;  %v5764_v30 = vcombine.high %v5727_v59, %v15231_v18  ;;  %v4828_v56 = vcombine.low %v4820_v31, %v4827_v24  ;;  %v5030_v13 = vrot.slane %v11730_v9, %v13311_v0 }
0x183f   :  { %v5023_v20 = vrot.slane %v4766_v54, %v13311_v0  ;;  %v11773_v38 = vcombine.high %v17385_v29, %v14574_v8  ;;  %v6264_v32 = vrot.slane %v11800_v23, %v13311_v0  ;;  %v5226_v51 = vrot.slane %v11740_v7, %v13311_v0 }
0x1840   :  { %v5767_v14 = vcombine.high %v15228_v2, %v15242_v47  ;;  %v11802_v46 = vcombine.low %v15228_v2, %v5764_v30  ;;  %v5219_v37 = vrot.slane %v4828_v56, %v13311_v0  ;;  %v5069_v34 = vrot.slane %v5030_v13, %v13311_v0 }
0x1841   :  { %v5034_v35 = vcombine.high %v5023_v20, %v5023_v20  ;;  %v5062_v41 = vrot.slane %v5023_v20, %v13311_v0  ;;  %v6301_v16 = vcombine.high %v6250_v33, %v6264_v32  ;;  %v6300_v10 = vcombine.low %v6250_v33, %v6264_v32 }
0x1842   :  { %v11804_v27 = vcombine.low %v5767_v14, %v15234_v21  ;;  %v6278_v61 = vrot.slane %v11802_v46, %v13311_v0  ;;  %v5230_v59 = vcombine.high %v5219_v37, %v5219_v37  ;;  %v5258_v54 = vrot.slane %v5219_v37, %v13311_v0 }
0x1843   :  { %v5076_v11 = vrot.slane %v5034_v35, %v13311_v0  ;;  %v15265_v31 = vrot.slane %v6301_v16, %v13311_v0  ;;  %v15268_v24 = vrot.slane %v6300_v10, %v13311_v0  ;;  %v5265_v30 = vrot.slane %v5226_v51, %v13311_v0  ;;  %v17386_v51 = vld [vmem:[#allocation17_spill] sm:$0xff] }
0x1844   :  { %v6292_v22 = vrot.slane %v11804_v27, %v13311_v0  ;;  %v5272_v23 = vrot.slane %v5230_v59, %v13311_v0  ;;  %v11771_v56 = vcombine.low %v5069_v34, %v14574_v8  ;;  %v5831_v29 = vrot.slane %v11773_v38, %v13311_v0 }
0x1845   :  { %v11767_v33 = vcombine.low %v5062_v41, %v5076_v11  ;;  %v11769_v9 = vcombine.high %v5062_v41, %v5076_v11  ;;  %v11781_v14 = vcombine.low %v5265_v30, %v14986_v60  ;;  %v17387_v38 = vcombine.high %v17384_v57, %v17386_v51 }
0x1846   :  { %v6304_v20 = vcombine.high %v6278_v61, %v6292_v22  ;;  %v6303_v7 = vcombine.low %v6278_v61, %v6292_v22  ;;  %v5817_v13 = vrot.slane %v11771_v56, %v13311_v0  ;;  %v11777_v35 = vcombine.low %v5258_v54, %v5272_v23  ;;  %v17389_v56 = vld [vmem:[#allocation56_spill] sm:$0xff] }
0x1847   :  { %v5789_v46 = vrot.slane %v11767_v33, %v13311_v0  ;;  %v5803_v32 = vrot.slane %v11769_v9, %v13311_v0  ;;  %v11779_v8 = vcombine.high %v5258_v54, %v5272_v23  ;;  %v5906_v27 = vrot.slane %v17387_v38, %v13311_v0 }
0x1848   :  { %v15279_v37 = vrot.slane %v6304_v20, %v13311_v0  ;;  %v15282_v41 = vrot.slane %v6303_v7, %v13311_v0  ;;  %v5837_v16 = vcombine.low %v5817_v13, %v5831_v29  ;;  %v5920_v10 = vrot.slane %v11777_v35, %v13311_v0  ;;  %v17395_v13 = vld [vmem:[#allocation59_spill] sm:$0xff] }
0x1849   :  { %v5834_v61 = vcombine.low %v5789_v46, %v5803_v32  ;;  %v5948_v34 = vrot.slane %v11781_v14, %v13311_v0  ;;  %v6381_v57 = vpack.c.bf16 %v6001_v50, %v5884_v53  ;;  %v5934_v30 = vrot.slane %v11779_v8, %v13311_v0  ;;  %v17388_v50 = vld [vmem:[#allocation28_spill] sm:$0xff]  ;;  %v17394_v32 = vld [vmem:[#allocation19_spill] sm:$0xff] }
0x184a   :  { %v6351_v11 = vcombine.low %v15265_v31, %v15279_v37  ;;  %v6348_v59 = vcombine.low %v15268_v24, %v15282_v41  ;;  %v5872_v22 = vrot.slane %v5837_v16, %v13311_v0  ;;  %v5951_v23 = vcombine.low %v5906_v27, %v5920_v10 }
0x184b   :  { %v5851_v54 = vrot.slane %v5834_v61, %v13311_v0  ;;  %v6380_v12 = vpack.c.bf16 %v5998_v15, %v5881_v4  ;;  %v6386_v36 = vpack.c.bf16 %v6235_v1, %v6118_v58  ;;  %v5954_v19 = vcombine.low %v5934_v30, %v5948_v34  ;;  %v17393_v4 = vld [vmem:[#allocation21_spill] sm:$0xff] }
0x184c   :  { %v6389_v33 = vpack.c.bf16 %v6351_v11, %v6351_v11  ;;  %v6388_v9 = vpack.c.bf16 %v6348_v59, %v6348_v59  ;;  %v5968_v53 = vrot.slane %v5951_v23, %v13311_v0  ;;  %v3516_v20 = vmul.f32 %v17389_v56, %v17388_v50  ;;  %v17396_v11 = vld [vmem:[#allocation26_spill] sm:$0xff]  ;;  %v17398_v30 = vld [vmem:[#allocation33_spill] sm:$0xff]  ;;  %v17399_v23 = vld [vmem:[#allocation32_spill] sm:$0xff] }
0x184d   :  { %v15315_v63 = vcombine.low %v5851_v54, %v5872_v22  ;;  %v3534_v55 = vmul.f32 %v17391_v44, %v17390_v26  ;;  %v4860_v15 = vcombine.low %v17393_v4, %v17392_v28  ;;  %v4922_v40 = vcombine.low %v17355_v62, %v15120_v45  ;;  %v12521_v22 = vld [vmem:[%s17006_s10 + $0x214] ss:$8 sps:$4 sm:$0xff]  }
0x184e   :  { %6925 = vmatprep.mubr.bf16.mxu1 %v6389_v33  ;;  %v11745_v48 = vcombine.low %v14927_v3, %v14927_v3  ;;  %v5989_v39 = vrot.slane %v5954_v19, %v13311_v0  ;;  %v4874_v42 = vrot.slane %v3516_v20, %v13311_v0  ;;  %v5374_v58 = vcombine.low %v14958_v17, %v14998_v49 }
0x184f   :  { %6926 = vmatmul.mubr.bf16.gmra.mrb[28].mxu1 %v6388_v9  ;;  %v11755_v1 = vcombine.low %v14938_v43, %v14938_v43  ;;  %v4867_v7 = vrot.slane %v4860_v15, %v13311_v0  ;;  %v4929_v29 = vrot.slane %v4922_v40, %v13311_v0  ;;  %v4936_v62 = vrot.slane %v3534_v55, %v13311_v0  ;;  %v17400_v9 = vld [vmem:[#allocation29_spill] sm:$0xff] }
0x1850   :  { %6966 = vmatprep.mubr.bf16.mxu1 %v6381_v57  ;;  %v5324_v3 = vrot.slane %v11745_v48, %v13311_v0  ;;  %v15338_v45 = vcombine.low %v5968_v53, %v5989_v39  ;;  %v4889_v14 = vrot.slane %v4874_v42, %v13311_v0  ;;  %v5570_v17 = vcombine.low %v15025_v52, %v15036_v6  ;;  %v12516_v52 = vld [vmem:[%s17006_s10 + $0x200] ss:$8 sps:$4 sm:$0xff]  }
0x1851   :  { %v5520_v46 = vrot.slane %v11755_v1, %v13311_v0  ;;  %v4875_v43 = vcombine.low %v17394_v32, %v4867_v7  ;;  %v4937_v35 = vcombine.low %v17395_v13, %v4929_v29  ;;  %v15347_v8 = vrot.slane %v4936_v62, %v13311_v0  ;;  %v17397_v57 = vld [vmem:[#allocation27_spill] sm:$0xff]  ;;  %v17401_v53 = vld [vmem:[#allocation34_spill] sm:$0xff] }
0x1852   :  { %v5363_v51 = vrot.slane %v5324_v3, %v13311_v0  ;;  %v6382_v38 = vpack.c.bf16 %v15338_v45, %v15315_v63  ;;  %v11750_v27 = vcombine.low %v4889_v14, %v4889_v14  ;;  %v11783_v16 = vcombine.high %v5374_v58, %v14986_v60  ;;  %v12522_v7 = vld [vmem:[%s17006_s10 + $0x220] ss:$8 sps:$4 sm:$0xff]  }
0x1853   :  { %v5559_v61 = vrot.slane %v5520_v46, %v13311_v0  ;;  %v4882_v10 = vrot.slane %v4875_v43, %v13311_v0  ;;  %v4944_v34 = vrot.slane %v4937_v35, %v13311_v0  ;;  %v11793_v54 = vcombine.high %v5570_v17, %v17397_v57  ;;  %v17404_v63 = vld [vmem:[#allocation31_spill] sm:$0xff] }
0x1854   :  { %v5373_v59 = vcombine.low %v17396_v11, %v5363_v51  ;;  %v6115_v33 = vcombine.high %v17399_v23, %v17398_v30  ;;  %v5422_v60 = vrot.slane %v11750_v27, %v13311_v0  ;;  %v6232_v50 = vcombine.high %v17401_v53, %v15112_v5  ;;  %v12519_v5 = vld [vmem:[%s17006_s10 + $0x210] ss:$8 sps:$4 sm:$0xff]   ;;  %v12533_v23 = vld [vmem:[%s17006_s10 + $0x254] ss:$8 sps:$4 sm:$0xff]  }
0x1855   :  { %v5569_v19 = vcombine.low %v17400_v9, %v5559_v61  ;;  %v4890_v56 = vcombine.low %v4882_v10, %v4889_v14  ;;  %v4952_v20 = vcombine.low %v4944_v34, %v15347_v8  ;;  %v6352_v44 = vcombine.high %v15265_v31, %v15279_v37  ;;  %v12524_v31 = vld [vmem:[%s17006_s10 + $0x224] ss:$8 sps:$4 sm:$0xff]   ;;  %v12527_v14 = vld [vmem:[%s17006_s10 + $0x234] ss:$8 sps:$4 sm:$0xff]   ;;  %v12525_v27 = vld [vmem:[%s17006_s10 + $0x230] ss:$8 sps:$4 sm:$0xff]  }
0x1856   :  { %v11785_v26 = vcombine.high %v14998_v49, %v5373_v59  ;;  %v5461_v55 = vrot.slane %v5422_v60, %v13311_v0  ;;  %v6023_v28 = vrot.slane %v11783_v16, %v13311_v0  ;;  %v6385_v42 = vpack.c.bf16 %v6232_v50, %v6115_v33 }
0x1857   :  { %6967 = vmatmul.mubr.bf16.vlgmr.msra.gmra.mrb[20].mxu1 %v6380_v12  ;;  %v11795_v4 = vcombine.high %v15036_v6, %v5569_v19  ;;  %v5415_v15 = vrot.slane %v4890_v56, %v13311_v0  ;;  %v5611_v49 = vrot.slane %v4952_v20, %v13311_v0  ;;  %v6154_v6 = vrot.slane %v11793_v54, %v13311_v0  ;;  %v12528_v54 = vld [vmem:[%s17006_s10 + $0x240] ss:$8 sps:$4 sm:$0xff]   ;;  %v12531_v19 = vld [vmem:[%s17006_s10 + $0x250] ss:$8 sps:$4 sm:$0xff]   ;;  %v12536_v56 = vld [vmem:[%s17006_s10 + $0x264] ss:$8 sps:$4 sm:$0xff]  }
0x1858   :  { %6996 = vmatpush1.bf16.msra.mxu1 %v12516_v52  ;;  %6976 = vmatprep.mubr.bf16.mxu1 %v6386_v36  ;;  %v6037_v12 = vrot.slane %v11785_v26, %v13311_v0  ;;  %v11791_v37 = vcombine.low %v5461_v55, %v17397_v57  ;;  %v6391_v29 = vpack.c.bf16 %v6352_v44, %v6352_v44  ;;  %v17140_v53 = vmov 0   ;;  %v12534_v55 = vld [vmem:[%s17006_s10 + $0x260] ss:$8 sps:$4 sm:$0xff]  }
0x1859   :  { %6997 = vmatprep.subr.bf16.mxu1 %v12521_v22  ;;  %v5426_v40 = vcombine.high %v5415_v15, %v5415_v15  ;;  %v5454_v48 = vrot.slane %v5415_v15, %v13311_v0  ;;  %v5622_v39 = vcombine.high %v5611_v49, %v5611_v49  ;;  %v15390_v36 = vrot.slane %v5611_v49, %v13311_v0 }
0x185a   :  { %v6068_v58 = vcombine.low %v6023_v28, %v6037_v12  ;;  %v6140_v1 = vrot.slane %v11791_v37, %v13311_v0  ;;  %v6168_v13 = vrot.slane %v11795_v4, %v13311_v0  ;;  %v6349_v35 = vcombine.high %v15268_v24, %v15282_v41  ;;  %v12530_v24 = vld [vmem:[%s17006_s10 + $0x244] ss:$8 sps:$4 sm:$0xff]   ;;  %v12539_v28 = vld [vmem:[%s17006_s10 + $0x274] ss:$8 sps:$4 sm:$0xff]  }
0x185b   :  { %v5468_v62 = vrot.slane %v5426_v40, %v13311_v0  ;;  %v5664_v3 = vrot.slane %v5622_v39, %v13311_v0  ;;  %v11765_v51 = vcombine.low %v15193_v25, %v15193_v25  ;;  %v11760_v59 = vcombine.low %v15347_v8, %v15347_v8 }
0x185c   :  { %6998 = vmatpush1.bf16.msra.mxu1 %v12519_v5  ;;  %v6185_v46 = vcombine.low %v6140_v1, %v6154_v6  ;;  %v6085_v25 = vrot.slane %v6068_v58, %v13311_v0  ;;  %v6390_v11 = vpack.c.bf16 %v6349_v35, %v6349_v35  ;;  %v5766_v44 = vcombine.low %v15228_v2, %v15242_v47  ;;  %v12537_v2 = vld [vmem:[%s17006_s10 + $0x270] ss:$8 sps:$4 sm:$0xff]  }
0x185d   :  { %6999 = vmatprep.subr.bf16.mxu1 %v12524_v31  ;;  %v11787_v17 = vcombine.low %v5454_v48, %v5468_v62  ;;  %v11789_v32 = vcombine.high %v5454_v48, %v5468_v62  ;;  %v11797_v43 = vcombine.low %v15390_v36, %v5664_v3  ;;  %v5716_v57 = vrot.slane %v11765_v51, %v13311_v0  ;;  %v12540_v62 = vld [vmem:[%s17007_s13 + $0x40] sm:$0xff]   ;;  %v12545_v51 = vld [vmem:[%s17007_s13 + $0x10] sm:$0xff]  }
0x185e   :  { %v6202_v34 = vrot.slane %v6185_v46, %v13311_v0  ;;  %v5618_v8 = vrot.slane %v11760_v59, %v13311_v0  ;;  %v11799_v4 = vcombine.high %v15390_v36, %v5664_v3  ;;  %v11803_v15 = vcombine.high %v5766_v44, %v15231_v18  ;;  %v12541_v3 = vld [vmem:[%s17007_s13] sm:$0xff]   ;;  %12032 = vmatprep.subr.bf16.mxu0 %v12540_v62 }
0x185f   :  { %6977 = vmatmul.mubr.bf16.gmra.mrb[24].mxu1 %v6385_v42  ;;  %v6051_v61 = vrot.slane %v11787_v17, %v13311_v0  ;;  %v6065_v16 = vrot.slane %v11789_v32, %v13311_v0  ;;  %v6182_v52 = vrot.slane %v11797_v43, %v13311_v0  ;;  %v5755_v9 = vrot.slane %v5716_v57, %v13311_v0  ;;  %v17403_v42 = vld [vmem:[#allocation54_spill] sm:$0xff]  ;;  %v12543_v32 = vld [vmem:[%s17007_s13 + $0x8] sm:$0xff]   ;;  %v12544_v43 = vld [vmem:[%s17007_s13 + $0x50] sm:$0xff]  }
0x1860   :  { %7000 = vmatpush1.bf16.msra.mxu1 %v12522_v7  ;;  %6986 = vmatprep.mubr.bf16.mxu1 %v6391_v29  ;;  %v5657_v20 = vrot.slane %v5618_v8, %v13311_v0  ;;  %v6257_v49 = vrot.slane %v11799_v4, %v13311_v0  ;;  %v6285_v31 = vrot.slane %v11803_v15, %v13311_v0  ;;  %v17402_v6 = vmov 0.0   ;;  %v12553_v57 = vld [vmem:[%s17007_s13 + $0x30] sm:$0xff]   ;;  %v17414_v8 = vld [vmem:[#allocation3_spill] sm:$0xff] }
0x1861   :  { %7001 = vmatprep.subr.bf16.mxu1 %v12527_v14  ;;  %v6071_v41 = vcombine.low %v6051_v61, %v6065_v16  ;;  %v6188_v10 = vcombine.low %v6168_v13, %v6182_v52  ;;  %v5765_v26 = vcombine.low %v15234_v21, %v5755_v9  ;;  %v1150_v45 = vmul.f32 %v17404_v63, %v17403_v42  ;;  %v12542_v14 = vld [vmem:[%s17007_s13 + $0x48] sm:$0xff]   ;;  %v12547_v52 = vld [vmem:[%s17007_s13 + $0x18] sm:$0xff]  }
0x1862   :  { %v11801_v5 = vcombine.low %v5657_v20, %v15231_v18  ;;  %v17405_v46 = vmov 20   ;;  %v17406_v17 = vmov 18   ;;  %12033 = vmatpush3.bf16.msra.mxu0 %v12541_v3  ;;  %v17407_v13 = vmov 23  }
0x1863   :  { %v6106_v22 = vrot.slane %v6071_v41, %v13311_v0  ;;  %v6223_v30 = vrot.slane %v6188_v10, %v13311_v0  ;;  %v11805_v21 = vcombine.high %v15242_v47, %v5765_v26  ;;  %12034 = vmatprep.subr.bf16.mxu0 %v12542_v14  ;;  %v17408_v35 = vmov 19   ;;  %v12550_v10 = vld [vmem:[%s17007_s13 + $0x68] sm:$0xff]  }
0x1864   :  { %7002 = vmatpush1.bf16.msra.mxu1 %v12525_v27  ;;  %v6271_v12 = vrot.slane %v11801_v5, %v13311_v0  ;;  %v12546_v27 = vld [vmem:[%s17007_s13 + $0x58] sm:$0xff]   ;;  %v17409_v61 = vmov 21   ;;  %v17410_v16 = vmov 17   ;;  %v17411_v41 = vmov 22  }
0x1865   :  { %7003 = vmatprep.subr.bf16.mxu1 %v12530_v24  ;;  %v6116_v33 = vcombine.low %v6085_v25, %v6106_v22  ;;  %v6233_v60 = vcombine.low %v6202_v34, %v6223_v30  ;;  %v6299_v37 = vrot.slane %v11805_v21, %v13311_v0  ;;  %v12548_v24 = vld [vmem:[%s17007_s13 + $0x60] sm:$0xff]   ;;  %v12551_v34 = vld [vmem:[%s17007_s13 + $0x28] sm:$0xff]   ;;  %v17412_v59 = vmov 16   ;;  %v12555_v22 = vld [vmem:[%s17007_s13 + $0x38] sm:$0xff]  }
0x1866   :  { %v6302_v18 = vcombine.low %v6257_v49, %v6271_v12  ;;  %12035 = vmatpush3.bf16.msra.mxu0 %v12543_v32  ;;  %v12549_v25 = vld [vmem:[%s17007_s13 + $0x20] sm:$0xff]  }
0x1867   :  { %6987 = vmatmul.mubr.bf16.gmra.mrb[28].mxu1 %v6390_v11  ;;  %v6387_v50 = vpack.c.bf16 %v6233_v60, %v6116_v33  ;;  %v6305_v47 = vcombine.low %v6285_v31, %v6299_v37  ;;  %12036 = vmatprep.subr.bf16.mxu0 %v12544_v43  ;;  %v12552_v11 = vld [vmem:[%s17007_s13 + $0x70] sm:$0xff]   ;;  %v7056_v30 = vld [vmem:[%s17008_s11] sm:$0x3] }
0x1868   :  { %7004 = vmatpush1.bf16.msra.mxu1 %v12528_v54  ;;  %7027 = vmatprep.mubr.bf16.mxu1 %v17140_v53  ;;  %v6319_v40 = vrot.slane %v6302_v18, %v13311_v0  ;;  %v12554_v54 = vld [vmem:[%s17007_s13 + $0x78] sm:$0xff]   ;;  %v17413_v33 = vld [vmem:[#allocation2_spill] sm:$0xff]  ;;  %v15542_v9 = vrot.slane %v7056_v30, %v17414_v8 }
0x1869   :  { %7005 = vmatprep.subr.bf16.mxu1 %v12533_v23  ;;  %v6340_v48 = vrot.slane %v6305_v47, %v13311_v0  ;;  %v7078_v23 = vld [vmem:[%s17009_s12] sm:$0x3]  ;;  %v15539_v60 = vrot.slane %v7056_v30, %v17413_v33 }
0x186a   :  { %12037 = vmatpush3.bf16.msra.mxu0 %v12545_v51 }
0x186b   :  { %v6350_v39 = vcombine.low %v6319_v40, %v6340_v48  ;;  %12038 = vmatprep.subr.bf16.mxu0 %v12546_v27 }
0x186c   :  { %7006 = vmatpush1.bf16.msra.mxu1 %v12531_v19  ;;  %v15545_v19 = vrot.slane %v7078_v23, %v17413_v33 }
0x186d   :  { %7007 = vmatprep.subr.bf16.mxu1 %v12536_v56  ;;  %v6392_v36 = vpack.c.bf16 %v6350_v39, %v6350_v39  ;;  %v15548_v56 = vrot.slane %v7078_v23, %v17414_v8 }
0x186e   :  { %12039 = vmatpush3.bf16.msra.mxu0 %v12547_v52 }
0x186f   :  { %12040 = vmatprep.subr.bf16.mxu0 %v12548_v24 }
0x1870   :  { %7008 = vmatpush1.bf16.msra.mxu1 %v12534_v55 }
0x1871   :  { %7009 = vmatprep.subr.bf16.mxu1 %v12539_v28 }
0x1872   :  { %12041 = vmatpush3.bf16.msra.mxu0 %v12549_v25 }
0x1873   :  { %12042 = vmatprep.subr.bf16.mxu0 %v12550_v10 }
0x1874   :  { %7010 = vmatpush1.bf16.msra.mxu1 %v12537_v2 }
0x1875   :  { %12225 = vmatprep.subr.bf16.mxu1 %v17402_v6 }
0x1876   :  { %12043 = vmatpush3.bf16.msra.mxu0 %v12551_v34 }
0x1877   :  { %7028 = vmatmul.mubr.bf16.vlgmr.msra.gmra.mrb[20].mxu1 %v6382_v38  ;;  %12044 = vmatprep.subr.bf16.mxu0 %v12552_v11 }
0x1878   :  { %7037 = vmatprep.mubr.bf16.mxu1 %v17140_v53 }
0x187a   :  { %12045 = vmatpush3.bf16.msra.mxu0 %v12553_v57 }
0x187b   :  { %12046 = vmatprep.subr.bf16.mxu0 %v12554_v54 }
0x187e   :  { %12047 = vmatpush3.bf16.msra.mxu0 %v12555_v22 }
0x187f   :  { %7038 = vmatmul.mubr.bf16.gmra.mrb[24].mxu1 %v6387_v50 }
0x1880   :  { %7047 = vmatprep.mubr.bf16.mxu1 %v17140_v53 }
0x1887   :  { %7048 = vmatmul.mubr.bf16.gmra.mrb[28].mxu1 %v6392_v36 }
0x1888   :  { %12241 = vmatprep.mubr.msk.bf16.mxu1 %vm12770_vm2, %v17402_v6 }
0x188d   :  { %v1158_v38 = vpop.permute.xlu1 %1157 }
0x188e   :  { %v15471_v58 = vadd.f32 %v1158_v38, %v1150_v45 }
0x1890   :  { %12713 = vtanh.f32 %v15471_v58 }
0x189a   :  { %v12714_v1 = vpop.eup %12713 }
0x189b   :  { %1163 = vrot.lane.b32.xlu0 %v12714_v1, %s12760_s3 }
0x190d   :  { %v1164_v7 = vpop.permute.xlu0 %1163 }
0x190e   :  { %v1166_v29 = vmul.f32 %v17404_v63, %v1164_v7 }
0x1910   :  { %1175 = vperm.xlu0 %12379, %v1166_v29   ;;  %1169 = vperm.xlu1 %12378, %v1166_v29  }
0x1914   :  { %12382 = vset.pattern.permute.xlu0 %v17405_v46  ;;  %12380 = vset.pattern.permute.xlu1 %v17406_v17 }
0x1915   :  { %1193 = vperm.xlu0 %12382, %v1166_v29   ;;  %1181 = vperm.xlu1 %12380, %v1166_v29  }
0x1919   :  { %12385 = vset.pattern.permute.xlu0 %v17407_v13  ;;  %12381 = vset.pattern.permute.xlu1 %v17408_v35 }
0x191a   :  { %1211 = vperm.xlu0 %12385, %v1166_v29   ;;  %1187 = vperm.xlu1 %12381, %v1166_v29  }
0x191e   :  { %12383 = vset.pattern.permute.xlu1 %v17409_v61  ;;  %12387 = vset.pattern.permute.xlu0 %v17410_v16 }
0x191f   :  { %1199 = vperm.xlu1 %12383, %v1166_v29  }
0x1923   :  { %12384 = vset.pattern.permute.xlu1 %v17411_v41 }
0x1924   :  { %1205 = vperm.xlu1 %12384, %v1166_v29  }
0x1928   :  { %12386 = vset.pattern.permute.xlu1 %v17412_v59 }
0x194a   :  { %v7029_v50 = vpop.f32.mrb[20].mxu1 }
0x194b   :  { %v7068_v20 = vmul.f32 %v15539_v60, %v7029_v50  ;;  %v7031_v26 = vpop.f32.mrb[21].mxu1 }
0x194c   :  { %v7069_v44 = vmul.f32 %v15542_v9, %v7031_v26  ;;  %v7033_v55 = vpop.f32.mrb[22].mxu1 }
0x194d   :  { %v7090_v28 = vadd.f32 %v15545_v19, %v7068_v20  ;;  %v7070_v4 = vmul.f32 %v15539_v60, %v7033_v55  ;;  %v7035_v5 = vpop.f32.mrb[23].mxu1 }
0x194e   :  { %v7091_v15 = vadd.f32 %v15548_v56, %v7069_v44  ;;  %v7071_v21 = vmul.f32 %v15542_v9, %v7035_v5 }
0x194f   :  { %v7100_v2 = vmax.f32 %v7090_v28, 0.0  ;;  %v7092_v49 = vadd.f32 %v15545_v19, %v7070_v4 }
0x1950   :  { %v7101_v12 = vmax.f32 %v7091_v15, 0.0  ;;  %v7093_v31 = vadd.f32 %v15548_v56, %v7071_v21 }
0x1951   :  { %v7102_v37 = vmax.f32 %v7092_v49, 0.0 }
0x1952   :  { %v7120_v18 = vcombine.low %v7100_v2, %v7101_v12  ;;  %v7121_v47 = vcombine.high %v7100_v2, %v7101_v12  ;;  %v7103_v40 = vmax.f32 %v7093_v31, 0.0  ;;  %v7039_v48 = vpop.f32.mrb[24].mxu1 }
0x1953   :  { %v7041_v39 = vpop.f32.mrb[25].mxu1  ;;  %v7072_v1 = vmul.f32 %v15539_v60, %v7039_v48 }
0x1954   :  { %v7128_v36 = vrot.slane %v7120_v18, %v13311_v0  ;;  %v7135_v42 = vrot.slane %v7121_v47, %v13311_v0  ;;  %v7170_v63 = vcombine.low %v7102_v37, %v7103_v40  ;;  %v7171_v45 = vcombine.high %v7102_v37, %v7103_v40  ;;  %v15560_v38 = vpop.f32.mrb[26].mxu1 }
0x1955   :  { %v15563_v7 = vpop.f32.mrb[27].mxu1  ;;  %v7073_v51 = vmul.f32 %v15542_v9, %v7041_v39  ;;  %v15587_v11 = vadd.f32 %v15545_v19, %v7072_v1 }
0x1956   :  { %v7136_v29 = vcombine.high %v7128_v36, %v7128_v36  ;;  %v7137_v62 = vcombine.high %v7135_v42, %v7135_v42  ;;  %v15566_v3 = vrot.slane %v7128_v36, %v13311_v0  ;;  %v15569_v14 = vrot.slane %v7135_v42, %v13311_v0 }
0x1957   :  { %v7178_v32 = vrot.slane %v7170_v63, %v13311_v0  ;;  %v7185_v43 = vrot.slane %v7171_v45, %v13311_v0  ;;  %v7095_v44 = vadd.f32 %v15548_v56, %v7073_v51  ;;  %v7104_v31 = vmax.f32 %v15587_v11, 0.0 }
0x1958   :  { %v15575_v27 = vrot.slane %v7136_v29, %v13311_v0  ;;  %v15578_v52 = vrot.slane %v7137_v62, %v13311_v0  ;;  %v15582_v24 = vcombine.high %v15569_v14, %v15569_v14  ;;  %v7432_v25 = vrot.slane %v15569_v14, %v13311_v0 }
0x1959   :  { %v7186_v10 = vcombine.high %v7178_v32, %v7178_v32  ;;  %v7187_v34 = vcombine.high %v7185_v43, %v7185_v43  ;;  %v15598_v30 = vrot.slane %v7178_v32, %v13311_v0  ;;  %v15605_v26 = vrot.slane %v7185_v43, %v13311_v0 }
0x195a   :  { %17415 = vst [vmem:[#allocation57_spill] sm:$0xff] %v15578_v52  ;;  %17416 = vst [vmem:[#allocation35_spill] sm:$0xff] %v15582_v24  ;;  %v15591_v57 = vcombine.high %v15578_v52, %v15578_v52  ;;  %v7410_v54 = vcombine.low %v15566_v3, %v15575_v27  ;;  %v11886_v22 = vcombine.high %v15566_v3, %v15575_v27  ;;  %v15600_v23 = vpop.f32.mrb[28].mxu1  ;;  %v7105_v62 = vmax.f32 %v7095_v44, 0.0 }
0x195b   :  { %v7435_v50 = vcombine.high %v7432_v25, %v7432_v25  ;;  %v7466_v20 = vcombine.low %v15578_v52, %v15582_v24  ;;  %17418 = vst [vmem:[#allocation38_spill] sm:$0xff] %v15605_v26  ;;  %v15608_v55 = vpop.f32.mrb[29].mxu1  ;;  %v15613_v5 = vrot.slane %v7186_v10, %v13311_v0  ;;  %v15616_v15 = vrot.slane %v7187_v34, %v13311_v0 }
0x195c   :  { %17417 = vst [vmem:[#allocation36_spill] sm:$0xff] %v15591_v57  ;;  %v7418_v28 = vrot.slane %v7410_v54, %v13311_v0  ;;  %v7425_v4 = vrot.slane %v11886_v22, %v13311_v0  ;;  %v7053_v21 = vpop.f32.mrb[30].mxu1  ;;  %v7456_v2 = vrot.slane %v7432_v25, %v13311_v0  ;;  %v15622_v12 = vcombine.high %v15605_v26, %v15605_v26 }
0x195d   :  { %17419 = vst [vmem:[#allocation60_spill] sm:$0xff] %v15616_v15  ;;  %v7463_v49 = vrot.slane %v7435_v50, %v13311_v0  ;;  %v7054_v37 = vpop.f32.mrb[31].mxu1  ;;  %v7474_v40 = vrot.slane %v7466_v20, %v13311_v0  ;;  %v7467_v48 = vcombine.low %v15591_v57, %v15598_v30  ;;  %v7488_v39 = vrot.slane %v15613_v5, %v13311_v0 }
0x195e   :  { %17420 = vst [vmem:[#allocation12_spill] sm:$0xff] %v15622_v12  ;;  %v7433_v18 = vcombine.low %v7418_v28, %v7425_v4  ;;  %v7434_v47 = vcombine.high %v7418_v28, %v7425_v4  ;;  %v11887_v36 = vcombine.high %v15598_v30, %v15613_v5  ;;  %v7523_v42 = vcombine.low %v15605_v26, %v15616_v15 }
0x195f   :  { %v7544_v63 = vrot.slane %v15622_v12, %v13311_v0  ;;  %v7481_v29 = vrot.slane %v7467_v48, %v13311_v0  ;;  %v7491_v32 = vcombine.high %v7488_v39, %v7488_v39  ;;  %v7512_v43 = vrot.slane %v7488_v39, %v13311_v0 }
0x1960   :  { %v7442_v45 = vrot.slane %v7433_v18, %v13311_v0  ;;  %v7449_v1 = vrot.slane %v7434_v47, %v13311_v0  ;;  %v7530_v51 = vrot.slane %v11887_v36, %v13311_v0  ;;  %v7537_v25 = vrot.slane %v7523_v42, %v13311_v0 }
0x1961   :  { %v7489_v11 = vcombine.low %v7474_v40, %v7481_v29  ;;  %v7490_v54 = vcombine.high %v7474_v40, %v7481_v29  ;;  %v7519_v22 = vrot.slane %v7491_v32, %v13311_v0  ;;  %v7547_v28 = vcombine.high %v7544_v63, %v7544_v63 }
0x1962   :  { %v7464_v10 = vcombine.low %v7442_v45, %v7456_v2  ;;  %v7465_v34 = vcombine.low %v7449_v1, %v7463_v49  ;;  %v7545_v50 = vcombine.low %v7530_v51, %v7537_v25  ;;  %v7546_v20 = vcombine.high %v7530_v51, %v7537_v25 }
0x1963   :  { %v7498_v21 = vrot.slane %v7489_v11, %v13311_v0  ;;  %v7505_v37 = vrot.slane %v7490_v54, %v13311_v0  ;;  %v7568_v48 = vrot.slane %v7544_v63, %v13311_v0  ;;  %v7575_v39 = vrot.slane %v7547_v28, %v13311_v0 }
0x1964   :  { %v7875_v4 = vsel %vm7874_vm13, %v7464_v10, 0.0  ;;  %v7882_v44 = vsel %vm7874_vm13, %v7465_v34, 0.0  ;;  %v7554_v2 = vrot.slane %v7545_v50, %v13311_v0  ;;  %v7561_v49 = vrot.slane %v7546_v20, %v13311_v0 }
0x1965   :  { %v7876_v18 = vrot.slane %v7875_v4, 4  ;;  %v7883_v47 = vrot.slane %v7882_v44, 4  ;;  %v7520_v40 = vcombine.low %v7498_v21, %v7512_v43  ;;  %v7521_v42 = vcombine.low %v7505_v37, %v7519_v22 }
0x1966   :  { %v7220_v45 = vcombine.low %v7104_v31, %v7105_v62  ;;  %v7576_v29 = vcombine.low %v7554_v2, %v7568_v48  ;;  %v7577_v32 = vcombine.low %v7561_v49, %v7575_v39  ;;  %v15654_v34 = vcombine.high %v15616_v15, %v15616_v15 }
0x1967   :  { %v7877_v36 = vadd.f32 %v7876_v18, %v7875_v4  ;;  %v7884_v1 = vadd.f32 %v7883_v47, %v7882_v44  ;;  %v7889_v51 = vsel %vm7874_vm13, %v7520_v40, 0.0  ;;  %v7074_v43 = vmul.f32 %v15539_v60, %v15560_v38 }
0x1968   :  { %v7890_v10 = vrot.slane %v7889_v51, 4  ;;  %17421 = vst [vmem:[#allocation20_spill] sm:$0xff] %v15654_v34  ;;  %v7903_v63 = vsel %vm7874_vm13, %v7576_v29, 0.0  ;;  %v7910_v11 = vsel %vm7874_vm13, %v7577_v32, 0.0  ;;  %v7221_v54 = vcombine.high %v7104_v31, %v7105_v62  ;;  %v15671_v31 = vld [vmem:[%s17185_s0] ss:$0 sm:$0xff] }
0x1969   :  { %v7878_v25 = vrot.slane %v7877_v36, 2  ;;  %v7228_v22 = vrot.slane %v7220_v45, %v13311_v0  ;;  %v15662_v28 = vsel %vm7874_vm13, %v7521_v42, 0.0  ;;  %v7904_v4 = vrot.slane %v7903_v63, 4  ;;  %v17423_v62 = vld [vmem:[#allocation51_spill] sm:$0xff] }
0x196a   :  { %v7891_v20 = vadd.f32 %v7890_v10, %v7889_v51  ;;  %v7885_v44 = vrot.slane %v7884_v1, 2  ;;  %v7235_v21 = vrot.slane %v7221_v54, %v13311_v0  ;;  %v7911_v49 = vrot.slane %v7910_v11, 4 }
0x196b   :  { %v7879_v50 = vadd.f32 %v7878_v25, %v7877_v36  ;;  %v7236_v37 = vcombine.high %v7228_v22, %v7228_v22  ;;  %v15666_v18 = vrot.slane %v7228_v22, %v13311_v0  ;;  %v7905_v2 = vadd.f32 %v7904_v4, %v7903_v63 }
0x196c   :  { %v7892_v47 = vrot.slane %v7891_v20, 2  ;;  %v15675_v40 = vadd.f32 %v15671_v31, %v17423_v62  ;;  %v7237_v48 = vcombine.high %v7235_v21, %v7235_v21  ;;  %v15678_v39 = vrot.slane %v7235_v21, %v13311_v0 }
0x196d   :  { %17422 = vst [vmem:[#allocation13_spill] sm:$0xff] %v15666_v18  ;;  %v7880_v38 = vrot.slane %v7879_v50, 1  ;;  %v15681_v36 = vrot.slane %v7236_v37, %v13311_v0  ;;  %v7906_v45 = vrot.slane %v7905_v2, 2  ;;  %v15685_v29 = vcombine.high %v15666_v18, %v15666_v18 }
0x196e   :  { %v7096_v32 = vadd.f32 %v15545_v19, %v7074_v43  ;;  %v7897_v51 = vrot.slane %v15662_v28, 4  ;;  %v15690_v25 = vrot.slane %v7237_v48, %v13311_v0  ;;  %v7578_v63 = vcombine.low %v15654_v34, %v15666_v18 }
0x196f   :  { %17424 = vst [vmem:[#allocation23_spill] sm:$0xff] %v15681_v36  ;;  %v7881_v42 = vadd.f32 %v7880_v38, %v7879_v50  ;;  %17425 = vst [vmem:[#allocation16_spill] sm:$0xff] %v15685_v29  ;;  %v15694_v10 = vcombine.high %v15681_v36, %v15681_v36  ;;  %v7886_v54 = vadd.f32 %v7885_v44, %v7884_v1 }
0x1970   :  { %v15698_v22 = vadd.f32 %v7892_v47, %v7891_v20  ;;  %v7912_v50 = vadd.f32 %v7911_v49, %v7910_v11  ;;  %v7579_v4 = vcombine.low %v15681_v36, %v15685_v29  ;;  %v7586_v21 = vrot.slane %v7578_v63, %v13311_v0 }
0x1971   :  { %17426 = vst [vmem:[#allocation24_spill] sm:$0xff] %v15694_v10  ;;  %v15702_v43 = vmul.f32 0.2, %v7881_v42  ;;  %v7600_v37 = vrot.slane %v15694_v10, %v13311_v0  ;;  %v7634_v38 = vcombine.low %v15678_v39, %v15690_v25  ;;  %v15709_v62 = vadd.f32 %v7906_v45, %v7905_v2 }
0x1972   :  { %v7593_v1 = vrot.slane %v7579_v4, %v13311_v0  ;;  %v11888_v11 = vcombine.high %v15678_v39, %v15690_v25  ;;  %v7106_v20 = vmax.f32 %v7096_v32, 0.0  ;;  %v7075_v48 = vmul.f32 %v15542_v9, %v15563_v7 }
0x1973   :  { %v7603_v44 = vcombine.high %v7600_v37, %v7600_v37  ;;  %v7624_v47 = vrot.slane %v7600_v37, %v13311_v0  ;;  %v7642_v49 = vrot.slane %v7634_v38, %v13311_v0  ;;  %v7076_v2 = vmul.f32 %v15539_v60, %v15600_v23 }
0x1974   :  { %v7601_v42 = vcombine.low %v7586_v21, %v7593_v1  ;;  %v7602_v63 = vcombine.high %v7586_v21, %v7593_v1  ;;  %v7649_v53 = vrot.slane %v11888_v11, %v13311_v0  ;;  %v7097_v4 = vadd.f32 %v15548_v56, %v7075_v48 }
0x1975   :  { %v7631_v45 = vrot.slane %v7603_v44, %v13311_v0  ;;  %v7077_v32 = vmul.f32 %v15542_v9, %v15608_v55  ;;  %v7887_v37 = vrot.slane %v7886_v54, 1  ;;  %v7098_v60 = vadd.f32 %v15545_v19, %v7076_v2 }
0x1976   :  { %v7610_v7 = vrot.slane %v7601_v42, %v13311_v0  ;;  %v7617_v21 = vrot.slane %v7602_v63, %v13311_v0  ;;  %v7657_v1 = vcombine.low %v7642_v49, %v7649_v53  ;;  %v7107_v6 = vmax.f32 %v7097_v4, 0.0 }
0x1977   :  { %v7099_v23 = vadd.f32 %v15548_v56, %v7077_v32  ;;  %v7658_v10 = vcombine.high %v7642_v49, %v7649_v53  ;;  %v15732_v9 = vadd.f32 %v7887_v37, %v7886_v54  ;;  %v7108_v38 = vmax.f32 %v7098_v60, 0.0 }
0x1978   :  { %v7632_v44 = vcombine.low %v7610_v7, %v7624_v47  ;;  %v7633_v48 = vcombine.low %v7617_v21, %v7631_v45  ;;  %v7270_v55 = vcombine.low %v7106_v20, %v7107_v6  ;;  %v7271_v29 = vcombine.high %v7106_v20, %v7107_v6 }
0x1979   :  { %v7109_v36 = vmax.f32 %v7099_v23, 0.0  ;;  %v7666_v4 = vrot.slane %v7657_v1, %v13311_v0  ;;  %v7898_v19 = vadd.f32 %v7897_v51, %v15662_v28  ;;  %v7913_v54 = vrot.slane %v7912_v50, 2 }
0x197a   :  { %v7917_v42 = vsel %vm7874_vm13, %v7632_v44, 0.0  ;;  %v15736_v63 = vsel %vm7874_vm13, %v7633_v48, 0.0  ;;  %v7278_v56 = vrot.slane %v7270_v55, %v13311_v0  ;;  %v7285_v53 = vrot.slane %v7271_v29, %v13311_v0 }
0x197b   :  { %v7918_v2 = vrot.slane %v7917_v42, 4  ;;  %v7673_v47 = vrot.slane %v7658_v10, %v13311_v0  ;;  %v7320_v6 = vcombine.low %v7108_v38, %v7109_v36  ;;  %v7321_v20 = vcombine.high %v7108_v38, %v7109_v36 }
0x197c   :  { %v7899_v49 = vrot.slane %v7898_v19, 2  ;;  %v7286_v32 = vcombine.high %v7278_v56, %v7278_v56  ;;  %v7287_v37 = vcombine.high %v7285_v53, %v7285_v53  ;;  %v15746_v7 = vrot.slane %v7278_v56, %v13311_v0 }
0x197d   :  { %v15743_v45 = vadd.f32 %v7918_v2, %v7917_v42  ;;  %v15750_v51 = vrot.slane %v7285_v53, %v13311_v0  ;;  %v7328_v29 = vrot.slane %v7320_v6, %v13311_v0  ;;  %v7335_v21 = vrot.slane %v7321_v20, %v13311_v0 }
0x197e   :  { %v15755_v10 = vrot.slane %v7286_v32, %v13311_v0  ;;  %v15758_v36 = vrot.slane %v7287_v37, %v13311_v0  ;;  %v15762_v38 = vcombine.high %v15746_v7, %v15746_v7  ;;  %v15764_v1 = vadd.f32 %v7913_v54, %v7912_v50 }
0x197f   :  { %v7656_v23 = vrot.slane %v15746_v7, %v13311_v0  ;;  %v7336_v44 = vcombine.high %v7328_v29, %v7328_v29  ;;  %v15769_v48 = vadd.f32 %v7899_v49, %v7898_v19  ;;  %v7337_v50 = vcombine.high %v7335_v21, %v7335_v21 }
0x1980   :  { %17427 = vst [vmem:[#allocation30_spill] sm:$0xff] %v15762_v38  ;;  %v15773_v55 = vcombine.high %v15755_v10, %v15755_v10  ;;  %v7690_v42 = vcombine.low %v15755_v10, %v15762_v38  ;;  %v7712_v2 = vrot.slane %v15758_v36, %v13311_v0  ;;  %v11889_v54 = vcombine.high %v15750_v51, %v15758_v36 }
0x1981   :  { %v7659_v56 = vcombine.high %v7656_v23, %v7656_v23  ;;  %v7680_v53 = vrot.slane %v7656_v23, %v13311_v0  ;;  %v15783_v19 = vrot.slane %v7328_v29, %v13311_v0  ;;  %v15792_v23 = vrot.slane %v7335_v21, %v13311_v0 }
0x1982   :  { %17428 = vst [vmem:[#allocation25_spill] sm:$0xff] %v15773_v55  ;;  %v7691_v6 = vcombine.low %v15773_v55, %v15750_v51  ;;  %v7698_v20 = vrot.slane %v7690_v42, %v13311_v0  ;;  %v7715_v49 = vcombine.high %v7712_v2, %v7712_v2  ;;  %v7736_v32 = vrot.slane %v7712_v2, %v13311_v0 }
0x1983   :  { %17429 = vst [vmem:[#allocation67_spill] sm:$0xff] %v15783_v19  ;;  %v7687_v37 = vrot.slane %v7659_v56, %v13311_v0  ;;  %v7688_v60 = vcombine.low %v7666_v4, %v7680_v53  ;;  %v7754_v11 = vrot.slane %v11889_v54, %v13311_v0  ;;  %17430 = vst [vmem:[#allocation66_spill] sm:$0xff] %v15792_v23 }
0x1984   :  { %v7705_v28 = vrot.slane %v7691_v6, %v13311_v0  ;;  %v7743_v29 = vrot.slane %v7715_v49, %v13311_v0  ;;  %v15797_v38 = vrot.slane %v7336_v44, %v13311_v0  ;;  %v15800_v42 = vrot.slane %v7337_v50, %v13311_v0 }
0x1985   :  { %v7689_v55 = vcombine.low %v7673_v47, %v7687_v37  ;;  %v7931_v2 = vsel %vm7874_vm13, %v7688_v60, 0.0  ;;  %v15805_v4 = vcombine.high %v15783_v19, %v15783_v19  ;;  %v15809_v21 = vcombine.high %v15792_v23, %v15792_v23 }
0x1986   :  { %17431 = vst [vmem:[#allocation68_spill] sm:$0xff] %v15797_v38  ;;  %17432 = vst [vmem:[#allocation69_spill] sm:$0xff] %v15800_v42  ;;  %v7713_v56 = vcombine.low %v7698_v20, %v7705_v28  ;;  %v7714_v53 = vcombine.high %v7698_v20, %v7705_v28  ;;  %v7932_v54 = vrot.slane %v7931_v2, 4  ;;  %v15813_v44 = vcombine.high %v15797_v38, %v15797_v38 }
0x1987   :  { %17433 = vst [vmem:[#allocation37_spill] sm:$0xff] %v15805_v4  ;;  %17434 = vst [vmem:[#allocation14_spill] sm:$0xff] %v15809_v21  ;;  %v7938_v50 = vsel %vm7874_vm13, %v7689_v55, 0.0  ;;  %v15818_v47 = vcombine.high %v15800_v42, %v15800_v42  ;;  %v7747_v60 = vcombine.low %v15783_v19, %v15797_v38  ;;  %v7768_v6 = vrot.slane %v15805_v4, %v13311_v0 }
0x1988   :  { %17435 = vst [vmem:[#allocation62_spill] sm:$0xff] %v15813_v44  ;;  %v7722_v49 = vrot.slane %v7713_v56, %v13311_v0  ;;  %v7729_v28 = vrot.slane %v7714_v53, %v13311_v0  ;;  %v15826_v20 = vadd.f32 %v7932_v54, %v7931_v2  ;;  %v7939_v37 = vrot.slane %v7938_v50, 4 }
0x1989   :  { %17436 = vst [vmem:[#allocation61_spill] sm:$0xff] %v15818_v47  ;;  %v7761_v18 = vrot.slane %v7747_v60, %v13311_v0  ;;  %v7771_v55 = vcombine.high %v7768_v6, %v7768_v6  ;;  %v7792_v34 = vrot.slane %v7768_v6, %v13311_v0  ;;  %v7802_v12 = vcombine.low %v15813_v44, %v15792_v23 }
0x198a   :  { %v15832_v15 = vcombine.low %v7722_v49, %v7736_v32  ;;  %v7803_v56 = vcombine.low %v15800_v42, %v15809_v21  ;;  %v7824_v2 = vrot.slane %v15818_v47, %v13311_v0  ;;  %v7745_v49 = vcombine.low %v7729_v28, %v7743_v29 }
0x198b   :  { %v7769_v53 = vcombine.low %v7754_v11, %v7761_v18  ;;  %v7770_v54 = vcombine.high %v7754_v11, %v7761_v18  ;;  %v7799_v60 = vrot.slane %v7771_v55, %v13311_v0  ;;  %v7810_v4 = vrot.slane %v7802_v12, %v13311_v0 }
0x198c   :  { %v7817_v6 = vrot.slane %v7803_v56, %v13311_v0  ;;  %v7827_v19 = vcombine.high %v7824_v2, %v7824_v2  ;;  %v7848_v32 = vrot.slane %v7824_v2, %v13311_v0  ;;  %v7901_v21 = vrot.slane %v15769_v48, 1 }
0x198d   :  { %v7778_v38 = vrot.slane %v7769_v53, %v13311_v0  ;;  %v7785_v23 = vrot.slane %v7770_v54, %v13311_v0  ;;  %v7915_v47 = vrot.slane %v15764_v1, 1  ;;  %v17437_v12 = vrot.slane %v15736_v63, 4 }
0x198e   :  { %v7825_v42 = vcombine.low %v7810_v4, %v7817_v6  ;;  %v7826_v18 = vcombine.high %v7810_v4, %v7817_v6  ;;  %v7855_v11 = vrot.slane %v7827_v19, %v13311_v0  ;;  %v7902_v29 = vadd.f32 %v7901_v21, %v15769_v48 }
0x198f   :  { %v7926_v55 = vadd.f32 %v17437_v12, %v15736_v63  ;;  %v15851_v56 = vcombine.low %v7778_v38, %v7792_v34  ;;  %v7801_v2 = vcombine.low %v7785_v23, %v7799_v60  ;;  %v7916_v28 = vadd.f32 %v7915_v47, %v15764_v1 }
0x1990   :  { %v7834_v53 = vrot.slane %v7825_v42, %v13311_v0  ;;  %v7841_v54 = vrot.slane %v7826_v18, %v13311_v0  ;;  %v7940_v26 = vadd.f32 %v7939_v37, %v7938_v50  ;;  %v7952_v4 = vsel %vm7874_vm13, %v7745_v49, 0.0 }
0x1991   :  { %v7927_v44 = vrot.slane %v7926_v55, 2  ;;  %v7966_v19 = vsel %vm7874_vm13, %v7801_v2, 0.0  ;;  %v7989_v6 = vmul.f32 0.2, %v15732_v9  ;;  %v7991_v63 = vmul.f32 0.2, %v7902_v29 }
0x1992   :  { %v7857_v34 = vcombine.low %v7841_v54, %v7855_v11  ;;  %v7941_v23 = vrot.slane %v7940_v26, 2  ;;  %v7953_v60 = vrot.slane %v7952_v4, 4  ;;  %v7967_v48 = vrot.slane %v7966_v19, 4 }
0x1993   :  { %v7928_v38 = vadd.f32 %v7927_v44, %v7926_v55  ;;  %v7993_v21 = vmul.f32 0.2, %v7916_v28  ;;  %v8005_v1 = vpack.c.bf16 %v7989_v6, %v7989_v6  ;;  %v8007_v47 = vpack.c.bf16 %v7991_v63, %v7991_v63 }
0x1994   :  { %v7942_v12 = vadd.f32 %v7941_v23, %v7940_v26  ;;  %v7954_v18 = vadd.f32 %v7953_v60, %v7952_v4  ;;  %v7980_v50 = vsel %vm7874_vm13, %v7857_v34, 0.0  ;;  %v7968_v37 = vadd.f32 %v7967_v48, %v7966_v19 }
0x1995   :  { %v7929_v42 = vrot.slane %v7928_v38, 1  ;;  %v7981_v49 = vrot.slane %v7980_v50, 4  ;;  %v8009_v57 = vpack.c.bf16 %v7993_v21, %v7993_v21  ;;  %v8069_v2 = vunpack.c.l.b16 %v8005_v1 }
0x1996   :  { %v7943_v9 = vrot.slane %v7942_v12, 1  ;;  %v7955_v29 = vrot.slane %v7954_v18, 2  ;;  %v8071_v11 = vunpack.c.l.b16 %v8007_v47  ;;  %v7969_v44 = vrot.slane %v7968_v37, 2 }
0x1997   :  { %v7930_v24 = vadd.f32 %v7929_v42, %v7928_v38  ;;  %v7982_v55 = vadd.f32 %v7981_v49, %v7980_v50  ;;  %v8073_v54 = vunpack.c.l.b16 %v8009_v57  ;;  %v7856_v52 = vcombine.low %v7834_v53, %v7848_v32  ;;  %v15867_v57 = vpop.permute.xlu1 %1169 }
0x1998   :  { %v7944_v28 = vadd.f32 %v7943_v9, %v7942_v12  ;;  %v7956_v6 = vadd.f32 %v7955_v29, %v7954_v18  ;;  %v8091_v26 = vsel %vm2774_vm5, %v8071_v11, %v8069_v2  ;;  %v7970_v4 = vadd.f32 %v7969_v44, %v7968_v37 }
0x1999   :  { %v7995_v63 = vmul.f32 0.2, %v7930_v24  ;;  %v7983_v23 = vrot.slane %v7982_v55, 2  ;;  %v8092_v19 = vsel %vm2776_vm6, %v8073_v54, %v8091_v26  ;;  %v7894_v34 = vrot.slane %v15698_v22, 1 }
0x199a   :  { %v7957_v60 = vrot.slane %v7956_v6, 1  ;;  %v7997_v38 = vmul.f32 0.2, %v7944_v28  ;;  %v17438_v21 = vrot.slane %v15709_v62, 1  ;;  %v7971_v32 = vrot.slane %v7970_v4, 1 }
0x199b   :  { %v8011_v48 = vpack.c.bf16 %v7995_v63, %v7995_v63  ;;  %v7984_v53 = vadd.f32 %v7983_v23, %v7982_v55  ;;  %v7895_v24 = vadd.f32 %v7894_v34, %v15698_v22  ;;  %v17439_v47 = vrot.slane %v15743_v45, 2 }
0x199c   :  { %v7909_v1 = vadd.f32 %v17438_v21, %v15709_v62  ;;  %v7958_v12 = vadd.f32 %v7957_v60, %v7956_v6  ;;  %v8013_v18 = vpack.c.bf16 %v7997_v38, %v7997_v38  ;;  %v17440_v37 = vrot.slane %v15826_v20, 2 }
0x199d   :  { %v7921_v42 = vadd.f32 %v17439_v47, %v15743_v45  ;;  %v8075_v50 = vunpack.c.l.b16 %v8011_v48  ;;  %v7972_v2 = vadd.f32 %v7971_v32, %v7970_v4  ;;  %v7985_v9 = vrot.slane %v7984_v53, 1  ;;  %v1182_v4 = vpop.permute.xlu1 %1181 }
0x199e   :  { %v7935_v49 = vadd.f32 %v17440_v37, %v15826_v20  ;;  %v7945_v29 = vsel %vm7874_vm13, %v15832_v15, 0.0  ;;  %v7999_v11 = vmul.f32 0.2, %v7958_v12  ;;  %v8077_v44 = vunpack.c.l.b16 %v8013_v18 }
0x199f   :  { %v7922_v62 = vrot.slane %v7921_v42, 1  ;;  %v8093_v22 = vsel %vm2778_vm7, %v8075_v50, %v8092_v19  ;;  %v7986_v54 = vadd.f32 %v7985_v9, %v7984_v53  ;;  %v8001_v45 = vmul.f32 0.2, %v7972_v2 }
0x19a0   :  { %v7936_v55 = vrot.slane %v7935_v49, 1  ;;  %v7946_v6 = vrot.slane %v7945_v29, 4  ;;  %v8015_v63 = vpack.c.bf16 %v7999_v11, %v7999_v11  ;;  %v8094_v26 = vsel %vm2780_vm8, %v8077_v44, %v8093_v22 }
0x19a1   :  { %v7923_v28 = vadd.f32 %v7922_v62, %v7921_v42  ;;  %v7959_v20 = vsel %vm7874_vm13, %v15851_v56, 0.0  ;;  %v8003_v34 = vmul.f32 0.2, %v7986_v54  ;;  %v8017_v60 = vpack.c.bf16 %v8001_v45, %v8001_v45 }
0x19a2   :  { %v7937_v23 = vadd.f32 %v7936_v55, %v7935_v49  ;;  %v7947_v15 = vadd.f32 %v7946_v6, %v7945_v29  ;;  %v7960_v38 = vrot.slane %v7959_v20, 4  ;;  %v8079_v48 = vunpack.c.l.b16 %v8015_v63 }
0x19a3   :  { %v7973_v19 = vsel %vm7874_vm13, %v7856_v52, 0.0  ;;  %v7990_v21 = vmul.f32 0.2, %v7895_v24  ;;  %v7992_v32 = vmul.f32 0.2, %v7909_v1  ;;  %v8019_v53 = vpack.c.bf16 %v8003_v34, %v8003_v34  ;;  %v1188_v24 = vpop.permute.xlu1 %1187 }
0x19a4   :  { %v8081_v47 = vunpack.c.l.b16 %v8017_v60  ;;  %v7948_v42 = vrot.slane %v7947_v15, 2  ;;  %v7961_v12 = vadd.f32 %v7960_v38, %v7959_v20  ;;  %v8095_v18 = vsel %vm2782_vm9, %v8079_v48, %v8094_v26 }
0x19a5   :  { %v7974_v50 = vrot.slane %v7973_v19, 4  ;;  %v7994_v37 = vmul.f32 0.2, %v7923_v28  ;;  %v7996_v49 = vmul.f32 0.2, %v7937_v23  ;;  %v8083_v56 = vunpack.c.l.b16 %v8019_v53 }
0x19a6   :  { %v8096_v2 = vsel %vm2784_vm10, %v8081_v47, %v8095_v18  ;;  %v7949_v9 = vadd.f32 %v7948_v42, %v7947_v15  ;;  %v7962_v62 = vrot.slane %v7961_v12, 2  ;;  %v8006_v11 = vpack.c.bf16 %v7990_v21, %v7990_v21  ;;  %v1176_v15 = vpop.permute.xlu0 %1175  ;;  %v17442_v47 = vld [vmem:[#allocation4_spill] sm:$0xff]  ;;  %v17443_v18 = vld [vmem:[#allocation5_spill] sm:$0xff] }
0x19a7   :  { %v7975_v29 = vadd.f32 %v7974_v50, %v7973_v19  ;;  %v8008_v44 = vpack.c.bf16 %v7992_v32, %v7992_v32  ;;  %v8010_v52 = vpack.c.bf16 %v7994_v37, %v7994_v37  ;;  %v8097_v1 = vsel %vm2786_vm11, %v8083_v56, %v8096_v2  ;;  %v1200_v37 = vpop.permute.xlu1 %1199 }
0x19a8   :  { %v7950_v22 = vrot.slane %v7949_v9, 1  ;;  %v7963_v55 = vadd.f32 %v7962_v62, %v7961_v12  ;;  %v8012_v54 = vpack.c.bf16 %v7996_v49, %v7996_v49  ;;  %v8099_v45 = vpack.c.b16 %v8097_v1, %v8097_v1 }
0x19a9   :  { %v7976_v6 = vrot.slane %v7975_v29, 2  ;;  %v17441_v28 = vpack.c.bf16 %v15702_v43, %v15702_v43  ;;  %v8070_v26 = vunpack.c.l.b16 %v8006_v11  ;;  %v8072_v34 = vunpack.c.l.b16 %v8008_v44 }
0x19aa   :  { %v7951_v23 = vadd.f32 %v7950_v22, %v7949_v9  ;;  %v7964_v20 = vrot.slane %v7963_v55, 1  ;;  %v8074_v60 = vunpack.c.l.b16 %v8010_v52  ;;  %8230 = vmatprep.mubr.bf16.mxu0 %v8099_v45  ;;  %v8076_v48 = vunpack.c.l.b16 %v8012_v54  ;;  %v17444_v9 = vld [vmem:[#allocation6_spill] sm:$0xff]  ;;  %v17445_v22 = vld [vmem:[#allocation7_spill] sm:$0xff]  ;;  %v1194_v54 = vpop.permute.xlu0 %1193 }
0x19ab   :  { %v8068_v63 = vunpack.c.l.b16 %v17441_v28  ;;  %v7977_v38 = vadd.f32 %v7976_v6, %v7975_v29  ;;  %v1172_v42 = vmul.f32 %v15867_v57, %v17442_v47  ;;  %v1178_v50 = vmul.f32 %v1176_v15, %v17443_v18 }
0x19ac   :  { %v7965_v21 = vadd.f32 %v7964_v20, %v7963_v55  ;;  %v7998_v32 = vmul.f32 0.2, %v7951_v23  ;;  %v1184_v62 = vmul.f32 %v1182_v4, %v17444_v9  ;;  %v1190_v57 = vmul.f32 %v1188_v24, %v17445_v22  ;;  %v17446_v23 = vld [vmem:[#allocation8_spill] sm:$0xff] }
0x19ad   :  { %v8084_v19 = vsel %vm2774_vm5, %v8070_v26, %v8068_v63  ;;  %v7978_v43 = vrot.slane %v7977_v38, 1  ;;  %v1173_v2 = vadd.f32 %v1172_v42, %v15675_v40  ;;  %v1206_v26 = vpop.permute.xlu1 %1205  ;;  %v1196_v4 = vmul.f32 %v1194_v54, %v17446_v23  ;;  %v17449_v42 = vld [vmem:[#allocation11_spill] sm:$0xff] }
0x19ae   :  { %v8085_v53 = vsel %vm2776_vm6, %v8072_v34, %v8084_v19  ;;  %v8000_v49 = vmul.f32 0.2, %v7965_v21  ;;  %v8014_v56 = vpack.c.bf16 %v7998_v32, %v7998_v32  ;;  %v17447_v34 = vld [vmem:[#allocation9_spill] sm:$0xff]  ;;  %v1212_v21 = vpop.permute.xlu0 %1211 }
0x19af   :  { %v8086_v12 = vsel %vm2778_vm7, %v8074_v60, %v8085_v53  ;;  %v7979_v29 = vadd.f32 %v7978_v43, %v7977_v38  ;;  %v1179_v1 = vadd.f32 %v1178_v50, %v1173_v2  ;;  %v1202_v60 = vmul.f32 %v1200_v37, %v17447_v34  ;;  %v12556_v37 = vld [vmem:[%s17010_s14] ss:$8 sps:$4 sm:$0xff]   ;;  %v12558_v2 = vld [vmem:[%s17010_s14 + $0x4] ss:$8 sps:$4 sm:$0xff]  }
0x19b0   :  { %v8087_v11 = vsel %vm2780_vm8, %v8076_v48, %v8086_v12  ;;  %v8016_v44 = vpack.c.bf16 %v8000_v49, %v8000_v49  ;;  %v8078_v52 = vunpack.c.l.b16 %v8014_v56  ;;  %v17448_v48 = vld [vmem:[#allocation10_spill] sm:$0xff]  ;;  %v1214_v43 = vmul.f32 %v1212_v21, %v17449_v42  ;;  %8256 = vmatprep.subr.bf16.mxu0 %v12558_v2  ;;  %v12565_v21 = vld [vmem:[%s17011_s15 + $0x58] sm:$0xff]   ;;  %v12572_v2 = vld [vmem:[%s17011_s15 + $0x30] sm:$0xff]  }
0x19b1   :  { %v8002_v55 = vmul.f32 0.2, %v7979_v29  ;;  %v1185_v28 = vadd.f32 %v1184_v62, %v1179_v1  ;;  %v1208_v19 = vmul.f32 %v1206_v26, %v17448_v48  ;;  %v17450_v50 = vmov 0  }
0x19b2   :  { %v8080_v45 = vunpack.c.l.b16 %v8016_v44  ;;  %v8088_v6 = vsel %vm2782_vm9, %v8078_v52, %v8087_v11 }
0x19b3   :  { %v8018_v63 = vpack.c.bf16 %v8002_v55, %v8002_v55  ;;  %v1191_v20 = vadd.f32 %v1190_v57, %v1185_v28 }
0x19b4   :  { %v8089_v40 = vsel %vm2784_vm10, %v8080_v45, %v8088_v6 }
0x19b5   :  { %v8082_v15 = vunpack.c.l.b16 %v8018_v63  ;;  %v1197_v38 = vadd.f32 %v1196_v4, %v1191_v20 }
0x19b7   :  { %v8090_v24 = vsel %vm2786_vm11, %v8082_v15, %v8089_v40  ;;  %v1203_v53 = vadd.f32 %v1202_v60, %v1197_v38  ;;  %v12559_v60 = vld [vmem:[%s17011_s15 + $0x40] sm:$0xff]   ;;  %v12562_v38 = vld [vmem:[%s17011_s15 + $0x8] sm:$0xff]  }
0x19b8   :  { %v8098_v32 = vpack.c.b16 %v8090_v24, %v8090_v24  ;;  %v12560_v15 = vld [vmem:[%s17011_s15] sm:$0xff]   ;;  %v12564_v24 = vld [vmem:[%s17011_s15 + $0x10] sm:$0xff]  }
0x19b9   :  { %v1209_v12 = vadd.f32 %v1208_v19, %v1203_v53  ;;  %v12563_v19 = vld [vmem:[%s17011_s15 + $0x50] sm:$0xff]   ;;  %v12567_v53 = vld [vmem:[%s17011_s15 + $0x60] sm:$0xff]  }
0x19ba   :  { %8231 = vmatmul.mubr.bf16.vlgmr.msra.gmra.mrb[24].mxu0 %v8098_v32  ;;  %v12566_v32 = vld [vmem:[%s17011_s15 + $0x18] sm:$0xff]  }
0x19bb   :  { %8288 = vmatprep.mubr.bf16.mxu0 %v17450_v50  ;;  %v1215_v49 = vadd.f32 %v1214_v43, %v1209_v12  ;;  %8257 = vmatpush1.bf16.msra.mxu0 %v12556_v37  ;;  %v12568_v43 = vld [vmem:[%s17011_s15 + $0x20] sm:$0xff]   ;;  %v12569_v50 = vld [vmem:[%s17011_s15 + $0x68] sm:$0xff]   ;;  %v12571_v37 = vld [vmem:[%s17011_s15 + $0x70] sm:$0xff]  }
0x19bc   :  { %12054 = vmatprep.subr.bf16.mxu0 %v12559_v60 }
0x19bd   :  { %12715 = vtanh.f32 %v1215_v49  ;;  %v11695_v62 = vmul.f32 -1.442695, %v1215_v49 }
0x19bf   :  { %12717 = vpow2.f32 %v11695_v62  ;;  %v12573_v62 = vld [vmem:[%s17011_s15 + $0x78] sm:$0xff]  }
0x19c7   :  { %v12716_v56 = vpop.eup %12715 }
0x19c8   :  { %1225 = vrot.lane.b32.xlu1 %v12716_v56, %s12759_s24  ;;  %v12570_v56 = vld [vmem:[%s17011_s15 + $0x28] sm:$0xff]  }
0x19c9   :  { %v12718_v29 = vpop.eup %12717 }
0x19ca   :  { %v1219_v11 = vadd.f32 1.0, %v12718_v29  ;;  %v12574_v29 = vld [vmem:[%s17011_s15 + $0x38] sm:$0xff]  }
0x19cc   :  { %12719 = vrcp.f32 %v1219_v11  ;;  %v12575_v11 = vld [vmem:[%s17011_s15 + $0xc0] sm:$0xff]  }
0x19d6   :  { %v12720_v44 = vpop.eup %12719 }
0x19d7   :  { %v1223_v26 = vmul.f32 %v12720_v44, %v15471_v58  ;;  %v12561_v58 = vld [vmem:[%s17011_s15 + $0x48] sm:$0xff]  }
0x1a3a   :  { %v1226_v52 = vpop.permute.xlu1 %1225 }
0x1a3b   :  { %v1228_v1 = vmul.f32 %v12720_v44, %v1226_v52 }
0x1a3d   :  { %1230 = vrot.lane.b32.xlu1 %v1228_v1, %s12760_s3 }
0x1a8d   :  { %v12048_v57 = vpop.f32.mrb[24].mxu0 }
0x1a8e   :  { %v12049_v55 = vpop.f32.mrb[25].mxu0 }
0x1a8f   :  { %v12050_v54 = vadd.f32 %v12049_v55, %v12048_v57  ;;  %v12051_v45 = vpop.f32.mrb[26].mxu0 }
0x1a90   :  { %v12052_v6 = vpop.f32.mrb[27].mxu0 }
0x1a91   :  { %v8238_v28 = vmax.f32 %v12050_v54, 0.0 }
0x1a93   :  { %v8239_v63 = vpack.c.bf16 %v8238_v28, %v8238_v28 }
0x1a95   :  { %11908 = vmatmul.mubr.msk.bf16.vlgmr.msra.gmra.mrb[28].mxu0 %vm8252_vm14, %v8239_v63 }
0x1a96   :  { %12055 = vmatpush3.bf16.msra.mxu0 %v12560_v15 }
0x1a97   :  { %12056 = vmatprep.subr.bf16.mxu0 %v12561_v58 }
0x1a9a   :  { %12057 = vmatpush3.bf16.msra.mxu0 %v12562_v38  ;;  %v17452_v38 = vld [vmem:[#allocation50_spill] sm:$0xff] }
0x1a9b   :  { %12058 = vmatprep.subr.bf16.mxu0 %v12563_v19  ;;  %v15983_v19 = vadd.f32 %v15671_v31, %v17452_v38 }
0x1a9e   :  { %12059 = vmatpush3.bf16.msra.mxu0 %v12564_v24 }
0x1a9f   :  { %12060 = vmatprep.subr.bf16.mxu0 %v12565_v21 }
0x1aa2   :  { %12061 = vmatpush3.bf16.msra.mxu0 %v12566_v32 }
0x1aa3   :  { %12062 = vmatprep.subr.bf16.mxu0 %v12567_v53 }
0x1aa6   :  { %12063 = vmatpush3.bf16.msra.mxu0 %v12568_v43 }
0x1aa7   :  { %12064 = vmatprep.subr.bf16.mxu0 %v12569_v50 }
0x1aaa   :  { %12065 = vmatpush3.bf16.msra.mxu0 %v12570_v56 }
0x1aab   :  { %12066 = vmatprep.subr.bf16.mxu0 %v12571_v37 }
0x1aae   :  { %12067 = vmatpush3.bf16.msra.mxu0 %v12572_v2 }
0x1aaf   :  { %v1231_v40 = vpop.permute.xlu1 %1230  ;;  %12068 = vmatprep.subr.bf16.mxu0 %v12573_v62 }
0x1ab0   :  { %v15916_v4 = vadd.f32 %v1231_v40, %v1223_v26 }
0x1ab2   :  { %17451 = vst [vmem:[#allocation63_spill] sm:$0xff] %v15916_v4  ;;  %12721 = vtanh.f32 %v15916_v4  ;;  %12069 = vmatpush3.bf16.msra.mxu0 %v12574_v29 }
0x1ab3   :  { %12082 = vmatprep.subr.bf16.mxu0 %v12575_v11 }
0x1abc   :  { %v12722_v20 = vpop.eup %12721 }
0x1abd   :  { %1236 = vrot.lane.b32.xlu0 %v12722_v20, %s12760_s3 }
0x1b2f   :  { %v1237_v12 = vpop.permute.xlu0 %1236 }
0x1b30   :  { %v1239_v49 = vmul.f32 %v12720_v44, %v1237_v12 }
0x1b32   :  { %1248 = vperm.xlu0 %12387, %v1239_v49   ;;  %1242 = vperm.xlu1 %12386, %v1239_v49  }
0x1b36   :  { %12390 = vset.pattern.permute.xlu0 %v17405_v46  ;;  %12388 = vset.pattern.permute.xlu1 %v17406_v17  ;;  %v17457_v46 = vld [vmem:[#allocation36_spill] sm:$0xff] }
0x1b37   :  { %1266 = vperm.xlu0 %12390, %v1239_v49   ;;  %1254 = vperm.xlu1 %12388, %v1239_v49  }
0x1b3b   :  { %12393 = vset.pattern.permute.xlu0 %v17407_v13  ;;  %12389 = vset.pattern.permute.xlu1 %v17408_v35  ;;  %v17456_v13 = vld [vmem:[#allocation35_spill] sm:$0xff] }
0x1b3c   :  { %1284 = vperm.xlu0 %12393, %v1239_v49   ;;  %1260 = vperm.xlu1 %12389, %v1239_v49  }
0x1b40   :  { %12391 = vset.pattern.permute.xlu1 %v17409_v61  ;;  %12395 = vset.pattern.permute.xlu0 %v17410_v16 }
0x1b41   :  { %1272 = vperm.xlu1 %12391, %v1239_v49  }
0x1b45   :  { %12392 = vset.pattern.permute.xlu1 %v17411_v41 }
0x1b46   :  { %1278 = vperm.xlu1 %12392, %v1239_v49  }
0x1b4a   :  { %12394 = vset.pattern.permute.xlu1 %v17412_v59 }
0x1b68   :  { %v8290_v44 = vpop.f32.mrb[28].mxu0 }
0x1b69   :  { %v11909_v52 = vmul.f32 -1.442695, %v8290_v44  ;;  %v8292_v1 = vpop.f32.mrb[29].mxu0 }
0x1b6a   :  { %v11910_v57 = vmul.f32 -1.442695, %v8292_v1  ;;  %v8294_v55 = vpop.f32.mrb[30].mxu0 }
0x1b6b   :  { %12723 = vpow2.f32 %v11909_v52  ;;  %v8295_v54 = vpop.f32.mrb[31].mxu0 }
0x1b6c   :  { %12725 = vpow2.f32 %v11910_v57 }
0x1b75   :  { %v12724_v45 = vpop.eup %12723 }
0x1b76   :  { %v12726_v6 = vpop.eup %12725  ;;  %v8303_v28 = vadd.f32 1.0, %v12724_v45 }
0x1b77   :  { %v8304_v63 = vadd.f32 1.0, %v12726_v6 }
0x1b78   :  { %12727 = vrcp.f32 %v8303_v28 }
0x1b79   :  { %12729 = vrcp.f32 %v8304_v63 }
0x1b82   :  { %v12728_v26 = vpop.eup %12727 }
0x1b83   :  { %v12730_v40 = vpop.eup %12729 }
0x1b84   :  { %v8311_v20 = vcombine.low %v12728_v26, %v12730_v40  ;;  %v8312_v60 = vcombine.high %v12728_v26, %v12730_v40 }
0x1b86   :  { %v8319_v15 = vrot.slane %v8311_v20, %v13311_v0  ;;  %v8326_v58 = vrot.slane %v8312_v60, %v13311_v0 }
0x1b88   :  { %v8327_v53 = vcombine.high %v8319_v15, %v8319_v15  ;;  %v8328_v43 = vcombine.high %v8326_v58, %v8326_v58  ;;  %v8335_v12 = vrot.slane %v8319_v15, %v13311_v0  ;;  %v8342_v50 = vrot.slane %v8326_v58, %v13311_v0 }
0x1b8a   :  { %v8349_v2 = vrot.slane %v8327_v53, %v13311_v0  ;;  %v8356_v62 = vrot.slane %v8328_v43, %v13311_v0  ;;  %v8357_v29 = vcombine.high %v8335_v12, %v8335_v12  ;;  %v8358_v11 = vcombine.high %v8342_v50, %v8342_v50 }
0x1b8b   :  { %v8364_v52 = vrot.slane %v8335_v12, %v17413_v33  ;;  %v8368_v1 = vrot.slane %v8335_v12, %v17414_v8  ;;  %v8396_v57 = vrot.slane %v8342_v50, %v17413_v33  ;;  %v8400_v26 = vrot.slane %v8342_v50, %v17414_v8 }
0x1b8c   :  { %v8359_v55 = vcombine.high %v8349_v2, %v8349_v2  ;;  %v8360_v54 = vcombine.high %v8356_v62, %v8356_v62  ;;  %v8372_v45 = vrot.slane %v8349_v2, %v17413_v33  ;;  %v8376_v6 = vrot.slane %v8349_v2, %v17414_v8 }
0x1b8d   :  { %v8380_v28 = vrot.slane %v8357_v29, %v17413_v33  ;;  %v8384_v63 = vrot.slane %v8357_v29, %v17414_v8  ;;  %v8404_v40 = vrot.slane %v8356_v62, %v17413_v33  ;;  %v8408_v15 = vrot.slane %v8356_v62, %v17414_v8 }
0x1b8e   :  { %v8388_v20 = vrot.slane %v8359_v55, %v17413_v33  ;;  %v8392_v60 = vrot.slane %v8359_v55, %v17414_v8  ;;  %v8412_v58 = vrot.slane %v8358_v11, %v17413_v33  ;;  %v8416_v38 = vrot.slane %v8358_v11, %v17414_v8 }
0x1b8f   :  { %v16020_v53 = vrot.slane %v8360_v54, %v17413_v33  ;;  %v8425_v43 = vcombine.low %v8364_v52, %v8368_v1  ;;  %v8426_v12 = vcombine.high %v8364_v52, %v8368_v1  ;;  %v8465_v2 = vcombine.low %v8372_v45, %v8376_v6 }
0x1b90   :  { %v8466_v29 = vcombine.high %v8372_v45, %v8376_v6  ;;  %v8505_v50 = vcombine.low %v8380_v28, %v8384_v63  ;;  %v8506_v44 = vcombine.high %v8380_v28, %v8384_v63  ;;  %v8545_v55 = vcombine.low %v8388_v20, %v8392_v60 }
0x1b91   :  { %v8433_v37 = vrot.slane %v8425_v43, %v13311_v0  ;;  %v8440_v56 = vrot.slane %v8426_v12, %v13311_v0  ;;  %v8546_v31 = vcombine.high %v8388_v20, %v8392_v60  ;;  %v8473_v62 = vrot.slane %v8465_v2, %v13311_v0 }
0x1b92   :  { %v16026_v49 = vrot.slane %v8466_v29, %v13311_v0  ;;  %v8513_v33 = vrot.slane %v8505_v50, %v13311_v0  ;;  %v16030_v11 = vrot.slane %v8506_v44, %v13311_v0  ;;  %v8424_v52 = vrot.slane %v8360_v54, %v17414_v8 }
0x1b93   :  { %v8441_v1 = vcombine.high %v8433_v37, %v8433_v37  ;;  %v8448_v45 = vrot.slane %v8433_v37, %v13311_v0  ;;  %v8553_v6 = vrot.slane %v8545_v55, %v13311_v0  ;;  %v8455_v28 = vrot.slane %v8440_v56, %v13311_v0 }
0x1b94   :  { %v8481_v63 = vcombine.high %v8473_v62, %v8473_v62  ;;  %v16037_v20 = vrot.slane %v8473_v62, %v13311_v0  ;;  %v8521_v60 = vcombine.high %v8513_v33, %v8513_v33  ;;  %v8495_v44 = vrot.slane %v16026_v49, %v13311_v0 }
0x1b95   :  { %v8462_v43 = vrot.slane %v8441_v1, %v13311_v0  ;;  %v8463_v12 = vcombine.high %v8448_v45, %v8448_v45  ;;  %v16043_v8 = vrot.slane %v8513_v33, %v13311_v0  ;;  %v8535_v56 = vrot.slane %v16030_v11, %v13311_v0 }
0x1b96   :  { %v8502_v37 = vrot.slane %v8481_v63, %v13311_v0  ;;  %v8503_v54 = vcombine.high %v16037_v20, %v16037_v20  ;;  %v16051_v2 = vrot.slane %v8546_v31, %v13311_v0  ;;  %v8542_v29 = vrot.slane %v8521_v60, %v13311_v0 }
0x1b97   :  { %v8543_v50 = vcombine.high %v16043_v8, %v16043_v8  ;;  %v8561_v49 = vcombine.high %v8553_v6, %v8553_v6  ;;  %v8585_v55 = vcombine.low %v8396_v57, %v8400_v26  ;;  %v8568_v62 = vrot.slane %v8553_v6, %v13311_v0 }
0x1b98   :  { %v8586_v33 = vcombine.high %v8396_v57, %v8400_v26  ;;  %v8625_v1 = vcombine.low %v8404_v40, %v8408_v15  ;;  %v8626_v63 = vcombine.high %v8404_v40, %v8408_v15  ;;  %v8575_v32 = vrot.slane %v16051_v2, %v13311_v0 }
0x1b99   :  { %v8593_v11 = vrot.slane %v8585_v55, %v13311_v0  ;;  %v8665_v21 = vcombine.low %v8412_v58, %v8416_v38  ;;  %v8666_v31 = vcombine.high %v8412_v58, %v8416_v38  ;;  %v8705_v41 = vcombine.low %v16020_v53, %v8424_v52 }
0x1b9a   :  { %v8600_v24 = vrot.slane %v8586_v33, %v13311_v0  ;;  %v8633_v60 = vrot.slane %v8625_v1, %v13311_v0  ;;  %v16063_v59 = vrot.slane %v8626_v63, %v13311_v0  ;;  %v8706_v40 = vcombine.high %v16020_v53, %v8424_v52 }
0x1b9b   :  { %v8601_v6 = vcombine.high %v8593_v11, %v8593_v11  ;;  %v8608_v57 = vrot.slane %v8593_v11, %v13311_v0  ;;  %v16068_v26 = vrot.slane %v8665_v21, %v13311_v0  ;;  %v16074_v2 = vrot.slane %v8666_v31, %v13311_v0 }
0x1b9c   :  { %v8615_v15 = vrot.slane %v8600_v24, %v13311_v0  ;;  %v8641_v58 = vcombine.high %v8633_v60, %v8633_v60  ;;  %v8648_v38 = vrot.slane %v8633_v60, %v13311_v0  ;;  %v16087_v52 = vrot.slane %v8705_v41, %v13311_v0 }
0x1b9d   :  { %v8622_v55 = vrot.slane %v8601_v6, %v13311_v0  ;;  %v8623_v33 = vcombine.high %v8608_v57, %v8608_v57  ;;  %v16084_v24 = vrot.slane %v16068_v26, %v13311_v0  ;;  %v16090_v11 = vrot.slane %v8706_v40, %v13311_v0 }
0x1b9e   :  { %v8662_v63 = vrot.slane %v8641_v58, %v13311_v0  ;;  %v8663_v53 = vcombine.high %v8648_v38, %v8648_v38  ;;  %v8785_v31 = vmul.f32 %v8448_v45, %v15566_v3  ;;  %v16094_v60 = vmul.f32 %v8455_v28, %v15569_v14 }
0x1b9f   :  { %v16097_v6 = vmul.f32 %v8608_v57, %v15678_v39  ;;  %v16102_v1 = vmul.f32 %v8615_v15, %v15746_v7  ;;  %v16105_v41 = vmul.f32 %v8648_v38, %v15755_v10  ;;  %v8464_v21 = vcombine.high %v8462_v43, %v8462_v43  ;;  %v17455_v38 = vld [vmem:[#allocation57_spill] sm:$0xff] }
0x1ba0   :  { %v8504_v40 = vcombine.high %v8502_v37, %v8502_v37  ;;  %v8544_v16 = vcombine.high %v8542_v29, %v8542_v29  ;;  %v8582_v45 = vrot.slane %v8561_v49, %v13311_v0  ;;  %v8583_v61 = vcombine.high %v8568_v62, %v8568_v62 }
0x1ba1   :  { %v8624_v14 = vcombine.high %v8622_v55, %v8622_v55  ;;  %v8664_v28 = vcombine.high %v8662_v63, %v8662_v63  ;;  %v16109_v57 = vmul.f32 %v8462_v43, %v15575_v27  ;;  %v17453_v58 = vcombine.high %v15566_v3, %v15566_v3 }
0x1ba2   :  { %v8584_v7 = vcombine.high %v8582_v45, %v8582_v45  ;;  %v17454_v10 = vcombine.high %v15575_v27, %v15575_v27  ;;  %v8790_v49 = vmul.f32 %v16037_v20, %v17455_v38  ;;  %v16124_v17 = vmul.f32 %v8502_v37, %v17456_v13  ;;  %v17460_v13 = vld [vmem:[#allocation38_spill] sm:$0xff]  ;;  %v17464_v38 = vld [vmem:[#allocation13_spill] sm:$0xff] }
0x1ba3   :  { %v16114_v35 = vmul.f32 %v8463_v12, %v17453_v58  ;;  %v16127_v43 = vmul.f32 %v8503_v54, %v17457_v46  ;;  %v16130_v4 = vmul.f32 %v8504_v40, %v15598_v30  ;;  %v16133_v3 = vmul.f32 %v8495_v44, %v15613_v5  ;;  %v17461_v46 = vld [vmem:[#allocation60_spill] sm:$0xff] }
0x1ba4   :  { %v16119_v15 = vmul.f32 %v8464_v21, %v17454_v10  ;;  %v17458_v27 = vcombine.high %v15598_v30, %v15598_v30  ;;  %v17459_v20 = vcombine.high %v15613_v5, %v15613_v5  ;;  %v16145_v37 = vmul.f32 %v8543_v50, %v17460_v13  ;;  %v17462_v58 = vld [vmem:[#allocation12_spill] sm:$0xff] }
0x1ba5   :  { %v16148_v54 = vmul.f32 %v8544_v16, %v17461_v46  ;;  %v16151_v40 = vmul.f32 %v8535_v56, %v17462_v58  ;;  %v17463_v44 = vld [vmem:[#allocation20_spill] sm:$0xff]  ;;  %v16155_v30 = vmul.f32 %v8582_v45, %v17464_v38  ;;  %v16167_v16 = vmul.f32 %v8622_v55, %v15690_v25 }
0x1ba6   :  { %v8795_v12 = vmul.f32 %v16043_v8, %v17458_v27  ;;  %v16142_v21 = vmul.f32 %v8542_v29, %v17459_v20  ;;  %v8800_v10 = vmul.f32 %v8568_v62, %v17463_v44  ;;  %v17465_v8 = vld [vmem:[#allocation23_spill] sm:$0xff]  ;;  %v17466_v5 = vld [vmem:[#allocation16_spill] sm:$0xff]  ;;  %v17468_v56 = vcombine.high %v15678_v39, %v15678_v39 }
0x1ba7   :  { %v16158_v27 = vmul.f32 %v8583_v61, %v17465_v8  ;;  %v16161_v29 = vmul.f32 %v8584_v7, %v17466_v5  ;;  %v17467_v20 = vld [vmem:[#allocation24_spill] sm:$0xff]  ;;  %v17469_v62 = vcombine.high %v15690_v25, %v15690_v25  ;;  %v17470_v61 = vld [vmem:[#allocation30_spill] sm:$0xff]  ;;  %v17471_v7 = vld [vmem:[#allocation25_spill] sm:$0xff]  ;;  %v8849_v55 = vcombine.low %v8785_v31, %v16109_v57 }
0x1ba8   :  { %v16164_v50 = vmul.f32 %v8575_v32, %v17467_v20  ;;  %v16172_v13 = vmul.f32 %v8623_v33, %v17468_v56  ;;  %v16180_v46 = vmul.f32 %v8662_v63, %v17470_v61  ;;  %v16183_v58 = vmul.f32 %v8663_v53, %v17471_v7 }
0x1ba9   :  { %v16177_v45 = vmul.f32 %v8624_v14, %v17469_v62  ;;  %v16186_v32 = vmul.f32 %v8664_v28, %v15750_v51  ;;  %v8863_v39 = vrot.slane %v16114_v35, %v13311_v0  ;;  %v8880_v33 = vcombine.low %v8790_v49, %v16124_v17 }
0x1baa   :  { %v8894_v25 = vrot.slane %v16127_v43, %v13311_v0  ;;  %v8911_v14 = vcombine.low %v8795_v12, %v16142_v21  ;;  %v8856_v63 = vrot.slane %v8849_v55, %v13311_v0  ;;  %v8925_v53 = vrot.slane %v16145_v37, %v13311_v0 }
0x1bab   :  { %v8942_v28 = vcombine.low %v8800_v10, %v16155_v30  ;;  %v8956_v31 = vrot.slane %v16158_v27, %v13311_v0  ;;  %v8887_v44 = vrot.slane %v8880_v33, %v13311_v0  ;;  %v8973_v49 = vcombine.low %v16097_v6, %v16167_v16 }
0x1bac   :  { %v8918_v38 = vrot.slane %v8911_v14, %v13311_v0  ;;  %v8987_v12 = vrot.slane %v16172_v13, %v13311_v0  ;;  %v8864_v8 = vcombine.low %v8856_v63, %v8863_v39  ;;  %v8865_v5 = vcombine.high %v8856_v63, %v8863_v39 }
0x1bad   :  { %v8949_v20 = vrot.slane %v8942_v28, %v13311_v0  ;;  %v9004_v10 = vcombine.low %v16105_v41, %v16180_v46  ;;  %v8895_v56 = vcombine.low %v8887_v44, %v8894_v25  ;;  %v8896_v62 = vcombine.high %v8887_v44, %v8894_v25 }
0x1bae   :  { %v8926_v61 = vcombine.low %v8918_v38, %v8925_v53  ;;  %v8927_v7 = vcombine.high %v8918_v38, %v8925_v53  ;;  %v16211_v55 = vrot.slane %v8864_v8, %v13311_v0  ;;  %v16214_v33 = vrot.slane %v8865_v5, %v13311_v0 }
0x1baf   :  { %v8957_v6 = vcombine.low %v8949_v20, %v8956_v31  ;;  %v8958_v14 = vcombine.high %v8949_v20, %v8956_v31  ;;  %v16217_v42 = vrot.slane %v8895_v56, %v13311_v0  ;;  %v16220_v39 = vrot.slane %v8896_v62, %v13311_v0 }
0x1bb0   :  { %v16223_v41 = vrot.slane %v8926_v61, %v13311_v0  ;;  %v16226_v25 = vrot.slane %v8927_v7, %v13311_v0  ;;  %v8980_v28 = vrot.slane %v8973_v49, %v13311_v0  ;;  %v9011_v31 = vrot.slane %v9004_v10, %v13311_v0 }
0x1bb1   :  { %v16229_v63 = vrot.slane %v8957_v6, %v13311_v0  ;;  %v16232_v53 = vrot.slane %v8958_v14, %v13311_v0  ;;  %v9018_v44 = vrot.slane %v16183_v58, %v13311_v0  ;;  %v9105_v38 = vcombine.low %v16109_v57, %v16114_v35 }
0x1bb2   :  { %v9119_v8 = vrot.slane %v16119_v15, %v13311_v0  ;;  %v9136_v5 = vcombine.low %v16124_v17, %v16127_v43  ;;  %v8988_v20 = vcombine.low %v8980_v28, %v8987_v12  ;;  %v8989_v56 = vcombine.high %v8980_v28, %v8987_v12 }
0x1bb3   :  { %v9150_v62 = vrot.slane %v16130_v4, %v13311_v0  ;;  %v9167_v49 = vcombine.low %v16142_v21, %v16145_v37  ;;  %v9019_v10 = vcombine.low %v9011_v31, %v9018_v44  ;;  %v9020_v61 = vcombine.high %v9011_v31, %v9018_v44 }
0x1bb4   :  { %v9112_v7 = vrot.slane %v9105_v38, %v13311_v0  ;;  %v9143_v57 = vrot.slane %v9136_v5, %v13311_v0  ;;  %v16251_v6 = vrot.slane %v8988_v20, %v13311_v0  ;;  %v16254_v14 = vrot.slane %v8989_v56, %v13311_v0 }
0x1bb5   :  { %v9174_v17 = vrot.slane %v9167_v49, %v13311_v0  ;;  %v9181_v12 = vrot.slane %v16148_v54, %v13311_v0  ;;  %v16260_v28 = vrot.slane %v9019_v10, %v13311_v0  ;;  %v16263_v21 = vrot.slane %v9020_v61, %v13311_v0 }
0x1bb6   :  { %v9120_v31 = vcombine.low %v9112_v7, %v9119_v8  ;;  %v9121_v44 = vcombine.high %v9112_v7, %v9119_v8  ;;  %v9151_v38 = vcombine.low %v9143_v57, %v9150_v62  ;;  %v9152_v5 = vcombine.high %v9143_v57, %v9150_v62 }
0x1bb7   :  { %v9182_v20 = vcombine.low %v9174_v17, %v9181_v12  ;;  %v9183_v48 = vcombine.high %v9174_v17, %v9181_v12  ;;  %v9198_v49 = vcombine.low %v16155_v30, %v16158_v27  ;;  %v9212_v10 = vrot.slane %v16161_v29, %v13311_v0 }
0x1bb8   :  { %v9128_v56 = vrot.slane %v9120_v31, %v13311_v0  ;;  %v9135_v34 = vrot.slane %v9121_v44, %v13311_v0  ;;  %v16272_v22 = vrot.slane %v9151_v38, %v13311_v0  ;;  %v16275_v61 = vrot.slane %v9152_v5, %v13311_v0 }
0x1bb9   :  { %v16278_v8 = vrot.slane %v9182_v20, %v13311_v0  ;;  %v16281_v62 = vrot.slane %v9183_v48, %v13311_v0  ;;  %v9205_v7 = vrot.slane %v9198_v49, %v13311_v0  ;;  %v9229_v30 = vcombine.low %v16167_v16, %v16172_v13 }
0x1bba   :  { %v9243_v57 = vrot.slane %v16177_v45, %v13311_v0  ;;  %v9260_v17 = vcombine.low %v16180_v46, %v16183_v58  ;;  %v9274_v12 = vrot.slane %v16186_v32, %v13311_v0  ;;  %v9361_v31 = vcombine.low %v16114_v35, %v16119_v15 }
0x1bbb   :  { %v9375_v48 = vrot.slane %v16094_v60, %v13311_v0  ;;  %v9392_v44 = vcombine.low %v16127_v43, %v16130_v4  ;;  %v9213_v38 = vcombine.low %v9205_v7, %v9212_v10  ;;  %v9214_v16 = vcombine.high %v9205_v7, %v9212_v10 }
0x1bbc   :  { %v9236_v5 = vrot.slane %v9229_v30, %v13311_v0  ;;  %v9267_v20 = vrot.slane %v9260_v17, %v13311_v0  ;;  %v9368_v46 = vrot.slane %v9361_v31, %v13311_v0  ;;  %v9406_v23 = vrot.slane %v16133_v3, %v13311_v0 }
0x1bbd   :  { %v9399_v49 = vrot.slane %v9392_v44, %v13311_v0  ;;  %v9423_v35 = vcombine.low %v16145_v37, %v16148_v54  ;;  %v16307_v60 = vrot.slane %v9213_v38, %v13311_v0  ;;  %v16310_v4 = vrot.slane %v9214_v16, %v13311_v0 }
0x1bbe   :  { %v9244_v15 = vcombine.low %v9236_v5, %v9243_v57  ;;  %v9245_v43 = vcombine.high %v9236_v5, %v9243_v57  ;;  %v9275_v10 = vcombine.low %v9267_v20, %v9274_v12  ;;  %v9276_v7 = vcombine.high %v9267_v20, %v9274_v12 }
0x1bbf   :  { %v9376_v30 = vcombine.low %v9368_v46, %v9375_v48  ;;  %v9377_v17 = vcombine.high %v9368_v46, %v9375_v48  ;;  %v9407_v44 = vcombine.low %v9399_v49, %v9406_v23  ;;  %v9408_v37 = vcombine.high %v9399_v49, %v9406_v23 }
0x1bc0   :  { %v16313_v31 = vrot.slane %v9244_v15, %v13311_v0  ;;  %v16316_v3 = vrot.slane %v9245_v43, %v13311_v0  ;;  %v16319_v54 = vrot.slane %v9275_v10, %v13311_v0  ;;  %v16322_v38 = vrot.slane %v9276_v7, %v13311_v0 }
0x1bc1   :  { %v9384_v57 = vrot.slane %v9376_v30, %v13311_v0  ;;  %v9391_v12 = vrot.slane %v9377_v17, %v13311_v0  ;;  %v9415_v48 = vrot.slane %v9407_v44, %v13311_v0  ;;  %v9422_v16 = vrot.slane %v9408_v37, %v13311_v0 }
0x1bc2   :  { %v9430_v5 = vrot.slane %v9423_v35, %v13311_v0  ;;  %v9437_v20 = vrot.slane %v16151_v40, %v13311_v0  ;;  %v9454_v23 = vcombine.low %v16158_v27, %v16161_v29  ;;  %v9468_v46 = vrot.slane %v16164_v50, %v13311_v0 }
0x1bc3   :  { %v9485_v49 = vcombine.low %v16172_v13, %v16177_v45  ;;  %v9499_v15 = vrot.slane %v16102_v1, %v13311_v0  ;;  %v9609_v35 = vcombine.low %v16211_v55, %v16214_v33  ;;  %v9610_v7 = vcombine.low %v9128_v56, %v9135_v34 }
0x1bc4   :  { %v9438_v43 = vcombine.low %v9430_v5, %v9437_v20  ;;  %v9439_v10 = vcombine.high %v9430_v5, %v9437_v20  ;;  %v9461_v40 = vrot.slane %v9454_v23, %v13311_v0  ;;  %v9611_v27 = vcombine.low %v9384_v57, %v9391_v12 }
0x1bc5   :  { %v9492_v30 = vrot.slane %v9485_v49, %v13311_v0  ;;  %v9667_v29 = vcombine.low %v16217_v42, %v16220_v39  ;;  %v9618_v1 = vrot.slane %v9609_v35, %v13311_v0  ;;  %v9625_v45 = vrot.slane %v9610_v7, %v13311_v0 }
0x1bc6   :  { %v9446_v50 = vrot.slane %v9438_v43, %v13311_v0  ;;  %v9453_v13 = vrot.slane %v9439_v10, %v13311_v0  ;;  %v9469_v17 = vcombine.low %v9461_v40, %v9468_v46  ;;  %v9470_v44 = vcombine.high %v9461_v40, %v9468_v46 }
0x1bc7   :  { %v9500_v55 = vcombine.low %v9492_v30, %v9499_v15  ;;  %v9501_v34 = vcombine.high %v9492_v30, %v9499_v15  ;;  %v16350_v33 = vrot.slane %v9611_v27, %v13311_v0  ;;  %v9633_v56 = vcombine.low %v9618_v1, %v9625_v45 }
0x1bc8   :  { %v9634_v37 = vcombine.high %v9618_v1, %v9625_v45  ;;  %v9668_v42 = vcombine.low %v16272_v22, %v16275_v61  ;;  %v9477_v39 = vrot.slane %v9469_v17, %v13311_v0  ;;  %v9484_v57 = vrot.slane %v9470_v44, %v13311_v0 }
0x1bc9   :  { %v9508_v12 = vrot.slane %v9500_v55, %v13311_v0  ;;  %v9515_v5 = vrot.slane %v9501_v34, %v13311_v0  ;;  %v9642_v20 = vrot.slane %v9633_v56, %v13311_v0  ;;  %v16362_v46 = vrot.slane %v16350_v33, %v13311_v0 }
0x1bca   :  { %v9649_v23 = vrot.slane %v9634_v37, %v13311_v0  ;;  %v9669_v49 = vcombine.low %v9415_v48, %v9422_v16  ;;  %v9676_v15 = vrot.slane %v9667_v29, %v13311_v0  ;;  %v9683_v22 = vrot.slane %v9668_v42, %v13311_v0 }
0x1bcb   :  { %v9725_v61 = vcombine.low %v16223_v41, %v16226_v25  ;;  %v9726_v43 = vcombine.low %v16278_v8, %v16281_v62  ;;  %v9665_v10 = vcombine.high %v9642_v20, %v16362_v46  ;;  %v9727_v7 = vcombine.low %v9446_v50, %v9453_v13 }
0x1bcc   :  { %v16372_v35 = vrot.slane %v9669_v49, %v13311_v0  ;;  %v9783_v40 = vcombine.low %v16229_v63, %v16232_v53  ;;  %v9691_v48 = vcombine.low %v9676_v15, %v9683_v22  ;;  %v9692_v16 = vcombine.high %v9676_v15, %v9683_v22 }
0x1bcd   :  { %v9734_v30 = vrot.slane %v9725_v61, %v13311_v0  ;;  %v9741_v27 = vrot.slane %v9726_v43, %v13311_v0  ;;  %v16383_v25 = vrot.slane %v9727_v7, %v13311_v0  ;;  %v9784_v8 = vcombine.low %v16307_v60, %v16310_v4 }
0x1bce   :  { %v16380_v41 = vrot.slane %v16372_v35, %v13311_v0  ;;  %v9785_v62 = vcombine.low %v9477_v39, %v9484_v57  ;;  %v16388_v29 = vrot.slane %v9691_v48, %v13311_v0  ;;  %v16391_v63 = vrot.slane %v9692_v16, %v13311_v0 }
0x1bcf   :  { %v9749_v53 = vcombine.low %v9734_v30, %v9741_v27  ;;  %v9750_v50 = vcombine.high %v9734_v30, %v9741_v27  ;;  %v16395_v13 = vrot.slane %v16383_v25, %v13311_v0  ;;  %v9792_v1 = vrot.slane %v9783_v40, %v13311_v0 }
0x1bd0   :  { %v9799_v45 = vrot.slane %v9784_v8, %v13311_v0  ;;  %v16400_v17 = vrot.slane %v9785_v62, %v13311_v0  ;;  %v9723_v60 = vcombine.high %v16388_v29, %v16380_v41  ;;  %v9841_v55 = vcombine.low %v16251_v6, %v16254_v14 }
0x1bd1   :  { %v9758_v4 = vrot.slane %v9749_v53, %v13311_v0  ;;  %v9765_v44 = vrot.slane %v9750_v50, %v13311_v0  ;;  %v9842_v42 = vcombine.low %v16313_v31, %v16316_v3  ;;  %v9843_v57 = vcombine.low %v9508_v12, %v9515_v5 }
0x1bd2   :  { %v9807_v34 = vcombine.low %v9792_v1, %v9799_v45  ;;  %v9808_v56 = vcombine.high %v9792_v1, %v9799_v45  ;;  %v16410_v37 = vrot.slane %v16400_v17, %v13311_v0  ;;  %v9850_v49 = vrot.slane %v9841_v55, %v13311_v0 }
0x1bd3   :  { %v9781_v39 = vcombine.high %v9758_v4, %v16395_v13  ;;  %v9899_v15 = vcombine.low %v16260_v28, %v16263_v21  ;;  %v9857_v14 = vrot.slane %v9842_v42, %v13311_v0  ;;  %v9900_v61 = vcombine.low %v16319_v54, %v16322_v38 }
0x1bd4   :  { %v16419_v22 = vrot.slane %v9807_v34, %v13311_v0  ;;  %v16422_v6 = vrot.slane %v9808_v56, %v13311_v0  ;;  %v16428_v31 = vrot.slane %v9843_v57, %v13311_v0  ;;  %v11911_v12 = vcombine.low %v9642_v20, %v9649_v23 }
0x1bd5   :  { %v16431_v3 = vrot.slane %v9899_v15, %v13311_v0  ;;  %v11913_v28 = vcombine.low %v9665_v10, %v16388_v29  ;;  %v9865_v5 = vcombine.low %v9850_v49, %v9857_v14  ;;  %v9866_v43 = vcombine.high %v9850_v49, %v9857_v14 }
0x1bd6   :  { %v9839_v21 = vcombine.high %v16419_v22, %v16410_v37  ;;  %v16437_v7 = vrot.slane %v9900_v61, %v13311_v0  ;;  %v16441_v54 = vrot.slane %v16428_v31, %v13311_v0  ;;  %v11915_v38 = vcombine.low %v16391_v63, %v9723_v60 }
0x1bd7   :  { %v11917_v40 = vcombine.low %v9758_v4, %v9765_v44  ;;  %v10087_v48 = vrot.slane %v11911_v12, %v13311_v0  ;;  %v9874_v20 = vrot.slane %v9865_v5, %v13311_v0  ;;  %v9881_v23 = vrot.slane %v9866_v43, %v13311_v0 }
0x1bd8   :  { %v9923_v10 = vcombine.low %v16431_v3, %v16437_v7  ;;  %v10101_v16 = vrot.slane %v11913_v28, %v13311_v0  ;;  %v10115_v30 = vrot.slane %v11915_v38, %v13311_v0  ;;  %v11919_v8 = vcombine.low %v9781_v39, %v16419_v22 }
0x1bd9   :  { %v10129_v27 = vrot.slane %v11917_v40, %v13311_v0  ;;  %v11921_v62 = vcombine.low %v16422_v6, %v9839_v21  ;;  %v9897_v53 = vcombine.high %v9874_v20, %v16441_v54  ;;  %v11923_v45 = vcombine.low %v9874_v20, %v9881_v23 }
0x1bda   :  { %v16456_v50 = vrot.slane %v9923_v10, %v13311_v0  ;;  %v10138_v1 = vcombine.high %v10087_v48, %v10101_v16  ;;  %v10221_v4 = vrot.slane %v11919_v8, %v13311_v0  ;;  %v10137_v55 = vcombine.low %v10087_v48, %v10101_v16 }
0x1bdb   :  { %v10142_v60 = vcombine.high %v10115_v30, %v10129_v27  ;;  %v10235_v44 = vrot.slane %v11921_v62, %v13311_v0  ;;  %v10249_v42 = vrot.slane %v11923_v45, %v13311_v0  ;;  %v10141_v39 = vcombine.low %v10115_v30, %v10129_v27 }
0x1bdc   :  { %v16461_v34 = vrot.slane %v10138_v1, %v13311_v0  ;;  %v11925_v56 = vcombine.low %v9897_v53, %v16456_v50  ;;  %v16469_v15 = vrot.slane %v10137_v55, %v13311_v0  ;;  %v8695_v61 = vrot.slane %v16074_v2, %v13311_v0  ;;  %v17477_v55 = vld [vmem:[#allocation67_spill] sm:$0xff] }
0x1bdd   :  { %v16466_v57 = vrot.slane %v10142_v60, %v13311_v0  ;;  %v10272_v49 = vcombine.high %v10221_v4, %v10235_v44  ;;  %v10271_v14 = vcombine.low %v10221_v4, %v10235_v44  ;;  %v16475_v28 = vrot.slane %v10141_v39, %v13311_v0 }
0x1bde   :  { %v10263_v12 = vrot.slane %v11925_v56, %v13311_v0  ;;  %v17472_v21 = vcombine.high %v16068_v26, %v16068_v26  ;;  %v8703_v40 = vcombine.high %v16084_v24, %v16084_v24  ;;  %v8728_v2 = vrot.slane %v16087_v52, %v13311_v0 }
0x1bdf   :  { %v10204_v43 = vcombine.low %v16461_v34, %v16466_v57  ;;  %v16484_v38 = vrot.slane %v10272_v49, %v13311_v0  ;;  %v10201_v20 = vcombine.low %v16469_v15, %v16475_v28  ;;  %v16493_v26 = vrot.slane %v10271_v14, %v13311_v0  ;;  %v17479_v14 = vld [vmem:[#allocation37_spill] sm:$0xff] }
0x1be0   :  { %v8702_v5 = vrot.slane %v17472_v21, %v13311_v0  ;;  %v10276_v48 = vcombine.high %v10249_v42, %v10263_v12  ;;  %v10275_v23 = vcombine.low %v10249_v42, %v10263_v12  ;;  %v8735_v16 = vrot.slane %v16090_v11, %v13311_v0  ;;  %v17478_v42 = vld [vmem:[#allocation68_spill] sm:$0xff]  ;;  %v17480_v12 = vld [vmem:[#allocation62_spill] sm:$0xff] }
0x1be1   :  { %v17473_v30 = vcombine.high %v16087_v52, %v16087_v52  ;;  %v8743_v8 = vcombine.high %v8728_v2, %v8728_v2  ;;  %v17474_v1 = vrot.slane %v16063_v59, %v13311_v0  ;;  %v17475_v11 = vcombine.high %v15750_v51, %v15750_v51  ;;  %v16537_v51 = vpop.permute.xlu1 %1242 }
0x1be2   :  { %v8704_v10 = vcombine.high %v8702_v5, %v8702_v5  ;;  %v16502_v62 = vrot.slane %v10276_v48, %v13311_v0  ;;  %v16505_v53 = vrot.slane %v10275_v23, %v13311_v0  ;;  %v17476_v52 = vcombine.high %v15758_v36, %v15758_v36  ;;  %v17481_v48 = vld [vmem:[#allocation66_spill] sm:$0xff] }
0x1be3   :  { %v8742_v27 = vrot.slane %v17473_v30, %v13311_v0  ;;  %v8814_v45 = vmul.f32 %v17474_v1, %v15758_v36  ;;  %v8815_v60 = vmul.f32 %v16084_v24, %v17475_v11  ;;  %v8817_v56 = vmul.f32 %v8703_v40, %v17477_v55  ;;  %v17483_v40 = vld [vmem:[#allocation14_spill] sm:$0xff] }
0x1be4   :  { %v8816_v44 = vmul.f32 %v8702_v5, %v17476_v52  ;;  %v8818_v39 = vmul.f32 %v8704_v10, %v17478_v42  ;;  %v10338_v49 = vcombine.low %v16484_v38, %v16502_v62  ;;  %v10335_v59 = vcombine.low %v16493_v26, %v16505_v53  ;;  %v17482_v5 = vld [vmem:[#allocation69_spill] sm:$0xff]  ;;  %v12576_v11 = vld [vmem:[%s17011_s15 + $0x80] sm:$0xff]  }
0x1be5   :  { %v8744_v4 = vcombine.high %v8742_v27, %v8742_v27  ;;  %v8819_v24 = vmul.f32 %v8695_v61, %v17479_v14  ;;  %v8820_v21 = vmul.f32 %v8728_v2, %v17480_v12  ;;  %v8821_v36 = vmul.f32 %v8742_v27, %v17481_v48  ;;  %v17484_v52 = vld [vmem:[#allocation61_spill] sm:$0xff]  ;;  %v12577_v61 = vld [vmem:[%s17011_s15 + $0xc8] sm:$0xff]  }
0x1be6   :  { %v16530_v23 = vmul.f32 %v8743_v8, %v17482_v5  ;;  %v10494_v30 = vpack.c.bf16 %v10338_v49, %v10204_v43  ;;  %v10493_v1 = vpack.c.bf16 %v10335_v59, %v10201_v20  ;;  %v8824_v55 = vmul.f32 %v8735_v16, %v17484_v52 }
0x1be7   :  { %v8823_v10 = vmul.f32 %v8744_v4, %v17483_v40  ;;  %v9035_v42 = vcombine.low %v8815_v60, %v8816_v44  ;;  %v9049_v2 = vrot.slane %v8817_v56, %v13311_v0  ;;  %v9066_v27 = vcombine.low %v8820_v21, %v8821_v36  ;;  %v12579_v40 = vld [vmem:[%s17011_s15 + $0xd0] sm:$0xff]  }
0x1be8   :  { %v9080_v43 = vrot.slane %v16530_v23, %v13311_v0  ;;  %v9291_v20 = vcombine.low %v8816_v44, %v8817_v56  ;;  %10921 = vmatprep.mubr.bf16.mxu0 %v10494_v30  ;;  %v9305_v4 = vrot.slane %v8818_v39, %v13311_v0  ;;  %v9322_v16 = vcombine.low %v8821_v36, %v16530_v23  ;;  %v12578_v44 = vld [vmem:[%s17011_s15 + $0x88] sm:$0xff]  }
0x1be9   :  { %v9042_v8 = vrot.slane %v9035_v42, %v13311_v0  ;;  %v9336_v60 = vrot.slane %v8823_v10, %v13311_v0  ;;  %10922 = vmatmul.mubr.bf16.vlgmr.msra.gmra.mrb[32].mxu0 %v10493_v1  ;;  %v9073_v49 = vrot.slane %v9066_v27, %v13311_v0  ;;  %v9516_v14 = vcombine.low %v16183_v58, %v16186_v32  ;;  %v16563_v27 = vpop.permute.xlu1 %1254 }
0x1bea   :  { %v9298_v59 = vrot.slane %v9291_v20, %v13311_v0  ;;  %v9530_v12 = vrot.slane %v8814_v45, %v13311_v0  ;;  %12083 = vmatpush3.bf16.msra.mxu0 %v12576_v11  ;;  %v9329_v36 = vrot.slane %v9322_v16, %v13311_v0  ;;  %v9547_v5 = vcombine.low %v8817_v56, %v8818_v39 }
0x1beb   :  { %v9050_v21 = vcombine.low %v9042_v8, %v9049_v2  ;;  %v9051_v48 = vcombine.high %v9042_v8, %v9049_v2  ;;  %12084 = vmatprep.subr.bf16.mxu0 %v12577_v61  ;;  %v9081_v30 = vcombine.low %v9073_v49, %v9080_v43  ;;  %v9082_v1 = vcombine.high %v9073_v49, %v9080_v43  ;;  %v12580_v43 = vld [vmem:[%s17011_s15 + $0x90] sm:$0xff]  }
0x1bec   :  { %v9306_v58 = vcombine.low %v9298_v59, %v9305_v4  ;;  %v9307_v32 = vcombine.high %v9298_v59, %v9305_v4  ;;  %v9337_v52 = vcombine.low %v9329_v36, %v9336_v60  ;;  %v9338_v42 = vcombine.high %v9329_v36, %v9336_v60  ;;  %v12581_v60 = vld [vmem:[%s17011_s15 + $0xd8] sm:$0xff]  }
0x1bed   :  { %v9058_v45 = vrot.slane %v9050_v21, %v13311_v0  ;;  %v9065_v11 = vrot.slane %v9051_v48, %v13311_v0  ;;  %v10202_v56 = vcombine.high %v16469_v15, %v16475_v28  ;;  %v9089_v39 = vrot.slane %v9081_v30, %v13311_v0  ;;  %v12588_v15 = vld [vmem:[%s17011_s15 + $0xb0] sm:$0xff]  }
0x1bee   :  { %v9314_v61 = vrot.slane %v9306_v58, %v13311_v0  ;;  %v9321_v2 = vrot.slane %v9307_v32, %v13311_v0  ;;  %12085 = vmatpush3.bf16.msra.mxu0 %v12578_v44  ;;  %v9096_v20 = vrot.slane %v9082_v1, %v13311_v0  ;;  %v9345_v8 = vrot.slane %v9337_v52, %v13311_v0  ;;  %v1261_v32 = vpop.permute.xlu1 %1260  ;;  %v17486_v28 = vld [vmem:[#allocation8_spill] sm:$0xff] }
0x1bef   :  { %v9523_v4 = vrot.slane %v9516_v14, %v13311_v0  ;;  %v9554_v16 = vrot.slane %v9547_v5, %v13311_v0  ;;  %12086 = vmatprep.subr.bf16.mxu0 %v12579_v40  ;;  %v9352_v49 = vrot.slane %v9338_v42, %v13311_v0  ;;  %v9561_v59 = vrot.slane %v8819_v24, %v13311_v0  ;;  %v12582_v24 = vld [vmem:[%s17011_s15 + $0x98] sm:$0xff]  }
0x1bf0   :  { %v9578_v44 = vcombine.low %v16530_v23, %v8823_v10  ;;  %v9592_v21 = vrot.slane %v8824_v55, %v13311_v0  ;;  %v9957_v30 = vcombine.low %v9058_v45, %v9065_v11  ;;  %v9958_v1 = vcombine.low %v9314_v61, %v9321_v2  ;;  %v12583_v45 = vld [vmem:[%s17011_s15 + $0xe0] sm:$0xff]  }
0x1bf1   :  { %v9531_v48 = vcombine.low %v9523_v4, %v9530_v12  ;;  %v9532_v36 = vcombine.high %v9523_v4, %v9530_v12  ;;  %v9562_v14 = vcombine.low %v9554_v16, %v9561_v59  ;;  %v9563_v58 = vcombine.high %v9554_v16, %v9561_v59 }
0x1bf2   :  { %v9585_v5 = vrot.slane %v9578_v44, %v13311_v0  ;;  %v9924_v40 = vcombine.high %v16431_v3, %v16437_v7  ;;  %12087 = vmatpush3.bf16.msra.mxu0 %v12580_v43  ;;  %v9966_v55 = vrot.slane %v9957_v30, %v13311_v0  ;;  %v9973_v12 = vrot.slane %v9958_v1, %v13311_v0  ;;  %v1249_v44 = vpop.permute.xlu0 %1248 }
0x1bf3   :  { %v9539_v23 = vrot.slane %v9531_v48, %v13311_v0  ;;  %v9546_v10 = vrot.slane %v9532_v36, %v13311_v0  ;;  %12088 = vmatprep.subr.bf16.mxu0 %v12581_v60  ;;  %v9570_v3 = vrot.slane %v9562_v14, %v13311_v0  ;;  %v9577_v7 = vrot.slane %v9563_v58, %v13311_v0  ;;  %v12584_v48 = vld [vmem:[%s17011_s15 + $0xa0] sm:$0xff]  }
0x1bf4   :  { %v9593_v11 = vcombine.low %v9585_v5, %v9592_v21  ;;  %v9594_v52 = vcombine.high %v9585_v5, %v9592_v21  ;;  %v9981_v61 = vcombine.low %v9966_v55, %v9973_v12  ;;  %v9982_v2 = vcombine.high %v9966_v55, %v9973_v12 }
0x1bf5   :  { %v9901_v42 = vcombine.low %v9539_v23, %v9546_v10  ;;  %v10015_v43 = vcombine.low %v9089_v39, %v9096_v20  ;;  %v9959_v59 = vcombine.low %v9570_v3, %v9577_v7  ;;  %v10016_v60 = vcombine.low %v9345_v8, %v9352_v49  ;;  %v12585_v20 = vld [vmem:[%s17011_s15 + $0xe8] sm:$0xff]   ;;  %v1273_v10 = vpop.permute.xlu1 %1272 }
0x1bf6   :  { %v9601_v4 = vrot.slane %v9593_v11, %v13311_v0  ;;  %v9608_v16 = vrot.slane %v9594_v52, %v13311_v0  ;;  %12089 = vmatpush3.bf16.msra.mxu0 %v12582_v24  ;;  %v9990_v21 = vrot.slane %v9981_v61, %v13311_v0  ;;  %v9997_v30 = vrot.slane %v9982_v2, %v13311_v0  ;;  %v12586_v3 = vld [vmem:[%s17011_s15 + $0xa8] sm:$0xff]   ;;  %v1267_v2 = vpop.permute.xlu0 %1266 }
0x1bf7   :  { %v16605_v36 = vrot.slane %v9901_v42, %v13311_v0  ;;  %v10024_v39 = vrot.slane %v10015_v43, %v13311_v0  ;;  %12090 = vmatprep.subr.bf16.mxu0 %v12583_v45  ;;  %v16614_v8 = vrot.slane %v9924_v40, %v13311_v0  ;;  %v16617_v49 = vrot.slane %v9959_v59, %v13311_v0 }
0x1bf8   :  { %v10017_v1 = vcombine.low %v9601_v4, %v9608_v16  ;;  %v10031_v14 = vrot.slane %v10016_v60, %v13311_v0  ;;  %v11929_v5 = vcombine.low %v9990_v21, %v9997_v30  ;;  %v1245_v24 = vmul.f32 %v16537_v51, %v17442_v47 }
0x1bf9   :  { %v16622_v58 = vrot.slane %v16605_v36, %v13311_v0  ;;  %v10205_v23 = vcombine.high %v16461_v34, %v16466_v57  ;;  %v16630_v40 = vrot.slane %v16617_v49, %v13311_v0  ;;  %v1251_v34 = vmul.f32 %v1249_v44, %v17443_v18  ;;  %v1279_v30 = vpop.permute.xlu1 %1278 }
0x1bfa   :  { %v16633_v55 = vrot.slane %v10017_v1, %v13311_v0  ;;  %v10039_v12 = vcombine.low %v10024_v39, %v10031_v14  ;;  %v10040_v45 = vcombine.high %v10024_v39, %v10031_v14  ;;  %12091 = vmatpush3.bf16.msra.mxu0 %v12584_v48  ;;  %v1246_v57 = vadd.f32 %v1245_v24, %v15983_v19  ;;  %v12587_v19 = vld [vmem:[%s17011_s15 + $0xf0] sm:$0xff]   ;;  %v17488_v14 = vld [vmem:[#allocation9_spill] sm:$0xff] }
0x1bfb   :  { %v9955_v51 = vcombine.high %v16456_v50, %v16622_v58  ;;  %v10339_v7 = vcombine.high %v16484_v38, %v16502_v62  ;;  %12092 = vmatprep.subr.bf16.mxu0 %v12585_v20  ;;  %v10013_v11 = vcombine.high %v9990_v21, %v16630_v40  ;;  %v10369_v62 = vrot.slane %v11929_v5, %v13311_v0 }
0x1bfc   :  { %v16646_v52 = vrot.slane %v10039_v12, %v13311_v0  ;;  %v16649_v42 = vrot.slane %v10040_v45, %v13311_v0  ;;  %v16653_v61 = vrot.slane %v16633_v55, %v13311_v0  ;;  %v17485_v4 = vcombine.high %v16493_v26, %v16505_v53  ;;  %v17487_v53 = vld [vmem:[#allocation7_spill] sm:$0xff] }
0x1bfd   :  { %v11927_v38 = vcombine.low %v16614_v8, %v9955_v51  ;;  %v16660_v43 = vpack.c.bf16 %v10339_v7, %v10205_v23  ;;  %v1252_v44 = vadd.f32 %v1251_v34, %v1246_v57  ;;  %v1257_v48 = vmul.f32 %v16563_v27, %v17444_v9  ;;  %v12589_v27 = vld [vmem:[%s17011_s15 + $0xf8] sm:$0xff]   ;;  %v17489_v51 = vld [vmem:[#allocation10_spill] sm:$0xff] }
0x1bfe   :  { %v16668_v16 = vpack.c.bf16 %v17485_v4, %v10202_v56  ;;  %v10071_v59 = vcombine.high %v16646_v52, %v16653_v61  ;;  %v11931_v60 = vcombine.low %v10013_v11, %v16646_v52  ;;  %12093 = vmatpush3.bf16.msra.mxu0 %v12586_v3  ;;  %v1269_v26 = vmul.f32 %v1267_v2, %v17486_v28 }
0x1bff   :  { %v10355_v21 = vrot.slane %v11927_v38, %v13311_v0  ;;  %v1263_v56 = vmul.f32 %v1261_v32, %v17487_v53  ;;  %12094 = vmatprep.subr.bf16.mxu0 %v12587_v19  ;;  %v1258_v1 = vadd.f32 %v1257_v48, %v1252_v44  ;;  %v1275_v5 = vmul.f32 %v1273_v10, %v17488_v14  ;;  %v12590_v10 = vld [vmem:[%s17011_s15 + $0xb8] sm:$0xff]  }
0x1c00   :  { %v11933_v39 = vcombine.low %v16649_v42, %v10071_v59  ;;  %v10383_v20 = vrot.slane %v11931_v60, %v13311_v0  ;;  %v9635_v12 = vcombine.high %v16350_v33, %v16350_v33  ;;  %v9693_v32 = vcombine.high %v16372_v35, %v16372_v35 }
0x1c01   :  { %v10406_v24 = vcombine.high %v10355_v21, %v10369_v62  ;;  %v10405_v23 = vcombine.low %v10355_v21, %v10369_v62  ;;  %v1264_v3 = vadd.f32 %v1263_v56, %v1258_v1  ;;  %v1281_v34 = vmul.f32 %v1279_v30, %v17489_v51  ;;  %v1285_v62 = vpop.permute.xlu0 %1284  ;;  %v17490_v56 = vld [vmem:[#allocation11_spill] sm:$0xff] }
0x1c02   :  { %v10397_v45 = vrot.slane %v11933_v39, %v13311_v0  ;;  %v9751_v57 = vcombine.high %v16383_v25, %v16383_v25  ;;  %12095 = vmatpush3.bf16.msra.mxu0 %v12588_v15  ;;  %v9663_v33 = vrot.slane %v9635_v12, %v13311_v0  ;;  %v9721_v11 = vrot.slane %v9693_v32, %v13311_v0  ;;  %v12591_v25 = vld [vmem:[%s17011_s15 + $0x140] sm:$0xff]  }
0x1c03   :  { %v10433_v7 = vrot.slane %v10406_v24, %v13311_v0  ;;  %v9722_v35 = vcombine.low %v16388_v29, %v16380_v41  ;;  %v16704_v38 = vrot.slane %v10405_v23, %v13311_v0  ;;  %12096 = vmatprep.subr.bf16.mxu0 %v12589_v27  ;;  %v1270_v4 = vadd.f32 %v1269_v26, %v1264_v3 }
0x1c04   :  { %v10410_v19 = vcombine.high %v10383_v20, %v10397_v45  ;;  %v10409_v2 = vcombine.low %v10383_v20, %v10397_v45  ;;  %v9724_v59 = vcombine.low %v16391_v63, %v9721_v11  ;;  %v9779_v60 = vrot.slane %v9751_v57, %v13311_v0 }
0x1c05   :  { %v9809_v44 = vcombine.high %v16400_v17, %v16400_v17  ;;  %v9867_v29 = vcombine.high %v16428_v31, %v16428_v31  ;;  %v1276_v15 = vadd.f32 %v1275_v5, %v1270_v4  ;;  %v1287_v30 = vmul.f32 %v1285_v62, %v17490_v56 }
0x1c06   :  { %v10461_v48 = vrot.slane %v10410_v19, %v13311_v0  ;;  %v10447_v21 = vrot.slane %v10409_v2, %v13311_v0  ;;  %12097 = vmatpush3.bf16.msra.mxu0 %v12590_v10  ;;  %v11912_v63 = vcombine.low %v16362_v46, %v9663_v33  ;;  %v11914_v39 = vcombine.high %v16362_v46, %v9722_v35 }
0x1c07   :  { %v9837_v26 = vrot.slane %v9809_v44, %v13311_v0  ;;  %12110 = vmatprep.subr.bf16.mxu0 %v12591_v25  ;;  %v1282_v27 = vadd.f32 %v1281_v34, %v1276_v15  ;;  %v9838_v31 = vcombine.low %v16419_v22, %v16410_v37  ;;  %v9895_v5 = vrot.slane %v9867_v29, %v13311_v0  ;;  %v12592_v29 = vld [vmem:[%s17011_s15 + $0x100] sm:$0xff]  }
0x1c08   :  { %v10472_v20 = vcombine.low %v10433_v7, %v10461_v48  ;;  %v10469_v17 = vcombine.low %v16704_v38, %v10447_v21  ;;  %v11916_v24 = vcombine.high %v9724_v59, %v16380_v41  ;;  %v11918_v23 = vcombine.low %v16395_v13, %v9779_v60 }
0x1c09   :  { %v9840_v1 = vcombine.low %v16422_v6, %v9837_v26  ;;  %v16728_v45 = vadd.f32 %v1287_v30, %v1282_v27  ;;  %v9954_v46 = vcombine.low %v16456_v50, %v16622_v58  ;;  %v10094_v3 = vrot.slane %v11912_v63, %v13311_v0  ;;  %v12593_v26 = vld [vmem:[%s17011_s15 + $0x148] sm:$0xff]  }
0x1c0a   :  { %v10500_v12 = vpack.c.bf16 %v10472_v20, %v10472_v20  ;;  %v10499_v32 = vpack.c.bf16 %v10469_v17, %v10469_v17  ;;  %v10108_v34 = vrot.slane %v11914_v39, %v13311_v0  ;;  %v10122_v22 = vrot.slane %v11916_v24, %v13311_v0 }
0x1c0b   :  { %12731 = vtanh.f32 %v16728_v45  ;;  %v10136_v41 = vrot.slane %v11918_v23, %v13311_v0  ;;  %v11920_v6 = vcombine.high %v16395_v13, %v9838_v31  ;;  %v11922_v33 = vcombine.high %v9840_v1, %v16410_v37 }
0x1c0c   :  { %10929 = vmatprep.mubr.bf16.mxu0 %v10500_v12  ;;  %v10139_v57 = vcombine.low %v10094_v3, %v10108_v34  ;;  %v10140_v10 = vcombine.high %v10094_v3, %v10108_v34  ;;  %v11924_v50 = vcombine.low %v16441_v54, %v9895_v5  ;;  %v10473_v11 = vcombine.high %v10433_v7, %v10461_v48  ;;  %v12594_v12 = vld [vmem:[%s17011_s15 + $0x108] sm:$0xff]   ;;  %v12596_v34 = vld [vmem:[%s17011_s15 + $0x110] sm:$0xff]  }
0x1c0d   :  { %10930 = vmatmul.mubr.bf16.gmra.mrb[36].mxu0 %v10499_v32  ;;  %v10143_v35 = vcombine.low %v10122_v22, %v10136_v41  ;;  %v10144_v19 = vcombine.high %v10122_v22, %v10136_v41  ;;  %v11926_v2 = vcombine.high %v16441_v54, %v9954_v46  ;;  %v10228_v62 = vrot.slane %v11920_v6, %v13311_v0 }
0x1c0e   :  { %10969 = vmatprep.mubr.bf16.mxu0 %v16660_v43  ;;  %v10172_v25 = vrot.slane %v10140_v10, %v13311_v0  ;;  %v10242_v13 = vrot.slane %v11922_v33, %v13311_v0  ;;  %v10256_v4 = vrot.slane %v11924_v50, %v13311_v0  ;;  %v10158_v60 = vrot.slane %v10139_v57, %v13311_v0  ;;  %v12597_v57 = vld [vmem:[%s17011_s15 + $0x158] sm:$0xff]   ;;  %v12599_v50 = vld [vmem:[%s17011_s15 + $0x160] sm:$0xff]  }
0x1c0f   :  { %v10200_v59 = vrot.slane %v10144_v19, %v13311_v0  ;;  %v10270_v37 = vrot.slane %v11926_v2, %v13311_v0  ;;  %v10186_v43 = vrot.slane %v10143_v35, %v13311_v0  ;;  %v9925_v54 = vcombine.high %v16605_v36, %v16605_v36  ;;  %v12598_v33 = vld [vmem:[%s17011_s15 + $0x118] sm:$0xff]   ;;  %v12602_v2 = vld [vmem:[%s17011_s15 + $0x128] sm:$0xff]  }
0x1c10   :  { %v10273_v7 = vcombine.low %v10228_v62, %v10242_v13  ;;  %v10274_v44 = vcombine.high %v10228_v62, %v10242_v13  ;;  %v10502_v48 = vpack.c.bf16 %v10473_v11, %v10473_v11  ;;  %v10041_v31 = vcombine.high %v16633_v55, %v16633_v55  ;;  %v12600_v11 = vld [vmem:[%s17011_s15 + $0x120] sm:$0xff]   ;;  %v12603_v13 = vld [vmem:[%s17011_s15 + $0x170] sm:$0xff]  }
0x1c11   :  { %v10277_v15 = vcombine.low %v10256_v4, %v10270_v37  ;;  %v10278_v30 = vcombine.high %v10256_v4, %v10270_v37  ;;  %v10206_v63 = vcombine.low %v10172_v25, %v10200_v59  ;;  %v10203_v27 = vcombine.low %v10158_v60, %v10186_v43  ;;  %v12604_v4 = vld [vmem:[%s17011_s15 + $0x130] sm:$0xff]   ;;  %v12605_v60 = vld [vmem:[%s17011_s15 + $0x178] sm:$0xff]  }
0x1c12   :  { %v10306_v39 = vrot.slane %v10274_v44, %v13311_v0  ;;  %v10292_v20 = vrot.slane %v10273_v7, %v13311_v0  ;;  %v10470_v1 = vcombine.high %v16704_v38, %v10447_v21  ;;  %v9953_v5 = vrot.slane %v9925_v54, %v13311_v0  ;;  %v12606_v44 = vld [vmem:[%s17011_s15 + $0x138] sm:$0xff]  }
0x1c13   :  { %v10334_v17 = vrot.slane %v10278_v30, %v13311_v0  ;;  %v10320_v36 = vrot.slane %v10277_v15, %v13311_v0  ;;  %v9983_v24 = vcombine.high %v16617_v49, %v16617_v49  ;;  %v10069_v55 = vrot.slane %v10041_v31, %v13311_v0 }
0x1c14   :  { %v10501_v21 = vpack.c.bf16 %v10470_v1, %v10470_v1  ;;  %v9956_v22 = vcombine.low %v16614_v8, %v9953_v5  ;;  %v10070_v41 = vcombine.low %v16646_v52, %v16653_v61  ;;  %v17491_v30 = vmov 0.0   ;;  %v12607_v1 = vld [vmem:[%s17012_s19] sm:$0xff]  }
0x1c15   :  { %10970 = vmatmul.mubr.bf16.vlgmr.msra.gmra.mrb[40].mxu0 %v16668_v16  ;;  %v12732_v23 = vpop.eup %12731  ;;  %v10340_v32 = vcombine.low %v10306_v39, %v10334_v17  ;;  %v10337_v46 = vcombine.low %v10292_v20, %v10320_v36  ;;  %v12595_v16 = vld [vmem:[%s17011_s15 + $0x150] sm:$0xff]   ;;  %v10011_v3 = vrot.slane %v9983_v24, %v13311_v0  ;;  %v10072_v6 = vcombine.low %v16649_v42, %v10069_v55 }
0x1c16   :  { %12111 = vmatpush3.bf16.msra.mxu0 %v12592_v29  ;;  %10977 = vmatprep.mubr.bf16.mxu0 %v10502_v48  ;;  %v11928_v8 = vcombine.high %v9956_v22, %v16622_v58  ;;  %v11932_v52 = vcombine.high %v16630_v40, %v10070_v41  ;;  %v11696_v39 = vmul.f32 -1.442695, %v16728_v45  ;;  %v12608_v45 = vld [vmem:[%s17012_s19 + $0x8] sm:$0xff]  }
0x1c17   :  { %12112 = vmatprep.subr.bf16.mxu0 %v12593_v26  ;;  %1298 = vrot.lane.b32.xlu1 %v12732_v23, %s12759_s24  ;;  %v10498_v38 = vpack.c.bf16 %v10340_v32, %v10206_v63  ;;  %v10497_v49 = vpack.c.bf16 %v10337_v46, %v10203_v27  ;;  %v11930_v10 = vcombine.low %v16630_v40, %v10011_v3  ;;  %v12609_v46 = vld [vmem:[%s17012_s19 + $0x10] sm:$0xff]   ;;  %v12614_v3 = vld [vmem:[%s17012_s19 + $0x38] sm:$0xff]  }
0x1c18   :  { %v11934_v42 = vcombine.high %v10072_v6, %v16653_v61  ;;  %v10362_v35 = vrot.slane %v11928_v8, %v13311_v0  ;;  %v10390_v58 = vrot.slane %v11932_v52, %v13311_v0  ;;  %v12601_v61 = vld [vmem:[%s17011_s15 + $0x168] sm:$0xff]   ;;  %12733 = vpow2.f32 %v11696_v39  ;;  %12226 = vmatpush3.bf16.msra.mxu1 %v12607_v1 }
0x1c19   :  { %v10376_v19 = vrot.slane %v11930_v10, %v13311_v0  ;;  %12227 = vmatprep.subr.bf16.mxu1 %v17491_v30 }
0x1c1a   :  { %12113 = vmatpush3.bf16.msra.mxu0 %v12594_v12  ;;  %v10404_v40 = vrot.slane %v11934_v42, %v13311_v0 }
0x1c1b   :  { %12114 = vmatprep.subr.bf16.mxu0 %v12595_v16  ;;  %v10408_v25 = vcombine.high %v10362_v35, %v10376_v19  ;;  %v10407_v43 = vcombine.low %v10362_v35, %v10376_v19  ;;  %v12610_v16 = vld [vmem:[%s17012_s19 + $0x18] sm:$0xff]  }
0x1c1c   :  { %v10412_v62 = vcombine.high %v10390_v58, %v10404_v40  ;;  %v10411_v7 = vcombine.low %v10390_v58, %v10404_v40  ;;  %12228 = vmatpush3.bf16.msra.mxu1 %v12608_v45 }
0x1c1d   :  { %10978 = vmatmul.mubr.bf16.gmra.mrb[44].mxu0 %v10501_v21  ;;  %v10440_v59 = vrot.slane %v10408_v25, %v13311_v0  ;;  %v10426_v29 = vrot.slane %v10407_v43, %v13311_v0  ;;  %12229 = vmatprep.subr.bf16.mxu1 %v17491_v30  ;;  %v12613_v21 = vld [vmem:[%s17012_s19 + $0x30] sm:$0xff]  }
0x1c1e   :  { %12115 = vmatpush3.bf16.msra.mxu0 %v12596_v34  ;;  %11017 = vmatprep.mubr.bf16.mxu0 %v10498_v38  ;;  %v10468_v37 = vrot.slane %v10412_v62, %v13311_v0  ;;  %v10454_v48 = vrot.slane %v10411_v7, %v13311_v0  ;;  %v12611_v38 = vld [vmem:[%s17012_s19 + $0x20] sm:$0xff]   ;;  %v17492_v62 = vld [vmem:[#allocation63_spill] sm:$0xff] }
0x1c1f   :  { %12116 = vmatprep.subr.bf16.mxu0 %v12597_v57 }
0x1c20   :  { %v10474_v54 = vcombine.low %v10440_v59, %v10468_v37  ;;  %v10471_v26 = vcombine.low %v10426_v29, %v10454_v48  ;;  %12230 = vmatpush3.bf16.msra.mxu1 %v12609_v46 }
0x1c21   :  { %12231 = vmatprep.subr.bf16.mxu1 %v17491_v30 }
0x1c22   :  { %12117 = vmatpush3.bf16.msra.mxu0 %v12598_v33  ;;  %v10504_v15 = vpack.c.bf16 %v10474_v54, %v10474_v54  ;;  %v10503_v63 = vpack.c.bf16 %v10471_v26, %v10471_v26  ;;  %v12734_v20 = vpop.eup %12733  ;;  %v11983_v54 = vld [vmem:[%s17013_s16] ss:$0 sm:$0xff] }
0x1c23   :  { %12118 = vmatprep.subr.bf16.mxu0 %v12599_v50  ;;  %v1292_v17 = vadd.f32 1.0, %v12734_v20 }
0x1c24   :  { %12232 = vmatpush3.bf16.msra.mxu1 %v12610_v16 }
0x1c25   :  { %12735 = vrcp.f32 %v1292_v17  ;;  %12233 = vmatprep.subr.bf16.mxu1 %v17491_v30 }
0x1c26   :  { %12119 = vmatpush3.bf16.msra.mxu0 %v12600_v11 }
0x1c27   :  { %12120 = vmatprep.subr.bf16.mxu0 %v12601_v61 }
0x1c28   :  { %12234 = vmatpush3.bf16.msra.mxu1 %v12611_v38 }
0x1c29   :  { %12235 = vmatprep.subr.bf16.mxu1 %v17491_v30 }
0x1c2a   :  { %12121 = vmatpush3.bf16.msra.mxu0 %v12602_v2 }
0x1c2b   :  { %12122 = vmatprep.subr.bf16.mxu0 %v12603_v13 }
0x1c2e   :  { %12123 = vmatpush3.bf16.msra.mxu0 %v12604_v4 }
0x1c2f   :  { %12124 = vmatprep.subr.bf16.mxu0 %v12605_v60  ;;  %v16831_v27 = vpop.eup %12735 }
0x1c30   :  { %v1296_v13 = vmul.f32 %v16831_v27, %v17492_v62 }
0x1c32   :  { %12125 = vmatpush3.bf16.msra.mxu0 %v12606_v44 }
0x1c33   :  { %12245 = vmatprep.subr.bf16.mxu0 %v17491_v30 }
0x1c35   :  { %11018 = vmatmul.mubr.bf16.vlgmr.msra.gmra.mrb[48].mxu0 %v10497_v49  ;;  %v12612_v49 = vld [vmem:[%s17012_s19 + $0x28] sm:$0xff]  }
0x1c36   :  { %11025 = vmatprep.mubr.bf16.mxu0 %v10504_v15  ;;  %12236 = vmatpush3.bf16.msra.mxu1 %v12612_v49 }
0x1c37   :  { %12237 = vmatprep.subr.bf16.mxu1 %v17491_v30 }
0x1c3a   :  { %12238 = vmatpush3.bf16.msra.mxu1 %v12613_v21 }
0x1c3b   :  { %12239 = vmatprep.subr.bf16.mxu1 %v17491_v30 }
0x1c3d   :  { %11026 = vmatmul.mubr.bf16.gmra.mrb[52].mxu0 %v10503_v63 }
0x1c3e   :  { %12247 = vmatprep.mubr.msk.bf16.mxu0 %vm12770_vm2, %v17491_v30  ;;  %12240 = vmatpush3.bf16.msra.mxu1 %v12614_v3  ;;  %v11984_v30 = vld [vmem:[%s17014_s17] ss:$0 sm:$0xff] }
0x1c89   :  { %v1299_v36 = vpop.permute.xlu1 %1298 }
0x1c8a   :  { %v1301_v31 = vmul.f32 %v16831_v27, %v1299_v36 }
0x1c8c   :  { %1303 = vrot.lane.b32.xlu1 %v1301_v31, %s12760_s3 }
0x1cbc   :  { %v12070_v5 = vpop.f32.mrb[32].mxu0 }
0x1cbd   :  { %v12071_v24 = vpop.f32.mrb[33].mxu0 }
0x1cbe   :  { %v12072_v23 = vadd.f32 %v12071_v24, %v12070_v5  ;;  %v12073_v12 = vpop.f32.mrb[34].mxu0 }
0x1cbf   :  { %v12074_v32 = vpop.f32.mrb[35].mxu0 }
0x1cc0   :  { %v12075_v55 = vadd.f32 %v12074_v32, %v12073_v12 }
0x1ce0   :  { %v12076_v34 = vpop.f32.mrb[36].mxu0 }
0x1ce1   :  { %v12077_v22 = vpop.f32.mrb[37].mxu0 }
0x1ce2   :  { %v12078_v41 = vadd.f32 %v12077_v22, %v12076_v34  ;;  %v12079_v6 = vpop.f32.mrb[38].mxu0 }
0x1ce3   :  { %v12080_v57 = vpop.f32.mrb[39].mxu0 }
0x1ce8   :  { %v12098_v10 = vpop.f32.mrb[40].mxu0 }
0x1ce9   :  { %v12099_v33 = vpop.f32.mrb[41].mxu0 }
0x1cea   :  { %v12100_v8 = vadd.f32 %v12099_v33, %v12098_v10  ;;  %v12101_v52 = vpop.f32.mrb[42].mxu0 }
0x1ceb   :  { %v12102_v42 = vpop.f32.mrb[43].mxu0 }
0x1cec   :  { %v10972_v50 = vadd.f32 %v12100_v8, %v12072_v23  ;;  %v12103_v11 = vadd.f32 %v12102_v42, %v12101_v52 }
0x1cee   :  { %v10975_v35 = vadd.f32 %v12103_v11, %v12075_v55 }
0x1cf0   :  { %v12104_v19 = vpop.f32.mrb[44].mxu0 }
0x1cf1   :  { %v12105_v58 = vpop.f32.mrb[45].mxu0 }
0x1cf2   :  { %v12106_v40 = vadd.f32 %v12105_v58, %v12104_v19  ;;  %v12107_v61 = vpop.f32.mrb[46].mxu0 }
0x1cf3   :  { %v12108_v2 = vpop.f32.mrb[47].mxu0 }
0x1cf4   :  { %v10980_v25 = vadd.f32 %v12106_v40, %v12078_v41 }
0x1cfe   :  { %v1304_v4 = vpop.permute.xlu1 %1303 }
0x1cff   :  { %v16868_v59 = vadd.f32 %v1304_v4, %v1296_v13 }
0x1d01   :  { %12737 = vtanh.f32 %v16868_v59 }
0x1d08   :  { %v12126_v37 = vpop.f32.mrb[48].mxu0 }
0x1d09   :  { %v12127_v60 = vpop.f32.mrb[49].mxu0 }
0x1d0a   :  { %v12128_v43 = vadd.f32 %v12127_v60, %v12126_v37  ;;  %v12129_v7 = vpop.f32.mrb[50].mxu0 }
0x1d0b   :  { %v12738_v44 = vpop.eup %12737  ;;  %v12130_v29 = vpop.f32.mrb[51].mxu0 }
0x1d0c   :  { %v11020_v48 = vadd.f32 %v12128_v43, %v10972_v50  ;;  %v12131_v15 = vadd.f32 %v12130_v29, %v12129_v7  ;;  %1309 = vrot.lane.b32.xlu0 %v12738_v44, %s12760_s3 }
0x1d0e   :  { %v11040_v26 = vmul.f32 %v11983_v54, %v11020_v48  ;;  %v11023_v63 = vadd.f32 %v12131_v15, %v10975_v35 }
0x1d10   :  { %v11050_v39 = vadd.f32 %v11984_v30, %v11040_v26  ;;  %v11041_v20 = vmul.f32 %v11983_v54, %v11023_v63  ;;  %v12132_v17 = vpop.f32.mrb[52].mxu0 }
0x1d11   :  { %v12133_v36 = vpop.f32.mrb[53].mxu0 }
0x1d12   :  { %v11053_v31 = vmax.f32 %v11050_v39, 0.0  ;;  %v11051_v1 = vadd.f32 %v11984_v30, %v11041_v20  ;;  %v12134_v45 = vadd.f32 %v12133_v36, %v12132_v17  ;;  %v12135_v5 = vpop.f32.mrb[54].mxu0 }
0x1d13   :  { %v12136_v24 = vpop.f32.mrb[55].mxu0 }
0x1d14   :  { %v11059_v23 = vcombine.high %v11053_v31, %v11053_v31  ;;  %v11066_v12 = vrot.slane %v11053_v31, %v13311_v0  ;;  %v11054_v32 = vmax.f32 %v11051_v1, 0.0  ;;  %v11028_v46 = vadd.f32 %v12134_v45, %v10980_v25 }
0x1d16   :  { %v11073_v55 = vrot.slane %v11059_v23, %v13311_v0  ;;  %v11074_v16 = vcombine.high %v11066_v12, %v11066_v12  ;;  %v11082_v38 = vrot.slane %v11066_v12, %v13311_v0  ;;  %v11108_v49 = vcombine.high %v11054_v32, %v11054_v32 }
0x1d17   :  { %v11115_v21 = vrot.slane %v11054_v32, %v13311_v0  ;;  %v11042_v3 = vmul.f32 %v11983_v54, %v11028_v46 }
0x1d18   :  { %v11075_v34 = vcombine.high %v11073_v55, %v11073_v55  ;;  %v11089_v22 = vrot.slane %v11073_v55, %v13311_v0  ;;  %v11096_v41 = vrot.slane %v11074_v16, %v13311_v0  ;;  %v11104_v6 = vcombine.high %v11082_v38, %v11082_v38 }
0x1d19   :  { %v11122_v57 = vrot.slane %v11108_v49, %v13311_v0  ;;  %v11123_v10 = vcombine.high %v11115_v21, %v11115_v21  ;;  %v11131_v33 = vrot.slane %v11115_v21, %v13311_v0  ;;  %v11052_v8 = vadd.f32 %v11984_v30, %v11042_v3 }
0x1d1a   :  { %v11103_v52 = vrot.slane %v11075_v34, %v13311_v0  ;;  %v11106_v42 = vcombine.high %v11096_v41, %v11096_v41  ;;  %v11206_v50 = vcombine.low %v11082_v38, %v11096_v41  ;;  %v11220_v11 = vrot.slane %v11104_v6, %v13311_v0 }
0x1d1b   :  { %v11124_v35 = vcombine.high %v11122_v57, %v11122_v57  ;;  %v11138_v19 = vrot.slane %v11122_v57, %v13311_v0  ;;  %v11145_v58 = vrot.slane %v11123_v10, %v13311_v0  ;;  %v11153_v40 = vcombine.high %v11131_v33, %v11131_v33 }
0x1d1c   :  { %v11213_v61 = vrot.slane %v11206_v50, %v13311_v0  ;;  %v11229_v2 = vcombine.low %v11106_v42, %v11089_v22  ;;  %v11243_v25 = vrot.slane %v11103_v52, %v13311_v0  ;;  %v11985_v62 = vcombine.high %v11089_v22, %v11103_v52 }
0x1d1d   :  { %v11152_v13 = vrot.slane %v11124_v35, %v13311_v0  ;;  %v11154_v4 = vcombine.high %v11138_v19, %v11138_v19  ;;  %v11155_v37 = vcombine.high %v11145_v58, %v11145_v58  ;;  %v11266_v60 = vrot.slane %v11131_v33, %v13311_v0 }
0x1d1e   :  { %v11221_v43 = vcombine.low %v11213_v61, %v11220_v11  ;;  %v11236_v7 = vrot.slane %v11229_v2, %v13311_v0  ;;  %v11259_v44 = vrot.slane %v11985_v62, %v13311_v0  ;;  %v11275_v54 = vcombine.low %v11145_v58, %v11153_v40 }
0x1d1f   :  { %v11289_v29 = vrot.slane %v11155_v37, %v13311_v0  ;;  %v11298_v48 = vcombine.low %v11138_v19, %v11152_v13  ;;  %v11312_v15 = vrot.slane %v11154_v4, %v13311_v0  ;;  %v11055_v30 = vmax.f32 %v11052_v8, 0.0 }
0x1d20   :  { %v11228_v26 = vrot.slane %v11221_v43, %v13311_v0  ;;  %v11244_v63 = vcombine.low %v11236_v7, %v11243_v25  ;;  %v11267_v39 = vcombine.low %v11259_v44, %v11266_v60  ;;  %v11282_v20 = vrot.slane %v11275_v54, %v13311_v0 }
0x1d21   :  { %v11305_v17 = vrot.slane %v11298_v48, %v13311_v0  ;;  %v11156_v36 = vcombine.high %v11152_v13, %v11152_v13  ;;  %v11157_v31 = vcombine.high %v11055_v30, %v11055_v30  ;;  %v11164_v1 = vrot.slane %v11055_v30, %v13311_v0 }
0x1d22   :  { %v11251_v45 = vrot.slane %v11244_v63, %v13311_v0  ;;  %v11399_v5 = vsel %vm11398_vm15, %v11228_v26, 0.0  ;;  %v11274_v24 = vrot.slane %v11267_v39, %v13311_v0  ;;  %v11290_v23 = vcombine.low %v11282_v20, %v11289_v29 }
0x1d23   :  { %v11400_v12 = vrot.slane %v11399_v5, 4  ;;  %v11313_v32 = vcombine.low %v11305_v17, %v11312_v15  ;;  %v11171_v46 = vrot.slane %v11157_v31, %v13311_v0  ;;  %v11172_v55 = vcombine.high %v11164_v1, %v11164_v1 }
0x1d24   :  { %v11406_v16 = vsel %vm11398_vm15, %v11251_v45, 0.0  ;;  %v11297_v38 = vrot.slane %v11290_v23, %v13311_v0  ;;  %v11413_v49 = vsel %vm11398_vm15, %v11274_v24, 0.0  ;;  %v11180_v21 = vrot.slane %v11164_v1, %v13311_v0 }
0x1d25   :  { %v11401_v3 = vadd.f32 %v11400_v12, %v11399_v5  ;;  %v11407_v34 = vrot.slane %v11406_v16, 4  ;;  %v11320_v22 = vrot.slane %v11313_v32, %v13311_v0  ;;  %v11414_v41 = vrot.slane %v11413_v49, 4 }
0x1d26   :  { %v11420_v6 = vsel %vm11398_vm15, %v11297_v38, 0.0  ;;  %v11173_v57 = vcombine.high %v11171_v46, %v11171_v46  ;;  %v11187_v10 = vrot.slane %v11171_v46, %v13311_v0  ;;  %v11194_v33 = vrot.slane %v11172_v55, %v13311_v0 }
0x1d27   :  { %v11402_v8 = vrot.slane %v11401_v3, 2  ;;  %v11408_v52 = vadd.f32 %v11407_v34, %v11406_v16  ;;  %v11415_v42 = vadd.f32 %v11414_v41, %v11413_v49  ;;  %v11421_v50 = vrot.slane %v11420_v6, 4 }
0x1d28   :  { %v11427_v11 = vsel %vm11398_vm15, %v11320_v22, 0.0  ;;  %v11201_v35 = vrot.slane %v11173_v57, %v13311_v0  ;;  %v11203_v19 = vcombine.high %v11187_v10, %v11187_v10  ;;  %v11321_v58 = vcombine.low %v11156_v36, %v11180_v21 }
0x1d29   :  { %v11403_v40 = vadd.f32 %v11402_v8, %v11401_v3  ;;  %v11409_v61 = vrot.slane %v11408_v52, 2  ;;  %v11416_v2 = vrot.slane %v11415_v42, 2  ;;  %v11422_v25 = vadd.f32 %v11421_v50, %v11420_v6 }
0x1d2a   :  { %v11428_v62 = vrot.slane %v11427_v11, 4  ;;  %v11205_v13 = vcombine.high %v11201_v35, %v11201_v35  ;;  %v11328_v4 = vrot.slane %v11321_v58, %v13311_v0  ;;  %v11335_v37 = vrot.slane %v11194_v33, %v13311_v0 }
0x1d2b   :  { %v11404_v60 = vrot.slane %v11403_v40, 1  ;;  %v11410_v43 = vadd.f32 %v11409_v61, %v11408_v52  ;;  %v11417_v7 = vadd.f32 %v11416_v2, %v11415_v42  ;;  %v11423_v44 = vrot.slane %v11422_v25, 2 }
0x1d2c   :  { %v11429_v54 = vadd.f32 %v11428_v62, %v11427_v11  ;;  %v11336_v29 = vcombine.low %v11328_v4, %v11335_v37  ;;  %v11986_v48 = vcombine.high %v11180_v21, %v11194_v33  ;;  %v11358_v15 = vrot.slane %v11187_v10, %v13311_v0 }
0x1d2d   :  { %v11405_v30 = vadd.f32 %v11404_v60, %v11403_v40  ;;  %v11411_v26 = vrot.slane %v11410_v43, 1  ;;  %v11418_v63 = vrot.slane %v11417_v7, 1  ;;  %v11424_v39 = vadd.f32 %v11423_v44, %v11422_v25 }
0x1d2e   :  { %v11430_v20 = vrot.slane %v11429_v54, 2  ;;  %v11343_v17 = vrot.slane %v11336_v29, %v13311_v0  ;;  %v11351_v36 = vrot.slane %v11986_v48, %v13311_v0  ;;  %v11367_v31 = vcombine.low %v11201_v35, %v11203_v19 }
0x1d2f   :  { %v11412_v1 = vadd.f32 %v11411_v26, %v11410_v43  ;;  %v11456_v45 = vmul.f32 0.33333334, %v11405_v30  ;;  %v11419_v5 = vadd.f32 %v11418_v63, %v11417_v7  ;;  %v11425_v24 = vrot.slane %v11424_v39, 1 }
0x1d30   :  { %v11431_v23 = vadd.f32 %v11430_v20, %v11429_v54  ;;  %v11359_v12 = vcombine.low %v11351_v36, %v11358_v15  ;;  %v11374_v32 = vrot.slane %v11367_v31, %v13311_v0  ;;  %v11381_v46 = vrot.slane %v11205_v13, %v13311_v0 }
0x1d31   :  { %v11457_v55 = vmul.f32 0.33333334, %v11412_v1  ;;  %v11466_v16 = vpack.c.bf16 %v11456_v45, %v11456_v45  ;;  %v11458_v38 = vmul.f32 0.33333334, %v11419_v5  ;;  %v11434_v49 = vsel %vm11398_vm15, %v11343_v17, 0.0 }
0x1d32   :  { %v11366_v21 = vrot.slane %v11359_v12, %v13311_v0  ;;  %v11382_v3 = vcombine.low %v11374_v32, %v11381_v46  ;;  %v11435_v34 = vrot.slane %v11434_v49, 4  ;;  %v11426_v22 = vadd.f32 %v11425_v24, %v11424_v39 }
0x1d33   :  { %v11467_v41 = vpack.c.bf16 %v11457_v55, %v11457_v55  ;;  %v11498_v6 = vunpack.c.l.b16 %v11466_v16  ;;  %v11468_v57 = vpack.c.bf16 %v11458_v38, %v11458_v38  ;;  %v11432_v10 = vrot.slane %v11431_v23, 1 }
0x1d34   :  { %v11389_v33 = vrot.slane %v11382_v3, %v13311_v0  ;;  %v11436_v8 = vadd.f32 %v11435_v34, %v11434_v49  ;;  %v11441_v52 = vsel %vm11398_vm15, %v11366_v21, 0.0  ;;  %v11459_v42 = vmul.f32 0.33333334, %v11426_v22 }
0x1d35   :  { %v11499_v50 = vunpack.c.l.b16 %v11467_v41  ;;  %v11500_v11 = vunpack.c.l.b16 %v11468_v57  ;;  %v11442_v35 = vrot.slane %v11441_v52, 4  ;;  %v11433_v19 = vadd.f32 %v11432_v10, %v11431_v23 }
0x1d36   :  { %v11437_v58 = vrot.slane %v11436_v8, 2  ;;  %v11448_v40 = vsel %vm11398_vm15, %v11389_v33, 0.0  ;;  %v11469_v61 = vpack.c.bf16 %v11459_v42, %v11459_v42  ;;  %v17493_v34 = vmov 20   ;;  %v17501_v42 = vld [vmem:[#allocation53_spill] sm:$0xff] }
0x1d37   :  { %v11443_v2 = vadd.f32 %v11442_v35, %v11441_v52  ;;  %v11449_v25 = vrot.slane %v11448_v40, 4  ;;  %v11460_v62 = vmul.f32 0.33333334, %v11433_v19  ;;  %v11506_v13 = vsel %vm2774_vm5, %v11499_v50, %v11498_v6  ;;  %v16947_v52 = vld [vmem:[%s17185_s0] ss:$0 sm:$0xff] }
0x1d38   :  { %v11438_v4 = vadd.f32 %v11437_v58, %v11436_v8  ;;  %v11501_v37 = vunpack.c.l.b16 %v11469_v61  ;;  %v11507_v0 = vsel %vm2776_vm6, %v11500_v11, %v11506_v13  ;;  %v17494_v22 = vmov 18  }
0x1d39   :  { %v11444_v60 = vrot.slane %v11443_v2, 2  ;;  %v11450_v43 = vadd.f32 %v11449_v25, %v11448_v40  ;;  %v11470_v7 = vpack.c.bf16 %v11460_v62, %v11460_v62  ;;  %v17495_v41 = vmov 23  }
0x1d3a   :  { %v11439_v44 = vrot.slane %v11438_v4, 1  ;;  %v11508_v54 = vsel %vm2778_vm7, %v11501_v37, %v11507_v0  ;;  %v17496_v6 = vmov 19   ;;  %v17497_v57 = vmov 21  }
0x1d3b   :  { %v11445_v29 = vadd.f32 %v11444_v60, %v11443_v2  ;;  %v11451_v48 = vrot.slane %v11450_v43, 2  ;;  %v11502_v15 = vunpack.c.l.b16 %v11470_v7  ;;  %v17498_v10 = vmov 17  }
0x1d3c   :  { %v11440_v30 = vadd.f32 %v11439_v44, %v11438_v4  ;;  %v17500_v33 = vmov 16   ;;  %v283_v50 = vadd.f32 %v16947_v52, %v17501_v42 }
0x1d3d   :  { %v11446_v26 = vrot.slane %v11445_v29, 1  ;;  %v11452_v63 = vadd.f32 %v11451_v48, %v11450_v43  ;;  %v11509_v39 = vsel %vm2780_vm8, %v11502_v15, %v11508_v54 }
0x1d3e   :  { %v11461_v20 = vmul.f32 0.33333334, %v11440_v30 }
0x1d3f   :  { %v11447_v17 = vadd.f32 %v11446_v26, %v11445_v29  ;;  %v11453_v36 = vrot.slane %v11452_v63, 1 }
0x1d40   :  { %v11471_v31 = vpack.c.bf16 %v11461_v20, %v11461_v20 }
0x1d41   :  { %v11454_v1 = vadd.f32 %v11453_v36, %v11452_v63  ;;  %v11462_v45 = vmul.f32 0.33333334, %v11447_v17 }
0x1d42   :  { %v11503_v5 = vunpack.c.l.b16 %v11471_v31 }
0x1d43   :  { %v11463_v24 = vmul.f32 0.33333334, %v11454_v1  ;;  %v11472_v23 = vpack.c.bf16 %v11462_v45, %v11462_v45 }
0x1d44   :  { %v11510_v12 = vsel %vm2782_vm9, %v11503_v5, %v11509_v39 }
0x1d45   :  { %v11473_v32 = vpack.c.bf16 %v11463_v24, %v11463_v24  ;;  %v11504_v46 = vunpack.c.l.b16 %v11472_v23 }
0x1d47   :  { %v11505_v55 = vunpack.c.l.b16 %v11473_v32  ;;  %v11511_v16 = vsel %vm2784_vm10, %v11504_v46, %v11510_v12 }
0x1d49   :  { %v11512_v38 = vsel %vm2786_vm11, %v11505_v55, %v11511_v16 }
0x1d4a   :  { %v11513_v49 = vpack.c.b16 %v11512_v38, %v11512_v38 }
0x1d4c   :  { %12242 = vmatmul.mubr.bf16.vlgmr.msra.gmra.mrb[32].mxu1 %v11513_v49  ;;  %v17502_v49 = vld [vmem:[#allocation52_spill] sm:$0xff] }
0x1d7e   :  { %v1310_v21 = vpop.permute.xlu0 %1309 }
0x1d7f   :  { %v1312_v3 = vmul.f32 %v16831_v27, %v1310_v21  ;;  %v17499_v27 = vmov 22   ;;  %v288_v21 = vadd.f32 %v16947_v52, %v17502_v49 }
0x1d81   :  { %1321 = vperm.xlu0 %12395, %v1312_v3   ;;  %1315 = vperm.xlu1 %12394, %v1312_v3  }
0x1d85   :  { %12398 = vset.pattern.permute.xlu0 %v17493_v34  ;;  %12396 = vset.pattern.permute.xlu1 %v17494_v22 }
0x1d86   :  { %1339 = vperm.xlu0 %12398, %v1312_v3   ;;  %1327 = vperm.xlu1 %12396, %v1312_v3  }
0x1d8a   :  { %12401 = vset.pattern.permute.xlu0 %v17495_v41  ;;  %12397 = vset.pattern.permute.xlu1 %v17496_v6 }
0x1d8b   :  { %1357 = vperm.xlu0 %12401, %v1312_v3   ;;  %1333 = vperm.xlu1 %12397, %v1312_v3  }
0x1d8f   :  { %12399 = vset.pattern.permute.xlu1 %v17497_v57  ;;  %12403 = vset.pattern.permute.xlu0 %v17498_v10 }
0x1d90   :  { %1345 = vperm.xlu1 %12399, %v1312_v3  }
0x1d94   :  { %12400 = vset.pattern.permute.xlu1 %v17499_v27 }
0x1d95   :  { %1351 = vperm.xlu1 %12400, %v1312_v3  }
0x1d99   :  { %12402 = vset.pattern.permute.xlu1 %v17500_v33 }
0x1e00   :  { %v1316_v8 = vpop.permute.xlu1 %1315  ;;  %v1322_v35 = vpop.permute.xlu0 %1321 }
0x1e01   :  { %v1318_v11 = vmul.f32 %v1316_v8, %v17442_v47  ;;  %v1324_v58 = vmul.f32 %v1322_v35, %v17443_v18 }
0x1e03   :  { %v1319_v19 = vadd.f32 %v1318_v11, %v283_v50 }
0x1e05   :  { %v1328_v40 = vpop.permute.xlu1 %1327  ;;  %v1325_v61 = vadd.f32 %v1324_v58, %v1319_v19  ;;  %v1340_v4 = vpop.permute.xlu0 %1339 }
0x1e06   :  { %v1330_v2 = vmul.f32 %v1328_v40, %v17444_v9  ;;  %v1342_v0 = vmul.f32 %v1340_v4, %v17486_v28 }
0x1e08   :  { %v1331_v62 = vadd.f32 %v1330_v2, %v1325_v61 }
0x1e0a   :  { %v1334_v25 = vpop.permute.xlu1 %1333  ;;  %v1358_v44 = vpop.permute.xlu0 %1357 }
0x1e0b   :  { %v1336_v13 = vmul.f32 %v1334_v25, %v17487_v53  ;;  %v1360_v15 = vmul.f32 %v1358_v44, %v17490_v56 }
0x1e0d   :  { %v1337_v37 = vadd.f32 %v1336_v13, %v1331_v62 }
0x1e0f   :  { %v1346_v60 = vpop.permute.xlu1 %1345  ;;  %v1343_v43 = vadd.f32 %v1342_v0, %v1337_v37 }
0x1e10   :  { %v1348_v7 = vmul.f32 %v1346_v60, %v17488_v14 }
0x1e12   :  { %v1349_v29 = vadd.f32 %v1348_v7, %v1343_v43 }
0x1e14   :  { %v1352_v54 = vpop.permute.xlu1 %1351 }
0x1e15   :  { %v1354_v48 = vmul.f32 %v1352_v54, %v17489_v51 }
0x1e17   :  { %v1355_v30 = vadd.f32 %v1354_v48, %v1349_v29 }
0x1e19   :  { %v1361_v26 = vadd.f32 %v1360_v15, %v1355_v30  ;;  %v11996_v15 = vld [vmem:[%s17016_s20] ss:$0 sm:$0xff] }
0x1e1b   :  { %12739 = vtanh.f32 %v1361_v26  ;;  %v11697_v31 = vmul.f32 -1.442695, %v1361_v26 }
0x1e1d   :  { %12741 = vpow2.f32 %v11697_v31 }
0x1e1f   :  { %v16959_v63 = vpop.f32.mrb[32].mxu1 }
0x1e20   :  { %v12243_v39 = vpop.f32.mrb[33].mxu1 }
0x1e21   :  { %v11600_v20 = vpop.f32.mrb[34].mxu1 }
0x1e22   :  { %v12244_v17 = vpop.f32.mrb[35].mxu1 }
0x1e25   :  { %v12740_v36 = vpop.eup %12739 }
0x1e26   :  { %1371 = vrot.lane.b32.xlu1 %v12740_v36, %s12759_s24 }
0x1e27   :  { %v12742_v1 = vpop.eup %12741 }
0x1e28   :  { %v1365_v45 = vadd.f32 1.0, %v12742_v1 }
0x1e2a   :  { %12743 = vrcp.f32 %v1365_v45 }
0x1e34   :  { %v12744_v5 = vpop.eup %12743 }
0x1e35   :  { %v1369_v12 = vmul.f32 %v12744_v5, %v16868_v59 }
0x1e98   :  { %v1372_v24 = vpop.permute.xlu1 %1371 }
0x1e99   :  { %v1374_v23 = vmul.f32 %v12744_v5, %v1372_v24 }
0x1e9b   :  { %1376 = vrot.lane.b32.xlu1 %v1374_v23, %s12760_s3 }
0x1f0d   :  { %v1377_v32 = vpop.permute.xlu1 %1376 }
0x1f0e   :  { %v1379_v46 = vadd.f32 %v1377_v32, %v1369_v12 }
0x1f10   :  { %12745 = vtanh.f32 %v1379_v46 }
0x1f1a   :  { %v12746_v55 = vpop.eup %12745 }
0x1f1b   :  { %1382 = vrot.lane.b32.xlu0 %v12746_v55, %s12760_s3 }
0x1f8d   :  { %v1383_v16 = vpop.permute.xlu0 %1382 }
0x1f8e   :  { %v1385_v38 = vmul.f32 %v12744_v5, %v1383_v16 }
0x1f90   :  { %1394 = vperm.xlu0 %12403, %v1385_v38   ;;  %1388 = vperm.xlu1 %12402, %v1385_v38  }
0x1f94   :  { %12406 = vset.pattern.permute.xlu0 %v17493_v34  ;;  %12404 = vset.pattern.permute.xlu1 %v17494_v22 }
0x1f95   :  { %1412 = vperm.xlu0 %12406, %v1385_v38   ;;  %1400 = vperm.xlu1 %12404, %v1385_v38  }
0x1f99   :  { %12409 = vset.pattern.permute.xlu0 %v17495_v41  ;;  %12405 = vset.pattern.permute.xlu1 %v17496_v6 }
0x1f9a   :  { %1430 = vperm.xlu0 %12409, %v1385_v38   ;;  %1406 = vperm.xlu1 %12405, %v1385_v38  }
0x1f9e   :  { %12407 = vset.pattern.permute.xlu1 %v17497_v57 }
0x1f9f   :  { %1418 = vperm.xlu1 %12407, %v1385_v38  }
0x1fa3   :  { %12408 = vset.pattern.permute.xlu1 %v17499_v27 }
0x1fa4   :  { %1424 = vperm.xlu1 %12408, %v1385_v38  }
0x200f   :  { %v1389_v59 = vpop.permute.xlu1 %1388  ;;  %v1395_v34 = vpop.permute.xlu0 %1394 }
0x2010   :  { %v1391_v3 = vmul.f32 %v1389_v59, %v17442_v47  ;;  %v1397_v41 = vmul.f32 %v1395_v34, %v17443_v18 }
0x2012   :  { %v1392_v22 = vadd.f32 %v1391_v3, %v288_v21 }
0x2014   :  { %v1401_v10 = vpop.permute.xlu1 %1400  ;;  %v1398_v6 = vadd.f32 %v1397_v41, %v1392_v22  ;;  %v1413_v27 = vpop.permute.xlu0 %1412 }
0x2015   :  { %v1403_v33 = vmul.f32 %v1401_v10, %v17444_v9  ;;  %v1415_v11 = vmul.f32 %v1413_v27, %v17486_v28 }
0x2017   :  { %v1404_v57 = vadd.f32 %v1403_v33, %v1398_v6 }
0x2019   :  { %v1407_v8 = vpop.permute.xlu1 %1406  ;;  %v1431_v19 = vpop.permute.xlu0 %1430 }
0x201a   :  { %v1409_v42 = vmul.f32 %v1407_v8, %v17487_v53  ;;  %v1433_v61 = vmul.f32 %v1431_v19, %v17490_v56  ;;  %v11465_v56 = vld [vmem:[%s17015_s18] sm:$0xf] }
0x201b   :  { %v11610_v60 = vsel %vm142_vm0, %v11465_v56, 0 }
0x201c   :  { %v1410_v50 = vadd.f32 %v1409_v42, %v1404_v57  ;;  %12246 = vmatpush3.bf16.msra.mxu0 %v11610_v60 }
0x201e   :  { %v1419_v35 = vpop.permute.xlu1 %1418  ;;  %v1416_v52 = vadd.f32 %v1415_v11, %v1410_v50 }
0x201f   :  { %v1421_v47 = vmul.f32 %v1419_v35, %v17488_v14 }
0x2021   :  { %v1422_v40 = vadd.f32 %v1421_v47, %v1416_v52 }
0x2023   :  { %v1425_v58 = vpop.permute.xlu1 %1424 }
0x2024   :  { %v1427_v18 = vmul.f32 %v1425_v58, %v17489_v51 }
0x2026   :  { %v1428_v9 = vadd.f32 %v1427_v18, %v1422_v40 }
0x2028   :  { %v1434_v2 = vadd.f32 %v1433_v61, %v1428_v9 }
0x202a   :  { %12747 = vtanh.f32 %v1434_v2  ;;  %v11698_v53 = vmul.f32 -1.442695, %v1434_v2 }
0x202c   :  { %12749 = vpow2.f32 %v11698_v53 }
0x2034   :  { %v12748_v25 = vpop.eup %12747 }
0x2035   :  { %1444 = vrot.lane.b32.xlu1 %v12748_v25, %s12759_s24  ;;  %s12773_s24 = smov 112  }
0x2036   :  { %v12750_v28 = vpop.eup %12749 }
0x2037   :  { %v1438_v62 = vadd.f32 1.0, %v12750_v28 }
0x2039   :  { %12751 = vrcp.f32 %v1438_v62 }
0x2043   :  { %v12752_v13 = vpop.eup %12751 }
0x2044   :  { %v1442_v37 = vmul.f32 %v12752_v13, %v1379_v46 }
0x20a7   :  { %v1445_v14 = vpop.permute.xlu1 %1444 }
0x20a8   :  { %v1447_v4 = vmul.f32 %v12752_v13, %v1445_v14 }
0x20aa   :  { %1449 = vrot.lane.b32.xlu1 %v1447_v4, %s12760_s3 }
0x211c   :  { %v1450_v51 = vpop.permute.xlu1 %1449 }
0x211d   :  { %v1452_v0 = vadd.f32 %v1450_v51, %v1442_v37 }
0x211f   :  { %12753 = vtanh.f32 %v1452_v0 }
0x2129   :  { %v12754_v43 = vpop.eup %12753 }
0x212a   :  { %1455 = vrot.lane.b32.xlu0 %v12754_v43, %s12760_s3 }
0x219c   :  { %v1456_v7 = vpop.permute.xlu0 %1455 }
0x219d   :  { %v1458_v44 = vmul.f32 %v12752_v13, %v1456_v7 }
0x219f   :  { %v11464_v54 = vpack.c.bf16 %v1458_v44, %v1458_v44 }
0x21a1   :  { %11604 = vrot.lane.b32.xlu1 %v11464_v54, %s12773_s24 }
0x2213   :  { %v11605_v29 = vpop.permute.xlu1 %11604 }
0x2214   :  { %12248 = vmatmul.mubr.msk.bf16.vlgmr.msra.gmra.mrb[56].mxu0 %vm2881_vm12, %v11605_v29 }
0x22e7   :  { %v11646_v48 = vpop.f32.mrb[56].mxu0 }
0x22e8   :  { %v11647_v30 = vadd.f32 %v11646_v48, %v16959_v63  ;;  %v12249_v26 = vpop.f32.mrb[57].mxu0 }
0x22e9   :  { %v11649_v39 = vpop.f32.mrb[58].mxu0 }
0x22ea   :  { %v11659_v20 = vadd.f32 %v11996_v15, %v11647_v30  ;;  %v12250_v17 = vpop.f32.mrb[59].mxu0 }
0x22ec   :  { %11660 = vst [vmem:[%s17017_s21] sm:$0xff] %v11659_v20 }

</bundles_post_ra>
